<compile_context>
chip_gen: v6e
topology: v6e:2x2x1
jax: 0.10.0
libtpu: 0.0.40
codegen_flags: <defaults>
</compile_context>

<pallas_src>
import functools

import jax
import jax.numpy as jnp
from jax.experimental import pallas as pl
from jax.experimental.pallas import tpu as pltpu

HIDDEN = 128
NUM_LAYERS = 2


def gru_actor_kernel(x_ref, h_init_ref,
                     wih0_ref, bih0_ref, whh0_ref, bhh0n_ref,
                     wih1_ref, b1i_ref, whh1_ref, b1hn_ref,
                     wa_ref, ba_ref,
                     mu_ref, h_out_ref,
                     gi0_sc, hseq_sc, h_carry_sc,
                     *, s_chunk, bp, s_real, need_mask):
    """One sequence chunk of the GRU_Actor forward.

    x_ref      : (s_chunk*BP, D)  time-major chunk, batch padded to BP
    h_init_ref : (2, BP, H)
    wih0_ref   : (D, 3H), bih0_ref : (1, 3H)   layer-0 input proj (r/z hidden bias folded)
    whh0_ref   : (H, 3H), bhh0n_ref: (1, H)    layer-0 recurrent proj + n-gate hidden bias
    wih1_ref   : (H, 3H), b1i_ref  : (1, 3H)   layer-1 input proj (combined r/z bias + i_n bias)
    whh1_ref   : (H, 3H), b1hn_ref : (1, H)    layer-1 recurrent proj + n-gate hidden bias
    wa_ref     : (H, AP=128k), ba_ref: (1, AP) lane-padded actor head
    mu_ref     : (s_chunk*BP, AP)
    h_out_ref  : (2, BP, H)
    gi0_sc     : (s_chunk*BP, 3H) scratch   hoisted layer-0 input gates
    hseq_sc    : (s_chunk*BP, H)  scratch   layer-1 outputs for this chunk (lane-dense)
    h_carry_sc : (2, BP, H)       scratch   hidden state carried across chunks
    """
    H = HIDDEN
    c = pl.program_id(0)

    # Seed the cross-chunk hidden-state carry on the first chunk.
    @pl.when(c == 0)
    def _():
        h_carry_sc[...] = h_init_ref[...]

    # Parallel pre-pass: layer-0 input projection for every step of this chunk
    # (no dependence on the hidden state).  Bias already contains b_hh_l0's
    # r/z halves, so the r/z gate sums below need no extra bias add.
    gi0_sc[...] = (
        jnp.dot(x_ref[...], wih0_ref[...], preferred_element_type=jnp.float32)
        + bih0_ref[...])

    # Hoist bias reads out of the recurrence (read once per chunk).
    bhh0n = bhh0n_ref[...]      # (1, H)
    b1i = b1i_ref[...]          # (1, 3H)
    b1hn = b1hn_ref[...]        # (1, H)

    def step(t, carry):
        h0, h1 = carry
        row = pl.multiple_of(t * bp, bp)        # sublane-aligned dynamic offset

        # Layer-1 recurrent half: depends only on h1_{t-1}; issued first so it
        # overlaps layer-0's recurrent matmul + gate math.
        gh1 = jnp.dot(h1, whh1_ref[...], preferred_element_type=jnp.float32)

        # ---- layer 0 ----
        gi0 = gi0_sc[pl.ds(row, bp), :]                              # (BP, 3H)
        gh0 = jnp.dot(h0, whh0_ref[...], preferred_element_type=jnp.float32)
        r0 = jax.nn.sigmoid(gi0[:, :H] + gh0[:, :H])
        z0 = jax.nn.sigmoid(gi0[:, H:2 * H] + gh0[:, H:2 * H])
        n0 = jnp.tanh(gi0[:, 2 * H:] + r0 * (gh0[:, 2 * H:] + bhh0n))
        h0n = (1.0 - z0) * n0 + z0 * h0

        # ---- layer 1 input half (needs the fresh h0) ----
        gi1 = (jnp.dot(h0n, wih1_ref[...], preferred_element_type=jnp.float32)
               + b1i)
        r1 = jax.nn.sigmoid(gi1[:, :H] + gh1[:, :H])
        z1 = jax.nn.sigmoid(gi1[:, H:2 * H] + gh1[:, H:2 * H])
        n1 = jnp.tanh(gi1[:, 2 * H:] + r1 * (gh1[:, 2 * H:] + b1hn))
        h1n = (1.0 - z1) * n1 + z1 * h1

        if need_mask:
            # Sequence was padded to a chunk multiple: freeze the hidden state
            # on padded time steps (their mu rows are sliced away outside).
            t_global = c * s_chunk + t
            m = (t_global < s_real).astype(jnp.float32)
            h0n = m * h0n + (1.0 - m) * h0
            h1n = m * h1n + (1.0 - m) * h1

        # Lane-dense (128-wide) store of the per-step layer-1 output.
        hseq_sc[pl.ds(row, bp), :] = h1n
        return (h0n, h1n)

    # Bounded unroll: full within a small chunk, 4 otherwise (keeps LLO
    # scheduling visibility without the code-size / vreg-pressure blowup).
    unroll = s_chunk if s_chunk <= 8 else 4
    h0f, h1f = jax.lax.fori_loop(0, s_chunk, step,
                                 (h_carry_sc[0], h_carry_sc[1]), unroll=unroll)
    h_carry_sc[0] = h0f
    h_carry_sc[1] = h1f
    # Output block index is constant across the grid, so this stays VMEM
    # resident and is written back to HBM once at the end of the grid.
    h_out_ref[0] = h0f
    h_out_ref[1] = h1f

    # Actor head: one batched, lane-dense (chunk*BP, H) @ (H, 128) matmul +
    # tanh, single unmasked store.
    mu_ref[...] = jnp.tanh(
        jnp.dot(hseq_sc[...], wa_ref[...], preferred_element_type=jnp.float32)
        + ba_ref[...])


def gru_actor_forward(state, hidden, params, *, s_chunk=None):
    """Returns (mu, std, h) -- (mu, std) parameterize Normal(mu, std)."""
    S, B, D = state.shape
    H = HIDDEN
    A = params["w_a"].shape[0]
    H3 = 3 * H

    # Pad batch to a full sublane group (8) so all row ops are unmasked, and
    # pad the sequence to a chunk multiple for the grid.
    BP = max(8, ((B + 7) // 8) * 8)
    if s_chunk is None:
        s_chunk = min(S, 16)
    n_chunks = pl.cdiv(S, s_chunk)
    SP = n_chunks * s_chunk
    AP = max(128, ((A + 127) // 128) * 128)    # lane-dense actor output width

    state_p = jnp.pad(state, ((0, SP - S), (0, BP - B), (0, 0)))
    hidden_p = jnp.pad(hidden, ((0, 0), (0, BP - B), (0, 0)))
    x2d = state_p.reshape(SP * BP, D)

    # Pre-transpose weights so the kernel does plain x @ W (lane-dense output).
    wih0_t = params["w_ih_l0"].T          # (D, 3H)
    whh0_t = params["w_hh_l0"].T          # (H, 3H)
    wih1_t = params["w_ih_l1"].T          # (H, 3H)
    whh1_t = params["w_hh_l1"].T          # (H, 3H)

    # Bias folding.  Layer 0: r/z halves of b_hh_l0 ride with the hoisted
    # input bias; the n column stays separate (it sits inside r * (.)).
    bih0 = (params["b_ih_l0"]
            + jnp.concatenate([params["b_hh_l0"][:2 * H],
                               jnp.zeros((H,), jnp.float32)])).reshape(1, H3)
    bhh0n = params["b_hh_l0"][2 * H:].reshape(1, H)
    # Layer 1: r/z biases combined, i_n bias rides with the input matmul,
    # h_n bias stays separate.
    b1i = jnp.concatenate(
        [params["b_ih_l1"][:2 * H] + params["b_hh_l1"][:2 * H],
         params["b_ih_l1"][2 * H:]]).reshape(1, H3)
    b1hn = params["b_hh_l1"][2 * H:].reshape(1, H)

    # Actor head padded to full lane width.
    wa_p = jnp.zeros((H, AP), jnp.float32).at[:, :A].set(params["w_a"].T)
    ba_p = jnp.zeros((1, AP), jnp.float32).at[:, :A].set(params["b_a"])

    rows = s_chunk * BP

    def full(arr):
        return pl.BlockSpec(arr.shape, lambda c: (0,) * arr.ndim)

    in_specs = [
        pl.BlockSpec((rows, D), lambda c: (c, 0)),      # x, streamed per chunk
        full(hidden_p), full(wih0_t), full(bih0), full(whh0_t), full(bhh0n),
        full(wih1_t), full(b1i), full(whh1_t), full(b1hn),
        full(wa_p), full(ba_p),
    ]
    out_specs = (
        pl.BlockSpec((rows, AP), lambda c: (c, 0)),               # mu, per chunk
        pl.BlockSpec((NUM_LAYERS, BP, H), lambda c: (0, 0, 0)),   # final hidden
    )

    # Explicit VMEM budget derived from the actual buffers (chunked x / mu are
    # double-buffered; add headroom for weights possibly being double-buffered
    # and Mosaic internal scratch).
    f32 = 4
    weight_bytes = sum(int(a.size) * f32 for a in
                       (wih0_t, bih0, whh0_t, bhh0n, wih1_t, b1i, whh1_t,
                        b1hn, wa_p, ba_p, hidden_p))
    stream_bytes = 2 * (rows * D + rows * AP) * f32
    scratch_bytes = (rows * H3 + rows * H + 2 * NUM_LAYERS * BP * H) * f32
    carry_bytes = NUM_LAYERS * BP * H * f32
    vmem_limit = min(
        2 * (weight_bytes + stream_bytes + scratch_bytes + carry_bytes)
        + (8 << 20),
        96 << 20)

    kernel = functools.partial(
        gru_actor_kernel, s_chunk=s_chunk, bp=BP, s_real=S,
        need_mask=(SP != S))

    mu_flat, h_out = pl.pallas_call(
        kernel,
        grid=(n_chunks,),
        out_shape=(jax.ShapeDtypeStruct((SP * BP, AP), jnp.float32),
                   jax.ShapeDtypeStruct((NUM_LAYERS, BP, H), jnp.float32)),
        in_specs=in_specs,
        out_specs=out_specs,
        scratch_shapes=[pltpu.VMEM((rows, H3), jnp.float32),          # gi0
                        pltpu.VMEM((rows, H), jnp.float32),           # h1 seq
                        pltpu.VMEM((NUM_LAYERS, BP, H), jnp.float32)],  # carry
        compiler_params=pltpu.CompilerParams(
            dimension_semantics=("arbitrary",),
            vmem_limit_bytes=int(vmem_limit)),
    )(x2d, hidden_p, wih0_t, bih0, whh0_t, bhh0n,
      wih1_t, b1i, whh1_t, b1hn, wa_p, ba_p)

    mu = mu_flat.reshape(SP, BP, AP)[:S, :B, :A]
    h = h_out[:, :B, :]
    # Normal(mu, std): std = exp(log_std) broadcast to mu's shape (trivial glue).
    std = jnp.broadcast_to(jnp.exp(params["log_std"]), mu.shape)
    return mu, std, h
    # TODO(synk): optional bf16 storage for x/weights/scratch and a
    # batch-parallel grid axis for v7x's 2 TCs (needs BP >= 16).


def init_params(key, state_dim, action_dim, std=1.0):
    """Deterministic synthetic parameters matching GRU_Actor.__init__ shapes.

    nn.GRU keeps its default init uniform(-1/sqrt(H), 1/sqrt(H));
    init_weights only touches nn.Linear (weight ~ N(0, 0.1), bias = 0.1).
    """
    H = HIDDEN
    k = 1.0 / jnp.sqrt(jnp.float32(H))
    keys = jax.random.split(key, 9)
    u = lambda kk, shape: jax.random.uniform(kk, shape, jnp.float32, -k, k)
    params = {
        "w_ih_l0": u(keys[0], (3 * H, state_dim)),
        "w_hh_l0": u(keys[1], (3 * H, H)),
        "b_ih_l0": u(keys[2], (3 * H,)),
        "b_hh_l0": u(keys[3], (3 * H,)),
        "w_ih_l1": u(keys[4], (3 * H, H)),
        "w_hh_l1": u(keys[5], (3 * H, H)),
        "b_ih_l1": u(keys[6], (3 * H,)),
        "b_hh_l1": u(keys[7], (3 * H,)),
        "w_a": 0.1 * jax.random.normal(keys[8], (action_dim, H), jnp.float32),
        "b_a": jnp.full((action_dim,), 0.1, jnp.float32),
        "log_std": jnp.ones((action_dim,), jnp.float32) * std,
    }
    return params


def reference_forward(state, hidden, params):
    """Pure-JAX reference (lax.scan) for correctness checking."""
    H = HIDDEN

    def cell(x, h, w_ih, w_hh, b_ih, b_hh):
        gi = x @ w_ih.T + b_ih
        gh = h @ w_hh.T + b_hh
        i_r, i_z, i_n = gi[:, :H], gi[:, H:2 * H], gi[:, 2 * H:]
        h_r, h_z, h_n = gh[:, :H], gh[:, H:2 * H], gh[:, 2 * H:]
        r = jax.nn.sigmoid(i_r + h_r)
        z = jax.nn.sigmoid(i_z + h_z)
        n = jnp.tanh(i_n + r * h_n)
        return (1.0 - z) * n + z * h

    def step(carry, x_t):
        h0, h1 = carry
        h0n = cell(x_t, h0, params["w_ih_l0"], params["w_hh_l0"],
                   params["b_ih_l0"], params["b_hh_l0"])
        h1n = cell(h0n, h1, params["w_ih_l1"], params["w_hh_l1"],
                   params["b_ih_l1"], params["b_hh_l1"])
        return (h0n, h1n), h1n

    (h0f, h1f), outs = jax.lax.scan(step, (hidden[0], hidden[1]), state)
    mu = jnp.tanh(outs @ params["w_a"].T + params["b_a"])
    std = jnp.broadcast_to(jnp.exp(params["log_std"]), mu.shape)
    return mu, std, jnp.stack([h0f, h1f], axis=0)


if __name__ == "__main__":
    SEQ, BATCH, STATE_DIM, ACTION_DIM = 8, 2, 16, 4

    root = jax.random.PRNGKey(0)
    k_param, k_state, k_hidden = jax.random.split(root, 3)

    params = init_params(k_param, STATE_DIM, ACTION_DIM, std=1.0)
    state = jax.random.normal(k_state, (SEQ, BATCH, STATE_DIM), jnp.float32)
    hidden = jax.random.normal(k_hidden, (NUM_LAYERS, BATCH, HIDDEN), jnp.float32)

    mu, std, h = jax.jit(functools.partial(gru_actor_forward, params=params))(
        state, hidden)
    jax.block_until_ready((mu, std, h))

    # Correctness check against the pure-JAX reference.
    mu_r, std_r, h_r = reference_forward(state, hidden, params)
    assert mu.shape == (SEQ, BATCH, ACTION_DIM)
    assert std.shape == (SEQ, BATCH, ACTION_DIM)
    assert h.shape == (NUM_LAYERS, BATCH, HIDDEN)
    assert jnp.allclose(mu, mu_r, atol=1e-4, rtol=1e-4)
    assert jnp.allclose(std, std_r, atol=1e-6, rtol=1e-6)
    assert jnp.allclose(h, h_r, atol=1e-4, rtol=1e-4)

    print("KERNEL_OK")
</pallas_src>

<mosaic_0001>
module attributes {stable_mosaic.version = 11 : i64} {
  func.func @gru_actor_kernel(%arg0: i32, %arg1: memref<64x16xf32, #tpu.memory_space<vmem>>, %arg2: memref<2x8x128xf32, #tpu.memory_space<vmem>>, %arg3: memref<16x384xf32, #tpu.memory_space<vmem>>, %arg4: memref<1x384xf32, #tpu.memory_space<vmem>>, %arg5: memref<128x384xf32, #tpu.memory_space<vmem>>, %arg6: memref<1x128xf32, #tpu.memory_space<vmem>>, %arg7: memref<128x384xf32, #tpu.memory_space<vmem>>, %arg8: memref<1x384xf32, #tpu.memory_space<vmem>>, %arg9: memref<128x384xf32, #tpu.memory_space<vmem>>, %arg10: memref<1x128xf32, #tpu.memory_space<vmem>>, %arg11: memref<128x128xf32, #tpu.memory_space<vmem>>, %arg12: memref<1x128xf32, #tpu.memory_space<vmem>>, %arg13: memref<64x128xf32, #tpu.memory_space<vmem>>, %arg14: memref<2x8x128xf32, #tpu.memory_space<vmem>>, %arg15: memref<64x384xf32, #tpu.memory_space<vmem>>, %arg16: memref<64x128xf32, #tpu.memory_space<vmem>>, %arg17: memref<2x8x128xf32, #tpu.memory_space<vmem>>) attributes {dimension_semantics = [#tpu.dimension_semantics<arbitrary>], iteration_bounds = array<i64: 1>, scalar_prefetch = 0 : i64, scratch_operands = 3 : i64, tpu.core_type = #tpu.core_type<tc>, window_params = [{transform_indices = @transform_0, window_bounds = array<i64: 64, 16>}, {pipeline_mode = #tpu.pipeline_mode<synchronous>, transform_indices = @transform_1, window_bounds = array<i64: 2, 8, 128>}, {pipeline_mode = #tpu.pipeline_mode<synchronous>, transform_indices = @transform_2, window_bounds = array<i64: 16, 384>}, {pipeline_mode = #tpu.pipeline_mode<synchronous>, transform_indices = @transform_3, window_bounds = array<i64: 1, 384>}, {pipeline_mode = #tpu.pipeline_mode<synchronous>, transform_indices = @transform_4, window_bounds = array<i64: 128, 384>}, {pipeline_mode = #tpu.pipeline_mode<synchronous>, transform_indices = @transform_5, window_bounds = array<i64: 1, 128>}, {pipeline_mode = #tpu.pipeline_mode<synchronous>, transform_indices = @transform_6, window_bounds = array<i64: 128, 384>}, {pipeline_mode = #tpu.pipeline_mode<synchronous>, transform_indices = @transform_7, window_bounds = array<i64: 1, 384>}, {pipeline_mode = #tpu.pipeline_mode<synchronous>, transform_indices = @transform_8, window_bounds = array<i64: 128, 384>}, {pipeline_mode = #tpu.pipeline_mode<synchronous>, transform_indices = @transform_9, window_bounds = array<i64: 1, 128>}, {pipeline_mode = #tpu.pipeline_mode<synchronous>, transform_indices = @transform_10, window_bounds = array<i64: 128, 128>}, {pipeline_mode = #tpu.pipeline_mode<synchronous>, transform_indices = @transform_11, window_bounds = array<i64: 1, 128>}, {transform_indices = @transform_12, window_bounds = array<i64: 64, 128>}, {pipeline_mode = #tpu.pipeline_mode<synchronous>, transform_indices = @transform_13, window_bounds = array<i64: 2, 8, 128>}]} {
    %c0_i32 = arith.constant 0 : i32
    %0 = arith.cmpi eq, %arg0, %c0_i32 : i32
    %1 = arith.extui %0 : i1 to i32
    %c0_i32_0 = arith.constant 0 : i32
    %2 = arith.cmpi ne, %1, %c0_i32_0 : i32
    scf.if %2 {
      %c0_185 = arith.constant 0 : index
      %c0_186 = arith.constant 0 : index
      %c0_187 = arith.constant 0 : index
      %597 = vector.load %arg2[%c0_185, %c0_186, %c0_187] : memref<2x8x128xf32, #tpu.memory_space<vmem>>, vector<2x8x128xf32>
      %c0_188 = arith.constant 0 : index
      %c0_189 = arith.constant 0 : index
      %c0_190 = arith.constant 0 : index
      %598 = vector.load %arg17[%c0_188, %c0_189, %c0_190] : memref<2x8x128xf32, #tpu.memory_space<vmem>>, vector<2x8x128xf32>
      tpu.vector_store %arg17[%c0_188, %c0_189, %c0_190], %597 {strides = array<i32>} : memref<2x8x128xf32, #tpu.memory_space<vmem>>, vector<2x8x128xf32>,
    } else {
    }
    %c0 = arith.constant 0 : index
    %c0_1 = arith.constant 0 : index
    %3 = vector.load %arg1[%c0, %c0_1] : memref<64x16xf32, #tpu.memory_space<vmem>>, vector<64x16xf32>
    %c0_2 = arith.constant 0 : index
    %c0_3 = arith.constant 0 : index
    %4 = vector.load %arg3[%c0_2, %c0_3] : memref<16x384xf32, #tpu.memory_space<vmem>>, vector<16x384xf32>
    %cst = arith.constant dense<0.000000e+00> : vector<64x384xf32>
    %5 = tpu.matmul %3, %4, %cst {dimension_numbers = #tpu.dot_dimension_numbers<[1], [0], [0], [1], [0, 0, 1, 1], [], []>} : vector<64x16xf32>, vector<16x384xf32>, vector<64x384xf32> -> vector<64x384xf32>
    %c0_4 = arith.constant 0 : index
    %c0_5 = arith.constant 0 : index
    %6 = vector.load %arg4[%c0_4, %c0_5] : memref<1x384xf32, #tpu.memory_space<vmem>>, vector<1x384xf32>
    %7 = vector.broadcast %6 : vector<1x384xf32> to vector<64x384xf32>
    %8 = arith.addf %5, %7 : vector<64x384xf32>
    %c0_6 = arith.constant 0 : index
    %c0_7 = arith.constant 0 : index
    %9 = vector.load %arg15[%c0_6, %c0_7] : memref<64x384xf32, #tpu.memory_space<vmem>>, vector<64x384xf32>
    tpu.vector_store %arg15[%c0_6, %c0_7], %8 {strides = array<i32>} : memref<64x384xf32, #tpu.memory_space<vmem>>, vector<64x384xf32>,
    %c0_8 = arith.constant 0 : index
    %c0_9 = arith.constant 0 : index
    %10 = vector.load %arg6[%c0_8, %c0_9] : memref<1x128xf32, #tpu.memory_space<vmem>>, vector<1x128xf32>
    %c0_10 = arith.constant 0 : index
    %c0_11 = arith.constant 0 : index
    %11 = vector.load %arg8[%c0_10, %c0_11] : memref<1x384xf32, #tpu.memory_space<vmem>>, vector<1x384xf32>
    %c0_12 = arith.constant 0 : index
    %c0_13 = arith.constant 0 : index
    %12 = vector.load %arg10[%c0_12, %c0_13] : memref<1x128xf32, #tpu.memory_space<vmem>>, vector<1x128xf32>
    %c0_14 = arith.constant 0 : index
    %c0_15 = arith.constant 0 : index
    %c0_16 = arith.constant 0 : index
    %13 = vector.load %arg17[%c0_14, %c0_15, %c0_16] : memref<2x8x128xf32, #tpu.memory_space<vmem>>, vector<1x8x128xf32>
    %14 = vector.shape_cast %13 : vector<1x8x128xf32> to vector<8x128xf32>
    %c1 = arith.constant 1 : index
    %c0_17 = arith.constant 0 : index
    %c0_18 = arith.constant 0 : index
    %15 = vector.load %arg17[%c1, %c0_17, %c0_18] : memref<2x8x128xf32, #tpu.memory_space<vmem>>, vector<1x8x128xf32>
    %16 = vector.shape_cast %15 : vector<1x8x128xf32> to vector<8x128xf32>
    %c0_i32_19 = arith.constant 0 : i32
    %c8_i32 = arith.constant 8 : i32
    %17 = arith.muli %c0_i32_19, %c8_i32 : i32
    %18 = tpu.assume_multiple %17, 8 : i32
    %c0_20 = arith.constant 0 : index
    %c0_21 = arith.constant 0 : index
    %19 = vector.load %arg9[%c0_20, %c0_21] : memref<128x384xf32, #tpu.memory_space<vmem>>, vector<128x384xf32>
    %cst_22 = arith.constant dense<0.000000e+00> : vector<8x384xf32>
    %20 = tpu.matmul %16, %19, %cst_22 {dimension_numbers = #tpu.dot_dimension_numbers<[1], [0], [0], [1], [0, 0, 1, 1], [], []>} : vector<8x128xf32>, vector<128x384xf32>, vector<8x384xf32> -> vector<8x384xf32>
    %21 = arith.index_cast %18 : i32 to index
    %c0_23 = arith.constant 0 : index
    %22 = vector.load %arg15[%21, %c0_23] : memref<64x384xf32, #tpu.memory_space<vmem>>, vector<8x384xf32>
    %c0_24 = arith.constant 0 : index
    %c0_25 = arith.constant 0 : index
    %23 = vector.load %arg5[%c0_24, %c0_25] : memref<128x384xf32, #tpu.memory_space<vmem>>, vector<128x384xf32>
    %cst_26 = arith.constant dense<0.000000e+00> : vector<8x384xf32>
    %24 = tpu.matmul %14, %23, %cst_26 {dimension_numbers = #tpu.dot_dimension_numbers<[1], [0], [0], [1], [0, 0, 1, 1], [], []>} : vector<8x128xf32>, vector<128x384xf32>, vector<8x384xf32> -> vector<8x384xf32>
    %25 = vector.extract_strided_slice %22 {offsets = [0, 0], sizes = [8, 128], strides = [1, 1]} : vector<8x384xf32> to vector<8x128xf32>
    %26 = vector.extract_strided_slice %24 {offsets = [0, 0], sizes = [8, 128], strides = [1, 1]} : vector<8x384xf32> to vector<8x128xf32>
    %27 = arith.addf %25, %26 : vector<8x128xf32>
    %28 = arith.negf %27 : vector<8x128xf32>
    %29 = math.exp %28 : vector<8x128xf32>
    %cst_27 = arith.constant 1.000000e+00 : f32
    %30 = vector.broadcast %cst_27 : f32 to vector<8x128xf32>
    %31 = arith.addf %30, %29 : vector<8x128xf32>
    %32 = arith.divf %30, %31 : vector<8x128xf32>
    %33 = vector.extract_strided_slice %22 {offsets = [0, 128], sizes = [8, 128], strides = [1, 1]} : vector<8x384xf32> to vector<8x128xf32>
    %34 = vector.extract_strided_slice %24 {offsets = [0, 128], sizes = [8, 128], strides = [1, 1]} : vector<8x384xf32> to vector<8x128xf32>
    %35 = arith.addf %33, %34 : vector<8x128xf32>
    %36 = arith.negf %35 : vector<8x128xf32>
    %37 = math.exp %36 : vector<8x128xf32>
    %cst_28 = arith.constant 1.000000e+00 : f32
    %38 = vector.broadcast %cst_28 : f32 to vector<8x128xf32>
    %39 = arith.addf %38, %37 : vector<8x128xf32>
    %40 = arith.divf %38, %39 : vector<8x128xf32>
    %41 = vector.extract_strided_slice %22 {offsets = [0, 256], sizes = [8, 128], strides = [1, 1]} : vector<8x384xf32> to vector<8x128xf32>
    %42 = vector.extract_strided_slice %24 {offsets = [0, 256], sizes = [8, 128], strides = [1, 1]} : vector<8x384xf32> to vector<8x128xf32>
    %43 = vector.broadcast %10 : vector<1x128xf32> to vector<8x128xf32>
    %44 = arith.addf %42, %43 : vector<8x128xf32>
    %45 = arith.mulf %32, %44 : vector<8x128xf32>
    %46 = arith.addf %41, %45 : vector<8x128xf32>
    %47 = math.tanh %46 : vector<8x128xf32>
    %cst_29 = arith.constant 1.000000e+00 : f32
    %48 = vector.broadcast %cst_29 : f32 to vector<8x128xf32>
    %49 = arith.subf %48, %40 : vector<8x128xf32>
    %50 = arith.mulf %49, %47 : vector<8x128xf32>
    %51 = arith.mulf %40, %14 : vector<8x128xf32>
    %52 = arith.addf %50, %51 : vector<8x128xf32>
    %c0_30 = arith.constant 0 : index
    %c0_31 = arith.constant 0 : index
    %53 = vector.load %arg7[%c0_30, %c0_31] : memref<128x384xf32, #tpu.memory_space<vmem>>, vector<128x384xf32>
    %cst_32 = arith.constant dense<0.000000e+00> : vector<8x384xf32>
    %54 = tpu.matmul %52, %53, %cst_32 {dimension_numbers = #tpu.dot_dimension_numbers<[1], [0], [0], [1], [0, 0, 1, 1], [], []>} : vector<8x128xf32>, vector<128x384xf32>, vector<8x384xf32> -> vector<8x384xf32>
    %55 = vector.broadcast %11 : vector<1x384xf32> to vector<8x384xf32>
    %56 = arith.addf %54, %55 : vector<8x384xf32>
    %57 = vector.extract_strided_slice %56 {offsets = [0, 0], sizes = [8, 128], strides = [1, 1]} : vector<8x384xf32> to vector<8x128xf32>
    %58 = vector.extract_strided_slice %20 {offsets = [0, 0], sizes = [8, 128], strides = [1, 1]} : vector<8x384xf32> to vector<8x128xf32>
    %59 = arith.addf %57, %58 : vector<8x128xf32>
    %60 = arith.negf %59 : vector<8x128xf32>
    %61 = math.exp %60 : vector<8x128xf32>
    %cst_33 = arith.constant 1.000000e+00 : f32
    %62 = vector.broadcast %cst_33 : f32 to vector<8x128xf32>
    %63 = arith.addf %62, %61 : vector<8x128xf32>
    %64 = arith.divf %62, %63 : vector<8x128xf32>
    %65 = vector.extract_strided_slice %56 {offsets = [0, 128], sizes = [8, 128], strides = [1, 1]} : vector<8x384xf32> to vector<8x128xf32>
    %66 = vector.extract_strided_slice %20 {offsets = [0, 128], sizes = [8, 128], strides = [1, 1]} : vector<8x384xf32> to vector<8x128xf32>
    %67 = arith.addf %65, %66 : vector<8x128xf32>
    %68 = arith.negf %67 : vector<8x128xf32>
    %69 = math.exp %68 : vector<8x128xf32>
    %cst_34 = arith.constant 1.000000e+00 : f32
    %70 = vector.broadcast %cst_34 : f32 to vector<8x128xf32>
    %71 = arith.addf %70, %69 : vector<8x128xf32>
    %72 = arith.divf %70, %71 : vector<8x128xf32>
    %73 = vector.extract_strided_slice %56 {offsets = [0, 256], sizes = [8, 128], strides = [1, 1]} : vector<8x384xf32> to vector<8x128xf32>
    %74 = vector.extract_strided_slice %20 {offsets = [0, 256], sizes = [8, 128], strides = [1, 1]} : vector<8x384xf32> to vector<8x128xf32>
    %75 = vector.broadcast %12 : vector<1x128xf32> to vector<8x128xf32>
    %76 = arith.addf %74, %75 : vector<8x128xf32>
    %77 = arith.mulf %64, %76 : vector<8x128xf32>
    %78 = arith.addf %73, %77 : vector<8x128xf32>
    %79 = math.tanh %78 : vector<8x128xf32>
    %cst_35 = arith.constant 1.000000e+00 : f32
    %80 = vector.broadcast %cst_35 : f32 to vector<8x128xf32>
    %81 = arith.subf %80, %72 : vector<8x128xf32>
    %82 = arith.mulf %81, %79 : vector<8x128xf32>
    %83 = arith.mulf %72, %16 : vector<8x128xf32>
    %84 = arith.addf %82, %83 : vector<8x128xf32>
    %85 = arith.index_cast %18 : i32 to index
    %c0_36 = arith.constant 0 : index
    %86 = vector.load %arg16[%85, %c0_36] : memref<64x128xf32, #tpu.memory_space<vmem>>, vector<8x128xf32>
    tpu.vector_store %arg16[%85, %c0_36], %84 {strides = array<i32>} : memref<64x128xf32, #tpu.memory_space<vmem>>, vector<8x128xf32>,
    %c1_i32 = arith.constant 1 : i32
    %c8_i32_37 = arith.constant 8 : i32
    %87 = arith.muli %c1_i32, %c8_i32_37 : i32
    %88 = tpu.assume_multiple %87, 8 : i32
    %c0_38 = arith.constant 0 : index
    %c0_39 = arith.constant 0 : index
    %89 = vector.load %arg9[%c0_38, %c0_39] : memref<128x384xf32, #tpu.memory_space<vmem>>, vector<128x384xf32>
    %cst_40 = arith.constant dense<0.000000e+00> : vector<8x384xf32>
    %90 = tpu.matmul %84, %89, %cst_40 {dimension_numbers = #tpu.dot_dimension_numbers<[1], [0], [0], [1], [0, 0, 1, 1], [], []>} : vector<8x128xf32>, vector<128x384xf32>, vector<8x384xf32> -> vector<8x384xf32>
    %91 = arith.index_cast %88 : i32 to index
    %c0_41 = arith.constant 0 : index
    %92 = vector.load %arg15[%91, %c0_41] : memref<64x384xf32, #tpu.memory_space<vmem>>, vector<8x384xf32>
    %c0_42 = arith.constant 0 : index
    %c0_43 = arith.constant 0 : index
    %93 = vector.load %arg5[%c0_42, %c0_43] : memref<128x384xf32, #tpu.memory_space<vmem>>, vector<128x384xf32>
    %cst_44 = arith.constant dense<0.000000e+00> : vector<8x384xf32>
    %94 = tpu.matmul %52, %93, %cst_44 {dimension_numbers = #tpu.dot_dimension_numbers<[1], [0], [0], [1], [0, 0, 1, 1], [], []>} : vector<8x128xf32>, vector<128x384xf32>, vector<8x384xf32> -> vector<8x384xf32>
    %95 = vector.extract_strided_slice %92 {offsets = [0, 0], sizes = [8, 128], strides = [1, 1]} : vector<8x384xf32> to vector<8x128xf32>
    %96 = vector.extract_strided_slice %94 {offsets = [0, 0], sizes = [8, 128], strides = [1, 1]} : vector<8x384xf32> to vector<8x128xf32>
    %97 = arith.addf %95, %96 : vector<8x128xf32>
    %98 = arith.negf %97 : vector<8x128xf32>
    %99 = math.exp %98 : vector<8x128xf32>
    %cst_45 = arith.constant 1.000000e+00 : f32
    %100 = vector.broadcast %cst_45 : f32 to vector<8x128xf32>
    %101 = arith.addf %100, %99 : vector<8x128xf32>
    %102 = arith.divf %100, %101 : vector<8x128xf32>
    %103 = vector.extract_strided_slice %92 {offsets = [0, 128], sizes = [8, 128], strides = [1, 1]} : vector<8x384xf32> to vector<8x128xf32>
    %104 = vector.extract_strided_slice %94 {offsets = [0, 128], sizes = [8, 128], strides = [1, 1]} : vector<8x384xf32> to vector<8x128xf32>
    %105 = arith.addf %103, %104 : vector<8x128xf32>
    %106 = arith.negf %105 : vector<8x128xf32>
    %107 = math.exp %106 : vector<8x128xf32>
    %cst_46 = arith.constant 1.000000e+00 : f32
    %108 = vector.broadcast %cst_46 : f32 to vector<8x128xf32>
    %109 = arith.addf %108, %107 : vector<8x128xf32>
    %110 = arith.divf %108, %109 : vector<8x128xf32>
    %111 = vector.extract_strided_slice %92 {offsets = [0, 256], sizes = [8, 128], strides = [1, 1]} : vector<8x384xf32> to vector<8x128xf32>
    %112 = vector.extract_strided_slice %94 {offsets = [0, 256], sizes = [8, 128], strides = [1, 1]} : vector<8x384xf32> to vector<8x128xf32>
    %113 = vector.broadcast %10 : vector<1x128xf32> to vector<8x128xf32>
    %114 = arith.addf %112, %113 : vector<8x128xf32>
    %115 = arith.mulf %102, %114 : vector<8x128xf32>
    %116 = arith.addf %111, %115 : vector<8x128xf32>
    %117 = math.tanh %116 : vector<8x128xf32>
    %cst_47 = arith.constant 1.000000e+00 : f32
    %118 = vector.broadcast %cst_47 : f32 to vector<8x128xf32>
    %119 = arith.subf %118, %110 : vector<8x128xf32>
    %120 = arith.mulf %119, %117 : vector<8x128xf32>
    %121 = arith.mulf %110, %52 : vector<8x128xf32>
    %122 = arith.addf %120, %121 : vector<8x128xf32>
    %c0_48 = arith.constant 0 : index
    %c0_49 = arith.constant 0 : index
    %123 = vector.load %arg7[%c0_48, %c0_49] : memref<128x384xf32, #tpu.memory_space<vmem>>, vector<128x384xf32>
    %cst_50 = arith.constant dense<0.000000e+00> : vector<8x384xf32>
    %124 = tpu.matmul %122, %123, %cst_50 {dimension_numbers = #tpu.dot_dimension_numbers<[1], [0], [0], [1], [0, 0, 1, 1], [], []>} : vector<8x128xf32>, vector<128x384xf32>, vector<8x384xf32> -> vector<8x384xf32>
    %125 = vector.broadcast %11 : vector<1x384xf32> to vector<8x384xf32>
    %126 = arith.addf %124, %125 : vector<8x384xf32>
    %127 = vector.extract_strided_slice %126 {offsets = [0, 0], sizes = [8, 128], strides = [1, 1]} : vector<8x384xf32> to vector<8x128xf32>
    %128 = vector.extract_strided_slice %90 {offsets = [0, 0], sizes = [8, 128], strides = [1, 1]} : vector<8x384xf32> to vector<8x128xf32>
    %129 = arith.addf %127, %128 : vector<8x128xf32>
    %130 = arith.negf %129 : vector<8x128xf32>
    %131 = math.exp %130 : vector<8x128xf32>
    %cst_51 = arith.constant 1.000000e+00 : f32
    %132 = vector.broadcast %cst_51 : f32 to vector<8x128xf32>
    %133 = arith.addf %132, %131 : vector<8x128xf32>
    %134 = arith.divf %132, %133 : vector<8x128xf32>
    %135 = vector.extract_strided_slice %126 {offsets = [0, 128], sizes = [8, 128], strides = [1, 1]} : vector<8x384xf32> to vector<8x128xf32>
    %136 = vector.extract_strided_slice %90 {offsets = [0, 128], sizes = [8, 128], strides = [1, 1]} : vector<8x384xf32> to vector<8x128xf32>
    %137 = arith.addf %135, %136 : vector<8x128xf32>
    %138 = arith.negf %137 : vector<8x128xf32>
    %139 = math.exp %138 : vector<8x128xf32>
    %cst_52 = arith.constant 1.000000e+00 : f32
    %140 = vector.broadcast %cst_52 : f32 to vector<8x128xf32>
    %141 = arith.addf %140, %139 : vector<8x128xf32>
    %142 = arith.divf %140, %141 : vector<8x128xf32>
    %143 = vector.extract_strided_slice %126 {offsets = [0, 256], sizes = [8, 128], strides = [1, 1]} : vector<8x384xf32> to vector<8x128xf32>
    %144 = vector.extract_strided_slice %90 {offsets = [0, 256], sizes = [8, 128], strides = [1, 1]} : vector<8x384xf32> to vector<8x128xf32>
    %145 = vector.broadcast %12 : vector<1x128xf32> to vector<8x128xf32>
    %146 = arith.addf %144, %145 : vector<8x128xf32>
    %147 = arith.mulf %134, %146 : vector<8x128xf32>
    %148 = arith.addf %143, %147 : vector<8x128xf32>
    %149 = math.tanh %148 : vector<8x128xf32>
    %cst_53 = arith.constant 1.000000e+00 : f32
    %150 = vector.broadcast %cst_53 : f32 to vector<8x128xf32>
    %151 = arith.subf %150, %142 : vector<8x128xf32>
    %152 = arith.mulf %151, %149 : vector<8x128xf32>
    %153 = arith.mulf %142, %84 : vector<8x128xf32>
    %154 = arith.addf %152, %153 : vector<8x128xf32>
    %155 = arith.index_cast %88 : i32 to index
    %c0_54 = arith.constant 0 : index
    %156 = vector.load %arg16[%155, %c0_54] : memref<64x128xf32, #tpu.memory_space<vmem>>, vector<8x128xf32>
    tpu.vector_store %arg16[%155, %c0_54], %154 {strides = array<i32>} : memref<64x128xf32, #tpu.memory_space<vmem>>, vector<8x128xf32>,
    %c2_i32 = arith.constant 2 : i32
    %c8_i32_55 = arith.constant 8 : i32
    %157 = arith.muli %c2_i32, %c8_i32_55 : i32
    %158 = tpu.assume_multiple %157, 8 : i32
    %c0_56 = arith.constant 0 : index
    %c0_57 = arith.constant 0 : index
    %159 = vector.load %arg9[%c0_56, %c0_57] : memref<128x384xf32, #tpu.memory_space<vmem>>, vector<128x384xf32>
    %cst_58 = arith.constant dense<0.000000e+00> : vector<8x384xf32>
    %160 = tpu.matmul %154, %159, %cst_58 {dimension_numbers = #tpu.dot_dimension_numbers<[1], [0], [0], [1], [0, 0, 1, 1], [], []>} : vector<8x128xf32>, vector<128x384xf32>, vector<8x384xf32> -> vector<8x384xf32>
    %161 = arith.index_cast %158 : i32 to index
    %c0_59 = arith.constant 0 : index
    %162 = vector.load %arg15[%161, %c0_59] : memref<64x384xf32, #tpu.memory_space<vmem>>, vector<8x384xf32>
    %c0_60 = arith.constant 0 : index
    %c0_61 = arith.constant 0 : index
    %163 = vector.load %arg5[%c0_60, %c0_61] : memref<128x384xf32, #tpu.memory_space<vmem>>, vector<128x384xf32>
    %cst_62 = arith.constant dense<0.000000e+00> : vector<8x384xf32>
    %164 = tpu.matmul %122, %163, %cst_62 {dimension_numbers = #tpu.dot_dimension_numbers<[1], [0], [0], [1], [0, 0, 1, 1], [], []>} : vector<8x128xf32>, vector<128x384xf32>, vector<8x384xf32> -> vector<8x384xf32>
    %165 = vector.extract_strided_slice %162 {offsets = [0, 0], sizes = [8, 128], strides = [1, 1]} : vector<8x384xf32> to vector<8x128xf32>
    %166 = vector.extract_strided_slice %164 {offsets = [0, 0], sizes = [8, 128], strides = [1, 1]} : vector<8x384xf32> to vector<8x128xf32>
    %167 = arith.addf %165, %166 : vector<8x128xf32>
    %168 = arith.negf %167 : vector<8x128xf32>
    %169 = math.exp %168 : vector<8x128xf32>
    %cst_63 = arith.constant 1.000000e+00 : f32
    %170 = vector.broadcast %cst_63 : f32 to vector<8x128xf32>
    %171 = arith.addf %170, %169 : vector<8x128xf32>
    %172 = arith.divf %170, %171 : vector<8x128xf32>
    %173 = vector.extract_strided_slice %162 {offsets = [0, 128], sizes = [8, 128], strides = [1, 1]} : vector<8x384xf32> to vector<8x128xf32>
    %174 = vector.extract_strided_slice %164 {offsets = [0, 128], sizes = [8, 128], strides = [1, 1]} : vector<8x384xf32> to vector<8x128xf32>
    %175 = arith.addf %173, %174 : vector<8x128xf32>
    %176 = arith.negf %175 : vector<8x128xf32>
    %177 = math.exp %176 : vector<8x128xf32>
    %cst_64 = arith.constant 1.000000e+00 : f32
    %178 = vector.broadcast %cst_64 : f32 to vector<8x128xf32>
    %179 = arith.addf %178, %177 : vector<8x128xf32>
    %180 = arith.divf %178, %179 : vector<8x128xf32>
    %181 = vector.extract_strided_slice %162 {offsets = [0, 256], sizes = [8, 128], strides = [1, 1]} : vector<8x384xf32> to vector<8x128xf32>
    %182 = vector.extract_strided_slice %164 {offsets = [0, 256], sizes = [8, 128], strides = [1, 1]} : vector<8x384xf32> to vector<8x128xf32>
    %183 = vector.broadcast %10 : vector<1x128xf32> to vector<8x128xf32>
    %184 = arith.addf %182, %183 : vector<8x128xf32>
    %185 = arith.mulf %172, %184 : vector<8x128xf32>
    %186 = arith.addf %181, %185 : vector<8x128xf32>
    %187 = math.tanh %186 : vector<8x128xf32>
    %cst_65 = arith.constant 1.000000e+00 : f32
    %188 = vector.broadcast %cst_65 : f32 to vector<8x128xf32>
    %189 = arith.subf %188, %180 : vector<8x128xf32>
    %190 = arith.mulf %189, %187 : vector<8x128xf32>
    %191 = arith.mulf %180, %122 : vector<8x128xf32>
    %192 = arith.addf %190, %191 : vector<8x128xf32>
    %c0_66 = arith.constant 0 : index
    %c0_67 = arith.constant 0 : index
    %193 = vector.load %arg7[%c0_66, %c0_67] : memref<128x384xf32, #tpu.memory_space<vmem>>, vector<128x384xf32>
    %cst_68 = arith.constant dense<0.000000e+00> : vector<8x384xf32>
    %194 = tpu.matmul %192, %193, %cst_68 {dimension_numbers = #tpu.dot_dimension_numbers<[1], [0], [0], [1], [0, 0, 1, 1], [], []>} : vector<8x128xf32>, vector<128x384xf32>, vector<8x384xf32> -> vector<8x384xf32>
    %195 = vector.broadcast %11 : vector<1x384xf32> to vector<8x384xf32>
    %196 = arith.addf %194, %195 : vector<8x384xf32>
    %197 = vector.extract_strided_slice %196 {offsets = [0, 0], sizes = [8, 128], strides = [1, 1]} : vector<8x384xf32> to vector<8x128xf32>
    %198 = vector.extract_strided_slice %160 {offsets = [0, 0], sizes = [8, 128], strides = [1, 1]} : vector<8x384xf32> to vector<8x128xf32>
    %199 = arith.addf %197, %198 : vector<8x128xf32>
    %200 = arith.negf %199 : vector<8x128xf32>
    %201 = math.exp %200 : vector<8x128xf32>
    %cst_69 = arith.constant 1.000000e+00 : f32
    %202 = vector.broadcast %cst_69 : f32 to vector<8x128xf32>
    %203 = arith.addf %202, %201 : vector<8x128xf32>
    %204 = arith.divf %202, %203 : vector<8x128xf32>
    %205 = vector.extract_strided_slice %196 {offsets = [0, 128], sizes = [8, 128], strides = [1, 1]} : vector<8x384xf32> to vector<8x128xf32>
    %206 = vector.extract_strided_slice %160 {offsets = [0, 128], sizes = [8, 128], strides = [1, 1]} : vector<8x384xf32> to vector<8x128xf32>
    %207 = arith.addf %205, %206 : vector<8x128xf32>
    %208 = arith.negf %207 : vector<8x128xf32>
    %209 = math.exp %208 : vector<8x128xf32>
    %cst_70 = arith.constant 1.000000e+00 : f32
    %210 = vector.broadcast %cst_70 : f32 to vector<8x128xf32>
    %211 = arith.addf %210, %209 : vector<8x128xf32>
    %212 = arith.divf %210, %211 : vector<8x128xf32>
    %213 = vector.extract_strided_slice %196 {offsets = [0, 256], sizes = [8, 128], strides = [1, 1]} : vector<8x384xf32> to vector<8x128xf32>
    %214 = vector.extract_strided_slice %160 {offsets = [0, 256], sizes = [8, 128], strides = [1, 1]} : vector<8x384xf32> to vector<8x128xf32>
    %215 = vector.broadcast %12 : vector<1x128xf32> to vector<8x128xf32>
    %216 = arith.addf %214, %215 : vector<8x128xf32>
    %217 = arith.mulf %204, %216 : vector<8x128xf32>
    %218 = arith.addf %213, %217 : vector<8x128xf32>
    %219 = math.tanh %218 : vector<8x128xf32>
    %cst_71 = arith.constant 1.000000e+00 : f32
    %220 = vector.broadcast %cst_71 : f32 to vector<8x128xf32>
    %221 = arith.subf %220, %212 : vector<8x128xf32>
    %222 = arith.mulf %221, %219 : vector<8x128xf32>
    %223 = arith.mulf %212, %154 : vector<8x128xf32>
    %224 = arith.addf %222, %223 : vector<8x128xf32>
    %225 = arith.index_cast %158 : i32 to index
    %c0_72 = arith.constant 0 : index
    %226 = vector.load %arg16[%225, %c0_72] : memref<64x128xf32, #tpu.memory_space<vmem>>, vector<8x128xf32>
    tpu.vector_store %arg16[%225, %c0_72], %224 {strides = array<i32>} : memref<64x128xf32, #tpu.memory_space<vmem>>, vector<8x128xf32>,
    %c3_i32 = arith.constant 3 : i32
    %c8_i32_73 = arith.constant 8 : i32
    %227 = arith.muli %c3_i32, %c8_i32_73 : i32
    %228 = tpu.assume_multiple %227, 8 : i32
    %c0_74 = arith.constant 0 : index
    %c0_75 = arith.constant 0 : index
    %229 = vector.load %arg9[%c0_74, %c0_75] : memref<128x384xf32, #tpu.memory_space<vmem>>, vector<128x384xf32>
    %cst_76 = arith.constant dense<0.000000e+00> : vector<8x384xf32>
    %230 = tpu.matmul %224, %229, %cst_76 {dimension_numbers = #tpu.dot_dimension_numbers<[1], [0], [0], [1], [0, 0, 1, 1], [], []>} : vector<8x128xf32>, vector<128x384xf32>, vector<8x384xf32> -> vector<8x384xf32>
    %231 = arith.index_cast %228 : i32 to index
    %c0_77 = arith.constant 0 : index
    %232 = vector.load %arg15[%231, %c0_77] : memref<64x384xf32, #tpu.memory_space<vmem>>, vector<8x384xf32>
    %c0_78 = arith.constant 0 : index
    %c0_79 = arith.constant 0 : index
    %233 = vector.load %arg5[%c0_78, %c0_79] : memref<128x384xf32, #tpu.memory_space<vmem>>, vector<128x384xf32>
    %cst_80 = arith.constant dense<0.000000e+00> : vector<8x384xf32>
    %234 = tpu.matmul %192, %233, %cst_80 {dimension_numbers = #tpu.dot_dimension_numbers<[1], [0], [0], [1], [0, 0, 1, 1], [], []>} : vector<8x128xf32>, vector<128x384xf32>, vector<8x384xf32> -> vector<8x384xf32>
    %235 = vector.extract_strided_slice %232 {offsets = [0, 0], sizes = [8, 128], strides = [1, 1]} : vector<8x384xf32> to vector<8x128xf32>
    %236 = vector.extract_strided_slice %234 {offsets = [0, 0], sizes = [8, 128], strides = [1, 1]} : vector<8x384xf32> to vector<8x128xf32>
    %237 = arith.addf %235, %236 : vector<8x128xf32>
    %238 = arith.negf %237 : vector<8x128xf32>
    %239 = math.exp %238 : vector<8x128xf32>
    %cst_81 = arith.constant 1.000000e+00 : f32
    %240 = vector.broadcast %cst_81 : f32 to vector<8x128xf32>
    %241 = arith.addf %240, %239 : vector<8x128xf32>
    %242 = arith.divf %240, %241 : vector<8x128xf32>
    %243 = vector.extract_strided_slice %232 {offsets = [0, 128], sizes = [8, 128], strides = [1, 1]} : vector<8x384xf32> to vector<8x128xf32>
    %244 = vector.extract_strided_slice %234 {offsets = [0, 128], sizes = [8, 128], strides = [1, 1]} : vector<8x384xf32> to vector<8x128xf32>
    %245 = arith.addf %243, %244 : vector<8x128xf32>
    %246 = arith.negf %245 : vector<8x128xf32>
    %247 = math.exp %246 : vector<8x128xf32>
    %cst_82 = arith.constant 1.000000e+00 : f32
    %248 = vector.broadcast %cst_82 : f32 to vector<8x128xf32>
    %249 = arith.addf %248, %247 : vector<8x128xf32>
    %250 = arith.divf %248, %249 : vector<8x128xf32>
    %251 = vector.extract_strided_slice %232 {offsets = [0, 256], sizes = [8, 128], strides = [1, 1]} : vector<8x384xf32> to vector<8x128xf32>
    %252 = vector.extract_strided_slice %234 {offsets = [0, 256], sizes = [8, 128], strides = [1, 1]} : vector<8x384xf32> to vector<8x128xf32>
    %253 = vector.broadcast %10 : vector<1x128xf32> to vector<8x128xf32>
    %254 = arith.addf %252, %253 : vector<8x128xf32>
    %255 = arith.mulf %242, %254 : vector<8x128xf32>
    %256 = arith.addf %251, %255 : vector<8x128xf32>
    %257 = math.tanh %256 : vector<8x128xf32>
    %cst_83 = arith.constant 1.000000e+00 : f32
    %258 = vector.broadcast %cst_83 : f32 to vector<8x128xf32>
    %259 = arith.subf %258, %250 : vector<8x128xf32>
    %260 = arith.mulf %259, %257 : vector<8x128xf32>
    %261 = arith.mulf %250, %192 : vector<8x128xf32>
    %262 = arith.addf %260, %261 : vector<8x128xf32>
    %c0_84 = arith.constant 0 : index
    %c0_85 = arith.constant 0 : index
    %263 = vector.load %arg7[%c0_84, %c0_85] : memref<128x384xf32, #tpu.memory_space<vmem>>, vector<128x384xf32>
    %cst_86 = arith.constant dense<0.000000e+00> : vector<8x384xf32>
    %264 = tpu.matmul %262, %263, %cst_86 {dimension_numbers = #tpu.dot_dimension_numbers<[1], [0], [0], [1], [0, 0, 1, 1], [], []>} : vector<8x128xf32>, vector<128x384xf32>, vector<8x384xf32> -> vector<8x384xf32>
    %265 = vector.broadcast %11 : vector<1x384xf32> to vector<8x384xf32>
    %266 = arith.addf %264, %265 : vector<8x384xf32>
    %267 = vector.extract_strided_slice %266 {offsets = [0, 0], sizes = [8, 128], strides = [1, 1]} : vector<8x384xf32> to vector<8x128xf32>
    %268 = vector.extract_strided_slice %230 {offsets = [0, 0], sizes = [8, 128], strides = [1, 1]} : vector<8x384xf32> to vector<8x128xf32>
    %269 = arith.addf %267, %268 : vector<8x128xf32>
    %270 = arith.negf %269 : vector<8x128xf32>
    %271 = math.exp %270 : vector<8x128xf32>
    %cst_87 = arith.constant 1.000000e+00 : f32
    %272 = vector.broadcast %cst_87 : f32 to vector<8x128xf32>
    %273 = arith.addf %272, %271 : vector<8x128xf32>
    %274 = arith.divf %272, %273 : vector<8x128xf32>
    %275 = vector.extract_strided_slice %266 {offsets = [0, 128], sizes = [8, 128], strides = [1, 1]} : vector<8x384xf32> to vector<8x128xf32>
    %276 = vector.extract_strided_slice %230 {offsets = [0, 128], sizes = [8, 128], strides = [1, 1]} : vector<8x384xf32> to vector<8x128xf32>
    %277 = arith.addf %275, %276 : vector<8x128xf32>
    %278 = arith.negf %277 : vector<8x128xf32>
    %279 = math.exp %278 : vector<8x128xf32>
    %cst_88 = arith.constant 1.000000e+00 : f32
    %280 = vector.broadcast %cst_88 : f32 to vector<8x128xf32>
    %281 = arith.addf %280, %279 : vector<8x128xf32>
    %282 = arith.divf %280, %281 : vector<8x128xf32>
    %283 = vector.extract_strided_slice %266 {offsets = [0, 256], sizes = [8, 128], strides = [1, 1]} : vector<8x384xf32> to vector<8x128xf32>
    %284 = vector.extract_strided_slice %230 {offsets = [0, 256], sizes = [8, 128], strides = [1, 1]} : vector<8x384xf32> to vector<8x128xf32>
    %285 = vector.broadcast %12 : vector<1x128xf32> to vector<8x128xf32>
    %286 = arith.addf %284, %285 : vector<8x128xf32>
    %287 = arith.mulf %274, %286 : vector<8x128xf32>
    %288 = arith.addf %283, %287 : vector<8x128xf32>
    %289 = math.tanh %288 : vector<8x128xf32>
    %cst_89 = arith.constant 1.000000e+00 : f32
    %290 = vector.broadcast %cst_89 : f32 to vector<8x128xf32>
    %291 = arith.subf %290, %282 : vector<8x128xf32>
    %292 = arith.mulf %291, %289 : vector<8x128xf32>
    %293 = arith.mulf %282, %224 : vector<8x128xf32>
    %294 = arith.addf %292, %293 : vector<8x128xf32>
    %295 = arith.index_cast %228 : i32 to index
    %c0_90 = arith.constant 0 : index
    %296 = vector.load %arg16[%295, %c0_90] : memref<64x128xf32, #tpu.memory_space<vmem>>, vector<8x128xf32>
    tpu.vector_store %arg16[%295, %c0_90], %294 {strides = array<i32>} : memref<64x128xf32, #tpu.memory_space<vmem>>, vector<8x128xf32>,
    %c4_i32 = arith.constant 4 : i32
    %c8_i32_91 = arith.constant 8 : i32
    %297 = arith.muli %c4_i32, %c8_i32_91 : i32
    %298 = tpu.assume_multiple %297, 8 : i32
    %c0_92 = arith.constant 0 : index
    %c0_93 = arith.constant 0 : index
    %299 = vector.load %arg9[%c0_92, %c0_93] : memref<128x384xf32, #tpu.memory_space<vmem>>, vector<128x384xf32>
    %cst_94 = arith.constant dense<0.000000e+00> : vector<8x384xf32>
    %300 = tpu.matmul %294, %299, %cst_94 {dimension_numbers = #tpu.dot_dimension_numbers<[1], [0], [0], [1], [0, 0, 1, 1], [], []>} : vector<8x128xf32>, vector<128x384xf32>, vector<8x384xf32> -> vector<8x384xf32>
    %301 = arith.index_cast %298 : i32 to index
    %c0_95 = arith.constant 0 : index
    %302 = vector.load %arg15[%301, %c0_95] : memref<64x384xf32, #tpu.memory_space<vmem>>, vector<8x384xf32>
    %c0_96 = arith.constant 0 : index
    %c0_97 = arith.constant 0 : index
    %303 = vector.load %arg5[%c0_96, %c0_97] : memref<128x384xf32, #tpu.memory_space<vmem>>, vector<128x384xf32>
    %cst_98 = arith.constant dense<0.000000e+00> : vector<8x384xf32>
    %304 = tpu.matmul %262, %303, %cst_98 {dimension_numbers = #tpu.dot_dimension_numbers<[1], [0], [0], [1], [0, 0, 1, 1], [], []>} : vector<8x128xf32>, vector<128x384xf32>, vector<8x384xf32> -> vector<8x384xf32>
    %305 = vector.extract_strided_slice %302 {offsets = [0, 0], sizes = [8, 128], strides = [1, 1]} : vector<8x384xf32> to vector<8x128xf32>
    %306 = vector.extract_strided_slice %304 {offsets = [0, 0], sizes = [8, 128], strides = [1, 1]} : vector<8x384xf32> to vector<8x128xf32>
    %307 = arith.addf %305, %306 : vector<8x128xf32>
    %308 = arith.negf %307 : vector<8x128xf32>
    %309 = math.exp %308 : vector<8x128xf32>
    %cst_99 = arith.constant 1.000000e+00 : f32
    %310 = vector.broadcast %cst_99 : f32 to vector<8x128xf32>
    %311 = arith.addf %310, %309 : vector<8x128xf32>
    %312 = arith.divf %310, %311 : vector<8x128xf32>
    %313 = vector.extract_strided_slice %302 {offsets = [0, 128], sizes = [8, 128], strides = [1, 1]} : vector<8x384xf32> to vector<8x128xf32>
    %314 = vector.extract_strided_slice %304 {offsets = [0, 128], sizes = [8, 128], strides = [1, 1]} : vector<8x384xf32> to vector<8x128xf32>
    %315 = arith.addf %313, %314 : vector<8x128xf32>
    %316 = arith.negf %315 : vector<8x128xf32>
    %317 = math.exp %316 : vector<8x128xf32>
    %cst_100 = arith.constant 1.000000e+00 : f32
    %318 = vector.broadcast %cst_100 : f32 to vector<8x128xf32>
    %319 = arith.addf %318, %317 : vector<8x128xf32>
    %320 = arith.divf %318, %319 : vector<8x128xf32>
    %321 = vector.extract_strided_slice %302 {offsets = [0, 256], sizes = [8, 128], strides = [1, 1]} : vector<8x384xf32> to vector<8x128xf32>
    %322 = vector.extract_strided_slice %304 {offsets = [0, 256], sizes = [8, 128], strides = [1, 1]} : vector<8x384xf32> to vector<8x128xf32>
    %323 = vector.broadcast %10 : vector<1x128xf32> to vector<8x128xf32>
    %324 = arith.addf %322, %323 : vector<8x128xf32>
    %325 = arith.mulf %312, %324 : vector<8x128xf32>
    %326 = arith.addf %321, %325 : vector<8x128xf32>
    %327 = math.tanh %326 : vector<8x128xf32>
    %cst_101 = arith.constant 1.000000e+00 : f32
    %328 = vector.broadcast %cst_101 : f32 to vector<8x128xf32>
    %329 = arith.subf %328, %320 : vector<8x128xf32>
    %330 = arith.mulf %329, %327 : vector<8x128xf32>
    %331 = arith.mulf %320, %262 : vector<8x128xf32>
    %332 = arith.addf %330, %331 : vector<8x128xf32>
    %c0_102 = arith.constant 0 : index
    %c0_103 = arith.constant 0 : index
    %333 = vector.load %arg7[%c0_102, %c0_103] : memref<128x384xf32, #tpu.memory_space<vmem>>, vector<128x384xf32>
    %cst_104 = arith.constant dense<0.000000e+00> : vector<8x384xf32>
    %334 = tpu.matmul %332, %333, %cst_104 {dimension_numbers = #tpu.dot_dimension_numbers<[1], [0], [0], [1], [0, 0, 1, 1], [], []>} : vector<8x128xf32>, vector<128x384xf32>, vector<8x384xf32> -> vector<8x384xf32>
    %335 = vector.broadcast %11 : vector<1x384xf32> to vector<8x384xf32>
    %336 = arith.addf %334, %335 : vector<8x384xf32>
    %337 = vector.extract_strided_slice %336 {offsets = [0, 0], sizes = [8, 128], strides = [1, 1]} : vector<8x384xf32> to vector<8x128xf32>
    %338 = vector.extract_strided_slice %300 {offsets = [0, 0], sizes = [8, 128], strides = [1, 1]} : vector<8x384xf32> to vector<8x128xf32>
    %339 = arith.addf %337, %338 : vector<8x128xf32>
    %340 = arith.negf %339 : vector<8x128xf32>
    %341 = math.exp %340 : vector<8x128xf32>
    %cst_105 = arith.constant 1.000000e+00 : f32
    %342 = vector.broadcast %cst_105 : f32 to vector<8x128xf32>
    %343 = arith.addf %342, %341 : vector<8x128xf32>
    %344 = arith.divf %342, %343 : vector<8x128xf32>
    %345 = vector.extract_strided_slice %336 {offsets = [0, 128], sizes = [8, 128], strides = [1, 1]} : vector<8x384xf32> to vector<8x128xf32>
    %346 = vector.extract_strided_slice %300 {offsets = [0, 128], sizes = [8, 128], strides = [1, 1]} : vector<8x384xf32> to vector<8x128xf32>
    %347 = arith.addf %345, %346 : vector<8x128xf32>
    %348 = arith.negf %347 : vector<8x128xf32>
    %349 = math.exp %348 : vector<8x128xf32>
    %cst_106 = arith.constant 1.000000e+00 : f32
    %350 = vector.broadcast %cst_106 : f32 to vector<8x128xf32>
    %351 = arith.addf %350, %349 : vector<8x128xf32>
    %352 = arith.divf %350, %351 : vector<8x128xf32>
    %353 = vector.extract_strided_slice %336 {offsets = [0, 256], sizes = [8, 128], strides = [1, 1]} : vector<8x384xf32> to vector<8x128xf32>
    %354 = vector.extract_strided_slice %300 {offsets = [0, 256], sizes = [8, 128], strides = [1, 1]} : vector<8x384xf32> to vector<8x128xf32>
    %355 = vector.broadcast %12 : vector<1x128xf32> to vector<8x128xf32>
    %356 = arith.addf %354, %355 : vector<8x128xf32>
    %357 = arith.mulf %344, %356 : vector<8x128xf32>
    %358 = arith.addf %353, %357 : vector<8x128xf32>
    %359 = math.tanh %358 : vector<8x128xf32>
    %cst_107 = arith.constant 1.000000e+00 : f32
    %360 = vector.broadcast %cst_107 : f32 to vector<8x128xf32>
    %361 = arith.subf %360, %352 : vector<8x128xf32>
    %362 = arith.mulf %361, %359 : vector<8x128xf32>
    %363 = arith.mulf %352, %294 : vector<8x128xf32>
    %364 = arith.addf %362, %363 : vector<8x128xf32>
    %365 = arith.index_cast %298 : i32 to index
    %c0_108 = arith.constant 0 : index
    %366 = vector.load %arg16[%365, %c0_108] : memref<64x128xf32, #tpu.memory_space<vmem>>, vector<8x128xf32>
    tpu.vector_store %arg16[%365, %c0_108], %364 {strides = array<i32>} : memref<64x128xf32, #tpu.memory_space<vmem>>, vector<8x128xf32>,
    %c5_i32 = arith.constant 5 : i32
    %c8_i32_109 = arith.constant 8 : i32
    %367 = arith.muli %c5_i32, %c8_i32_109 : i32
    %368 = tpu.assume_multiple %367, 8 : i32
    %c0_110 = arith.constant 0 : index
    %c0_111 = arith.constant 0 : index
    %369 = vector.load %arg9[%c0_110, %c0_111] : memref<128x384xf32, #tpu.memory_space<vmem>>, vector<128x384xf32>
    %cst_112 = arith.constant dense<0.000000e+00> : vector<8x384xf32>
    %370 = tpu.matmul %364, %369, %cst_112 {dimension_numbers = #tpu.dot_dimension_numbers<[1], [0], [0], [1], [0, 0, 1, 1], [], []>} : vector<8x128xf32>, vector<128x384xf32>, vector<8x384xf32> -> vector<8x384xf32>
    %371 = arith.index_cast %368 : i32 to index
    %c0_113 = arith.constant 0 : index
    %372 = vector.load %arg15[%371, %c0_113] : memref<64x384xf32, #tpu.memory_space<vmem>>, vector<8x384xf32>
    %c0_114 = arith.constant 0 : index
    %c0_115 = arith.constant 0 : index
    %373 = vector.load %arg5[%c0_114, %c0_115] : memref<128x384xf32, #tpu.memory_space<vmem>>, vector<128x384xf32>
    %cst_116 = arith.constant dense<0.000000e+00> : vector<8x384xf32>
    %374 = tpu.matmul %332, %373, %cst_116 {dimension_numbers = #tpu.dot_dimension_numbers<[1], [0], [0], [1], [0, 0, 1, 1], [], []>} : vector<8x128xf32>, vector<128x384xf32>, vector<8x384xf32> -> vector<8x384xf32>
    %375 = vector.extract_strided_slice %372 {offsets = [0, 0], sizes = [8, 128], strides = [1, 1]} : vector<8x384xf32> to vector<8x128xf32>
    %376 = vector.extract_strided_slice %374 {offsets = [0, 0], sizes = [8, 128], strides = [1, 1]} : vector<8x384xf32> to vector<8x128xf32>
    %377 = arith.addf %375, %376 : vector<8x128xf32>
    %378 = arith.negf %377 : vector<8x128xf32>
    %379 = math.exp %378 : vector<8x128xf32>
    %cst_117 = arith.constant 1.000000e+00 : f32
    %380 = vector.broadcast %cst_117 : f32 to vector<8x128xf32>
    %381 = arith.addf %380, %379 : vector<8x128xf32>
    %382 = arith.divf %380, %381 : vector<8x128xf32>
    %383 = vector.extract_strided_slice %372 {offsets = [0, 128], sizes = [8, 128], strides = [1, 1]} : vector<8x384xf32> to vector<8x128xf32>
    %384 = vector.extract_strided_slice %374 {offsets = [0, 128], sizes = [8, 128], strides = [1, 1]} : vector<8x384xf32> to vector<8x128xf32>
    %385 = arith.addf %383, %384 : vector<8x128xf32>
    %386 = arith.negf %385 : vector<8x128xf32>
    %387 = math.exp %386 : vector<8x128xf32>
    %cst_118 = arith.constant 1.000000e+00 : f32
    %388 = vector.broadcast %cst_118 : f32 to vector<8x128xf32>
    %389 = arith.addf %388, %387 : vector<8x128xf32>
    %390 = arith.divf %388, %389 : vector<8x128xf32>
    %391 = vector.extract_strided_slice %372 {offsets = [0, 256], sizes = [8, 128], strides = [1, 1]} : vector<8x384xf32> to vector<8x128xf32>
    %392 = vector.extract_strided_slice %374 {offsets = [0, 256], sizes = [8, 128], strides = [1, 1]} : vector<8x384xf32> to vector<8x128xf32>
    %393 = vector.broadcast %10 : vector<1x128xf32> to vector<8x128xf32>
    %394 = arith.addf %392, %393 : vector<8x128xf32>
    %395 = arith.mulf %382, %394 : vector<8x128xf32>
    %396 = arith.addf %391, %395 : vector<8x128xf32>
    %397 = math.tanh %396 : vector<8x128xf32>
    %cst_119 = arith.constant 1.000000e+00 : f32
    %398 = vector.broadcast %cst_119 : f32 to vector<8x128xf32>
    %399 = arith.subf %398, %390 : vector<8x128xf32>
    %400 = arith.mulf %399, %397 : vector<8x128xf32>
    %401 = arith.mulf %390, %332 : vector<8x128xf32>
    %402 = arith.addf %400, %401 : vector<8x128xf32>
    %c0_120 = arith.constant 0 : index
    %c0_121 = arith.constant 0 : index
    %403 = vector.load %arg7[%c0_120, %c0_121] : memref<128x384xf32, #tpu.memory_space<vmem>>, vector<128x384xf32>
    %cst_122 = arith.constant dense<0.000000e+00> : vector<8x384xf32>
    %404 = tpu.matmul %402, %403, %cst_122 {dimension_numbers = #tpu.dot_dimension_numbers<[1], [0], [0], [1], [0, 0, 1, 1], [], []>} : vector<8x128xf32>, vector<128x384xf32>, vector<8x384xf32> -> vector<8x384xf32>
    %405 = vector.broadcast %11 : vector<1x384xf32> to vector<8x384xf32>
    %406 = arith.addf %404, %405 : vector<8x384xf32>
    %407 = vector.extract_strided_slice %406 {offsets = [0, 0], sizes = [8, 128], strides = [1, 1]} : vector<8x384xf32> to vector<8x128xf32>
    %408 = vector.extract_strided_slice %370 {offsets = [0, 0], sizes = [8, 128], strides = [1, 1]} : vector<8x384xf32> to vector<8x128xf32>
    %409 = arith.addf %407, %408 : vector<8x128xf32>
    %410 = arith.negf %409 : vector<8x128xf32>
    %411 = math.exp %410 : vector<8x128xf32>
    %cst_123 = arith.constant 1.000000e+00 : f32
    %412 = vector.broadcast %cst_123 : f32 to vector<8x128xf32>
    %413 = arith.addf %412, %411 : vector<8x128xf32>
    %414 = arith.divf %412, %413 : vector<8x128xf32>
    %415 = vector.extract_strided_slice %406 {offsets = [0, 128], sizes = [8, 128], strides = [1, 1]} : vector<8x384xf32> to vector<8x128xf32>
    %416 = vector.extract_strided_slice %370 {offsets = [0, 128], sizes = [8, 128], strides = [1, 1]} : vector<8x384xf32> to vector<8x128xf32>
    %417 = arith.addf %415, %416 : vector<8x128xf32>
    %418 = arith.negf %417 : vector<8x128xf32>
    %419 = math.exp %418 : vector<8x128xf32>
    %cst_124 = arith.constant 1.000000e+00 : f32
    %420 = vector.broadcast %cst_124 : f32 to vector<8x128xf32>
    %421 = arith.addf %420, %419 : vector<8x128xf32>
    %422 = arith.divf %420, %421 : vector<8x128xf32>
    %423 = vector.extract_strided_slice %406 {offsets = [0, 256], sizes = [8, 128], strides = [1, 1]} : vector<8x384xf32> to vector<8x128xf32>
    %424 = vector.extract_strided_slice %370 {offsets = [0, 256], sizes = [8, 128], strides = [1, 1]} : vector<8x384xf32> to vector<8x128xf32>
    %425 = vector.broadcast %12 : vector<1x128xf32> to vector<8x128xf32>
    %426 = arith.addf %424, %425 : vector<8x128xf32>
    %427 = arith.mulf %414, %426 : vector<8x128xf32>
    %428 = arith.addf %423, %427 : vector<8x128xf32>
    %429 = math.tanh %428 : vector<8x128xf32>
    %cst_125 = arith.constant 1.000000e+00 : f32
    %430 = vector.broadcast %cst_125 : f32 to vector<8x128xf32>
    %431 = arith.subf %430, %422 : vector<8x128xf32>
    %432 = arith.mulf %431, %429 : vector<8x128xf32>
    %433 = arith.mulf %422, %364 : vector<8x128xf32>
    %434 = arith.addf %432, %433 : vector<8x128xf32>
    %435 = arith.index_cast %368 : i32 to index
    %c0_126 = arith.constant 0 : index
    %436 = vector.load %arg16[%435, %c0_126] : memref<64x128xf32, #tpu.memory_space<vmem>>, vector<8x128xf32>
    tpu.vector_store %arg16[%435, %c0_126], %434 {strides = array<i32>} : memref<64x128xf32, #tpu.memory_space<vmem>>, vector<8x128xf32>,
    %c6_i32 = arith.constant 6 : i32
    %c8_i32_127 = arith.constant 8 : i32
    %437 = arith.muli %c6_i32, %c8_i32_127 : i32
    %438 = tpu.assume_multiple %437, 8 : i32
    %c0_128 = arith.constant 0 : index
    %c0_129 = arith.constant 0 : index
    %439 = vector.load %arg9[%c0_128, %c0_129] : memref<128x384xf32, #tpu.memory_space<vmem>>, vector<128x384xf32>
    %cst_130 = arith.constant dense<0.000000e+00> : vector<8x384xf32>
    %440 = tpu.matmul %434, %439, %cst_130 {dimension_numbers = #tpu.dot_dimension_numbers<[1], [0], [0], [1], [0, 0, 1, 1], [], []>} : vector<8x128xf32>, vector<128x384xf32>, vector<8x384xf32> -> vector<8x384xf32>
    %441 = arith.index_cast %438 : i32 to index
    %c0_131 = arith.constant 0 : index
    %442 = vector.load %arg15[%441, %c0_131] : memref<64x384xf32, #tpu.memory_space<vmem>>, vector<8x384xf32>
    %c0_132 = arith.constant 0 : index
    %c0_133 = arith.constant 0 : index
    %443 = vector.load %arg5[%c0_132, %c0_133] : memref<128x384xf32, #tpu.memory_space<vmem>>, vector<128x384xf32>
    %cst_134 = arith.constant dense<0.000000e+00> : vector<8x384xf32>
    %444 = tpu.matmul %402, %443, %cst_134 {dimension_numbers = #tpu.dot_dimension_numbers<[1], [0], [0], [1], [0, 0, 1, 1], [], []>} : vector<8x128xf32>, vector<128x384xf32>, vector<8x384xf32> -> vector<8x384xf32>
    %445 = vector.extract_strided_slice %442 {offsets = [0, 0], sizes = [8, 128], strides = [1, 1]} : vector<8x384xf32> to vector<8x128xf32>
    %446 = vector.extract_strided_slice %444 {offsets = [0, 0], sizes = [8, 128], strides = [1, 1]} : vector<8x384xf32> to vector<8x128xf32>
    %447 = arith.addf %445, %446 : vector<8x128xf32>
    %448 = arith.negf %447 : vector<8x128xf32>
    %449 = math.exp %448 : vector<8x128xf32>
    %cst_135 = arith.constant 1.000000e+00 : f32
    %450 = vector.broadcast %cst_135 : f32 to vector<8x128xf32>
    %451 = arith.addf %450, %449 : vector<8x128xf32>
    %452 = arith.divf %450, %451 : vector<8x128xf32>
    %453 = vector.extract_strided_slice %442 {offsets = [0, 128], sizes = [8, 128], strides = [1, 1]} : vector<8x384xf32> to vector<8x128xf32>
    %454 = vector.extract_strided_slice %444 {offsets = [0, 128], sizes = [8, 128], strides = [1, 1]} : vector<8x384xf32> to vector<8x128xf32>
    %455 = arith.addf %453, %454 : vector<8x128xf32>
    %456 = arith.negf %455 : vector<8x128xf32>
    %457 = math.exp %456 : vector<8x128xf32>
    %cst_136 = arith.constant 1.000000e+00 : f32
    %458 = vector.broadcast %cst_136 : f32 to vector<8x128xf32>
    %459 = arith.addf %458, %457 : vector<8x128xf32>
    %460 = arith.divf %458, %459 : vector<8x128xf32>
    %461 = vector.extract_strided_slice %442 {offsets = [0, 256], sizes = [8, 128], strides = [1, 1]} : vector<8x384xf32> to vector<8x128xf32>
    %462 = vector.extract_strided_slice %444 {offsets = [0, 256], sizes = [8, 128], strides = [1, 1]} : vector<8x384xf32> to vector<8x128xf32>
    %463 = vector.broadcast %10 : vector<1x128xf32> to vector<8x128xf32>
    %464 = arith.addf %462, %463 : vector<8x128xf32>
    %465 = arith.mulf %452, %464 : vector<8x128xf32>
    %466 = arith.addf %461, %465 : vector<8x128xf32>
    %467 = math.tanh %466 : vector<8x128xf32>
    %cst_137 = arith.constant 1.000000e+00 : f32
    %468 = vector.broadcast %cst_137 : f32 to vector<8x128xf32>
    %469 = arith.subf %468, %460 : vector<8x128xf32>
    %470 = arith.mulf %469, %467 : vector<8x128xf32>
    %471 = arith.mulf %460, %402 : vector<8x128xf32>
    %472 = arith.addf %470, %471 : vector<8x128xf32>
    %c0_138 = arith.constant 0 : index
    %c0_139 = arith.constant 0 : index
    %473 = vector.load %arg7[%c0_138, %c0_139] : memref<128x384xf32, #tpu.memory_space<vmem>>, vector<128x384xf32>
    %cst_140 = arith.constant dense<0.000000e+00> : vector<8x384xf32>
    %474 = tpu.matmul %472, %473, %cst_140 {dimension_numbers = #tpu.dot_dimension_numbers<[1], [0], [0], [1], [0, 0, 1, 1], [], []>} : vector<8x128xf32>, vector<128x384xf32>, vector<8x384xf32> -> vector<8x384xf32>
    %475 = vector.broadcast %11 : vector<1x384xf32> to vector<8x384xf32>
    %476 = arith.addf %474, %475 : vector<8x384xf32>
    %477 = vector.extract_strided_slice %476 {offsets = [0, 0], sizes = [8, 128], strides = [1, 1]} : vector<8x384xf32> to vector<8x128xf32>
    %478 = vector.extract_strided_slice %440 {offsets = [0, 0], sizes = [8, 128], strides = [1, 1]} : vector<8x384xf32> to vector<8x128xf32>
    %479 = arith.addf %477, %478 : vector<8x128xf32>
    %480 = arith.negf %479 : vector<8x128xf32>
    %481 = math.exp %480 : vector<8x128xf32>
    %cst_141 = arith.constant 1.000000e+00 : f32
    %482 = vector.broadcast %cst_141 : f32 to vector<8x128xf32>
    %483 = arith.addf %482, %481 : vector<8x128xf32>
    %484 = arith.divf %482, %483 : vector<8x128xf32>
    %485 = vector.extract_strided_slice %476 {offsets = [0, 128], sizes = [8, 128], strides = [1, 1]} : vector<8x384xf32> to vector<8x128xf32>
    %486 = vector.extract_strided_slice %440 {offsets = [0, 128], sizes = [8, 128], strides = [1, 1]} : vector<8x384xf32> to vector<8x128xf32>
    %487 = arith.addf %485, %486 : vector<8x128xf32>
    %488 = arith.negf %487 : vector<8x128xf32>
    %489 = math.exp %488 : vector<8x128xf32>
    %cst_142 = arith.constant 1.000000e+00 : f32
    %490 = vector.broadcast %cst_142 : f32 to vector<8x128xf32>
    %491 = arith.addf %490, %489 : vector<8x128xf32>
    %492 = arith.divf %490, %491 : vector<8x128xf32>
    %493 = vector.extract_strided_slice %476 {offsets = [0, 256], sizes = [8, 128], strides = [1, 1]} : vector<8x384xf32> to vector<8x128xf32>
    %494 = vector.extract_strided_slice %440 {offsets = [0, 256], sizes = [8, 128], strides = [1, 1]} : vector<8x384xf32> to vector<8x128xf32>
    %495 = vector.broadcast %12 : vector<1x128xf32> to vector<8x128xf32>
    %496 = arith.addf %494, %495 : vector<8x128xf32>
    %497 = arith.mulf %484, %496 : vector<8x128xf32>
    %498 = arith.addf %493, %497 : vector<8x128xf32>
    %499 = math.tanh %498 : vector<8x128xf32>
    %cst_143 = arith.constant 1.000000e+00 : f32
    %500 = vector.broadcast %cst_143 : f32 to vector<8x128xf32>
    %501 = arith.subf %500, %492 : vector<8x128xf32>
    %502 = arith.mulf %501, %499 : vector<8x128xf32>
    %503 = arith.mulf %492, %434 : vector<8x128xf32>
    %504 = arith.addf %502, %503 : vector<8x128xf32>
    %505 = arith.index_cast %438 : i32 to index
    %c0_144 = arith.constant 0 : index
    %506 = vector.load %arg16[%505, %c0_144] : memref<64x128xf32, #tpu.memory_space<vmem>>, vector<8x128xf32>
    tpu.vector_store %arg16[%505, %c0_144], %504 {strides = array<i32>} : memref<64x128xf32, #tpu.memory_space<vmem>>, vector<8x128xf32>,
    %c7_i32 = arith.constant 7 : i32
    %c8_i32_145 = arith.constant 8 : i32
    %507 = arith.muli %c7_i32, %c8_i32_145 : i32
    %508 = tpu.assume_multiple %507, 8 : i32
    %c0_146 = arith.constant 0 : index
    %c0_147 = arith.constant 0 : index
    %509 = vector.load %arg9[%c0_146, %c0_147] : memref<128x384xf32, #tpu.memory_space<vmem>>, vector<128x384xf32>
    %cst_148 = arith.constant dense<0.000000e+00> : vector<8x384xf32>
    %510 = tpu.matmul %504, %509, %cst_148 {dimension_numbers = #tpu.dot_dimension_numbers<[1], [0], [0], [1], [0, 0, 1, 1], [], []>} : vector<8x128xf32>, vector<128x384xf32>, vector<8x384xf32> -> vector<8x384xf32>
    %511 = arith.index_cast %508 : i32 to index
    %c0_149 = arith.constant 0 : index
    %512 = vector.load %arg15[%511, %c0_149] : memref<64x384xf32, #tpu.memory_space<vmem>>, vector<8x384xf32>
    %c0_150 = arith.constant 0 : index
    %c0_151 = arith.constant 0 : index
    %513 = vector.load %arg5[%c0_150, %c0_151] : memref<128x384xf32, #tpu.memory_space<vmem>>, vector<128x384xf32>
    %cst_152 = arith.constant dense<0.000000e+00> : vector<8x384xf32>
    %514 = tpu.matmul %472, %513, %cst_152 {dimension_numbers = #tpu.dot_dimension_numbers<[1], [0], [0], [1], [0, 0, 1, 1], [], []>} : vector<8x128xf32>, vector<128x384xf32>, vector<8x384xf32> -> vector<8x384xf32>
    %515 = vector.extract_strided_slice %512 {offsets = [0, 0], sizes = [8, 128], strides = [1, 1]} : vector<8x384xf32> to vector<8x128xf32>
    %516 = vector.extract_strided_slice %514 {offsets = [0, 0], sizes = [8, 128], strides = [1, 1]} : vector<8x384xf32> to vector<8x128xf32>
    %517 = arith.addf %515, %516 : vector<8x128xf32>
    %518 = arith.negf %517 : vector<8x128xf32>
    %519 = math.exp %518 : vector<8x128xf32>
    %cst_153 = arith.constant 1.000000e+00 : f32
    %520 = vector.broadcast %cst_153 : f32 to vector<8x128xf32>
    %521 = arith.addf %520, %519 : vector<8x128xf32>
    %522 = arith.divf %520, %521 : vector<8x128xf32>
    %523 = vector.extract_strided_slice %512 {offsets = [0, 128], sizes = [8, 128], strides = [1, 1]} : vector<8x384xf32> to vector<8x128xf32>
    %524 = vector.extract_strided_slice %514 {offsets = [0, 128], sizes = [8, 128], strides = [1, 1]} : vector<8x384xf32> to vector<8x128xf32>
    %525 = arith.addf %523, %524 : vector<8x128xf32>
    %526 = arith.negf %525 : vector<8x128xf32>
    %527 = math.exp %526 : vector<8x128xf32>
    %cst_154 = arith.constant 1.000000e+00 : f32
    %528 = vector.broadcast %cst_154 : f32 to vector<8x128xf32>
    %529 = arith.addf %528, %527 : vector<8x128xf32>
    %530 = arith.divf %528, %529 : vector<8x128xf32>
    %531 = vector.extract_strided_slice %512 {offsets = [0, 256], sizes = [8, 128], strides = [1, 1]} : vector<8x384xf32> to vector<8x128xf32>
    %532 = vector.extract_strided_slice %514 {offsets = [0, 256], sizes = [8, 128], strides = [1, 1]} : vector<8x384xf32> to vector<8x128xf32>
    %533 = vector.broadcast %10 : vector<1x128xf32> to vector<8x128xf32>
    %534 = arith.addf %532, %533 : vector<8x128xf32>
    %535 = arith.mulf %522, %534 : vector<8x128xf32>
    %536 = arith.addf %531, %535 : vector<8x128xf32>
    %537 = math.tanh %536 : vector<8x128xf32>
    %cst_155 = arith.constant 1.000000e+00 : f32
    %538 = vector.broadcast %cst_155 : f32 to vector<8x128xf32>
    %539 = arith.subf %538, %530 : vector<8x128xf32>
    %540 = arith.mulf %539, %537 : vector<8x128xf32>
    %541 = arith.mulf %530, %472 : vector<8x128xf32>
    %542 = arith.addf %540, %541 : vector<8x128xf32>
    %c0_156 = arith.constant 0 : index
    %c0_157 = arith.constant 0 : index
    %543 = vector.load %arg7[%c0_156, %c0_157] : memref<128x384xf32, #tpu.memory_space<vmem>>, vector<128x384xf32>
    %cst_158 = arith.constant dense<0.000000e+00> : vector<8x384xf32>
    %544 = tpu.matmul %542, %543, %cst_158 {dimension_numbers = #tpu.dot_dimension_numbers<[1], [0], [0], [1], [0, 0, 1, 1], [], []>} : vector<8x128xf32>, vector<128x384xf32>, vector<8x384xf32> -> vector<8x384xf32>
    %545 = vector.broadcast %11 : vector<1x384xf32> to vector<8x384xf32>
    %546 = arith.addf %544, %545 : vector<8x384xf32>
    %547 = vector.extract_strided_slice %546 {offsets = [0, 0], sizes = [8, 128], strides = [1, 1]} : vector<8x384xf32> to vector<8x128xf32>
    %548 = vector.extract_strided_slice %510 {offsets = [0, 0], sizes = [8, 128], strides = [1, 1]} : vector<8x384xf32> to vector<8x128xf32>
    %549 = arith.addf %547, %548 : vector<8x128xf32>
    %550 = arith.negf %549 : vector<8x128xf32>
    %551 = math.exp %550 : vector<8x128xf32>
    %cst_159 = arith.constant 1.000000e+00 : f32
    %552 = vector.broadcast %cst_159 : f32 to vector<8x128xf32>
    %553 = arith.addf %552, %551 : vector<8x128xf32>
    %554 = arith.divf %552, %553 : vector<8x128xf32>
    %555 = vector.extract_strided_slice %546 {offsets = [0, 128], sizes = [8, 128], strides = [1, 1]} : vector<8x384xf32> to vector<8x128xf32>
    %556 = vector.extract_strided_slice %510 {offsets = [0, 128], sizes = [8, 128], strides = [1, 1]} : vector<8x384xf32> to vector<8x128xf32>
    %557 = arith.addf %555, %556 : vector<8x128xf32>
    %558 = arith.negf %557 : vector<8x128xf32>
    %559 = math.exp %558 : vector<8x128xf32>
    %cst_160 = arith.constant 1.000000e+00 : f32
    %560 = vector.broadcast %cst_160 : f32 to vector<8x128xf32>
    %561 = arith.addf %560, %559 : vector<8x128xf32>
    %562 = arith.divf %560, %561 : vector<8x128xf32>
    %563 = vector.extract_strided_slice %546 {offsets = [0, 256], sizes = [8, 128], strides = [1, 1]} : vector<8x384xf32> to vector<8x128xf32>
    %564 = vector.extract_strided_slice %510 {offsets = [0, 256], sizes = [8, 128], strides = [1, 1]} : vector<8x384xf32> to vector<8x128xf32>
    %565 = vector.broadcast %12 : vector<1x128xf32> to vector<8x128xf32>
    %566 = arith.addf %564, %565 : vector<8x128xf32>
    %567 = arith.mulf %554, %566 : vector<8x128xf32>
    %568 = arith.addf %563, %567 : vector<8x128xf32>
    %569 = math.tanh %568 : vector<8x128xf32>
    %cst_161 = arith.constant 1.000000e+00 : f32
    %570 = vector.broadcast %cst_161 : f32 to vector<8x128xf32>
    %571 = arith.subf %570, %562 : vector<8x128xf32>
    %572 = arith.mulf %571, %569 : vector<8x128xf32>
    %573 = arith.mulf %562, %504 : vector<8x128xf32>
    %574 = arith.addf %572, %573 : vector<8x128xf32>
    %575 = arith.index_cast %508 : i32 to index
    %c0_162 = arith.constant 0 : index
    %576 = vector.load %arg16[%575, %c0_162] : memref<64x128xf32, #tpu.memory_space<vmem>>, vector<8x128xf32>
    tpu.vector_store %arg16[%575, %c0_162], %574 {strides = array<i32>} : memref<64x128xf32, #tpu.memory_space<vmem>>, vector<8x128xf32>,
    %c8_i32_163 = arith.constant 8 : i32
    %c0_164 = arith.constant 0 : index
    %c0_165 = arith.constant 0 : index
    %c0_166 = arith.constant 0 : index
    %577 = vector.load %arg17[%c0_164, %c0_165, %c0_166] : memref<2x8x128xf32, #tpu.memory_space<vmem>>, vector<1x8x128xf32>
    %578 = vector.shape_cast %577 : vector<1x8x128xf32> to vector<8x128xf32>
    %579 = vector.shape_cast %542 : vector<8x128xf32> to vector<1x8x128xf32>
    tpu.vector_store %arg17[%c0_164, %c0_165, %c0_166], %579 {strides = array<i32>} : memref<2x8x128xf32, #tpu.memory_space<vmem>>, vector<1x8x128xf32>,
    %c1_167 = arith.constant 1 : index
    %c0_168 = arith.constant 0 : index
    %c0_169 = arith.constant 0 : index
    %580 = vector.load %arg17[%c1_167, %c0_168, %c0_169] : memref<2x8x128xf32, #tpu.memory_space<vmem>>, vector<1x8x128xf32>
    %581 = vector.shape_cast %580 : vector<1x8x128xf32> to vector<8x128xf32>
    %582 = vector.shape_cast %574 : vector<8x128xf32> to vector<1x8x128xf32>
    tpu.vector_store %arg17[%c1_167, %c0_168, %c0_169], %582 {strides = array<i32>} : memref<2x8x128xf32, #tpu.memory_space<vmem>>, vector<1x8x128xf32>,
    %c0_170 = arith.constant 0 : index
    %c0_171 = arith.constant 0 : index
    %c0_172 = arith.constant 0 : index
    %583 = vector.load %arg14[%c0_170, %c0_171, %c0_172] : memref<2x8x128xf32, #tpu.memory_space<vmem>>, vector<1x8x128xf32>
    %584 = vector.shape_cast %583 : vector<1x8x128xf32> to vector<8x128xf32>
    %585 = vector.shape_cast %542 : vector<8x128xf32> to vector<1x8x128xf32>
    tpu.vector_store %arg14[%c0_170, %c0_171, %c0_172], %585 {strides = array<i32>} : memref<2x8x128xf32, #tpu.memory_space<vmem>>, vector<1x8x128xf32>,
    %c1_173 = arith.constant 1 : index
    %c0_174 = arith.constant 0 : index
    %c0_175 = arith.constant 0 : index
    %586 = vector.load %arg14[%c1_173, %c0_174, %c0_175] : memref<2x8x128xf32, #tpu.memory_space<vmem>>, vector<1x8x128xf32>
    %587 = vector.shape_cast %586 : vector<1x8x128xf32> to vector<8x128xf32>
    %588 = vector.shape_cast %574 : vector<8x128xf32> to vector<1x8x128xf32>
    tpu.vector_store %arg14[%c1_173, %c0_174, %c0_175], %588 {strides = array<i32>} : memref<2x8x128xf32, #tpu.memory_space<vmem>>, vector<1x8x128xf32>,
    %c0_176 = arith.constant 0 : index
    %c0_177 = arith.constant 0 : index
    %589 = vector.load %arg16[%c0_176, %c0_177] : memref<64x128xf32, #tpu.memory_space<vmem>>, vector<64x128xf32>
    %c0_178 = arith.constant 0 : index
    %c0_179 = arith.constant 0 : index
    %590 = vector.load %arg11[%c0_178, %c0_179] : memref<128x128xf32, #tpu.memory_space<vmem>>, vector<128x128xf32>
    %cst_180 = arith.constant dense<0.000000e+00> : vector<64x128xf32>
    %591 = tpu.matmul %589, %590, %cst_180 {dimension_numbers = #tpu.dot_dimension_numbers<[1], [0], [0], [1], [0, 0, 1, 1], [], []>} : vector<64x128xf32>, vector<128x128xf32>, vector<64x128xf32> -> vector<64x128xf32>
    %c0_181 = arith.constant 0 : index
    %c0_182 = arith.constant 0 : index
    %592 = vector.load %arg12[%c0_181, %c0_182] : memref<1x128xf32, #tpu.memory_space<vmem>>, vector<1x128xf32>
    %593 = vector.broadcast %592 : vector<1x128xf32> to vector<64x128xf32>
    %594 = arith.addf %591, %593 : vector<64x128xf32>
    %595 = math.tanh %594 : vector<64x128xf32>
    %c0_183 = arith.constant 0 : index
    %c0_184 = arith.constant 0 : index
    %596 = vector.load %arg13[%c0_183, %c0_184] : memref<64x128xf32, #tpu.memory_space<vmem>>, vector<64x128xf32>
    tpu.vector_store %arg13[%c0_183, %c0_184], %595 {strides = array<i32>} : memref<64x128xf32, #tpu.memory_space<vmem>>, vector<64x128xf32>,
    return
  }
  func.func @transform_0(%arg0: i32) -> (i32, i32) {
    %c0_i32 = arith.constant 0 : i32
    %c0_i32_0 = arith.constant 0 : i32
    return %arg0, %c0_i32 : i32, i32
  }
  func.func @transform_1(%arg0: i32) -> (i32, i32, i32) {
    %c0_i32 = arith.constant 0 : i32
    %c0_i32_0 = arith.constant 0 : i32
    %c0_i32_1 = arith.constant 0 : i32
    %c0_i32_2 = arith.constant 0 : i32
    return %c0_i32, %c0_i32_0, %c0_i32_1 : i32, i32, i32
  }
  func.func @transform_2(%arg0: i32) -> (i32, i32) {
    %c0_i32 = arith.constant 0 : i32
    %c0_i32_0 = arith.constant 0 : i32
    %c0_i32_1 = arith.constant 0 : i32
    return %c0_i32, %c0_i32_0 : i32, i32
  }
  func.func @transform_3(%arg0: i32) -> (i32, i32) {
    %c0_i32 = arith.constant 0 : i32
    %c0_i32_0 = arith.constant 0 : i32
    %c0_i32_1 = arith.constant 0 : i32
    return %c0_i32, %c0_i32_0 : i32, i32
  }
  func.func @transform_4(%arg0: i32) -> (i32, i32) {
    %c0_i32 = arith.constant 0 : i32
    %c0_i32_0 = arith.constant 0 : i32
    %c0_i32_1 = arith.constant 0 : i32
    return %c0_i32, %c0_i32_0 : i32, i32
  }
  func.func @transform_5(%arg0: i32) -> (i32, i32) {
    %c0_i32 = arith.constant 0 : i32
    %c0_i32_0 = arith.constant 0 : i32
    %c0_i32_1 = arith.constant 0 : i32
    return %c0_i32, %c0_i32_0 : i32, i32
  }
  func.func @transform_6(%arg0: i32) -> (i32, i32) {
    %c0_i32 = arith.constant 0 : i32
    %c0_i32_0 = arith.constant 0 : i32
    %c0_i32_1 = arith.constant 0 : i32
    return %c0_i32, %c0_i32_0 : i32, i32
  }
  func.func @transform_7(%arg0: i32) -> (i32, i32) {
    %c0_i32 = arith.constant 0 : i32
    %c0_i32_0 = arith.constant 0 : i32
    %c0_i32_1 = arith.constant 0 : i32
    return %c0_i32, %c0_i32_0 : i32, i32
  }
  func.func @transform_8(%arg0: i32) -> (i32, i32) {
    %c0_i32 = arith.constant 0 : i32
    %c0_i32_0 = arith.constant 0 : i32
    %c0_i32_1 = arith.constant 0 : i32
    return %c0_i32, %c0_i32_0 : i32, i32
  }
  func.func @transform_9(%arg0: i32) -> (i32, i32) {
    %c0_i32 = arith.constant 0 : i32
    %c0_i32_0 = arith.constant 0 : i32
    %c0_i32_1 = arith.constant 0 : i32
    return %c0_i32, %c0_i32_0 : i32, i32
  }
  func.func @transform_10(%arg0: i32) -> (i32, i32) {
    %c0_i32 = arith.constant 0 : i32
    %c0_i32_0 = arith.constant 0 : i32
    %c0_i32_1 = arith.constant 0 : i32
    return %c0_i32, %c0_i32_0 : i32, i32
  }
  func.func @transform_11(%arg0: i32) -> (i32, i32) {
    %c0_i32 = arith.constant 0 : i32
    %c0_i32_0 = arith.constant 0 : i32
    %c0_i32_1 = arith.constant 0 : i32
    return %c0_i32, %c0_i32_0 : i32, i32
  }
  func.func @transform_12(%arg0: i32) -> (i32, i32) {
    %c0_i32 = arith.constant 0 : i32
    %c0_i32_0 = arith.constant 0 : i32
    return %arg0, %c0_i32 : i32, i32
  }
  func.func @transform_13(%arg0: i32) -> (i32, i32, i32) {
    %c0_i32 = arith.constant 0 : i32
    %c0_i32_0 = arith.constant 0 : i32
    %c0_i32_1 = arith.constant 0 : i32
    %c0_i32_2 = arith.constant 0 : i32
    return %c0_i32, %c0_i32_0, %c0_i32_1 : i32, i32, i32
  }
}

</mosaic_0001>

<bundles_post_ra>
// kernel: gru_actor_forward.1
= control target key start
LH: loop header
LB: loop body
LE: loop exit
PB: predicated region body
PF: predicated region fallthrough
CT: control target
= control target key end

     0   :  { %19 = vsyncpa [#allocation6], 0  ;;  %s10966_s0 = inlined_call_operand.vmem [shape: f32[64,16], index: 0, kind: input, shape index: {}]   ;;  %s10967_s1 = inlined_call_operand.vmem [shape: f32[2,8,128], index: 1, kind: input, shape index: {}]   ;;  %s10968_s2 = inlined_call_operand.vmem [shape: f32[16,384], index: 2, kind: input, shape index: {}]   ;;  %s10969_s3 = inlined_call_operand.vmem [shape: f32[1,384], index: 3, kind: input, shape index: {}]   ;;  %s10970_s4 = inlined_call_operand.hbm [shape: f32[128,384], index: 4, kind: input, shape index: {}]   ;;  %s10971_s5 = inlined_call_operand.vmem [shape: f32[1,128], index: 5, kind: input, shape index: {}]   ;;  %s10972_s6 = inlined_call_operand.hbm [shape: f32[128,384], index: 6, kind: input, shape index: {}]   ;;  %s10973_s7 = inlined_call_operand.vmem [shape: f32[1,384], index: 7, kind: input, shape index: {}]   ;;  %s10974_s8 = inlined_call_operand.vmem [shape: f32[128,384], index: 8, kind: input, shape index: {}]   ;;  %s10975_s9 = inlined_call_operand.vmem [shape: f32[1,128], index: 9, kind: input, shape index: {}]   ;;  %s10976_s10 = inlined_call_operand.vmem [shape: f32[128,128], index: 10, kind: input, shape index: {}]   ;;  %s10977_s11 = inlined_call_operand.vmem [shape: f32[1,128], index: 11, kind: input, shape index: {}]   ;;  %s10978_s12 = inlined_call_operand.vmem [shape: f32[64,128], index: 12, kind: output, shape index: {0}]   ;;  %s10979_s13 = inlined_call_operand.vmem [shape: f32[2,8,128], index: 13, kind: output, shape index: {1}]  }
   0x1   :  { %20 = vsyncpa [#allocation8], 0  ;;  %s7162_s25 = smov [#allocation5]  }
   0x2   :  { %s34_s26 = sshll.u32 %s7162_s25, 4  ;;  %s35_s26 = int_to_ptr.vmem [resolvable:$true] %s34_s26 }
   0x3   :  { %s7126_s27 = scalar_lea.vmem %s35_s26, 6144  ;;  %p7131_p1 = scmp.lt.s32.totalorder %s35_s26, %s35_s26 }
   0x4   :  { %p7127_p0 = scmp.ne.s32.totalorder %s35_s26, %s7126_s27  ;;  %p7132_p2 = scmp.lt.s32.totalorder %s7126_s27, %s7126_s27 }
   0x6   :  { %p7133_p3 = por %p7132_p2, %p7131_p1 }
   0x8   :  { %p7134_p4 = pnand %p7133_p3, %p7127_p0 }
   0xa   :  { %7137 = shalt.err (!%p7134_p4)
}
   0xb   :  { %s7163_s28 = smov 384   ;;  %s7164_s29 = smov 24  }
   0xc   :  { %40 = dma.hbm_to_vmem [thread:$0]  %s10970_s4, 6144, %s35_s26, [#allocation6], %s7163_s28, %s7163_s28, %s7164_s29  }
   0xd   :  { %s7165_s15 = smov [#allocation7]  }
   0xe   :  { %s48_s16 = sshll.u32 %s7165_s15, 4  ;;  %s49_s16 = int_to_ptr.vmem [resolvable:$true] %s48_s16 }
   0xf   :  { %s7146_s17 = scalar_lea.vmem %s49_s16, 6144  ;;  %p7151_p6 = scmp.lt.s32.totalorder %s49_s16, %s49_s16 }
  0x10   :  { %p7147_p5 = scmp.ne.s32.totalorder %s49_s16, %s7146_s17  ;;  %p7152_p7 = scmp.lt.s32.totalorder %s7146_s17, %s7146_s17 }
  0x12   :  { %p7153_p8 = por %p7152_p7, %p7151_p6 }
  0x14   :  { %p7154_p9 = pnand %p7153_p8, %p7147_p5 }
  0x16   :  { %7157 = shalt.err (!%p7154_p9)
}
  0x17   :  { %54 = dma.hbm_to_vmem [thread:$0]  %s10972_s6, 6144, %s49_s16, [#allocation8], %s7163_s28, %s7163_s28, %s7164_s29  }
  0x18   :  { %7158 = dma.done.wait [#allocation6], 6144  }
  0x19   :  { %7159 = vsyncadd [#allocation6], 4294961152 }
  0x1a   :  { %7160 = dma.done.wait [#allocation8], 6144  }
  0x1b   :  { %7161 = vsyncadd [#allocation8], 4294961152  ;;  %v11050_v0 = vmov 0.0   ;;  %v91_v1 = vld [vmem:[%s10968_s2 + $0x20] sm:$0xff]  ;;  %v92_v2 = vld [vmem:[%s10968_s2 + $0x28] sm:$0xff]  ;;  %vm110_vm0 = vcmask 130048  }
  0x1c   :  { %199 = vmatprep.mubr.f32.mxu0 %v11050_v0  ;;  %v90_v3 = vld [vmem:[%s10968_s2 + $0x18] sm:$0xff]  ;;  %163 = vmatprep.subr.mxu0 %v91_v1  ;;  %v88_v4 = vld [vmem:[%s10968_s2 + $0x8] sm:$0xff]  ;;  %v89_v5 = vld [vmem:[%s10968_s2 + $0x10] sm:$0xff]  ;;  %vm7167_vm1 = vmmov 0  }
  0x1d   :  { %6030 = vmatprep.subr.mxu1 %v92_v2  ;;  %v87_v6 = vld [vmem:[%s10968_s2] sm:$0xff]  ;;  %164 = vmatpush1.msra.mxu0 %v90_v3  ;;  %v80_v8 = vld [vmem:[%s10966_s0 + $0x8] sm:$0xff]  ;;  %v7272_v9 = vld [vmem:[%s10974_s8 + $0x170] sm:$0xff] }
  0x1e   :  { %6031 = vmatpush3.msra.mxu1 %v92_v2  ;;  %v79_v7 = vld [vmem:[%s10966_s0] sm:$0xff]  ;;  %165 = vmatprep.subr.mxu0 %v88_v4  ;;  %v624_v10 = vld [vmem:[#allocation5 + $0x170] sm:$0xff]  ;;  %v7277_v11 = vld [vmem:[%s10974_s8 + $0x168] sm:$0xff] }
  0x1f   :  { %6032 = vmatprep.subr.mxu1 %v89_v5  ;;  %166 = vmatpush1.msra.mxu0 %v87_v6  ;;  %v623_v12 = vld [vmem:[#allocation5 + $0x168] sm:$0xff]  ;;  %v7284_v13 = vld [vmem:[%s10974_s8 + $0x158] sm:$0xff]  ;;  %v7292_v15 = vld [vmem:[%s10974_s8 + $0x150] sm:$0xff] }
  0x20   :  { %6033 = vmatpush3.msra.mxu1 %v89_v5  ;;  %6034 = vmatprep.mubr.msk.f32.mxu1 %vm110_vm0, %v79_v7  ;;  %v621_v14 = vld [vmem:[#allocation5 + $0x158] sm:$0xff]  ;;  %v620_v16 = vld [vmem:[#allocation5 + $0x150] sm:$0xff]  ;;  %v7298_v17 = vld [vmem:[%s10974_s8 + $0x140] sm:$0xff] }
  0x21   :  { %5536 = vmatmul.mubr.msk.f32.vlgmr.msra.gmra.mxu0 %vm110_vm0, %v79_v7  ;;  %6035 = vmatmul.mubr.msk.f32.vlgmr.msra.gmra.mxu1 %vm110_vm0, %v80_v8  ;;  %v618_v18 = vld [vmem:[#allocation5 + $0x140] sm:$0xff]  ;;  %v7304_v19 = vld [vmem:[%s10974_s8 + $0x138] sm:$0xff]  ;;  %v7310_v21 = vld [vmem:[%s10974_s8 + $0x128] sm:$0xff] }
  0x22   :  { %431 = vmatprep.subr.mxu1 %v7272_v9  ;;  %626 = vmatprep.subr.mxu0 %v624_v10  ;;  %v617_v20 = vld [vmem:[#allocation5 + $0x138] sm:$0xff]  ;;  %v615_v22 = vld [vmem:[#allocation5 + $0x128] sm:$0xff]  ;;  %v7318_v23 = vld [vmem:[%s10974_s8 + $0x120] sm:$0xff] }
  0x23   :  { %432 = vmatpush1.msra.mxu1 %v7277_v11  ;;  %627 = vmatpush1.msra.mxu0 %v623_v12  ;;  %v614_v24 = vld [vmem:[#allocation5 + $0x120] sm:$0xff]  ;;  %v81_v25 = vld [vmem:[%s10966_s0 + $0x10] sm:$0xff]  ;;  %v7333_v28 = vld [vmem:[%s10974_s8 + $0x108] sm:$0xff] }
  0x24   :  { %433 = vmatprep.subr.mxu1 %v7284_v13  ;;  %628 = vmatprep.subr.mxu0 %v621_v14  ;;  %v7327_v26 = vld [vmem:[%s10974_s8 + $0x110] sm:$0xff]  ;;  %v611_v29 = vld [vmem:[#allocation5 + $0x108] sm:$0xff]  ;;  %v7339_v30 = vld [vmem:[%s10974_s8 + $0xf8] sm:$0xff] }
  0x25   :  { %205 = vmatprep.mubr.f32.mxu0 %v11050_v0  ;;  %434 = vmatpush1.msra.mxu1 %v7292_v15  ;;  %v612_v27 = vld [vmem:[#allocation5 + $0x110] sm:$0xff]  ;;  %v609_v31 = vld [vmem:[#allocation5 + $0xf8] sm:$0xff]  ;;  %v7356_v35 = vld [vmem:[%s10974_s8 + $0xe0] sm:$0xff] }
  0x26   :  { %629 = vmatpush1.msra.mxu0 %v620_v16  ;;  %435 = vmatprep.subr.mxu1 %v7298_v17  ;;  %v7347_v32 = vld [vmem:[%s10974_s8 + $0xf0] sm:$0xff]  ;;  %v82_v34 = vld [vmem:[%s10966_s0 + $0x18] sm:$0xff]  ;;  %v606_v36 = vld [vmem:[#allocation5 + $0xe0] sm:$0xff] }
  0x27   :  { %5537 = vmatmul.mubr.msk.f32.gmra.mxu0 %vm110_vm0, %v80_v8  ;;  %630 = vmatprep.subr.mxu0 %v618_v18  ;;  %v608_v33 = vld [vmem:[#allocation5 + $0xf0] sm:$0xff]  ;;  %v7362_v37 = vld [vmem:[%s10974_s8 + $0xd8] sm:$0xff]  ;;  %v7368_v39 = vld [vmem:[%s10974_s8 + $0xc8] sm:$0xff] }
  0x28   :  { %436 = vmatpush1.msra.mxu1 %v7304_v19  ;;  %631 = vmatpush1.msra.mxu0 %v617_v20  ;;  %v605_v38 = vld [vmem:[#allocation5 + $0xd8] sm:$0xff]  ;;  %v603_v40 = vld [vmem:[#allocation5 + $0xc8] sm:$0xff]  ;;  %v7376_v41 = vld [vmem:[%s10974_s8 + $0xc0] sm:$0xff] }
  0x29   :  { %437 = vmatprep.subr.mxu1 %v7310_v21  ;;  %632 = vmatprep.subr.mxu0 %v615_v22  ;;  %v602_v42 = vld [vmem:[#allocation5 + $0xc0] sm:$0xff]  ;;  %v7385_v44 = vld [vmem:[%s10974_s8 + $0xb0] sm:$0xff]  ;;  %v7391_v46 = vld [vmem:[%s10974_s8 + $0xa8] sm:$0xff] }
  0x2a   :  { %211 = vmatprep.mubr.f32.mxu0 %v11050_v0  ;;  %438 = vmatpush1.msra.mxu1 %v7318_v23  ;;  %v83_v43 = vld [vmem:[%s10966_s0 + $0x20] sm:$0xff]  ;;  %v600_v45 = vld [vmem:[#allocation5 + $0xb0] sm:$0xff]  ;;  %v599_v47 = vld [vmem:[#allocation5 + $0xa8] sm:$0xff] }
  0x2b   :  { %633 = vmatpush1.msra.mxu0 %v614_v24  ;;  %439 = vmatprep.subr.mxu1 %v7327_v26  ;;  %v7399_v48 = vld [vmem:[%s10974_s8 + $0x98] sm:$0xff]  ;;  %v7406_v50 = vld [vmem:[%s10974_s8 + $0x90] sm:$0xff]  ;;  %v84_v52 = vld [vmem:[%s10966_s0 + $0x28] sm:$0xff] }
  0x2c   :  { %5538 = vmatmul.mubr.msk.f32.gmra.mxu0 %vm110_vm0, %v81_v25  ;;  %634 = vmatprep.subr.mxu0 %v612_v27  ;;  %v597_v49 = vld [vmem:[#allocation5 + $0x98] sm:$0xff]  ;;  %v596_v51 = vld [vmem:[#allocation5 + $0x90] sm:$0xff]  ;;  %v7415_v53 = vld [vmem:[%s10974_s8 + $0x80] sm:$0xff] }
  0x2d   :  { %440 = vmatpush1.msra.mxu1 %v7333_v28  ;;  %635 = vmatpush1.msra.mxu0 %v611_v29  ;;  %v594_v54 = vld [vmem:[#allocation5 + $0x80] sm:$0xff]  ;;  %v7422_v55 = vld [vmem:[%s10974_s8 + $0x78] sm:$0xff]  ;;  %v7430_v57 = vld [vmem:[%s10974_s8 + $0x68] sm:$0xff] }
  0x2e   :  { %441 = vmatprep.subr.mxu1 %v7339_v30  ;;  %636 = vmatprep.subr.mxu0 %v609_v31  ;;  %v593_v56 = vld [vmem:[#allocation5 + $0x78] sm:$0xff]  ;;  %v591_v58 = vld [vmem:[#allocation5 + $0x68] sm:$0xff]  ;;  %v7437_v59 = vld [vmem:[%s10974_s8 + $0x60] sm:$0xff] }
  0x2f   :  { %217 = vmatprep.mubr.f32.mxu0 %v11050_v0  ;;  %442 = vmatpush1.msra.mxu1 %v7347_v32  ;;  %v590_v60 = vld [vmem:[#allocation5 + $0x60] sm:$0xff]  ;;  %v85_v61 = vld [vmem:[%s10966_s0 + $0x30] sm:$0xff]  ;;  %v7453_v1 = vld [vmem:[%s10974_s8 + $0x48] sm:$0xff] }
  0x30   :  { %637 = vmatpush1.msra.mxu0 %v608_v33  ;;  %443 = vmatprep.subr.mxu1 %v7356_v35  ;;  %v7446_v62 = vld [vmem:[%s10974_s8 + $0x50] sm:$0xff]  ;;  %v587_v2 = vld [vmem:[#allocation5 + $0x48] sm:$0xff]  ;;  %v7461_v3 = vld [vmem:[%s10974_s8 + $0x38] sm:$0xff] }
  0x31   :  { %5539 = vmatmul.mubr.msk.f32.gmra.mxu0 %vm110_vm0, %v82_v34  ;;  %638 = vmatprep.subr.mxu0 %v606_v36  ;;  %v588_v63 = vld [vmem:[#allocation5 + $0x50] sm:$0xff]  ;;  %v585_v4 = vld [vmem:[#allocation5 + $0x38] sm:$0xff]  ;;  %v7477_v8 = vld [vmem:[%s10974_s8 + $0x20] sm:$0xff] }
  0x32   :  { %444 = vmatpush1.msra.mxu1 %v7362_v37  ;;  %639 = vmatpush1.msra.mxu0 %v605_v38  ;;  %v86_v5 = vld [vmem:[%s10966_s0 + $0x38] sm:$0xff]  ;;  %v7471_v6 = vld [vmem:[%s10974_s8 + $0x30] sm:$0xff]  ;;  %v582_v10 = vld [vmem:[#allocation5 + $0x20] sm:$0xff] }
  0x33   :  { %445 = vmatprep.subr.mxu1 %v7368_v39  ;;  %640 = vmatprep.subr.mxu0 %v603_v40  ;;  %v584_v7 = vld [vmem:[#allocation5 + $0x30] sm:$0xff]  ;;  %v7484_v12 = vld [vmem:[%s10974_s8 + $0x18] sm:$0xff]  ;;  %v7490_v16 = vld [vmem:[%s10974_s8 + $0x8] sm:$0xff] }
  0x34   :  { %223 = vmatprep.mubr.f32.mxu0 %v11050_v0  ;;  %446 = vmatpush1.msra.mxu1 %v7376_v41  ;;  %11274 = vst [vmem:[#allocation11_spill] sm:$0xff] %v7484_v12  ;;  %v581_v14 = vld [vmem:[#allocation5 + $0x18] sm:$0xff]  ;;  %11275 = vst [vmem:[#allocation12_spill] sm:$0xff] %v7490_v16  ;;  %v579_v18 = vld [vmem:[#allocation5 + $0x8] sm:$0xff] }
  0x35   :  { %641 = vmatpush1.msra.mxu0 %v602_v42  ;;  %447 = vmatprep.subr.mxu1 %v7385_v44  ;;  %v7497_v20 = vld [vmem:[%s10974_s8] sm:$0xff]  ;;  %v7504_v24 = vld [vmem:[%s10967_s1 + $0x8] sm:$0xff]  ;;  %v7516_v27 = vld [vmem:[%s10974_s8 + $0x178] sm:$0xff] }
  0x36   :  { %5540 = vmatmul.mubr.msk.f32.gmra.mxu0 %vm110_vm0, %v83_v43  ;;  %642 = vmatprep.subr.mxu0 %v600_v45  ;;  %11276 = vst [vmem:[#allocation13_spill] sm:$0xff] %v7497_v20  ;;  %v578_v22 = vld [vmem:[#allocation5] sm:$0xff]  ;;  %11277 = vst [vmem:[#allocation14_spill] sm:$0xff] %v7504_v24  ;;  %v7534_v31 = vld [vmem:[%s10974_s8 + $0x148] sm:$0xff] }
  0x37   :  { %448 = vmatpush1.msra.mxu1 %v7391_v46  ;;  %643 = vmatpush1.msra.mxu0 %v599_v47  ;;  %v7525_v29 = vld [vmem:[%s10974_s8 + $0x160] sm:$0xff]  ;;  %v7542_v33 = vld [vmem:[%s10974_s8 + $0x130] sm:$0xff]  ;;  %v7563_v38 = vld [vmem:[%s10974_s8 + $0xe8] sm:$0xff] }
  0x38   :  { %6037 = vmatprep.mubr.msk.f32.mxu1 %vm110_vm0, %v81_v25  ;;  %449 = vmatprep.subr.mxu1 %v7399_v48  ;;  %v7510_v25 = vld [vmem:[%s10967_s1] sm:$0xff]  ;;  %v7570_v40 = vld [vmem:[%s10974_s8 + $0xd0] sm:$0xff]  ;;  %v7577_v42 = vld [vmem:[%s10974_s8 + $0xb8] sm:$0xff] }
  0x39   :  { %644 = vmatprep.subr.mxu0 %v597_v49  ;;  %229 = vmatprep.mubr.f32.mxu0 %v11050_v0  ;;  %v7556_v36 = vld [vmem:[%s10974_s8 + $0x100] sm:$0xff]  ;;  %v7591_v45 = vld [vmem:[%s10974_s8 + $0x88] sm:$0xff]  ;;  %v7598_v47 = vld [vmem:[%s10974_s8 + $0x70] sm:$0xff] }
  0x3a   :  { %6038 = vmatmul.mubr.msk.f32.gmra.mxu1 %vm110_vm0, %v82_v34  ;;  %645 = vmatpush1.msra.mxu0 %v596_v51  ;;  %v7549_v34 = vld [vmem:[%s10974_s8 + $0x118] sm:$0xff]  ;;  %v7612_v51 = vld [vmem:[%s10974_s8 + $0x40] sm:$0xff] }
  0x3b   :  { %450 = vmatpush1.msra.mxu1 %v7406_v50  ;;  %5541 = vmatmul.mubr.msk.f32.gmra.mxu0 %vm110_vm0, %v84_v52  ;;  %v7605_v49 = vld [vmem:[%s10974_s8 + $0x58] sm:$0xff] }
  0x3c   :  { %451 = vmatprep.subr.mxu1 %v7415_v53  ;;  %646 = vmatprep.subr.mxu0 %v594_v54  ;;  %v7626_v54 = vld [vmem:[%s10974_s8 + $0x10] sm:$0xff] }
  0x3d   :  { %452 = vmatpush1.msra.mxu1 %v7422_v55  ;;  %647 = vmatpush1.msra.mxu0 %v593_v56  ;;  %11279 = vst [vmem:[#allocation16_spill] sm:$0xff] %v7626_v54  ;;  %v7630_v56 = vld [vmem:[#allocation5 + $0x178] sm:$0xff] }
  0x3e   :  { %6040 = vmatprep.mubr.msk.f32.mxu1 %vm110_vm0, %v83_v43  ;;  %453 = vmatprep.subr.mxu1 %v7430_v57  ;;  %v7584_v43 = vld [vmem:[%s10974_s8 + $0xa0] sm:$0xff]  ;;  %11280 = vst [vmem:[#allocation17_spill] sm:$0xff] %v7630_v56 }
  0x3f   :  { %648 = vmatprep.subr.mxu0 %v591_v58  ;;  %235 = vmatprep.mubr.f32.mxu0 %v11050_v0  ;;  %v7635_v58 = vld [vmem:[#allocation5 + $0x160] sm:$0xff] }
  0x40   :  { %6041 = vmatmul.mubr.msk.f32.gmra.mxu1 %vm110_vm0, %v84_v52  ;;  %649 = vmatpush1.msra.mxu0 %v590_v60  ;;  %v7619_v52 = vld [vmem:[%s10974_s8 + $0x28] sm:$0xff]  ;;  %11281 = vst [vmem:[#allocation18_spill] sm:$0xff] %v7635_v58 }
  0x41   :  { %454 = vmatpush1.msra.mxu1 %v7437_v59  ;;  %5542 = vmatmul.mubr.msk.f32.gmra.mxu0 %vm110_vm0, %v85_v61  ;;  %11278 = vst [vmem:[#allocation15_spill] sm:$0xff] %v7619_v52  ;;  %v7641_v60 = vld [vmem:[#allocation5 + $0x148] sm:$0xff] }
  0x42   :  { %455 = vmatprep.subr.mxu1 %v7446_v62  ;;  %650 = vmatprep.subr.mxu0 %v588_v63  ;;  %11282 = vst [vmem:[#allocation19_spill] sm:$0xff] %v7641_v60  ;;  %v7649_v63 = vld [vmem:[#allocation5 + $0x118] sm:$0xff] }
  0x43   :  { %456 = vmatpush1.msra.mxu1 %v7453_v1  ;;  %651 = vmatpush1.msra.mxu0 %v587_v2  ;;  %11284 = vst [vmem:[#allocation21_spill] sm:$0xff] %v7649_v63  ;;  %v7653_v2 = vld [vmem:[#allocation5 + $0x100] sm:$0xff] }
  0x44   :  { %6043 = vmatprep.mubr.msk.f32.mxu1 %vm110_vm0, %v85_v61  ;;  %457 = vmatprep.subr.mxu1 %v7461_v3  ;;  %v7645_v61 = vld [vmem:[#allocation5 + $0x130] sm:$0xff]  ;;  %11285 = vst [vmem:[#allocation22_spill] sm:$0xff] %v7653_v2 }
  0x45   :  { %652 = vmatprep.subr.mxu0 %v585_v4  ;;  %241 = vmatprep.mubr.f32.mxu0 %v11050_v0  ;;  %11283 = vst [vmem:[#allocation20_spill] sm:$0xff] %v7645_v61  ;;  %v7657_v4 = vld [vmem:[#allocation5 + $0xe8] sm:$0xff] }
  0x46   :  { %6044 = vmatmul.mubr.msk.f32.gmra.mxu1 %vm110_vm0, %v86_v5  ;;  %653 = vmatpush1.msra.mxu0 %v584_v7  ;;  %11286 = vst [vmem:[#allocation23_spill] sm:$0xff] %v7657_v4  ;;  %v7665_v7 = vld [vmem:[#allocation5 + $0xb8] sm:$0xff] }
  0x47   :  { %458 = vmatpush1.msra.mxu1 %v7471_v6  ;;  %5543 = vmatmul.mubr.msk.f32.gmra.mxu0 %vm110_vm0, %v86_v5  ;;  %v7661_v5 = vld [vmem:[#allocation5 + $0xd0] sm:$0xff]  ;;  %11288 = vst [vmem:[#allocation25_spill] sm:$0xff] %v7665_v7 }
  0x48   :  { %459 = vmatprep.subr.mxu1 %v7477_v8  ;;  %654 = vmatprep.subr.mxu0 %v582_v10  ;;  %11287 = vst [vmem:[#allocation24_spill] sm:$0xff] %v7661_v5  ;;  %v7669_v10 = vld [vmem:[#allocation5 + $0xa0] sm:$0xff] }
  0x49   :  { %460 = vmatpush1.msra.mxu1 %v7484_v12  ;;  %655 = vmatpush1.msra.mxu0 %v581_v14  ;;  %11289 = vst [vmem:[#allocation26_spill] sm:$0xff] %v7669_v10  ;;  %v7673_v14 = vld [vmem:[#allocation5 + $0x88] sm:$0xff] }
  0x4a   :  { %461 = vmatprep.subr.mxu1 %v7490_v16  ;;  %656 = vmatprep.subr.mxu0 %v579_v18  ;;  %11290 = vst [vmem:[#allocation27_spill] sm:$0xff] %v7673_v14  ;;  %v7677_v18 = vld [vmem:[#allocation5 + $0x70] sm:$0xff] }
  0x4b   :  { %462 = vmatpush1.msra.mxu1 %v7497_v20  ;;  %495 = vmatprep.mubr.f32.mxu1 %v11050_v0  ;;  %11291 = vst [vmem:[#allocation28_spill] sm:$0xff] %v7677_v18  ;;  %v7871_v20 = vld [vmem:[#allocation7 + $0x10] sm:$0xff] }
  0x4c   :  { %657 = vmatpush1.msra.mxu0 %v578_v22  ;;  %690 = vmatprep.mubr.f32.mxu0 %v11050_v0  ;;  %v7681_v22 = vld [vmem:[#allocation5 + $0x58] sm:$0xff]  ;;  %11346 = vst [vmem:[#allocation82_spill] sm:$0xff] %v7871_v20 }
  0x4d   :  { %496 = vmatmul.mubr.f32.vlgmr.msra.gmra.mxu1 %v7504_v24  ;;  %6046 = vmatprep.subr.mxu1 %v11050_v0  ;;  %11292 = vst [vmem:[#allocation29_spill] sm:$0xff] %v7681_v22 }
  0x4e   :  { %691 = vmatmul.mubr.f32.vlgmr.msra.gmra.mxu0 %v7510_v25  ;;  %6047 = vmatpush3.msra.mxu1 %v7516_v27 }
  0x4f   :  { %6078 = vmatprep.mubr.msk.f32.mxu1 %vm7167_vm1, %v11050_v0  ;;  %6048 = vmatprep.subr.mxu1 %v11050_v0 }
  0x50   :  { %923 = vmatprep.mubr.f32.mxu0 %v11050_v0  ;;  %6049 = vmatpush3.msra.mxu1 %v7525_v29 }
  0x51   :  { %6050 = vmatprep.subr.mxu1 %v11050_v0 }
  0x52   :  { %6051 = vmatpush3.msra.mxu1 %v7534_v31 }
  0x53   :  { %6052 = vmatprep.subr.mxu1 %v11050_v0 }
  0x54   :  { %6053 = vmatpush3.msra.mxu1 %v7542_v33 }
  0x55   :  { %6054 = vmatprep.subr.mxu1 %v11050_v0 }
  0x56   :  { %6055 = vmatpush3.msra.mxu1 %v7549_v34 }
  0x57   :  { %6056 = vmatprep.subr.mxu1 %v11050_v0 }
  0x58   :  { %6057 = vmatpush3.msra.mxu1 %v7556_v36 }
  0x59   :  { %6058 = vmatprep.subr.mxu1 %v11050_v0 }
  0x5a   :  { %6059 = vmatpush3.msra.mxu1 %v7563_v38 }
  0x5b   :  { %6060 = vmatprep.subr.mxu1 %v11050_v0 }
  0x5c   :  { %6061 = vmatpush3.msra.mxu1 %v7570_v40 }
  0x5d   :  { %6062 = vmatprep.subr.mxu1 %v11050_v0 }
  0x5e   :  { %6063 = vmatpush3.msra.mxu1 %v7577_v42 }
  0x5f   :  { %6064 = vmatprep.subr.mxu1 %v11050_v0 }
  0x60   :  { %6065 = vmatpush3.msra.mxu1 %v7584_v43 }
  0x61   :  { %6066 = vmatprep.subr.mxu1 %v11050_v0 }
  0x62   :  { %6067 = vmatpush3.msra.mxu1 %v7591_v45 }
  0x63   :  { %6068 = vmatprep.subr.mxu1 %v11050_v0 }
  0x64   :  { %6069 = vmatpush3.msra.mxu1 %v7598_v47 }
  0x65   :  { %6070 = vmatprep.subr.mxu1 %v11050_v0 }
  0x66   :  { %6071 = vmatpush3.msra.mxu1 %v7605_v49 }
  0x67   :  { %6072 = vmatprep.subr.mxu1 %v11050_v0 }
  0x68   :  { %6073 = vmatpush3.msra.mxu1 %v7612_v51 }
  0x69   :  { %6074 = vmatprep.subr.mxu1 %v11050_v0 }
  0x6a   :  { %6075 = vmatpush3.msra.mxu1 %v7619_v52 }
  0x6b   :  { %6076 = vmatprep.subr.mxu1 %v11050_v0 }
  0x6c   :  { %6077 = vmatpush3.msra.mxu1 %v7626_v54 }
  0x6d   :  { %6079 = vmatmul.mubr.f32.vlgmr.msra.gmra.mxu1 %v7504_v24  ;;  %6081 = vmatprep.subr.mxu1 %v11050_v0 }
  0x6e   :  { %6082 = vmatpush3.msra.mxu1 %v7630_v56  ;;  %6113 = vmatprep.mubr.msk.f32.mxu1 %vm7167_vm1, %v11050_v0 }
  0x6f   :  { %6083 = vmatprep.subr.mxu1 %v11050_v0 }
  0x70   :  { %6084 = vmatpush3.msra.mxu1 %v7635_v58 }
  0x71   :  { %6085 = vmatprep.subr.mxu1 %v11050_v0 }
  0x72   :  { %6086 = vmatpush3.msra.mxu1 %v7641_v60  ;;  %v93_v60 = vld [vmem:[%s10969_s3] sm:$0x7] }
  0x73   :  { %6087 = vmatprep.subr.mxu1 %v11050_v0 }
  0x74   :  { %6088 = vmatpush3.msra.mxu1 %v7645_v61  ;;  %v7795_v61 = vld [vmem:[#allocation7 + $0xa0] sm:$0xff] }
  0x75   :  { %6089 = vmatprep.subr.mxu1 %v11050_v0  ;;  %11326 = vst [vmem:[#allocation63_spill] sm:$0xff] %v7795_v61 }
  0x76   :  { %6090 = vmatpush3.msra.mxu1 %v7649_v63 }
  0x77   :  { %6091 = vmatprep.subr.mxu1 %v11050_v0 }
  0x78   :  { %6092 = vmatpush3.msra.mxu1 %v7653_v2  ;;  %v7720_v2 = vld [vmem:[#allocation7 + $0x148] sm:$0xff] }
  0x79   :  { %6093 = vmatprep.subr.mxu1 %v11050_v0  ;;  %11303 = vst [vmem:[#allocation40_spill] sm:$0xff] %v7720_v2 }
  0x7a   :  { %6094 = vmatpush3.msra.mxu1 %v7657_v4  ;;  %v7718_v4 = vld [vmem:[#allocation7 + $0x140] sm:$0xff] }
  0x7b   :  { %6095 = vmatprep.subr.mxu1 %v11050_v0  ;;  %11302 = vst [vmem:[#allocation39_spill] sm:$0xff] %v7718_v4 }
  0x7c   :  { %6096 = vmatpush3.msra.mxu1 %v7661_v5  ;;  %v7714_v5 = vld [vmem:[#allocation7 + $0x160] sm:$0xff] }
  0x7d   :  { %6097 = vmatprep.subr.mxu1 %v11050_v0  ;;  %11301 = vst [vmem:[#allocation38_spill] sm:$0xff] %v7714_v5 }
  0x7e   :  { %6098 = vmatpush3.msra.mxu1 %v7665_v7  ;;  %v7685_v7 = vld [vmem:[#allocation5 + $0x40] sm:$0xff] }
  0x7f   :  { %6099 = vmatprep.subr.mxu1 %v11050_v0  ;;  %11293 = vst [vmem:[#allocation30_spill] sm:$0xff] %v7685_v7 }
  0x80   :  { %6100 = vmatpush3.msra.mxu1 %v7669_v10  ;;  %v7689_v10 = vld [vmem:[#allocation5 + $0x28] sm:$0xff] }
  0x81   :  { %6101 = vmatprep.subr.mxu1 %v11050_v0  ;;  %11294 = vst [vmem:[#allocation31_spill] sm:$0xff] %v7689_v10 }
  0x82   :  { %6102 = vmatpush3.msra.mxu1 %v7673_v14  ;;  %v7693_v14 = vld [vmem:[#allocation5 + $0x10] sm:$0xff] }
  0x83   :  { %6103 = vmatprep.subr.mxu1 %v11050_v0  ;;  %11295 = vst [vmem:[#allocation32_spill] sm:$0xff] %v7693_v14 }
  0x84   :  { %6104 = vmatpush3.msra.mxu1 %v7677_v18  ;;  %v7706_v18 = vld [vmem:[#allocation7 + $0x178] sm:$0xff] }
  0x85   :  { %6105 = vmatprep.subr.mxu1 %v11050_v0  ;;  %11298 = vst [vmem:[#allocation35_spill] sm:$0xff] %v7706_v18 }
  0x86   :  { %6106 = vmatpush3.msra.mxu1 %v7681_v22  ;;  %v7702_v22 = vld [vmem:[#allocation7 + $0x170] sm:$0xff] }
  0x87   :  { %6107 = vmatprep.subr.mxu1 %v11050_v0  ;;  %11296 = vst [vmem:[#allocation33_spill] sm:$0xff] %v7702_v22  ;;  %859 = vmatprep.subr.mxu0 %v7702_v22  ;;  %v7724_v22 = vld [vmem:[#allocation7 + $0x138] sm:$0xff] }
  0x88   :  { %6108 = vmatpush3.msra.mxu1 %v7685_v7  ;;  %v7704_v7 = vld [vmem:[#allocation7 + $0x168] sm:$0xff]  ;;  %11304 = vst [vmem:[#allocation41_spill] sm:$0xff] %v7724_v22 }
  0x89   :  { %6109 = vmatprep.subr.mxu1 %v11050_v0  ;;  %11297 = vst [vmem:[#allocation34_spill] sm:$0xff] %v7704_v7  ;;  %860 = vmatpush1.msra.mxu0 %v7704_v7  ;;  %v7783_v7 = vld [vmem:[#allocation7 + $0xa8] sm:$0xff] }
  0x8a   :  { %6110 = vmatpush3.msra.mxu1 %v7689_v10  ;;  %v7710_v10 = vld [vmem:[#allocation7 + $0x158] sm:$0xff]  ;;  %11321 = vst [vmem:[#allocation58_spill] sm:$0xff] %v7783_v7 }
  0x8b   :  { %6111 = vmatprep.subr.mxu1 %v11050_v0  ;;  %11299 = vst [vmem:[#allocation36_spill] sm:$0xff] %v7710_v10  ;;  %861 = vmatprep.subr.mxu0 %v7710_v10  ;;  %v7735_v10 = vld [vmem:[#allocation7 + $0x120] sm:$0xff] }
  0x8c   :  { %6112 = vmatpush3.msra.mxu1 %v7693_v14  ;;  %v7712_v14 = vld [vmem:[#allocation7 + $0x150] sm:$0xff]  ;;  %11306 = vst [vmem:[#allocation43_spill] sm:$0xff] %v7735_v10 }
  0x8d   :  { %6114 = vmatmul.mubr.f32.vlgmr.msra.gmra.mxu1 %v7510_v25  ;;  %6116 = vmatprep.subr.mxu1 %v11050_v0  ;;  %11300 = vst [vmem:[#allocation37_spill] sm:$0xff] %v7712_v14 }
  0x8e   :  { %6148 = vmatprep.mubr.msk.f32.mxu1 %vm7167_vm1, %v11050_v0  ;;  %6117 = vmatpush3.msra.mxu1 %v7706_v18  ;;  %v7728_v18 = vld [vmem:[#allocation7 + $0x128] sm:$0xff] }
  0x8f   :  { %6118 = vmatprep.subr.mxu1 %v11050_v0  ;;  %862 = vmatpush1.msra.mxu0 %v7712_v14  ;;  %11305 = vst [vmem:[#allocation42_spill] sm:$0xff] %v7728_v18  ;;  %v7741_v14 = vld [vmem:[#allocation7 + $0x110] sm:$0xff] }
  0x90   :  { %6119 = vmatpush3.msra.mxu1 %v7714_v5  ;;  %863 = vmatprep.subr.mxu0 %v7718_v4  ;;  %v7737_v5 = vld [vmem:[#allocation7 + $0x130] sm:$0xff]  ;;  %11308 = vst [vmem:[#allocation45_spill] sm:$0xff] %v7741_v14  ;;  %v95_v4 = vlaneseq }
  0x91   :  { %6120 = vmatprep.subr.mxu1 %v11050_v0  ;;  %864 = vmatpush1.msra.mxu0 %v7724_v22  ;;  %11307 = vst [vmem:[#allocation44_spill] sm:$0xff] %v7737_v5  ;;  %v7747_v22 = vld [vmem:[#allocation7 + $0x118] sm:$0xff] }
  0x92   :  { %6121 = vmatpush3.msra.mxu1 %v7720_v2  ;;  %865 = vmatprep.subr.mxu0 %v7728_v18  ;;  %v7745_v2 = vld [vmem:[#allocation7 + $0x108] sm:$0xff]  ;;  %11310 = vst [vmem:[#allocation47_spill] sm:$0xff] %v7747_v22  ;;  %v7751_v18 = vld [vmem:[#allocation7 + $0xf8] sm:$0xff]  ;;  %v7789_v63 = vshrl.u32 %v95_v4, 7 }
  0x93   :  { %6122 = vmatprep.subr.mxu1 %v11050_v0  ;;  %866 = vmatpush1.msra.mxu0 %v7735_v10  ;;  %11309 = vst [vmem:[#allocation46_spill] sm:$0xff] %v7745_v2  ;;  %11311 = vst [vmem:[#allocation48_spill] sm:$0xff] %v7751_v18  ;;  %v7757_v10 = vld [vmem:[#allocation7 + $0x100] sm:$0xff]  ;;  %v7803_v4 = vld [vmem:[#allocation7 + $0x78] sm:$0xff] }
  0x94   :  { %6123 = vmatpush3.msra.mxu1 %v7737_v5  ;;  %867 = vmatprep.subr.mxu0 %v7741_v14  ;;  %v7755_v5 = vld [vmem:[#allocation7 + $0xf0] sm:$0xff]  ;;  %11313 = vst [vmem:[#allocation50_spill] sm:$0xff] %v7757_v10  ;;  %v7761_v14 = vld [vmem:[#allocation7 + $0xe0] sm:$0xff]  ;;  %11324 = vst [vmem:[#allocation61_spill] sm:$0xff] %v7789_v63  ;;  %v11054_v56 = vsub.s32 1, %v7789_v63 }
  0x95   :  { %6124 = vmatprep.subr.mxu1 %v11050_v0  ;;  %868 = vmatpush1.msra.mxu0 %v7745_v2  ;;  %11312 = vst [vmem:[#allocation49_spill] sm:$0xff] %v7755_v5  ;;  %11314 = vst [vmem:[#allocation51_spill] sm:$0xff] %v7761_v14  ;;  %v7771_v2 = vld [vmem:[#allocation7 + $0xc8] sm:$0xff] }
  0x96   :  { %6125 = vmatpush3.msra.mxu1 %v7747_v22  ;;  %869 = vmatprep.subr.mxu0 %v7751_v18  ;;  %v7765_v22 = vld [vmem:[#allocation7 + $0xd8] sm:$0xff]  ;;  %v7767_v18 = vld [vmem:[#allocation7 + $0xe8] sm:$0xff]  ;;  %11317 = vst [vmem:[#allocation54_spill] sm:$0xff] %v7771_v2  ;;  %11328 = vst [vmem:[#allocation65_spill] sm:$0xff] %v7803_v4 }
  0x97   :  { %6126 = vmatprep.subr.mxu1 %v11050_v0  ;;  %870 = vmatpush1.msra.mxu0 %v7755_v5  ;;  %11315 = vst [vmem:[#allocation52_spill] sm:$0xff] %v7765_v22  ;;  %11316 = vst [vmem:[#allocation53_spill] sm:$0xff] %v7767_v18  ;;  %v7777_v5 = vld [vmem:[#allocation7 + $0xd0] sm:$0xff] }
  0x98   :  { %6127 = vmatpush3.msra.mxu1 %v7757_v10  ;;  %871 = vmatprep.subr.mxu0 %v7761_v14  ;;  %v7775_v10 = vld [vmem:[#allocation7 + $0xc0] sm:$0xff]  ;;  %11319 = vst [vmem:[#allocation56_spill] sm:$0xff] %v7777_v5  ;;  %v7779_v14 = vld [vmem:[#allocation7 + $0xb0] sm:$0xff] }
  0x99   :  { %6128 = vmatprep.subr.mxu1 %v11050_v0  ;;  %872 = vmatpush1.msra.mxu0 %v7765_v22  ;;  %11318 = vst [vmem:[#allocation55_spill] sm:$0xff] %v7775_v10  ;;  %11320 = vst [vmem:[#allocation57_spill] sm:$0xff] %v7779_v14  ;;  %v7785_v22 = vld [vmem:[#allocation7 + $0xb8] sm:$0xff] }
  0x9a   :  { %6129 = vmatpush3.msra.mxu1 %v7767_v18  ;;  %873 = vmatprep.subr.mxu0 %v7771_v2  ;;  %11322 = vst [vmem:[#allocation59_spill] sm:$0xff] %v7785_v22  ;;  %v7787_v18 = vld [vmem:[#allocation7 + $0x98] sm:$0xff]  ;;  %v7793_v2 = vld [vmem:[#allocation7 + $0x90] sm:$0xff] }
  0x9b   :  { %6130 = vmatprep.subr.mxu1 %v11050_v0  ;;  %874 = vmatpush1.msra.mxu0 %v7775_v10  ;;  %11323 = vst [vmem:[#allocation60_spill] sm:$0xff] %v7787_v18  ;;  %11325 = vst [vmem:[#allocation62_spill] sm:$0xff] %v7793_v2  ;;  %v7805_v10 = vld [vmem:[#allocation7 + $0x88] sm:$0xff] }
  0x9c   :  { %6131 = vmatpush3.msra.mxu1 %v7777_v5  ;;  %875 = vmatprep.subr.mxu0 %v7779_v14  ;;  %v7799_v5 = vld [vmem:[#allocation7 + $0x80] sm:$0xff]  ;;  %11329 = vst [vmem:[#allocation66_spill] sm:$0xff] %v7805_v10  ;;  %v7809_v14 = vld [vmem:[#allocation7 + $0x68] sm:$0xff] }
  0x9d   :  { %6132 = vmatprep.subr.mxu1 %v11050_v0  ;;  %876 = vmatpush1.msra.mxu0 %v7783_v7  ;;  %11327 = vst [vmem:[#allocation64_spill] sm:$0xff] %v7799_v5  ;;  %11330 = vst [vmem:[#allocation67_spill] sm:$0xff] %v7809_v14  ;;  %v7827_v7 = vld [vmem:[#allocation7 + $0x48] sm:$0xff] }
  0x9e   :  { %6133 = vmatpush3.msra.mxu1 %v7785_v22  ;;  %877 = vmatprep.subr.mxu0 %v7787_v18  ;;  %v7814_v22 = vld [vmem:[#allocation7 + $0x60] sm:$0xff]  ;;  %v7816_v18 = vld [vmem:[#allocation7 + $0x70] sm:$0xff]  ;;  %11334 = vst [vmem:[#allocation71_spill] sm:$0xff] %v7827_v7 }
  0x9f   :  { %6134 = vmatprep.subr.mxu1 %v11050_v0  ;;  %878 = vmatpush1.msra.mxu0 %v7793_v2  ;;  %11331 = vst [vmem:[#allocation68_spill] sm:$0xff] %v7814_v22  ;;  %11332 = vst [vmem:[#allocation69_spill] sm:$0xff] %v7816_v18  ;;  %v7833_v2 = vld [vmem:[#allocation7 + $0x38] sm:$0xff] }
  0xa0   :  { %6135 = vmatpush3.msra.mxu1 %v7795_v61  ;;  %879 = vmatprep.subr.mxu0 %v7799_v5  ;;  %v7823_v61 = vld [vmem:[#allocation7 + $0x50] sm:$0xff]  ;;  %v7829_v5 = vld [vmem:[#allocation7 + $0x58] sm:$0xff]  ;;  %11336 = vst [vmem:[#allocation73_spill] sm:$0xff] %v7833_v2 }
  0xa1   :  { %6136 = vmatprep.subr.mxu1 %v11050_v0  ;;  %880 = vmatpush1.msra.mxu0 %v7803_v4  ;;  %11333 = vst [vmem:[#allocation70_spill] sm:$0xff] %v7823_v61  ;;  %11335 = vst [vmem:[#allocation72_spill] sm:$0xff] %v7829_v5  ;;  %v11337_v4 = vsub.s32 2, %v7789_v63 }
  0xa2   :  { %6137 = vmatpush3.msra.mxu1 %v7805_v10  ;;  %881 = vmatprep.subr.mxu0 %v7809_v14  ;;  %v7841_v14 = vld [vmem:[#allocation7 + $0x30] sm:$0xff]  ;;  %v7843_v10 = vld [vmem:[#allocation7 + $0x40] sm:$0xff] }
  0xa3   :  { %6138 = vmatprep.subr.mxu1 %v11050_v0  ;;  %882 = vmatpush1.msra.mxu0 %v7814_v22  ;;  %v7837_v58 = vrot.slane %v93_v60, %v11337_v4  ;;  %11338 = vst [vmem:[#allocation74_spill] sm:$0xff] %v7841_v14  ;;  %11339 = vst [vmem:[#allocation75_spill] sm:$0xff] %v7843_v10  ;;  %v7847_v22 = vld [vmem:[#allocation7 + $0x20] sm:$0xff]  ;;  %v7853_v4 = vld [vmem:[#allocation7 + $0x18] sm:$0xff] }
  0xa4   :  { %6139 = vmatpush3.msra.mxu1 %v7816_v18  ;;  %883 = vmatprep.subr.mxu0 %v7823_v61  ;;  %11340 = vst [vmem:[#allocation76_spill] sm:$0xff] %v7847_v22  ;;  %11341 = vst [vmem:[#allocation77_spill] sm:$0xff] %v7853_v4  ;;  %v7855_v61 = vld [vmem:[#allocation7 + $0x28] sm:$0xff] }
  0xa5   :  { %6140 = vmatprep.subr.mxu1 %v11050_v0  ;;  %884 = vmatpush1.msra.mxu0 %v7827_v7  ;;  %11342 = vst [vmem:[#allocation78_spill] sm:$0xff] %v7855_v61 }
  0xa6   :  { %6141 = vmatpush3.msra.mxu1 %v7829_v5  ;;  %885 = vmatprep.subr.mxu0 %v7833_v2  ;;  %v7860_v5 = vld [vmem:[#allocation7 + $0x8] sm:$0xff]  ;;  %v7869_v2 = vld [vmem:[#allocation7] sm:$0xff] }
  0xa7   :  { %6142 = vmatprep.subr.mxu1 %v11050_v0  ;;  %886 = vmatpush1.msra.mxu0 %v7841_v14  ;;  %11343 = vst [vmem:[#allocation79_spill] sm:$0xff] %v7860_v5  ;;  %11345 = vst [vmem:[#allocation81_spill] sm:$0xff] %v7869_v2 }
  0xa8   :  { %6143 = vmatpush3.msra.mxu1 %v7843_v10  ;;  %887 = vmatprep.subr.mxu0 %v7847_v22 }
  0xa9   :  { %6144 = vmatprep.subr.mxu1 %v11050_v0  ;;  %888 = vmatpush1.msra.mxu0 %v7853_v4  ;;  %v102_v4 = vrot.slane %v93_v60, %v11054_v56 }
  0xaa   :  { %6145 = vmatpush3.msra.mxu1 %v7855_v61  ;;  %889 = vmatprep.subr.mxu0 %v7860_v5 }
  0xab   :  { %6146 = vmatprep.subr.mxu1 %v11050_v0  ;;  %890 = vmatpush1.msra.mxu0 %v7869_v2 }
  0xac   :  { %6147 = vmatpush3.msra.mxu1 %v7871_v20  ;;  %1077 = vmatprep.subr.mxu0 %v7272_v9 }
  0xad   :  { %6151 = vmatprep.subr.mxu1 %v11050_v0 }
  0xe1   :  { %v7849_v18 = vpop.f32.mrf.mxu0  ;;  %v6036_v24 = vpop.f32.mrf.mxu1 }
  0xe2   :  { %v7863_v7 = vadd.f32 %v6036_v24, %v7837_v58  ;;  %v11347_v24 = vsub.s32 0, %v7789_v63 }
  0xe3   :  { %v7865_v54 = vpop.f32.mrf.mxu0 }
  0xe4   :  { %11344 = vst [vmem:[#allocation80_spill] sm:$0xff] %v7863_v7  ;;  %v98_v7 = vrot.slane %v93_v60, %v11347_v24  ;;  %v314_v60 = vpop.f32.mrf.mxu1 }
  0xe7   :  { %v207_v22 = vpop.f32.mrf.mxu0 }
  0xe8   :  { %v7886_v61 = vadd.f32 %v207_v22, %v98_v7 }
  0xe9   :  { %v209_v5 = vpop.f32.mrf.mxu0 }
  0xea   :  { %11348 = vst [vmem:[#allocation83_spill] sm:$0xff] %v7886_v61  ;;  %v7888_v10 = vadd.f32 %v209_v5, %v102_v4 }
  0xec   :  { %11349 = vst [vmem:[#allocation84_spill] sm:$0xff] %v7888_v10  ;;  %v213_v14 = vpop.f32.mrf.mxu0 }
  0xed   :  { %v7890_v16 = vadd.f32 %v213_v14, %v98_v7 }
  0xee   :  { %v215_v24 = vpop.f32.mrf.mxu0 }
  0xef   :  { %11350 = vst [vmem:[#allocation85_spill] sm:$0xff] %v7890_v16  ;;  %v7892_v2 = vadd.f32 %v215_v24, %v102_v4 }
  0xf1   :  { %11351 = vst [vmem:[#allocation86_spill] sm:$0xff] %v7892_v2  ;;  %v219_v20 = vpop.f32.mrf.mxu0 }
  0xf2   :  { %v7894_v52 = vadd.f32 %v219_v20, %v98_v7 }
  0xf3   :  { %v221_v9 = vpop.f32.mrf.mxu0 }
  0xf4   :  { %11352 = vst [vmem:[#allocation87_spill] sm:$0xff] %v7894_v52  ;;  %v7896_v12 = vadd.f32 %v221_v9, %v102_v4 }
  0xf6   :  { %11353 = vst [vmem:[#allocation88_spill] sm:$0xff] %v7896_v12  ;;  %v225_v0 = vpop.f32.mrf.mxu0 }
  0xf7   :  { %v7898_v63 = vadd.f32 %v225_v0, %v98_v7 }
  0xf8   :  { %v227_v22 = vpop.f32.mrf.mxu0 }
  0xf9   :  { %11354 = vst [vmem:[#allocation89_spill] sm:$0xff] %v7898_v63  ;;  %v7900_v56 = vadd.f32 %v227_v22, %v102_v4 }
  0xfa   :  { %v6039_v5 = vpop.f32.mrf.mxu1 }
  0xfb   :  { %11355 = vst [vmem:[#allocation90_spill] sm:$0xff] %v7900_v56  ;;  %v7903_v14 = vadd.f32 %v6039_v5, %v7837_v58  ;;  %v231_v16 = vpop.f32.mrf.mxu0 }
  0xfc   :  { %v324_v24 = vpop.f32.mrf.mxu1  ;;  %v7905_v2 = vadd.f32 %v231_v16, %v98_v7 }
  0xfd   :  { %11356 = vst [vmem:[#allocation91_spill] sm:$0xff] %v7903_v14  ;;  %v7908_v20 = vadd.f32 %v324_v24, %v7837_v58  ;;  %v233_v9 = vpop.f32.mrf.mxu0 }
  0xfe   :  { %11357 = vst [vmem:[#allocation92_spill] sm:$0xff] %v7905_v2  ;;  %v7910_v12 = vadd.f32 %v233_v9, %v102_v4 }
  0xff   :  { %11358 = vst [vmem:[#allocation93_spill] sm:$0xff] %v7908_v20 }
 0x100   :  { %11359 = vst [vmem:[#allocation94_spill] sm:$0xff] %v7910_v12  ;;  %v6042_v0 = vpop.f32.mrf.mxu1 }
 0x101   :  { %v7913_v63 = vadd.f32 %v6042_v0, %v7837_v58  ;;  %v237_v22 = vpop.f32.mrf.mxu0 }
 0x102   :  { %v334_v56 = vpop.f32.mrf.mxu1  ;;  %v7915_v52 = vadd.f32 %v237_v22, %v98_v7 }
 0x103   :  { %11360 = vst [vmem:[#allocation95_spill] sm:$0xff] %v7913_v63  ;;  %v7918_v5 = vadd.f32 %v334_v56, %v7837_v58  ;;  %v239_v14 = vpop.f32.mrf.mxu0  ;;  %v202_v56 = vadd.f32 %v7849_v18, %v98_v7 }
 0x104   :  { %11361 = vst [vmem:[#allocation96_spill] sm:$0xff] %v7915_v52  ;;  %v7920_v16 = vadd.f32 %v239_v14, %v102_v4 }
 0x105   :  { %11362 = vst [vmem:[#allocation97_spill] sm:$0xff] %v7918_v5 }
 0x106   :  { %11363 = vst [vmem:[#allocation98_spill] sm:$0xff] %v7920_v16  ;;  %v6045_v2 = vpop.f32.mrf.mxu1 }
 0x107   :  { %v7923_v24 = vadd.f32 %v6045_v2, %v7837_v58  ;;  %v243_v9 = vpop.f32.mrf.mxu0 }
 0x108   :  { %v344_v12 = vpop.f32.mrf.mxu1  ;;  %v7925_v20 = vadd.f32 %v243_v9, %v98_v7 }
 0x109   :  { %11364 = vst [vmem:[#allocation99_spill] sm:$0xff] %v7923_v24  ;;  %v7928_v0 = vadd.f32 %v344_v12, %v7837_v58  ;;  %v245_v63 = vpop.f32.mrf.mxu0  ;;  %v204_v24 = vadd.f32 %v7865_v54, %v102_v4  ;;  %v315_v54 = vadd.f32 %v314_v60, %v7837_v58  ;;  %v11368_v58 = vmov 0.0   ;;  %v11381_v60 = vld [vmem:[#allocation17_spill] sm:$0xff] }
 0x10a   :  { %11365 = vst [vmem:[#allocation100_spill] sm:$0xff] %v7925_v20  ;;  %v7930_v22 = vadd.f32 %v245_v63, %v102_v4 }
 0x10b   :  { %11366 = vst [vmem:[#allocation101_spill] sm:$0xff] %v7928_v0 }
 0x10c   :  { %11367 = vst [vmem:[#allocation102_spill] sm:$0xff] %v7930_v22 }
 0x10d   :  { %v7933_v14 = vpop.f32.mrf.mxu1 }
 0x10e   :  { %v692_v52 = vpop.f32.mrf.mxu0 }
 0x10f   :  { %v767_v5 = vadd.f32 %v692_v52, %v202_v56  ;;  %v7935_v10 = vpop.f32.mrf.mxu1  ;;  %v7943_v52 = vld [vmem:[%s10971_s5] ss:$0 sm:$0xff] }
 0x110   :  { %v694_v12 = vpop.f32.mrf.mxu0 }
 0x111   :  { %v5552_v16 = vmul.f32 -1.442695, %v767_v5  ;;  %v774_v20 = vadd.f32 %v694_v12, %v204_v24 }
 0x113   :  { %6936 = vpow2.f32 %v5552_v16  ;;  %v5553_v0 = vmul.f32 -1.442695, %v774_v20 }
 0x115   :  { %6938 = vpow2.f32 %v5553_v0 }
 0x120   :  { %v6937_v63 = vpop.eup %6936 }
 0x121   :  { %v771_v22 = vadd.f32 1.0, %v6937_v63 }
 0x122   :  { %v6939_v7 = vpop.eup %6938 }
 0x123   :  { %6940 = vrcp.f32 %v771_v22  ;;  %v778_v18 = vadd.f32 1.0, %v6939_v7  ;;  %v11382_v7 = vld [vmem:[#allocation18_spill] sm:$0xff] }
 0x125   :  { %6942 = vrcp.f32 %v778_v18  ;;  %v8069_v18 = vld [vmem:[#allocation5 + $0x128] sm:$0xff] }
 0x12d   :  { %v7937_v2 = vpop.f32.mrf.mxu1 }
 0x12f   :  { %v6080_v9 = vpop.f32.mrf.mxu1 }
 0x130   :  { %v6941_v56 = vpop.eup %6940 }
 0x132   :  { %v6943_v24 = vpop.eup %6942 }
 0x133   :  { %v791_v0 = vsub.f32 1.0, %v6943_v24  ;;  %v793_v63 = vmul.f32 %v6943_v24, %v7510_v25  ;;  %v11385_v24 = vld [vmem:[#allocation21_spill] sm:$0xff] }
 0x14d   :  { %v763_v5 = vpop.f32.mrf.mxu1 }
 0x14e   :  { %v787_v16 = vadd.f32 %v7943_v52, %v763_v5  ;;  %v8073_v5 = vld [vmem:[#allocation5 + $0x120] sm:$0xff] }
 0x14f   :  { %v6115_v9 = vpop.f32.mrf.mxu1 }
 0x150   :  { %v788_v4 = vmul.f32 %v6941_v56, %v787_v16  ;;  %v11383_v16 = vld [vmem:[#allocation19_spill] sm:$0xff]  ;;  %v8077_v56 = vld [vmem:[#allocation5 + $0x110] sm:$0xff]  ;;  %v8081_v9 = vld [vmem:[#allocation5 + $0x108] sm:$0xff] }
 0x152   :  { %v789_v20 = vadd.f32 %v788_v4, %v315_v54  ;;  %v11384_v54 = vld [vmem:[#allocation20_spill] sm:$0xff]  ;;  %v8085_v4 = vld [vmem:[#allocation5 + $0xf8] sm:$0xff] }
 0x154   :  { %6944 = vtanh.f32 %v789_v20  ;;  %v8089_v20 = vld [vmem:[#allocation5 + $0xf0] sm:$0xff] }
 0x161   :  { %v6945_v22 = vpop.eup %6944 }
 0x162   :  { %v792_v12 = vmul.f32 %v6945_v22, %v791_v0  ;;  %v8093_v0 = vld [vmem:[#allocation5 + $0xe0] sm:$0xff]  ;;  %v8097_v22 = vld [vmem:[#allocation5 + $0xd8] sm:$0xff] }
 0x164   :  { %v7948_v61 = vadd.f32 %v793_v63, %v792_v12  ;;  %v11386_v12 = vld [vmem:[#allocation22_spill] sm:$0xff]  ;;  %v8101_v63 = vld [vmem:[#allocation5 + $0xc8] sm:$0xff] }
 0x166   :  { %924 = vmatmul.mubr.f32.vlgmr.msra.gmra.mxu0 %v7948_v61  ;;  %6149 = vmatmul.mubr.f32.vlgmr.msra.gmra.mxu1 %v7948_v61 }
 0x167   :  { %1078 = vmatpush1.msra.mxu0 %v7277_v11  ;;  %6152 = vmatpush3.msra.mxu1 %v7516_v27  ;;  %v11369_v11 = vld [vmem:[#allocation11_spill] sm:$0xff] }
 0x168   :  { %1079 = vmatprep.subr.mxu0 %v7284_v13  ;;  %6153 = vmatprep.subr.mxu1 %v11368_v58  ;;  %v11370_v13 = vld [vmem:[#allocation15_spill] sm:$0xff] }
 0x169   :  { %1080 = vmatpush1.msra.mxu0 %v7292_v15  ;;  %6154 = vmatpush3.msra.mxu1 %v7525_v29  ;;  %v11371_v15 = vld [vmem:[#allocation12_spill] sm:$0xff] }
 0x16a   :  { %1081 = vmatprep.subr.mxu0 %v7298_v17  ;;  %6155 = vmatprep.subr.mxu1 %v11368_v58  ;;  %v11372_v17 = vld [vmem:[#allocation13_spill] sm:$0xff] }
 0x16b   :  { %1082 = vmatpush1.msra.mxu0 %v7304_v19  ;;  %6156 = vmatpush3.msra.mxu1 %v7534_v31  ;;  %v11373_v19 = vld [vmem:[#allocation16_spill] sm:$0xff] }
 0x16c   :  { %1083 = vmatprep.subr.mxu0 %v7310_v21  ;;  %6157 = vmatprep.subr.mxu1 %v11368_v58  ;;  %v8018_v21 = vld [vmem:[#allocation5 + $0x170] sm:$0xff] }
 0x16d   :  { %1084 = vmatpush1.msra.mxu0 %v7318_v23  ;;  %6158 = vmatpush3.msra.mxu1 %v7542_v33  ;;  %v378_v23 = vld [vmem:[%s10973_s7] sm:$0x7] }
 0x16e   :  { %1085 = vmatprep.subr.mxu0 %v7327_v26  ;;  %6159 = vmatprep.subr.mxu1 %v11368_v58  ;;  %v11374_v26 = vld [vmem:[#allocation61_spill] sm:$0xff] }
 0x16f   :  { %1086 = vmatpush1.msra.mxu0 %v7333_v28  ;;  %6160 = vmatpush3.msra.mxu1 %v7549_v34  ;;  %v11375_v28 = vsub.s32 0, %v11374_v26 }
 0x170   :  { %1087 = vmatprep.subr.mxu0 %v7339_v30  ;;  %6161 = vmatprep.subr.mxu1 %v11368_v58 }
 0x171   :  { %1088 = vmatpush1.msra.mxu0 %v7347_v32  ;;  %6162 = vmatpush3.msra.mxu1 %v7556_v36  ;;  %v8026_v30 = vrot.slane %v378_v23, %v11375_v28  ;;  %v11389_v28 = vld [vmem:[#allocation25_spill] sm:$0xff] }
 0x172   :  { %1089 = vmatprep.subr.mxu0 %v7356_v35  ;;  %6163 = vmatprep.subr.mxu1 %v11368_v58 }
 0x173   :  { %1090 = vmatpush1.msra.mxu0 %v7362_v37  ;;  %6164 = vmatpush3.msra.mxu1 %v7563_v38  ;;  %11376 = vst [vmem:[#allocation11_spill] sm:$0xff] %v8026_v30 }
 0x174   :  { %1091 = vmatprep.subr.mxu0 %v7368_v39  ;;  %6165 = vmatprep.subr.mxu1 %v11368_v58  ;;  %v11377_v39 = vsub.s32 1, %v11374_v26 }
 0x175   :  { %1092 = vmatpush1.msra.mxu0 %v7376_v41  ;;  %6166 = vmatpush3.msra.mxu1 %v7570_v40 }
 0x176   :  { %1093 = vmatprep.subr.mxu0 %v7385_v44  ;;  %6167 = vmatprep.subr.mxu1 %v11368_v58  ;;  %v8031_v41 = vrot.slane %v378_v23, %v11377_v39  ;;  %v8133_v39 = vld [vmem:[#allocation5 + $0x68] sm:$0xff] }
 0x177   :  { %1094 = vmatpush1.msra.mxu0 %v7391_v46  ;;  %6168 = vmatpush3.msra.mxu1 %v7577_v42 }
 0x178   :  { %1095 = vmatprep.subr.mxu0 %v7399_v48  ;;  %6169 = vmatprep.subr.mxu1 %v11368_v58 }
 0x179   :  { %1096 = vmatpush1.msra.mxu0 %v7406_v50  ;;  %6170 = vmatpush3.msra.mxu1 %v7584_v43  ;;  %v11379_v43 = vld [vmem:[#allocation14_spill] sm:$0xff] }
 0x17a   :  { %1097 = vmatprep.subr.mxu0 %v7415_v53  ;;  %6171 = vmatprep.subr.mxu1 %v11368_v58 }
 0x17b   :  { %1098 = vmatpush1.msra.mxu0 %v7422_v55  ;;  %6172 = vmatpush3.msra.mxu1 %v7591_v45 }
 0x17c   :  { %1099 = vmatprep.subr.mxu0 %v7430_v57  ;;  %6173 = vmatprep.subr.mxu1 %v11368_v58 }
 0x17d   :  { %1100 = vmatpush1.msra.mxu0 %v7437_v59  ;;  %6174 = vmatpush3.msra.mxu1 %v7598_v47 }
 0x17e   :  { %1101 = vmatprep.subr.mxu0 %v7446_v62  ;;  %6175 = vmatprep.subr.mxu1 %v11368_v58 }
 0x17f   :  { %1102 = vmatpush1.msra.mxu0 %v7453_v1  ;;  %6176 = vmatpush3.msra.mxu1 %v7605_v49  ;;  %v8051_v49 = vld [vmem:[#allocation5 + $0x168] sm:$0xff] }
 0x180   :  { %1103 = vmatprep.subr.mxu0 %v7461_v3  ;;  %6177 = vmatprep.subr.mxu1 %v11368_v58  ;;  %v8039_v3 = vld [vmem:[%s10975_s9] ss:$0 sm:$0xff] }
 0x181   :  { %1104 = vmatpush1.msra.mxu0 %v7471_v6  ;;  %6178 = vmatpush3.msra.mxu1 %v7612_v51  ;;  %v11378_v6 = vsub.s32 2, %v11374_v26  ;;  %v1020_v27 = vadd.f32 %v8039_v3, %v7937_v2  ;;  %v8053_v51 = vld [vmem:[#allocation5 + $0x158] sm:$0xff]  ;;  %v8121_v26 = vld [vmem:[#allocation5 + $0x90] sm:$0xff] }
 0x182   :  { %1105 = vmatprep.subr.mxu0 %v7477_v8  ;;  %6179 = vmatprep.subr.mxu1 %v11368_v58  ;;  %v8065_v2 = vld [vmem:[#allocation5 + $0x138] sm:$0xff] }
 0x183   :  { %1106 = vmatpush1.msra.mxu0 %v11369_v11  ;;  %6180 = vmatpush3.msra.mxu1 %v11370_v13  ;;  %v8043_v8 = vrot.slane %v378_v23, %v11378_v6  ;;  %v8105_v11 = vld [vmem:[#allocation5 + $0xc0] sm:$0xff]  ;;  %v8117_v23 = vld [vmem:[#allocation5 + $0x98] sm:$0xff] }
 0x184   :  { %1107 = vmatprep.subr.mxu0 %v11371_v15  ;;  %6181 = vmatprep.subr.mxu1 %v11368_v58  ;;  %v11387_v13 = vld [vmem:[#allocation23_spill] sm:$0xff]  ;;  %v8109_v15 = vld [vmem:[#allocation5 + $0xb0] sm:$0xff]  ;;  %v11394_v6 = vld [vmem:[#allocation30_spill] sm:$0xff] }
 0x185   :  { %1108 = vmatpush1.msra.mxu0 %v11372_v17  ;;  %6182 = vmatpush3.msra.mxu1 %v11373_v19  ;;  %v8113_v17 = vld [vmem:[#allocation5 + $0xa8] sm:$0xff] }
 0x186   :  { %1141 = vmatprep.mubr.f32.mxu0 %v11368_v58  ;;  %6183 = vmatprep.mubr.msk.f32.mxu1 %vm7167_vm1, %v11368_v58  ;;  %v11388_v19 = vld [vmem:[#allocation24_spill] sm:$0xff] }
 0x187   :  { %6186 = vmatprep.subr.mxu1 %v11368_v58  ;;  %1272 = vmatprep.subr.mxu0 %v8018_v21 }
 0x226   :  { %v925_v32 = vpop.f32.mrf.mxu0  ;;  %v996_v35 = vpop.f32.mrf.mxu1 }
 0x227   :  { %v926_v37 = vadd.f32 %v925_v32, %v8026_v30  ;;  %v997_v31 = vadd.f32 %v996_v35, %v8043_v8  ;;  %v8125_v32 = vld [vmem:[#allocation5 + $0x80] sm:$0xff]  ;;  %v8129_v35 = vld [vmem:[#allocation5 + $0x78] sm:$0xff] }
 0x228   :  { %v927_v44 = vpop.f32.mrf.mxu0  ;;  %v6150_v46 = vpop.f32.mrf.mxu1 }
 0x229   :  { %v1000_v48 = vadd.f32 %v926_v37, %v7933_v14  ;;  %v928_v53 = vadd.f32 %v927_v44, %v8031_v41  ;;  %v8061_v14 = vld [vmem:[#allocation5 + $0x140] sm:$0xff]  ;;  %v11390_v37 = vld [vmem:[#allocation26_spill] sm:$0xff] }
 0x22a   :  { %v8137_v44 = vld [vmem:[#allocation5 + $0x60] sm:$0xff] }
 0x22b   :  { %v5555_v50 = vmul.f32 -1.442695, %v1000_v48  ;;  %v1007_v55 = vadd.f32 %v928_v53, %v7935_v10  ;;  %v8057_v10 = vld [vmem:[#allocation5 + $0x150] sm:$0xff]  ;;  %v11391_v46 = vld [vmem:[#allocation27_spill] sm:$0xff]  ;;  %v11392_v53 = vld [vmem:[#allocation28_spill] sm:$0xff] }
 0x22c   :  { %v8141_v48 = vld [vmem:[#allocation5 + $0x50] sm:$0xff] }
 0x22d   :  { %6946 = vpow2.f32 %v5555_v50  ;;  %v5556_v57 = vmul.f32 -1.442695, %v1007_v55  ;;  %v8145_v50 = vld [vmem:[#allocation5 + $0x48] sm:$0xff]  ;;  %v8149_v55 = vld [vmem:[#allocation5 + $0x38] sm:$0xff] }
 0x22f   :  { %6948 = vpow2.f32 %v5556_v57  ;;  %v8153_v57 = vld [vmem:[#allocation5 + $0x30] sm:$0xff] }
 0x23a   :  { %v6947_v59 = vpop.eup %6946 }
 0x23b   :  { %v1004_v62 = vadd.f32 1.0, %v6947_v59  ;;  %v11393_v59 = vld [vmem:[#allocation29_spill] sm:$0xff] }
 0x23c   :  { %v6949_v1 = vpop.eup %6948 }
 0x23d   :  { %6950 = vrcp.f32 %v1004_v62  ;;  %v1011_v25 = vadd.f32 1.0, %v6949_v1  ;;  %v8157_v62 = vld [vmem:[#allocation5 + $0x20] sm:$0xff]  ;;  %v8161_v1 = vld [vmem:[#allocation5 + $0x18] sm:$0xff] }
 0x23f   :  { %6952 = vrcp.f32 %v1011_v25  ;;  %v8165_v25 = vld [vmem:[#allocation5 + $0x8] sm:$0xff] }
 0x24a   :  { %v6951_v29 = vpop.eup %6950 }
 0x24b   :  { %v1021_v33 = vmul.f32 %v6951_v29, %v1020_v27  ;;  %v8169_v27 = vld [vmem:[#allocation5] sm:$0xff] }
 0x24c   :  { %v6953_v36 = vpop.eup %6952  ;;  %v11395_v29 = vld [vmem:[#allocation31_spill] sm:$0xff] }
 0x24d   :  { %v1022_v34 = vadd.f32 %v1021_v33, %v997_v31  ;;  %v1024_v38 = vsub.f32 1.0, %v6953_v36  ;;  %v1026_v45 = vmul.f32 %v6953_v36, %v11379_v43  ;;  %v11396_v31 = vld [vmem:[#allocation32_spill] sm:$0xff]  ;;  %v11397_v33 = vld [vmem:[#allocation33_spill] sm:$0xff]  ;;  %v11399_v36 = vld [vmem:[#allocation35_spill] sm:$0xff] }
 0x24e   :  { %v11403_v43 = vld [vmem:[#allocation39_spill] sm:$0xff] }
 0x24f   :  { %6954 = vtanh.f32 %v1022_v34  ;;  %v11398_v34 = vld [vmem:[#allocation34_spill] sm:$0xff] }
 0x25c   :  { %v6955_v40 = vpop.eup %6954 }
 0x25d   :  { %v1025_v42 = vmul.f32 %v6955_v40, %v1024_v38  ;;  %v11400_v38 = vld [vmem:[#allocation36_spill] sm:$0xff]  ;;  %v11401_v40 = vld [vmem:[#allocation37_spill] sm:$0xff] }
 0x25f   :  { %v8049_v47 = vadd.f32 %v1026_v45, %v1025_v42  ;;  %v11402_v42 = vld [vmem:[#allocation38_spill] sm:$0xff]  ;;  %v11404_v45 = vld [vmem:[#allocation41_spill] sm:$0xff] }
 0x261   :  { %11380 = vst [vmem:[#allocation15_spill] sm:$0xff] %v8049_v47  ;;  %1142 = vmatmul.mubr.f32.vlgmr.msra.gmra.mxu0 %v8049_v47  ;;  %6184 = vmatmul.mubr.f32.vlgmr.msra.gmra.mxu1 %v8049_v47 }
 0x262   :  { %1273 = vmatpush1.msra.mxu0 %v8051_v49  ;;  %6187 = vmatpush3.msra.mxu1 %v11381_v60  ;;  %v11405_v60 = vld [vmem:[#allocation40_spill] sm:$0xff] }
 0x263   :  { %1274 = vmatprep.subr.mxu0 %v8053_v51  ;;  %6188 = vmatprep.subr.mxu1 %v11368_v58 }
 0x264   :  { %1275 = vmatpush1.msra.mxu0 %v8057_v10  ;;  %6189 = vmatpush3.msra.mxu1 %v11382_v7  ;;  %v11406_v7 = vld [vmem:[#allocation42_spill] sm:$0xff] }
 0x265   :  { %1276 = vmatprep.subr.mxu0 %v8061_v14  ;;  %6190 = vmatprep.subr.mxu1 %v11368_v58 }
 0x266   :  { %1277 = vmatpush1.msra.mxu0 %v8065_v2  ;;  %6191 = vmatpush3.msra.mxu1 %v11383_v16  ;;  %v11407_v16 = vld [vmem:[#allocation43_spill] sm:$0xff] }
 0x267   :  { %1278 = vmatprep.subr.mxu0 %v8069_v18  ;;  %6192 = vmatprep.subr.mxu1 %v11368_v58 }
 0x268   :  { %1279 = vmatpush1.msra.mxu0 %v8073_v5  ;;  %6193 = vmatpush3.msra.mxu1 %v11384_v54  ;;  %v11408_v54 = vld [vmem:[#allocation44_spill] sm:$0xff] }
 0x269   :  { %1280 = vmatprep.subr.mxu0 %v8077_v56  ;;  %6194 = vmatprep.subr.mxu1 %v11368_v58 }
 0x26a   :  { %1281 = vmatpush1.msra.mxu0 %v8081_v9  ;;  %6195 = vmatpush3.msra.mxu1 %v11385_v24  ;;  %v11409_v24 = vld [vmem:[#allocation45_spill] sm:$0xff] }
 0x26b   :  { %1282 = vmatprep.subr.mxu0 %v8085_v4  ;;  %6196 = vmatprep.subr.mxu1 %v11368_v58 }
 0x26c   :  { %1283 = vmatpush1.msra.mxu0 %v8089_v20  ;;  %6197 = vmatpush3.msra.mxu1 %v11386_v12  ;;  %v11410_v12 = vld [vmem:[#allocation46_spill] sm:$0xff] }
 0x26d   :  { %1284 = vmatprep.subr.mxu0 %v8093_v0  ;;  %6198 = vmatprep.subr.mxu1 %v11368_v58 }
 0x26e   :  { %1285 = vmatpush1.msra.mxu0 %v8097_v22  ;;  %6199 = vmatpush3.msra.mxu1 %v11387_v13  ;;  %v11411_v13 = vld [vmem:[#allocation47_spill] sm:$0xff] }
 0x26f   :  { %1286 = vmatprep.subr.mxu0 %v8101_v63  ;;  %6200 = vmatprep.subr.mxu1 %v11368_v58 }
 0x270   :  { %1287 = vmatpush1.msra.mxu0 %v8105_v11  ;;  %6201 = vmatpush3.msra.mxu1 %v11388_v19  ;;  %v11412_v19 = vld [vmem:[#allocation48_spill] sm:$0xff] }
 0x271   :  { %1288 = vmatprep.subr.mxu0 %v8109_v15  ;;  %6202 = vmatprep.subr.mxu1 %v11368_v58 }
 0x272   :  { %1289 = vmatpush1.msra.mxu0 %v8113_v17  ;;  %6203 = vmatpush3.msra.mxu1 %v11389_v28  ;;  %v11413_v28 = vld [vmem:[#allocation49_spill] sm:$0xff] }
 0x273   :  { %1290 = vmatprep.subr.mxu0 %v8117_v23  ;;  %6204 = vmatprep.subr.mxu1 %v11368_v58 }
 0x274   :  { %1291 = vmatpush1.msra.mxu0 %v8121_v26  ;;  %6205 = vmatpush3.msra.mxu1 %v11390_v37  ;;  %v11414_v37 = vld [vmem:[#allocation50_spill] sm:$0xff] }
 0x275   :  { %1292 = vmatprep.subr.mxu0 %v8125_v32  ;;  %6206 = vmatprep.subr.mxu1 %v11368_v58 }
 0x276   :  { %1293 = vmatpush1.msra.mxu0 %v8129_v35  ;;  %6207 = vmatpush3.msra.mxu1 %v11391_v46  ;;  %v11415_v46 = vld [vmem:[#allocation51_spill] sm:$0xff] }
 0x277   :  { %1294 = vmatprep.subr.mxu0 %v8133_v39  ;;  %6208 = vmatprep.subr.mxu1 %v11368_v58 }
 0x278   :  { %1295 = vmatpush1.msra.mxu0 %v8137_v44  ;;  %6209 = vmatpush3.msra.mxu1 %v11392_v53  ;;  %v11416_v53 = vld [vmem:[#allocation52_spill] sm:$0xff] }
 0x279   :  { %1296 = vmatprep.subr.mxu0 %v8141_v48  ;;  %6210 = vmatprep.subr.mxu1 %v11368_v58 }
 0x27a   :  { %1297 = vmatpush1.msra.mxu0 %v8145_v50  ;;  %6211 = vmatpush3.msra.mxu1 %v11393_v59  ;;  %v11417_v59 = vld [vmem:[#allocation53_spill] sm:$0xff] }
 0x27b   :  { %1298 = vmatprep.subr.mxu0 %v8149_v55  ;;  %6212 = vmatprep.subr.mxu1 %v11368_v58 }
 0x27c   :  { %1299 = vmatpush1.msra.mxu0 %v8153_v57  ;;  %6213 = vmatpush3.msra.mxu1 %v11394_v6  ;;  %v11418_v6 = vld [vmem:[#allocation54_spill] sm:$0xff] }
 0x27d   :  { %1300 = vmatprep.subr.mxu0 %v8157_v62  ;;  %6214 = vmatprep.subr.mxu1 %v11368_v58 }
 0x27e   :  { %1301 = vmatpush1.msra.mxu0 %v8161_v1  ;;  %6215 = vmatpush3.msra.mxu1 %v11395_v29  ;;  %v11419_v29 = vld [vmem:[#allocation55_spill] sm:$0xff] }
 0x27f   :  { %1302 = vmatprep.subr.mxu0 %v8165_v25  ;;  %6216 = vmatprep.subr.mxu1 %v11368_v58 }
 0x280   :  { %1303 = vmatpush1.msra.mxu0 %v8169_v27  ;;  %1336 = vmatprep.mubr.f32.mxu0 %v11368_v58 }
 0x281   :  { %6217 = vmatpush3.msra.mxu1 %v11396_v31  ;;  %6218 = vmatprep.mubr.msk.f32.mxu1 %vm7167_vm1, %v11368_v58  ;;  %v11420_v31 = vld [vmem:[#allocation56_spill] sm:$0xff] }
 0x282   :  { %1337 = vmatmul.mubr.f32.vlgmr.msra.gmra.mxu0 %v7948_v61  ;;  %6219 = vmatmul.mubr.f32.vlgmr.msra.gmra.mxu1 %v7948_v61 }
 0x283   :  { %1483 = vmatprep.subr.mxu0 %v11397_v33  ;;  %6221 = vmatprep.subr.mxu1 %v11368_v58  ;;  %v11421_v33 = vld [vmem:[#allocation57_spill] sm:$0xff] }
 0x284   :  { %1484 = vmatpush1.msra.mxu0 %v11398_v34  ;;  %6222 = vmatpush3.msra.mxu1 %v11399_v36  ;;  %v11422_v34 = vld [vmem:[#allocation58_spill] sm:$0xff]  ;;  %v11423_v36 = vld [vmem:[#allocation59_spill] sm:$0xff] }
 0x285   :  { %1485 = vmatprep.subr.mxu0 %v11400_v38  ;;  %6223 = vmatprep.subr.mxu1 %v11368_v58  ;;  %v11424_v38 = vld [vmem:[#allocation60_spill] sm:$0xff] }
 0x286   :  { %1486 = vmatpush1.msra.mxu0 %v11401_v40  ;;  %6224 = vmatpush3.msra.mxu1 %v11402_v42  ;;  %v11425_v40 = vld [vmem:[#allocation62_spill] sm:$0xff]  ;;  %v11426_v42 = vld [vmem:[#allocation63_spill] sm:$0xff] }
 0x287   :  { %1487 = vmatprep.subr.mxu0 %v11403_v43  ;;  %6225 = vmatprep.subr.mxu1 %v11368_v58  ;;  %v11427_v43 = vld [vmem:[#allocation64_spill] sm:$0xff] }
 0x288   :  { %1488 = vmatpush1.msra.mxu0 %v11404_v45  ;;  %6226 = vmatpush3.msra.mxu1 %v11405_v60  ;;  %v11428_v45 = vld [vmem:[#allocation65_spill] sm:$0xff]  ;;  %v11429_v60 = vld [vmem:[#allocation66_spill] sm:$0xff] }
 0x289   :  { %1489 = vmatprep.subr.mxu0 %v11406_v7  ;;  %6227 = vmatprep.subr.mxu1 %v11368_v58  ;;  %v11430_v7 = vld [vmem:[#allocation67_spill] sm:$0xff] }
 0x28a   :  { %1490 = vmatpush1.msra.mxu0 %v11407_v16  ;;  %6228 = vmatpush3.msra.mxu1 %v11408_v54  ;;  %v11431_v16 = vld [vmem:[#allocation68_spill] sm:$0xff]  ;;  %v11432_v54 = vld [vmem:[#allocation69_spill] sm:$0xff] }
 0x28b   :  { %1491 = vmatprep.subr.mxu0 %v11409_v24  ;;  %6229 = vmatprep.subr.mxu1 %v11368_v58  ;;  %v11433_v24 = vld [vmem:[#allocation70_spill] sm:$0xff] }
 0x28c   :  { %1492 = vmatpush1.msra.mxu0 %v11410_v12  ;;  %6230 = vmatpush3.msra.mxu1 %v11411_v13  ;;  %v11434_v12 = vld [vmem:[#allocation71_spill] sm:$0xff]  ;;  %v11435_v13 = vld [vmem:[#allocation72_spill] sm:$0xff] }
 0x28d   :  { %1493 = vmatprep.subr.mxu0 %v11412_v19  ;;  %6231 = vmatprep.subr.mxu1 %v11368_v58  ;;  %v11436_v19 = vld [vmem:[#allocation73_spill] sm:$0xff] }
 0x28e   :  { %1494 = vmatpush1.msra.mxu0 %v11413_v28  ;;  %6232 = vmatpush3.msra.mxu1 %v11414_v37  ;;  %v11437_v28 = vld [vmem:[#allocation74_spill] sm:$0xff]  ;;  %v11438_v37 = vld [vmem:[#allocation75_spill] sm:$0xff] }
 0x28f   :  { %1495 = vmatprep.subr.mxu0 %v11415_v46  ;;  %6233 = vmatprep.subr.mxu1 %v11368_v58  ;;  %v11439_v46 = vld [vmem:[#allocation76_spill] sm:$0xff] }
 0x290   :  { %1496 = vmatpush1.msra.mxu0 %v11416_v53  ;;  %6234 = vmatpush3.msra.mxu1 %v11417_v59  ;;  %v11440_v53 = vld [vmem:[#allocation77_spill] sm:$0xff]  ;;  %v11441_v59 = vld [vmem:[#allocation78_spill] sm:$0xff] }
 0x291   :  { %1497 = vmatprep.subr.mxu0 %v11418_v6  ;;  %6235 = vmatprep.subr.mxu1 %v11368_v58  ;;  %v11442_v6 = vld [vmem:[#allocation79_spill] sm:$0xff] }
 0x292   :  { %1498 = vmatpush1.msra.mxu0 %v11419_v29  ;;  %6236 = vmatpush3.msra.mxu1 %v11420_v31  ;;  %v11443_v29 = vld [vmem:[#allocation81_spill] sm:$0xff]  ;;  %v11444_v31 = vld [vmem:[#allocation82_spill] sm:$0xff] }
 0x293   :  { %1499 = vmatprep.subr.mxu0 %v11421_v33  ;;  %6237 = vmatprep.subr.mxu1 %v11368_v58 }
 0x294   :  { %1500 = vmatpush1.msra.mxu0 %v11422_v34  ;;  %6238 = vmatpush3.msra.mxu1 %v11423_v36 }
 0x295   :  { %1501 = vmatprep.subr.mxu0 %v11424_v38  ;;  %6239 = vmatprep.subr.mxu1 %v11368_v58 }
 0x296   :  { %1502 = vmatpush1.msra.mxu0 %v11425_v40  ;;  %6240 = vmatpush3.msra.mxu1 %v11426_v42 }
 0x297   :  { %1503 = vmatprep.subr.mxu0 %v11427_v43  ;;  %6241 = vmatprep.subr.mxu1 %v11368_v58  ;;  %v11445_v43 = vld [vmem:[#allocation83_spill] sm:$0xff] }
 0x298   :  { %1504 = vmatpush1.msra.mxu0 %v11428_v45  ;;  %6242 = vmatpush3.msra.mxu1 %v11429_v60 }
 0x299   :  { %1505 = vmatprep.subr.mxu0 %v11430_v7  ;;  %6243 = vmatprep.subr.mxu1 %v11368_v58 }
 0x29a   :  { %1506 = vmatpush1.msra.mxu0 %v11431_v16  ;;  %6244 = vmatpush3.msra.mxu1 %v11432_v54  ;;  %v11446_v54 = vld [vmem:[#allocation84_spill] sm:$0xff] }
 0x29b   :  { %1507 = vmatprep.subr.mxu0 %v11433_v24  ;;  %6245 = vmatprep.subr.mxu1 %v11368_v58 }
 0x29c   :  { %1508 = vmatpush1.msra.mxu0 %v11434_v12  ;;  %6246 = vmatpush3.msra.mxu1 %v11435_v13 }
 0x29d   :  { %1509 = vmatprep.subr.mxu0 %v11436_v19  ;;  %6247 = vmatprep.subr.mxu1 %v11368_v58 }
 0x29e   :  { %1510 = vmatpush1.msra.mxu0 %v11437_v28  ;;  %6248 = vmatpush3.msra.mxu1 %v11438_v37 }
 0x29f   :  { %1511 = vmatprep.subr.mxu0 %v11439_v46  ;;  %6249 = vmatprep.subr.mxu1 %v11368_v58 }
 0x2a0   :  { %1512 = vmatpush1.msra.mxu0 %v11440_v53  ;;  %6250 = vmatpush3.msra.mxu1 %v11441_v59 }
 0x2a1   :  { %1513 = vmatprep.subr.mxu0 %v11442_v6  ;;  %6251 = vmatprep.subr.mxu1 %v11368_v58  ;;  %v11447_v6 = vld [vmem:[#allocation80_spill] sm:$0xff] }
 0x2a2   :  { %1514 = vmatpush1.msra.mxu0 %v11443_v29  ;;  %1547 = vmatprep.mubr.f32.mxu0 %v11368_v58 }
 0x2a3   :  { %6252 = vmatpush3.msra.mxu1 %v11444_v31  ;;  %6253 = vmatprep.mubr.msk.f32.mxu1 %vm7167_vm1, %v11368_v58 }
 0x2a4   :  { %6256 = vmatprep.subr.mxu1 %v11368_v58 }
 0x321   :  { %v8250_v33 = vpop.f32.mrf.mxu1  ;;  %v8252_v36 = vpop.f32.mrf.mxu0 }
 0x323   :  { %v6185_v34 = vpop.f32.mrf.mxu1  ;;  %v8254_v38 = vpop.f32.mrf.mxu0 }
 0x342   :  { %v1338_v40 = vpop.f32.mrf.mxu0  ;;  %v1409_v42 = vpop.f32.mrf.mxu1 }
 0x343   :  { %v1413_v45 = vadd.f32 %v1338_v40, %v11445_v43  ;;  %v1427_v46 = vadd.f32 %v7943_v52, %v1409_v42  ;;  %v8271_v52 = vld [vmem:[%s10974_s8 + $0x170] sm:$0xff]  ;;  %v8282_v42 = vld [vmem:[%s10974_s8 + $0x178] sm:$0xff] }
 0x344   :  { %v6220_v60 = vpop.f32.mrf.mxu1  ;;  %v1340_v16 = vpop.f32.mrf.mxu0  ;;  %1696 = vmatprep.subr.mxu0 %v8271_v52 }
 0x345   :  { %v5558_v7 = vmul.f32 -1.442695, %v1413_v45  ;;  %v1420_v24 = vadd.f32 %v1340_v16, %v11446_v54  ;;  %v8296_v16 = vld [vmem:[%s10974_s8 + $0x150] sm:$0xff]  ;;  %v8301_v54 = vld [vmem:[%s10974_s8 + $0x160] sm:$0xff] }
 0x347   :  { %6956 = vpow2.f32 %v5558_v7  ;;  %v5559_v12 = vmul.f32 -1.442695, %v1420_v24  ;;  %v8289_v7 = vld [vmem:[%s10974_s8 + $0x158] sm:$0xff]  ;;  %v8308_v24 = vld [vmem:[%s10974_s8 + $0x140] sm:$0xff] }
 0x349   :  { %6958 = vpow2.f32 %v5559_v12  ;;  %v8315_v12 = vld [vmem:[%s10974_s8 + $0x138] sm:$0xff] }
 0x354   :  { %v6957_v13 = vpop.eup %6956 }
 0x355   :  { %v1417_v19 = vadd.f32 1.0, %v6957_v13  ;;  %v8320_v13 = vld [vmem:[%s10974_s8 + $0x148] sm:$0xff] }
 0x356   :  { %v6959_v28 = vpop.eup %6958 }
 0x357   :  { %6960 = vrcp.f32 %v1417_v19  ;;  %v1424_v37 = vadd.f32 1.0, %v6959_v28  ;;  %v8327_v19 = vld [vmem:[%s10974_s8 + $0x128] sm:$0xff]  ;;  %v8334_v28 = vld [vmem:[%s10974_s8 + $0x120] sm:$0xff] }
 0x358   :  { %11448 = vst [vmem:[#allocation12_spill] sm:$0xff] %v8327_v19  ;;  %11449 = vst [vmem:[#allocation13_spill] sm:$0xff] %v8334_v28 }
 0x359   :  { %6962 = vrcp.f32 %v1424_v37  ;;  %v8339_v37 = vld [vmem:[%s10974_s8 + $0x130] sm:$0xff] }
 0x35a   :  { %11450 = vst [vmem:[#allocation16_spill] sm:$0xff] %v8339_v37 }
 0x364   :  { %v6961_v53 = vpop.eup %6960 }
 0x365   :  { %v1428_v59 = vmul.f32 %v6961_v53, %v1427_v46  ;;  %v8346_v46 = vld [vmem:[%s10974_s8 + $0x110] sm:$0xff]  ;;  %v8353_v53 = vld [vmem:[%s10974_s8 + $0x108] sm:$0xff] }
 0x366   :  { %v6963_v31 = vpop.eup %6962  ;;  %11451 = vst [vmem:[#allocation61_spill] sm:$0xff] %v8346_v46  ;;  %11452 = vst [vmem:[#allocation14_spill] sm:$0xff] %v8353_v53 }
 0x367   :  { %v1429_v29 = vadd.f32 %v1428_v59, %v11447_v6  ;;  %v1431_v34 = vsub.f32 1.0, %v6963_v31  ;;  %v1433_v45 = vmul.f32 %v6963_v31, %v7948_v61  ;;  %v8277_v61 = vld [vmem:[%s10974_s8 + $0x168] sm:$0xff]  ;;  %v8358_v59 = vld [vmem:[%s10974_s8 + $0x118] sm:$0xff]  ;;  %v8377_v31 = vld [vmem:[%s10974_s8 + $0x100] sm:$0xff] }
 0x368   :  { %11453 = vst [vmem:[#allocation17_spill] sm:$0xff] %v8358_v59  ;;  %v8365_v6 = vld [vmem:[%s10974_s8 + $0xf8] sm:$0xff]  ;;  %11456 = vst [vmem:[#allocation20_spill] sm:$0xff] %v8377_v31 }
 0x369   :  { %6964 = vtanh.f32 %v1429_v29  ;;  %11454 = vst [vmem:[#allocation18_spill] sm:$0xff] %v8365_v6  ;;  %v8372_v29 = vld [vmem:[%s10974_s8 + $0xf0] sm:$0xff] }
 0x36a   :  { %11455 = vst [vmem:[#allocation19_spill] sm:$0xff] %v8372_v29 }
 0x376   :  { %v6965_v40 = vpop.eup %6964 }
 0x377   :  { %v1432_v43 = vmul.f32 %v6965_v40, %v1431_v34  ;;  %v8384_v34 = vld [vmem:[%s10974_s8 + $0xe0] sm:$0xff]  ;;  %v8391_v40 = vld [vmem:[%s10974_s8 + $0xd8] sm:$0xff] }
 0x378   :  { %11457 = vst [vmem:[#allocation21_spill] sm:$0xff] %v8384_v34  ;;  %11458 = vst [vmem:[#allocation22_spill] sm:$0xff] %v8391_v40 }
 0x379   :  { %v8261_v60 = vadd.f32 %v1433_v45, %v1432_v43  ;;  %v8396_v43 = vld [vmem:[%s10974_s8 + $0xe8] sm:$0xff] }
 0x37a   :  { %11459 = vst [vmem:[#allocation23_spill] sm:$0xff] %v8396_v43  ;;  %v8403_v45 = vld [vmem:[%s10974_s8 + $0xc8] sm:$0xff] }
 0x37b   :  { %1548 = vmatmul.mubr.f32.vlgmr.msra.gmra.mxu0 %v8261_v60  ;;  %6254 = vmatmul.mubr.f32.vlgmr.msra.gmra.mxu1 %v8261_v60  ;;  %11460 = vst [vmem:[#allocation24_spill] sm:$0xff] %v8403_v45 }
 0x37c   :  { %1760 = vmatprep.mubr.f32.mxu0 %v11368_v58  ;;  %6288 = vmatprep.mubr.msk.f32.mxu1 %vm7167_vm1, %v11368_v58 }
 0x37d   :  { %1697 = vmatpush1.msra.mxu0 %v8277_v61  ;;  %6257 = vmatpush3.msra.mxu1 %v8282_v42 }
 0x37e   :  { %1698 = vmatprep.subr.mxu0 %v8289_v7  ;;  %6258 = vmatprep.subr.mxu1 %v11368_v58 }
 0x37f   :  { %1699 = vmatpush1.msra.mxu0 %v8296_v16  ;;  %6259 = vmatpush3.msra.mxu1 %v8301_v54 }
 0x380   :  { %1700 = vmatprep.subr.mxu0 %v8308_v24  ;;  %6260 = vmatprep.subr.mxu1 %v11368_v58 }
 0x381   :  { %1701 = vmatpush1.msra.mxu0 %v8315_v12  ;;  %6261 = vmatpush3.msra.mxu1 %v8320_v13 }
 0x382   :  { %1702 = vmatprep.subr.mxu0 %v8327_v19  ;;  %6262 = vmatprep.subr.mxu1 %v11368_v58 }
 0x383   :  { %1703 = vmatpush1.msra.mxu0 %v8334_v28  ;;  %6263 = vmatpush3.msra.mxu1 %v8339_v37 }
 0x384   :  { %1704 = vmatprep.subr.mxu0 %v8346_v46  ;;  %6264 = vmatprep.subr.mxu1 %v11368_v58 }
 0x385   :  { %1705 = vmatpush1.msra.mxu0 %v8353_v53  ;;  %6265 = vmatpush3.msra.mxu1 %v8358_v59 }
 0x386   :  { %1706 = vmatprep.subr.mxu0 %v8365_v6  ;;  %6266 = vmatprep.subr.mxu1 %v11368_v58  ;;  %v8463_v6 = vld [vmem:[%s10974_s8 + $0x78] sm:$0xff] }
 0x387   :  { %1707 = vmatpush1.msra.mxu0 %v8372_v29  ;;  %6267 = vmatpush3.msra.mxu1 %v8377_v31  ;;  %v8432_v31 = vld [vmem:[%s10974_s8 + $0xb8] sm:$0xff]  ;;  %v8449_v29 = vld [vmem:[%s10974_s8 + $0xa0] sm:$0xff]  ;;  %11470 = vst [vmem:[#allocation34_spill] sm:$0xff] %v8463_v6 }
 0x388   :  { %1708 = vmatprep.subr.mxu0 %v8384_v34  ;;  %6268 = vmatprep.subr.mxu1 %v11368_v58  ;;  %v8410_v34 = vld [vmem:[%s10974_s8 + $0xc0] sm:$0xff]  ;;  %11465 = vst [vmem:[#allocation29_spill] sm:$0xff] %v8432_v31  ;;  %11468 = vst [vmem:[#allocation32_spill] sm:$0xff] %v8449_v29 }
 0x389   :  { %1709 = vmatpush1.msra.mxu0 %v8391_v40  ;;  %6269 = vmatpush3.msra.mxu1 %v8396_v43  ;;  %11461 = vst [vmem:[#allocation25_spill] sm:$0xff] %v8410_v34  ;;  %v8415_v40 = vld [vmem:[%s10974_s8 + $0xd0] sm:$0xff]  ;;  %v8427_v43 = vld [vmem:[%s10974_s8 + $0xa8] sm:$0xff] }
 0x38a   :  { %1710 = vmatprep.subr.mxu0 %v8403_v45  ;;  %6270 = vmatprep.subr.mxu1 %v11368_v58  ;;  %11462 = vst [vmem:[#allocation26_spill] sm:$0xff] %v8415_v40  ;;  %v8422_v45 = vld [vmem:[%s10974_s8 + $0xb0] sm:$0xff]  ;;  %11464 = vst [vmem:[#allocation28_spill] sm:$0xff] %v8427_v43 }
 0x38b   :  { %1711 = vmatpush1.msra.mxu0 %v8410_v34  ;;  %6271 = vmatpush3.msra.mxu1 %v8415_v40  ;;  %11463 = vst [vmem:[#allocation27_spill] sm:$0xff] %v8422_v45  ;;  %v8439_v40 = vld [vmem:[%s10974_s8 + $0x98] sm:$0xff]  ;;  %v8444_v34 = vld [vmem:[%s10974_s8 + $0x90] sm:$0xff] }
 0x38c   :  { %1712 = vmatprep.subr.mxu0 %v8422_v45  ;;  %6272 = vmatprep.subr.mxu1 %v11368_v58  ;;  %11466 = vst [vmem:[#allocation30_spill] sm:$0xff] %v8439_v40  ;;  %11467 = vst [vmem:[#allocation31_spill] sm:$0xff] %v8444_v34  ;;  %v8456_v45 = vld [vmem:[%s10974_s8 + $0x80] sm:$0xff] }
 0x38d   :  { %1713 = vmatpush1.msra.mxu0 %v8427_v43  ;;  %6273 = vmatpush3.msra.mxu1 %v8432_v31  ;;  %11469 = vst [vmem:[#allocation33_spill] sm:$0xff] %v8456_v45  ;;  %v8468_v43 = vld [vmem:[%s10974_s8 + $0x88] sm:$0xff]  ;;  %v8482_v31 = vld [vmem:[%s10974_s8 + $0x60] sm:$0xff] }
 0x38e   :  { %1714 = vmatprep.subr.mxu0 %v8439_v40  ;;  %6274 = vmatprep.subr.mxu1 %v11368_v58  ;;  %11471 = vst [vmem:[#allocation35_spill] sm:$0xff] %v8468_v43  ;;  %v8475_v40 = vld [vmem:[%s10974_s8 + $0x68] sm:$0xff]  ;;  %11473 = vst [vmem:[#allocation37_spill] sm:$0xff] %v8482_v31 }
 0x38f   :  { %1715 = vmatpush1.msra.mxu0 %v8444_v34  ;;  %6275 = vmatpush3.msra.mxu1 %v8449_v29  ;;  %11472 = vst [vmem:[#allocation36_spill] sm:$0xff] %v8475_v40  ;;  %v8487_v34 = vld [vmem:[%s10974_s8 + $0x70] sm:$0xff]  ;;  %v8501_v29 = vld [vmem:[%s10974_s8 + $0x48] sm:$0xff] }
 0x390   :  { %1716 = vmatprep.subr.mxu0 %v8456_v45  ;;  %6276 = vmatprep.subr.mxu1 %v11368_v58  ;;  %11474 = vst [vmem:[#allocation38_spill] sm:$0xff] %v8487_v34  ;;  %v8494_v45 = vld [vmem:[%s10974_s8 + $0x50] sm:$0xff]  ;;  %11476 = vst [vmem:[#allocation41_spill] sm:$0xff] %v8501_v29 }
 0x391   :  { %1717 = vmatpush1.msra.mxu0 %v8463_v6  ;;  %6277 = vmatpush3.msra.mxu1 %v8468_v43  ;;  %11475 = vst [vmem:[#allocation39_spill] sm:$0xff] %v8494_v45  ;;  %v8506_v6 = vld [vmem:[%s10974_s8 + $0x58] sm:$0xff]  ;;  %v8520_v43 = vld [vmem:[%s10974_s8 + $0x30] sm:$0xff] }
 0x392   :  { %1718 = vmatprep.subr.mxu0 %v8475_v40  ;;  %6278 = vmatprep.subr.mxu1 %v11368_v58  ;;  %11477 = vst [vmem:[#allocation40_spill] sm:$0xff] %v8506_v6  ;;  %v8513_v40 = vld [vmem:[%s10974_s8 + $0x38] sm:$0xff]  ;;  %11479 = vst [vmem:[#allocation43_spill] sm:$0xff] %v8520_v43 }
 0x393   :  { %1719 = vmatpush1.msra.mxu0 %v8482_v31  ;;  %6279 = vmatpush3.msra.mxu1 %v8487_v34  ;;  %11478 = vst [vmem:[#allocation42_spill] sm:$0xff] %v8513_v40  ;;  %v8525_v31 = vld [vmem:[%s10974_s8 + $0x40] sm:$0xff]  ;;  %v8539_v34 = vld [vmem:[%s10974_s8 + $0x18] sm:$0xff] }
 0x394   :  { %1720 = vmatprep.subr.mxu0 %v8494_v45  ;;  %6280 = vmatprep.subr.mxu1 %v11368_v58  ;;  %11480 = vst [vmem:[#allocation44_spill] sm:$0xff] %v8525_v31  ;;  %v8532_v45 = vld [vmem:[%s10974_s8 + $0x20] sm:$0xff]  ;;  %11482 = vst [vmem:[#allocation46_spill] sm:$0xff] %v8539_v34 }
 0x395   :  { %1721 = vmatpush1.msra.mxu0 %v8501_v29  ;;  %6281 = vmatpush3.msra.mxu1 %v8506_v6  ;;  %11481 = vst [vmem:[#allocation45_spill] sm:$0xff] %v8532_v45  ;;  %v8544_v29 = vld [vmem:[%s10974_s8 + $0x28] sm:$0xff]  ;;  %v8558_v6 = vld [vmem:[%s10974_s8] sm:$0xff] }
 0x396   :  { %1722 = vmatprep.subr.mxu0 %v8513_v40  ;;  %6282 = vmatprep.subr.mxu1 %v11368_v58  ;;  %11483 = vst [vmem:[#allocation47_spill] sm:$0xff] %v8544_v29  ;;  %v8551_v40 = vld [vmem:[%s10974_s8 + $0x8] sm:$0xff]  ;;  %11485 = vst [vmem:[#allocation49_spill] sm:$0xff] %v8558_v6 }
 0x397   :  { %1723 = vmatpush1.msra.mxu0 %v8520_v43  ;;  %6283 = vmatpush3.msra.mxu1 %v8525_v31  ;;  %11484 = vst [vmem:[#allocation48_spill] sm:$0xff] %v8551_v40  ;;  %v8563_v43 = vld [vmem:[%s10974_s8 + $0x10] sm:$0xff] }
 0x398   :  { %1724 = vmatprep.subr.mxu0 %v8532_v45  ;;  %6284 = vmatprep.subr.mxu1 %v11368_v58  ;;  %11486 = vst [vmem:[#allocation50_spill] sm:$0xff] %v8563_v43 }
 0x399   :  { %1725 = vmatpush1.msra.mxu0 %v8539_v34  ;;  %6285 = vmatpush3.msra.mxu1 %v8544_v29 }
 0x39a   :  { %1726 = vmatprep.subr.mxu0 %v8551_v40  ;;  %6286 = vmatprep.subr.mxu1 %v11368_v58 }
 0x39b   :  { %1727 = vmatpush1.msra.mxu0 %v8558_v6  ;;  %6287 = vmatpush3.msra.mxu1 %v8563_v43 }
 0x39c   :  { %1891 = vmatprep.subr.mxu0 %v8018_v21  ;;  %6291 = vmatprep.subr.mxu1 %v11368_v58 }
 0x43b   :  { %v1549_v45 = vpop.f32.mrf.mxu0  ;;  %v1620_v31 = vpop.f32.mrf.mxu1 }
 0x43c   :  { %v1550_v59 = vadd.f32 %v1549_v45, %v8026_v30  ;;  %v1638_v45 = vadd.f32 %v8039_v3, %v8250_v33  ;;  %v8587_v3 = vld [vmem:[#allocation5 + $0x160] sm:$0xff]  ;;  %v8599_v33 = vld [vmem:[#allocation5 + $0x130] sm:$0xff] }
 0x43d   :  { %v1551_v53 = vpop.f32.mrf.mxu0  ;;  %v6255_v34 = vpop.f32.mrf.mxu1 }
 0x43e   :  { %v1624_v29 = vadd.f32 %v1550_v59, %v8252_v36  ;;  %v1552_v40 = vadd.f32 %v1551_v53, %v8031_v41  ;;  %v1621_v34 = vadd.f32 %v1620_v31, %v8043_v8  ;;  %v8757_v31 = vld [vmem:[#allocation7 + $0xc8] sm:$0xff] }
 0x43f   :  { %11492 = vst [vmem:[#allocation56_spill] sm:$0xff] %v8757_v31 }
 0x440   :  { %v5560_v46 = vmul.f32 -1.442695, %v1624_v29  ;;  %v1631_v6 = vadd.f32 %v1552_v40, %v8254_v38  ;;  %v8583_v40 = vld [vmem:[#allocation5 + $0x178] sm:$0xff] }
 0x442   :  { %6966 = vpow2.f32 %v5560_v46  ;;  %v5561_v37 = vmul.f32 -1.442695, %v1631_v6 }
 0x444   :  { %6968 = vpow2.f32 %v5561_v37 }
 0x44f   :  { %v6967_v43 = vpop.eup %6966 }
 0x450   :  { %v1628_v21 = vadd.f32 1.0, %v6967_v43  ;;  %v8761_v43 = vld [vmem:[#allocation7 + $0xc0] sm:$0xff] }
 0x451   :  { %v6969_v28 = vpop.eup %6968  ;;  %11493 = vst [vmem:[#allocation57_spill] sm:$0xff] %v8761_v43 }
 0x452   :  { %6970 = vrcp.f32 %v1628_v21  ;;  %v1635_v19 = vadd.f32 1.0, %v6969_v28  ;;  %v8753_v28 = vld [vmem:[#allocation7 + $0xe8] sm:$0xff]  ;;  %v8763_v21 = vld [vmem:[#allocation7 + $0xd0] sm:$0xff] }
 0x453   :  { %11491 = vst [vmem:[#allocation55_spill] sm:$0xff] %v8753_v28  ;;  %11494 = vst [vmem:[#allocation58_spill] sm:$0xff] %v8763_v21 }
 0x454   :  { %6972 = vrcp.f32 %v1635_v19  ;;  %v8751_v19 = vld [vmem:[#allocation7 + $0xd8] sm:$0xff] }
 0x455   :  { %11490 = vst [vmem:[#allocation54_spill] sm:$0xff] %v8751_v19 }
 0x45f   :  { %v6971_v30 = vpop.eup %6970 }
 0x460   :  { %v1639_v36 = vmul.f32 %v6971_v30, %v1638_v45  ;;  %v8593_v30 = vld [vmem:[#allocation5 + $0x148] sm:$0xff]  ;;  %v8765_v45 = vld [vmem:[#allocation7 + $0xb0] sm:$0xff] }
 0x461   :  { %v6973_v46 = vpop.eup %6972  ;;  %11495 = vst [vmem:[#allocation59_spill] sm:$0xff] %v8765_v45 }
 0x462   :  { %v1640_v59 = vadd.f32 %v1639_v36, %v1621_v34  ;;  %v1642_v53 = vsub.f32 1.0, %v6973_v46  ;;  %v1644_v37 = vmul.f32 %v6973_v46, %v8049_v47  ;;  %v8769_v34 = vld [vmem:[#allocation7 + $0xa8] sm:$0xff]  ;;  %v8771_v36 = vld [vmem:[#allocation7 + $0xb8] sm:$0xff]  ;;  %v8777_v46 = vld [vmem:[#allocation7 + $0x90] sm:$0xff] }
 0x463   :  { %11496 = vst [vmem:[#allocation60_spill] sm:$0xff] %v8769_v34  ;;  %11497 = vst [vmem:[#allocation62_spill] sm:$0xff] %v8771_v36  ;;  %v8793_v47 = vld [vmem:[#allocation7 + $0x68] sm:$0xff] }
 0x464   :  { %6974 = vtanh.f32 %v1640_v59  ;;  %v8773_v59 = vld [vmem:[#allocation7 + $0x98] sm:$0xff]  ;;  %11499 = vst [vmem:[#allocation64_spill] sm:$0xff] %v8777_v46  ;;  %11504 = vst [vmem:[#allocation69_spill] sm:$0xff] %v8793_v47 }
 0x465   :  { %11498 = vst [vmem:[#allocation63_spill] sm:$0xff] %v8773_v59 }
 0x471   :  { %v6975_v38 = vpop.eup %6974 }
 0x472   :  { %v1643_v6 = vmul.f32 %v6975_v38, %v1642_v53  ;;  %v8779_v53 = vld [vmem:[#allocation7 + $0xa0] sm:$0xff] }
 0x473   :  { %11500 = vst [vmem:[#allocation65_spill] sm:$0xff] %v8779_v53  ;;  %v8783_v38 = vld [vmem:[#allocation7 + $0x80] sm:$0xff] }
 0x474   :  { %v8581_v29 = vadd.f32 %v1644_v37, %v1643_v6  ;;  %11501 = vst [vmem:[#allocation66_spill] sm:$0xff] %v8783_v38  ;;  %v8787_v6 = vld [vmem:[#allocation7 + $0x78] sm:$0xff]  ;;  %v8789_v37 = vld [vmem:[#allocation7 + $0x88] sm:$0xff] }
 0x475   :  { %11502 = vst [vmem:[#allocation67_spill] sm:$0xff] %v8787_v6  ;;  %11503 = vst [vmem:[#allocation68_spill] sm:$0xff] %v8789_v37 }
 0x476   :  { %11487 = vst [vmem:[#allocation51_spill] sm:$0xff] %v8581_v29  ;;  %1761 = vmatmul.mubr.f32.vlgmr.msra.gmra.mxu0 %v8581_v29  ;;  %6289 = vmatmul.mubr.f32.vlgmr.msra.gmra.mxu1 %v8581_v29 }
 0x477   :  { %1892 = vmatpush1.msra.mxu0 %v8051_v49  ;;  %6292 = vmatpush3.msra.mxu1 %v8583_v40  ;;  %v8605_v49 = vld [vmem:[#allocation5 + $0x118] sm:$0xff] }
 0x478   :  { %1893 = vmatprep.subr.mxu0 %v8053_v51  ;;  %6293 = vmatprep.subr.mxu1 %v11368_v58  ;;  %v8611_v51 = vld [vmem:[#allocation5 + $0x100] sm:$0xff] }
 0x479   :  { %1894 = vmatpush1.msra.mxu0 %v8057_v10  ;;  %6294 = vmatpush3.msra.mxu1 %v8587_v3  ;;  %v8617_v10 = vld [vmem:[#allocation5 + $0xe8] sm:$0xff] }
 0x47a   :  { %1895 = vmatprep.subr.mxu0 %v8061_v14  ;;  %6295 = vmatprep.subr.mxu1 %v11368_v58  ;;  %v8623_v14 = vld [vmem:[#allocation5 + $0xd0] sm:$0xff] }
 0x47b   :  { %1896 = vmatpush1.msra.mxu0 %v8065_v2  ;;  %6296 = vmatpush3.msra.mxu1 %v8593_v30  ;;  %v8629_v2 = vld [vmem:[#allocation5 + $0xb8] sm:$0xff] }
 0x47c   :  { %1897 = vmatprep.subr.mxu0 %v8069_v18  ;;  %6297 = vmatprep.subr.mxu1 %v11368_v58  ;;  %v8635_v18 = vld [vmem:[#allocation5 + $0xa0] sm:$0xff] }
 0x47d   :  { %1898 = vmatpush1.msra.mxu0 %v8073_v5  ;;  %6298 = vmatpush3.msra.mxu1 %v8599_v33  ;;  %v8641_v5 = vld [vmem:[#allocation5 + $0x88] sm:$0xff] }
 0x47e   :  { %1899 = vmatprep.subr.mxu0 %v8077_v56  ;;  %6299 = vmatprep.subr.mxu1 %v11368_v58  ;;  %v8647_v56 = vld [vmem:[#allocation5 + $0x70] sm:$0xff] }
 0x47f   :  { %1900 = vmatpush1.msra.mxu0 %v8081_v9  ;;  %6300 = vmatpush3.msra.mxu1 %v8605_v49  ;;  %v8653_v9 = vld [vmem:[#allocation5 + $0x58] sm:$0xff] }
 0x480   :  { %1901 = vmatprep.subr.mxu0 %v8085_v4  ;;  %6301 = vmatprep.subr.mxu1 %v11368_v58  ;;  %v8659_v4 = vld [vmem:[#allocation5 + $0x40] sm:$0xff] }
 0x481   :  { %1902 = vmatpush1.msra.mxu0 %v8089_v20  ;;  %6302 = vmatpush3.msra.mxu1 %v8611_v51  ;;  %v8665_v20 = vld [vmem:[#allocation5 + $0x28] sm:$0xff] }
 0x482   :  { %1903 = vmatprep.subr.mxu0 %v8093_v0  ;;  %6303 = vmatprep.subr.mxu1 %v11368_v58  ;;  %v8673_v0 = vld [vmem:[#allocation5 + $0x10] sm:$0xff] }
 0x483   :  { %1904 = vmatpush1.msra.mxu0 %v8097_v22  ;;  %6304 = vmatpush3.msra.mxu1 %v8617_v10  ;;  %v8688_v22 = vld [vmem:[#allocation7 + $0x170] sm:$0xff] }
 0x484   :  { %1905 = vmatprep.subr.mxu0 %v8101_v63  ;;  %6305 = vmatprep.subr.mxu1 %v11368_v58  ;;  %v8691_v63 = vld [vmem:[#allocation7 + $0x168] sm:$0xff] }
 0x485   :  { %1906 = vmatpush1.msra.mxu0 %v8105_v11  ;;  %6306 = vmatpush3.msra.mxu1 %v8623_v14  ;;  %v8693_v11 = vld [vmem:[#allocation7 + $0x178] sm:$0xff] }
 0x486   :  { %1907 = vmatprep.subr.mxu0 %v8109_v15  ;;  %6307 = vmatprep.subr.mxu1 %v11368_v58  ;;  %v8697_v15 = vld [vmem:[#allocation7 + $0x158] sm:$0xff] }
 0x487   :  { %1908 = vmatpush1.msra.mxu0 %v8113_v17  ;;  %6308 = vmatpush3.msra.mxu1 %v8629_v2  ;;  %v8701_v17 = vld [vmem:[#allocation7 + $0x150] sm:$0xff] }
 0x488   :  { %1909 = vmatprep.subr.mxu0 %v8117_v23  ;;  %6309 = vmatprep.subr.mxu1 %v11368_v58  ;;  %v8703_v23 = vld [vmem:[#allocation7 + $0x160] sm:$0xff] }
 0x489   :  { %1910 = vmatpush1.msra.mxu0 %v8121_v26  ;;  %6310 = vmatpush3.msra.mxu1 %v8635_v18  ;;  %v8707_v26 = vld [vmem:[#allocation7 + $0x140] sm:$0xff] }
 0x48a   :  { %1911 = vmatprep.subr.mxu0 %v8125_v32  ;;  %6311 = vmatprep.subr.mxu1 %v11368_v58  ;;  %v8711_v32 = vld [vmem:[#allocation7 + $0x138] sm:$0xff] }
 0x48b   :  { %1912 = vmatpush1.msra.mxu0 %v8129_v35  ;;  %6312 = vmatpush3.msra.mxu1 %v8641_v5  ;;  %v8713_v35 = vld [vmem:[#allocation7 + $0x148] sm:$0xff] }
 0x48c   :  { %1913 = vmatprep.subr.mxu0 %v8133_v39  ;;  %6313 = vmatprep.subr.mxu1 %v11368_v58  ;;  %v8717_v39 = vld [vmem:[#allocation7 + $0x128] sm:$0xff] }
 0x48d   :  { %1914 = vmatpush1.msra.mxu0 %v8137_v44  ;;  %6314 = vmatpush3.msra.mxu1 %v8647_v56  ;;  %v8721_v44 = vld [vmem:[#allocation7 + $0x120] sm:$0xff] }
 0x48e   :  { %1915 = vmatprep.subr.mxu0 %v8141_v48  ;;  %6315 = vmatprep.subr.mxu1 %v11368_v58  ;;  %v8723_v48 = vld [vmem:[#allocation7 + $0x130] sm:$0xff] }
 0x48f   :  { %1916 = vmatpush1.msra.mxu0 %v8145_v50  ;;  %6316 = vmatpush3.msra.mxu1 %v8653_v9  ;;  %v8727_v50 = vld [vmem:[#allocation7 + $0x110] sm:$0xff] }
 0x490   :  { %1917 = vmatprep.subr.mxu0 %v8149_v55  ;;  %6317 = vmatprep.subr.mxu1 %v11368_v58  ;;  %v8731_v55 = vld [vmem:[#allocation7 + $0x108] sm:$0xff] }
 0x491   :  { %1918 = vmatpush1.msra.mxu0 %v8153_v57  ;;  %6318 = vmatpush3.msra.mxu1 %v8659_v4  ;;  %v8733_v57 = vld [vmem:[#allocation7 + $0x118] sm:$0xff] }
 0x492   :  { %1919 = vmatprep.subr.mxu0 %v8157_v62  ;;  %6319 = vmatprep.subr.mxu1 %v11368_v58  ;;  %v8737_v62 = vld [vmem:[#allocation7 + $0xf8] sm:$0xff] }
 0x493   :  { %1920 = vmatpush1.msra.mxu0 %v8161_v1  ;;  %6320 = vmatpush3.msra.mxu1 %v8665_v20  ;;  %v8741_v1 = vld [vmem:[#allocation7 + $0xf0] sm:$0xff] }
 0x494   :  { %1921 = vmatprep.subr.mxu0 %v8165_v25  ;;  %6321 = vmatprep.subr.mxu1 %v11368_v58  ;;  %v8743_v25 = vld [vmem:[#allocation7 + $0x100] sm:$0xff] }
 0x495   :  { %1922 = vmatpush1.msra.mxu0 %v8169_v27  ;;  %1955 = vmatprep.mubr.f32.mxu0 %v11368_v58  ;;  %11488 = vst [vmem:[#allocation52_spill] sm:$0xff] %v8743_v25  ;;  %v8747_v27 = vld [vmem:[#allocation7 + $0xe0] sm:$0xff] }
 0x496   :  { %6322 = vmatpush3.msra.mxu1 %v8673_v0  ;;  %6323 = vmatprep.mubr.msk.f32.mxu1 %vm7167_vm1, %v11368_v58  ;;  %11489 = vst [vmem:[#allocation53_spill] sm:$0xff] %v8747_v27 }
 0x497   :  { %1956 = vmatmul.mubr.f32.vlgmr.msra.gmra.mxu0 %v8261_v60  ;;  %6324 = vmatmul.mubr.f32.vlgmr.msra.gmra.mxu1 %v8261_v60 }
 0x498   :  { %6326 = vmatprep.subr.mxu1 %v11368_v58  ;;  %2166 = vmatprep.mubr.f32.mxu0 %v11368_v58 }
 0x499   :  { %6358 = vmatprep.mubr.msk.f32.mxu1 %vm7167_vm1, %v11368_v58  ;;  %2102 = vmatprep.subr.mxu0 %v8688_v22 }
 0x49a   :  { %2103 = vmatpush1.msra.mxu0 %v8691_v63  ;;  %6327 = vmatpush3.msra.mxu1 %v8693_v11 }
 0x49b   :  { %2104 = vmatprep.subr.mxu0 %v8697_v15  ;;  %6328 = vmatprep.subr.mxu1 %v11368_v58 }
 0x49c   :  { %2105 = vmatpush1.msra.mxu0 %v8701_v17  ;;  %6329 = vmatpush3.msra.mxu1 %v8703_v23 }
 0x49d   :  { %2106 = vmatprep.subr.mxu0 %v8707_v26  ;;  %6330 = vmatprep.subr.mxu1 %v11368_v58 }
 0x49e   :  { %2107 = vmatpush1.msra.mxu0 %v8711_v32  ;;  %6331 = vmatpush3.msra.mxu1 %v8713_v35 }
 0x49f   :  { %2108 = vmatprep.subr.mxu0 %v8717_v39  ;;  %6332 = vmatprep.subr.mxu1 %v11368_v58 }
 0x4a0   :  { %2109 = vmatpush1.msra.mxu0 %v8721_v44  ;;  %6333 = vmatpush3.msra.mxu1 %v8723_v48 }
 0x4a1   :  { %2110 = vmatprep.subr.mxu0 %v8727_v50  ;;  %6334 = vmatprep.subr.mxu1 %v11368_v58 }
 0x4a2   :  { %2111 = vmatpush1.msra.mxu0 %v8731_v55  ;;  %6335 = vmatpush3.msra.mxu1 %v8733_v57 }
 0x4a3   :  { %2112 = vmatprep.subr.mxu0 %v8737_v62  ;;  %6336 = vmatprep.subr.mxu1 %v11368_v58 }
 0x4a4   :  { %2113 = vmatpush1.msra.mxu0 %v8741_v1  ;;  %6337 = vmatpush3.msra.mxu1 %v8743_v25  ;;  %v8860_v25 = vld [vmem:[%s10971_s5] ss:$0 sm:$0xff] }
 0x4a5   :  { %2114 = vmatprep.subr.mxu0 %v8747_v27  ;;  %6338 = vmatprep.subr.mxu1 %v11368_v58 }
 0x4a6   :  { %2115 = vmatpush1.msra.mxu0 %v8751_v19  ;;  %6339 = vmatpush3.msra.mxu1 %v8753_v28 }
 0x4a7   :  { %2116 = vmatprep.subr.mxu0 %v8757_v31  ;;  %6340 = vmatprep.subr.mxu1 %v11368_v58 }
 0x4a8   :  { %2117 = vmatpush1.msra.mxu0 %v8761_v43  ;;  %6341 = vmatpush3.msra.mxu1 %v8763_v21 }
 0x4a9   :  { %2118 = vmatprep.subr.mxu0 %v8765_v45  ;;  %6342 = vmatprep.subr.mxu1 %v11368_v58 }
 0x4aa   :  { %2119 = vmatpush1.msra.mxu0 %v8769_v34  ;;  %6343 = vmatpush3.msra.mxu1 %v8771_v36  ;;  %v8797_v36 = vld [vmem:[#allocation7 + $0x60] sm:$0xff]  ;;  %v8799_v34 = vld [vmem:[#allocation7 + $0x70] sm:$0xff] }
 0x4ab   :  { %2120 = vmatprep.subr.mxu0 %v8773_v59  ;;  %6344 = vmatprep.subr.mxu1 %v11368_v58  ;;  %11505 = vst [vmem:[#allocation70_spill] sm:$0xff] %v8797_v36  ;;  %11506 = vst [vmem:[#allocation71_spill] sm:$0xff] %v8799_v34  ;;  %v8803_v59 = vld [vmem:[#allocation7 + $0x50] sm:$0xff] }
 0x4ac   :  { %2121 = vmatpush1.msra.mxu0 %v8777_v46  ;;  %6345 = vmatpush3.msra.mxu1 %v8779_v53  ;;  %11507 = vst [vmem:[#allocation72_spill] sm:$0xff] %v8803_v59  ;;  %v8807_v53 = vld [vmem:[#allocation7 + $0x48] sm:$0xff]  ;;  %v8809_v46 = vld [vmem:[#allocation7 + $0x58] sm:$0xff] }
 0x4ad   :  { %2122 = vmatprep.subr.mxu0 %v8783_v38  ;;  %6346 = vmatprep.subr.mxu1 %v11368_v58  ;;  %11508 = vst [vmem:[#allocation73_spill] sm:$0xff] %v8807_v53  ;;  %11509 = vst [vmem:[#allocation74_spill] sm:$0xff] %v8809_v46  ;;  %v8813_v38 = vld [vmem:[#allocation7 + $0x38] sm:$0xff] }
 0x4ae   :  { %2123 = vmatpush1.msra.mxu0 %v8787_v6  ;;  %6347 = vmatpush3.msra.mxu1 %v8789_v37  ;;  %11510 = vst [vmem:[#allocation75_spill] sm:$0xff] %v8813_v38  ;;  %v8817_v37 = vld [vmem:[#allocation7 + $0x30] sm:$0xff]  ;;  %v8819_v6 = vld [vmem:[#allocation7 + $0x40] sm:$0xff] }
 0x4af   :  { %2124 = vmatprep.subr.mxu0 %v8793_v47  ;;  %6348 = vmatprep.subr.mxu1 %v11368_v58  ;;  %11511 = vst [vmem:[#allocation76_spill] sm:$0xff] %v8817_v37  ;;  %11512 = vst [vmem:[#allocation77_spill] sm:$0xff] %v8819_v6  ;;  %v8823_v47 = vld [vmem:[#allocation7 + $0x20] sm:$0xff] }
 0x4b0   :  { %2125 = vmatpush1.msra.mxu0 %v8797_v36  ;;  %6349 = vmatpush3.msra.mxu1 %v8799_v34  ;;  %11513 = vst [vmem:[#allocation78_spill] sm:$0xff] %v8823_v47  ;;  %v8827_v34 = vld [vmem:[#allocation7 + $0x18] sm:$0xff]  ;;  %v8829_v36 = vld [vmem:[#allocation7 + $0x28] sm:$0xff] }
 0x4b1   :  { %2126 = vmatprep.subr.mxu0 %v8803_v59  ;;  %6350 = vmatprep.subr.mxu1 %v11368_v58  ;;  %11514 = vst [vmem:[#allocation79_spill] sm:$0xff] %v8827_v34  ;;  %11515 = vst [vmem:[#allocation81_spill] sm:$0xff] %v8829_v36  ;;  %v8833_v59 = vld [vmem:[#allocation7 + $0x8] sm:$0xff] }
 0x4b2   :  { %2127 = vmatpush1.msra.mxu0 %v8807_v53  ;;  %6351 = vmatpush3.msra.mxu1 %v8809_v46  ;;  %11516 = vst [vmem:[#allocation82_spill] sm:$0xff] %v8833_v59  ;;  %v8837_v46 = vld [vmem:[#allocation7] sm:$0xff]  ;;  %v8839_v53 = vld [vmem:[#allocation7 + $0x10] sm:$0xff] }
 0x4b3   :  { %2128 = vmatprep.subr.mxu0 %v8813_v38  ;;  %6352 = vmatprep.subr.mxu1 %v11368_v58  ;;  %11517 = vst [vmem:[#allocation83_spill] sm:$0xff] %v8837_v46  ;;  %11518 = vst [vmem:[#allocation84_spill] sm:$0xff] %v8839_v53 }
 0x4b4   :  { %2129 = vmatpush1.msra.mxu0 %v8817_v37  ;;  %6353 = vmatpush3.msra.mxu1 %v8819_v6 }
 0x4b5   :  { %2130 = vmatprep.subr.mxu0 %v8823_v47  ;;  %6354 = vmatprep.subr.mxu1 %v11368_v58 }
 0x4b6   :  { %2131 = vmatpush1.msra.mxu0 %v8827_v34  ;;  %6355 = vmatpush3.msra.mxu1 %v8829_v36 }
 0x4b7   :  { %2132 = vmatprep.subr.mxu0 %v8833_v59  ;;  %6356 = vmatprep.subr.mxu1 %v11368_v58  ;;  %v11519_v59 = vld [vmem:[#allocation85_spill] sm:$0xff] }
 0x4b8   :  { %2133 = vmatpush1.msra.mxu0 %v8837_v46  ;;  %6357 = vmatpush3.msra.mxu1 %v8839_v53  ;;  %v11520_v53 = vld [vmem:[#allocation86_spill] sm:$0xff] }
 0x4b9   :  { %2315 = vmatprep.subr.mxu0 %v8271_v52  ;;  %6361 = vmatprep.subr.mxu1 %v11368_v58 }
 0x536   :  { %v8849_v47 = vpop.f32.mrf.mxu1  ;;  %v8851_v37 = vpop.f32.mrf.mxu0 }
 0x538   :  { %v6290_v6 = vpop.f32.mrf.mxu1  ;;  %v8853_v34 = vpop.f32.mrf.mxu0 }
 0x557   :  { %v1957_v36 = vpop.f32.mrf.mxu0  ;;  %v2028_v38 = vpop.f32.mrf.mxu1 }
 0x558   :  { %v2032_v45 = vadd.f32 %v1957_v36, %v11519_v59  ;;  %v2046_v36 = vadd.f32 %v8860_v25, %v2028_v38  ;;  %v11532_v38 = vld [vmem:[#allocation22_spill] sm:$0xff] }
 0x559   :  { %v6325_v21 = vpop.f32.mrf.mxu1  ;;  %v1959_v46 = vpop.f32.mrf.mxu0 }
 0x55a   :  { %v5562_v43 = vmul.f32 -1.442695, %v2032_v45  ;;  %v2039_v31 = vadd.f32 %v1959_v46, %v11520_v53 }
 0x55c   :  { %6976 = vpow2.f32 %v5562_v43  ;;  %v5563_v52 = vmul.f32 -1.442695, %v2039_v31  ;;  %v11521_v43 = vld [vmem:[#allocation93_spill] sm:$0xff] }
 0x55e   :  { %6978 = vpow2.f32 %v5563_v52 }
 0x569   :  { %v6977_v28 = vpop.eup %6976 }
 0x56a   :  { %v2036_v19 = vadd.f32 1.0, %v6977_v28 }
 0x56b   :  { %v6979_v6 = vpop.eup %6978 }
 0x56c   :  { %6980 = vrcp.f32 %v2036_v19  ;;  %v2043_v27 = vadd.f32 1.0, %v6979_v6  ;;  %v11533_v6 = vld [vmem:[#allocation23_spill] sm:$0xff] }
 0x56e   :  { %6982 = vrcp.f32 %v2043_v27  ;;  %v11531_v27 = vld [vmem:[#allocation21_spill] sm:$0xff] }
 0x579   :  { %v6981_v21 = vpop.eup %6980 }
 0x57a   :  { %v2047_v45 = vmul.f32 %v6981_v21, %v2046_v36  ;;  %v11534_v36 = vld [vmem:[#allocation24_spill] sm:$0xff]  ;;  %v11535_v21 = vld [vmem:[#allocation25_spill] sm:$0xff] }
 0x57b   :  { %v6983_v31 = vpop.eup %6982 }
 0x57c   :  { %v2048_v59 = vadd.f32 %v2047_v45, %v11521_v43  ;;  %v2050_v46 = vsub.f32 1.0, %v6983_v31  ;;  %v2052_v19 = vmul.f32 %v6983_v31, %v8261_v60  ;;  %v11522_v60 = vld [vmem:[#allocation12_spill] sm:$0xff]  ;;  %v11536_v45 = vld [vmem:[#allocation26_spill] sm:$0xff]  ;;  %v11537_v43 = vld [vmem:[#allocation27_spill] sm:$0xff] }
 0x57d   :  { %v11539_v31 = vld [vmem:[#allocation29_spill] sm:$0xff] }
 0x57e   :  { %6984 = vtanh.f32 %v2048_v59  ;;  %v11538_v59 = vld [vmem:[#allocation28_spill] sm:$0xff] }
 0x58b   :  { %v6985_v53 = vpop.eup %6984 }
 0x58c   :  { %v2051_v28 = vmul.f32 %v6985_v53, %v2050_v46  ;;  %v11540_v46 = vld [vmem:[#allocation30_spill] sm:$0xff]  ;;  %v11541_v53 = vld [vmem:[#allocation31_spill] sm:$0xff] }
 0x58e   :  { %v8865_v52 = vadd.f32 %v2052_v19, %v2051_v28  ;;  %v11542_v28 = vld [vmem:[#allocation32_spill] sm:$0xff]  ;;  %v11543_v19 = vld [vmem:[#allocation33_spill] sm:$0xff] }
 0x590   :  { %2167 = vmatmul.mubr.f32.vlgmr.msra.gmra.mxu0 %v8865_v52  ;;  %6359 = vmatmul.mubr.f32.vlgmr.msra.gmra.mxu1 %v8865_v52 }
 0x591   :  { %2316 = vmatpush1.msra.mxu0 %v8277_v61  ;;  %6362 = vmatpush3.msra.mxu1 %v8282_v42  ;;  %v11523_v61 = vld [vmem:[#allocation13_spill] sm:$0xff]  ;;  %v11524_v42 = vld [vmem:[#allocation16_spill] sm:$0xff] }
 0x592   :  { %2317 = vmatprep.subr.mxu0 %v8289_v7  ;;  %6363 = vmatprep.subr.mxu1 %v11368_v58  ;;  %v11525_v7 = vld [vmem:[#allocation61_spill] sm:$0xff] }
 0x593   :  { %2318 = vmatpush1.msra.mxu0 %v8296_v16  ;;  %6364 = vmatpush3.msra.mxu1 %v8301_v54  ;;  %v11526_v16 = vld [vmem:[#allocation14_spill] sm:$0xff]  ;;  %v11527_v54 = vld [vmem:[#allocation17_spill] sm:$0xff] }
 0x594   :  { %2319 = vmatprep.subr.mxu0 %v8308_v24  ;;  %6365 = vmatprep.subr.mxu1 %v11368_v58  ;;  %v11528_v24 = vld [vmem:[#allocation18_spill] sm:$0xff] }
 0x595   :  { %2320 = vmatpush1.msra.mxu0 %v8315_v12  ;;  %6366 = vmatpush3.msra.mxu1 %v8320_v13  ;;  %v11529_v12 = vld [vmem:[#allocation19_spill] sm:$0xff]  ;;  %v11530_v13 = vld [vmem:[#allocation20_spill] sm:$0xff] }
 0x596   :  { %2321 = vmatprep.subr.mxu0 %v11522_v60  ;;  %6367 = vmatprep.subr.mxu1 %v11368_v58  ;;  %v11544_v60 = vld [vmem:[#allocation34_spill] sm:$0xff] }
 0x597   :  { %2322 = vmatpush1.msra.mxu0 %v11523_v61  ;;  %6368 = vmatpush3.msra.mxu1 %v11524_v42  ;;  %v11545_v61 = vld [vmem:[#allocation35_spill] sm:$0xff]  ;;  %v11546_v42 = vld [vmem:[#allocation36_spill] sm:$0xff] }
 0x598   :  { %2323 = vmatprep.subr.mxu0 %v11525_v7  ;;  %6369 = vmatprep.subr.mxu1 %v11368_v58  ;;  %v11547_v7 = vld [vmem:[#allocation37_spill] sm:$0xff] }
 0x599   :  { %2324 = vmatpush1.msra.mxu0 %v11526_v16  ;;  %6370 = vmatpush3.msra.mxu1 %v11527_v54  ;;  %v11548_v16 = vld [vmem:[#allocation38_spill] sm:$0xff]  ;;  %v11549_v54 = vld [vmem:[#allocation39_spill] sm:$0xff] }
 0x59a   :  { %2325 = vmatprep.subr.mxu0 %v11528_v24  ;;  %6371 = vmatprep.subr.mxu1 %v11368_v58  ;;  %v11550_v24 = vld [vmem:[#allocation41_spill] sm:$0xff] }
 0x59b   :  { %2326 = vmatpush1.msra.mxu0 %v11529_v12  ;;  %6372 = vmatpush3.msra.mxu1 %v11530_v13  ;;  %v11551_v12 = vld [vmem:[#allocation40_spill] sm:$0xff]  ;;  %v11552_v13 = vld [vmem:[#allocation42_spill] sm:$0xff] }
 0x59c   :  { %2327 = vmatprep.subr.mxu0 %v11531_v27  ;;  %6373 = vmatprep.subr.mxu1 %v11368_v58  ;;  %v11553_v27 = vld [vmem:[#allocation43_spill] sm:$0xff] }
 0x59d   :  { %2328 = vmatpush1.msra.mxu0 %v11532_v38  ;;  %6374 = vmatpush3.msra.mxu1 %v11533_v6  ;;  %v11554_v38 = vld [vmem:[#allocation44_spill] sm:$0xff]  ;;  %v11555_v6 = vld [vmem:[#allocation45_spill] sm:$0xff] }
 0x59e   :  { %2329 = vmatprep.subr.mxu0 %v11534_v36  ;;  %6375 = vmatprep.subr.mxu1 %v11368_v58  ;;  %v11556_v36 = vld [vmem:[#allocation46_spill] sm:$0xff] }
 0x59f   :  { %2330 = vmatpush1.msra.mxu0 %v11535_v21  ;;  %6376 = vmatpush3.msra.mxu1 %v11536_v45  ;;  %v11557_v21 = vld [vmem:[#allocation47_spill] sm:$0xff]  ;;  %v11558_v45 = vld [vmem:[#allocation48_spill] sm:$0xff] }
 0x5a0   :  { %2331 = vmatprep.subr.mxu0 %v11537_v43  ;;  %6377 = vmatprep.subr.mxu1 %v11368_v58  ;;  %v11559_v43 = vld [vmem:[#allocation49_spill] sm:$0xff] }
 0x5a1   :  { %2332 = vmatpush1.msra.mxu0 %v11538_v59  ;;  %6378 = vmatpush3.msra.mxu1 %v11539_v31  ;;  %v11560_v59 = vld [vmem:[#allocation50_spill] sm:$0xff]  ;;  %v8935_v31 = vld [vmem:[#allocation5 + $0x170] sm:$0xff] }
 0x5a2   :  { %2333 = vmatprep.subr.mxu0 %v11540_v46  ;;  %6379 = vmatprep.subr.mxu1 %v11368_v58 }
 0x5a3   :  { %2334 = vmatpush1.msra.mxu0 %v11541_v53  ;;  %6380 = vmatpush3.msra.mxu1 %v11542_v28  ;;  %v11561_v28 = vld [vmem:[#allocation11_spill] sm:$0xff] }
 0x5a4   :  { %2335 = vmatprep.subr.mxu0 %v11543_v19  ;;  %6381 = vmatprep.subr.mxu1 %v11368_v58 }
 0x5a5   :  { %2336 = vmatpush1.msra.mxu0 %v11544_v60  ;;  %6382 = vmatpush3.msra.mxu1 %v11545_v61 }
 0x5a6   :  { %2337 = vmatprep.subr.mxu0 %v11546_v42  ;;  %6383 = vmatprep.subr.mxu1 %v11368_v58 }
 0x5a7   :  { %2338 = vmatpush1.msra.mxu0 %v11547_v7  ;;  %6384 = vmatpush3.msra.mxu1 %v11548_v16 }
 0x5a8   :  { %2339 = vmatprep.subr.mxu0 %v11549_v54  ;;  %6385 = vmatprep.subr.mxu1 %v11368_v58 }
 0x5a9   :  { %2340 = vmatpush1.msra.mxu0 %v11550_v24  ;;  %6386 = vmatpush3.msra.mxu1 %v11551_v12 }
 0x5aa   :  { %2341 = vmatprep.subr.mxu0 %v11552_v13  ;;  %6387 = vmatprep.subr.mxu1 %v11368_v58 }
 0x5ab   :  { %2342 = vmatpush1.msra.mxu0 %v11553_v27  ;;  %6388 = vmatpush3.msra.mxu1 %v11554_v38 }
 0x5ac   :  { %2343 = vmatprep.subr.mxu0 %v11555_v6  ;;  %6389 = vmatprep.subr.mxu1 %v11368_v58  ;;  %v8945_v6 = vld [vmem:[%s10975_s9] ss:$0 sm:$0xff] }
 0x5ad   :  { %2344 = vmatpush1.msra.mxu0 %v11556_v36  ;;  %6390 = vmatpush3.msra.mxu1 %v11557_v21 }
 0x5ae   :  { %2345 = vmatprep.subr.mxu0 %v11558_v45  ;;  %6391 = vmatprep.subr.mxu1 %v11368_v58 }
 0x5af   :  { %2346 = vmatpush1.msra.mxu0 %v11559_v43  ;;  %6392 = vmatpush3.msra.mxu1 %v11560_v59 }
 0x5b0   :  { %2379 = vmatprep.mubr.f32.mxu0 %v11368_v58  ;;  %6393 = vmatprep.mubr.msk.f32.mxu1 %vm7167_vm1, %v11368_v58 }
 0x5b1   :  { %6396 = vmatprep.subr.mxu1 %v11368_v58  ;;  %2510 = vmatprep.subr.mxu0 %v8935_v31 }
 0x650   :  { %v2168_v46 = vpop.f32.mrf.mxu0  ;;  %v2239_v53 = vpop.f32.mrf.mxu1 }
 0x651   :  { %v2169_v19 = vadd.f32 %v2168_v46, %v11561_v28  ;;  %v2240_v21 = vadd.f32 %v2239_v53, %v8043_v8  ;;  %v8963_v53 = vld [vmem:[#allocation5 + $0x140] sm:$0xff] }
 0x652   :  { %v2170_v60 = vpop.f32.mrf.mxu0  ;;  %v6360_v61 = vpop.f32.mrf.mxu1 }
 0x653   :  { %v2243_v42 = vadd.f32 %v2169_v19, %v8851_v37  ;;  %v2171_v16 = vadd.f32 %v2170_v60, %v8031_v41  ;;  %v2257_v37 = vadd.f32 %v8945_v6, %v8849_v47  ;;  %v8959_v47 = vld [vmem:[#allocation5 + $0x150] sm:$0xff] }
 0x655   :  { %v5564_v7 = vmul.f32 -1.442695, %v2243_v42  ;;  %v2250_v54 = vadd.f32 %v2171_v16, %v8853_v34  ;;  %v8953_v42 = vld [vmem:[#allocation5 + $0x168] sm:$0xff]  ;;  %v8967_v16 = vld [vmem:[#allocation5 + $0x138] sm:$0xff] }
 0x657   :  { %6986 = vpow2.f32 %v5564_v7  ;;  %v5565_v24 = vmul.f32 -1.442695, %v2250_v54  ;;  %v8955_v7 = vld [vmem:[#allocation5 + $0x158] sm:$0xff]  ;;  %v8971_v54 = vld [vmem:[#allocation5 + $0x128] sm:$0xff] }
 0x659   :  { %6988 = vpow2.f32 %v5565_v24  ;;  %v8975_v24 = vld [vmem:[#allocation5 + $0x120] sm:$0xff] }
 0x664   :  { %v6987_v12 = vpop.eup %6986 }
 0x665   :  { %v2247_v13 = vadd.f32 1.0, %v6987_v12  ;;  %v8983_v12 = vld [vmem:[#allocation5 + $0x108] sm:$0xff] }
 0x666   :  { %v6989_v27 = vpop.eup %6988 }
 0x667   :  { %6990 = vrcp.f32 %v2247_v13  ;;  %v2254_v38 = vadd.f32 1.0, %v6989_v27  ;;  %v8991_v13 = vld [vmem:[#allocation5 + $0xf0] sm:$0xff]  ;;  %v8999_v27 = vld [vmem:[#allocation5 + $0xd8] sm:$0xff] }
 0x669   :  { %6992 = vrcp.f32 %v2254_v38  ;;  %v9007_v38 = vld [vmem:[#allocation5 + $0xc0] sm:$0xff] }
 0x674   :  { %v6991_v36 = vpop.eup %6990 }
 0x675   :  { %v2258_v45 = vmul.f32 %v6991_v36, %v2257_v37  ;;  %v9015_v37 = vld [vmem:[#allocation5 + $0xa8] sm:$0xff]  ;;  %v9023_v36 = vld [vmem:[#allocation5 + $0x90] sm:$0xff] }
 0x676   :  { %v6993_v43 = vpop.eup %6992 }
 0x677   :  { %v2259_v34 = vadd.f32 %v2258_v45, %v2240_v21  ;;  %v2261_v59 = vsub.f32 1.0, %v6993_v43  ;;  %v2263_v60 = vmul.f32 %v6993_v43, %v8581_v29  ;;  %v9031_v21 = vld [vmem:[#allocation5 + $0x78] sm:$0xff]  ;;  %v9039_v45 = vld [vmem:[#allocation5 + $0x60] sm:$0xff]  ;;  %v9055_v43 = vld [vmem:[#allocation5 + $0x30] sm:$0xff] }
 0x678   :  { %v9305_v29 = vld [vmem:[%s10974_s8 + $0xc8] sm:$0xff] }
 0x679   :  { %6994 = vtanh.f32 %v2259_v34  ;;  %v9047_v34 = vld [vmem:[#allocation5 + $0x48] sm:$0xff]  ;;  %11609 = vst [vmem:[#allocation21_spill] sm:$0xff] %v9305_v29 }
 0x686   :  { %v6995_v46 = vpop.eup %6994 }
 0x687   :  { %v2262_v19 = vmul.f32 %v6995_v46, %v2261_v59  ;;  %v9063_v59 = vld [vmem:[#allocation5 + $0x18] sm:$0xff]  ;;  %v9071_v46 = vld [vmem:[#allocation5] sm:$0xff] }
 0x689   :  { %v8951_v61 = vadd.f32 %v2263_v60, %v2262_v19  ;;  %v11584_v19 = vld [vmem:[#allocation74_spill] sm:$0xff]  ;;  %v11585_v60 = vld [vmem:[#allocation75_spill] sm:$0xff] }
 0x68b   :  { %11562 = vst [vmem:[#allocation80_spill] sm:$0xff] %v8951_v61  ;;  %2380 = vmatmul.mubr.f32.vlgmr.msra.gmra.mxu0 %v8951_v61  ;;  %6394 = vmatmul.mubr.f32.vlgmr.msra.gmra.mxu1 %v8951_v61 }
 0x68c   :  { %2511 = vmatpush1.msra.mxu0 %v8953_v42  ;;  %6397 = vmatpush3.msra.mxu1 %v8583_v40  ;;  %v8979_v40 = vld [vmem:[#allocation5 + $0x110] sm:$0xff] }
 0x68d   :  { %2512 = vmatprep.subr.mxu0 %v8955_v7  ;;  %6398 = vmatprep.subr.mxu1 %v11368_v58 }
 0x68e   :  { %2513 = vmatpush1.msra.mxu0 %v8959_v47  ;;  %6399 = vmatpush3.msra.mxu1 %v8587_v3  ;;  %v8987_v3 = vld [vmem:[#allocation5 + $0xf8] sm:$0xff] }
 0x68f   :  { %2514 = vmatprep.subr.mxu0 %v8963_v53  ;;  %6400 = vmatprep.subr.mxu1 %v11368_v58 }
 0x690   :  { %2515 = vmatpush1.msra.mxu0 %v8967_v16  ;;  %6401 = vmatpush3.msra.mxu1 %v8593_v30  ;;  %v8995_v30 = vld [vmem:[#allocation5 + $0xe0] sm:$0xff] }
 0x691   :  { %2516 = vmatprep.subr.mxu0 %v8971_v54  ;;  %6402 = vmatprep.subr.mxu1 %v11368_v58 }
 0x692   :  { %2517 = vmatpush1.msra.mxu0 %v8975_v24  ;;  %6403 = vmatpush3.msra.mxu1 %v8599_v33  ;;  %v9003_v33 = vld [vmem:[#allocation5 + $0xc8] sm:$0xff] }
 0x693   :  { %2518 = vmatprep.subr.mxu0 %v8979_v40  ;;  %6404 = vmatprep.subr.mxu1 %v11368_v58 }
 0x694   :  { %2519 = vmatpush1.msra.mxu0 %v8983_v12  ;;  %6405 = vmatpush3.msra.mxu1 %v8605_v49  ;;  %v9011_v49 = vld [vmem:[#allocation5 + $0xb0] sm:$0xff] }
 0x695   :  { %2520 = vmatprep.subr.mxu0 %v8987_v3  ;;  %6406 = vmatprep.subr.mxu1 %v11368_v58 }
 0x696   :  { %2521 = vmatpush1.msra.mxu0 %v8991_v13  ;;  %6407 = vmatpush3.msra.mxu1 %v8611_v51  ;;  %v9019_v51 = vld [vmem:[#allocation5 + $0x98] sm:$0xff] }
 0x697   :  { %2522 = vmatprep.subr.mxu0 %v8995_v30  ;;  %6408 = vmatprep.subr.mxu1 %v11368_v58 }
 0x698   :  { %2523 = vmatpush1.msra.mxu0 %v8999_v27  ;;  %6409 = vmatpush3.msra.mxu1 %v8617_v10  ;;  %v9027_v10 = vld [vmem:[#allocation5 + $0x80] sm:$0xff] }
 0x699   :  { %2524 = vmatprep.subr.mxu0 %v9003_v33  ;;  %6410 = vmatprep.subr.mxu1 %v11368_v58 }
 0x69a   :  { %2525 = vmatpush1.msra.mxu0 %v9007_v38  ;;  %6411 = vmatpush3.msra.mxu1 %v8623_v14  ;;  %v9035_v14 = vld [vmem:[#allocation5 + $0x68] sm:$0xff] }
 0x69b   :  { %2526 = vmatprep.subr.mxu0 %v9011_v49  ;;  %6412 = vmatprep.subr.mxu1 %v11368_v58 }
 0x69c   :  { %2527 = vmatpush1.msra.mxu0 %v9015_v37  ;;  %6413 = vmatpush3.msra.mxu1 %v8629_v2  ;;  %v9043_v2 = vld [vmem:[#allocation5 + $0x50] sm:$0xff] }
 0x69d   :  { %2528 = vmatprep.subr.mxu0 %v9019_v51  ;;  %6414 = vmatprep.subr.mxu1 %v11368_v58 }
 0x69e   :  { %2529 = vmatpush1.msra.mxu0 %v9023_v36  ;;  %6415 = vmatpush3.msra.mxu1 %v8635_v18  ;;  %v9051_v18 = vld [vmem:[#allocation5 + $0x38] sm:$0xff] }
 0x69f   :  { %2530 = vmatprep.subr.mxu0 %v9027_v10  ;;  %6416 = vmatprep.subr.mxu1 %v11368_v58 }
 0x6a0   :  { %2531 = vmatpush1.msra.mxu0 %v9031_v21  ;;  %6417 = vmatpush3.msra.mxu1 %v8641_v5  ;;  %v9059_v5 = vld [vmem:[#allocation5 + $0x20] sm:$0xff] }
 0x6a1   :  { %2532 = vmatprep.subr.mxu0 %v9035_v14  ;;  %6418 = vmatprep.subr.mxu1 %v11368_v58 }
 0x6a2   :  { %2533 = vmatpush1.msra.mxu0 %v9039_v45  ;;  %6419 = vmatpush3.msra.mxu1 %v8647_v56  ;;  %v9067_v56 = vld [vmem:[#allocation5 + $0x8] sm:$0xff] }
 0x6a3   :  { %2534 = vmatprep.subr.mxu0 %v9043_v2  ;;  %6420 = vmatprep.subr.mxu1 %v11368_v58 }
 0x6a4   :  { %2535 = vmatpush1.msra.mxu0 %v9047_v34  ;;  %6421 = vmatpush3.msra.mxu1 %v8653_v9  ;;  %v11563_v9 = vld [vmem:[#allocation52_spill] sm:$0xff] }
 0x6a5   :  { %2536 = vmatprep.subr.mxu0 %v9051_v18  ;;  %6422 = vmatprep.subr.mxu1 %v11368_v58 }
 0x6a6   :  { %2537 = vmatpush1.msra.mxu0 %v9055_v43  ;;  %6423 = vmatpush3.msra.mxu1 %v8659_v4  ;;  %v11564_v4 = vld [vmem:[#allocation53_spill] sm:$0xff] }
 0x6a7   :  { %2538 = vmatprep.subr.mxu0 %v9059_v5  ;;  %6424 = vmatprep.subr.mxu1 %v11368_v58 }
 0x6a8   :  { %2539 = vmatpush1.msra.mxu0 %v9063_v59  ;;  %6425 = vmatpush3.msra.mxu1 %v8665_v20  ;;  %v11565_v20 = vld [vmem:[#allocation54_spill] sm:$0xff] }
 0x6a9   :  { %2540 = vmatprep.subr.mxu0 %v9067_v56  ;;  %6426 = vmatprep.subr.mxu1 %v11368_v58 }
 0x6aa   :  { %2541 = vmatpush1.msra.mxu0 %v9071_v46  ;;  %2574 = vmatprep.mubr.f32.mxu0 %v11368_v58 }
 0x6ab   :  { %6427 = vmatpush3.msra.mxu1 %v8673_v0  ;;  %6428 = vmatprep.mubr.msk.f32.mxu1 %vm7167_vm1, %v11368_v58  ;;  %v11566_v0 = vld [vmem:[#allocation55_spill] sm:$0xff] }
 0x6ac   :  { %2575 = vmatmul.mubr.f32.vlgmr.msra.gmra.mxu0 %v8865_v52  ;;  %6429 = vmatmul.mubr.f32.vlgmr.msra.gmra.mxu1 %v8865_v52 }
 0x6ad   :  { %2721 = vmatprep.subr.mxu0 %v8688_v22  ;;  %6431 = vmatprep.subr.mxu1 %v11368_v58  ;;  %v11567_v22 = vld [vmem:[#allocation56_spill] sm:$0xff] }
 0x6ae   :  { %2722 = vmatpush1.msra.mxu0 %v8691_v63  ;;  %6432 = vmatpush3.msra.mxu1 %v8693_v11  ;;  %v11568_v63 = vld [vmem:[#allocation57_spill] sm:$0xff]  ;;  %v11569_v11 = vld [vmem:[#allocation58_spill] sm:$0xff] }
 0x6af   :  { %2723 = vmatprep.subr.mxu0 %v8697_v15  ;;  %6433 = vmatprep.subr.mxu1 %v11368_v58  ;;  %v11570_v15 = vld [vmem:[#allocation59_spill] sm:$0xff] }
 0x6b0   :  { %2724 = vmatpush1.msra.mxu0 %v8701_v17  ;;  %6434 = vmatpush3.msra.mxu1 %v8703_v23  ;;  %v11571_v17 = vld [vmem:[#allocation60_spill] sm:$0xff]  ;;  %v11572_v23 = vld [vmem:[#allocation62_spill] sm:$0xff] }
 0x6b1   :  { %2725 = vmatprep.subr.mxu0 %v8707_v26  ;;  %6435 = vmatprep.subr.mxu1 %v11368_v58  ;;  %v11573_v26 = vld [vmem:[#allocation63_spill] sm:$0xff] }
 0x6b2   :  { %2726 = vmatpush1.msra.mxu0 %v8711_v32  ;;  %6436 = vmatpush3.msra.mxu1 %v8713_v35  ;;  %v11574_v32 = vld [vmem:[#allocation64_spill] sm:$0xff]  ;;  %v11575_v35 = vld [vmem:[#allocation65_spill] sm:$0xff] }
 0x6b3   :  { %2727 = vmatprep.subr.mxu0 %v8717_v39  ;;  %6437 = vmatprep.subr.mxu1 %v11368_v58  ;;  %v11576_v39 = vld [vmem:[#allocation66_spill] sm:$0xff] }
 0x6b4   :  { %2728 = vmatpush1.msra.mxu0 %v8721_v44  ;;  %6438 = vmatpush3.msra.mxu1 %v8723_v48  ;;  %v11577_v44 = vld [vmem:[#allocation67_spill] sm:$0xff]  ;;  %v11578_v48 = vld [vmem:[#allocation68_spill] sm:$0xff] }
 0x6b5   :  { %2729 = vmatprep.subr.mxu0 %v8727_v50  ;;  %6439 = vmatprep.subr.mxu1 %v11368_v58  ;;  %v11579_v50 = vld [vmem:[#allocation69_spill] sm:$0xff] }
 0x6b6   :  { %2730 = vmatpush1.msra.mxu0 %v8731_v55  ;;  %6440 = vmatpush3.msra.mxu1 %v8733_v57  ;;  %v11580_v55 = vld [vmem:[#allocation70_spill] sm:$0xff]  ;;  %v11581_v57 = vld [vmem:[#allocation71_spill] sm:$0xff] }
 0x6b7   :  { %2731 = vmatprep.subr.mxu0 %v8737_v62  ;;  %6441 = vmatprep.subr.mxu1 %v11368_v58  ;;  %v11582_v62 = vld [vmem:[#allocation72_spill] sm:$0xff] }
 0x6b8   :  { %2732 = vmatpush1.msra.mxu0 %v8741_v1  ;;  %6442 = vmatpush3.msra.mxu1 %v11563_v9  ;;  %v11583_v1 = vld [vmem:[#allocation73_spill] sm:$0xff]  ;;  %v11586_v9 = vld [vmem:[#allocation76_spill] sm:$0xff] }
 0x6b9   :  { %2733 = vmatprep.subr.mxu0 %v11564_v4  ;;  %6443 = vmatprep.subr.mxu1 %v11368_v58  ;;  %v11587_v4 = vld [vmem:[#allocation77_spill] sm:$0xff] }
 0x6ba   :  { %2734 = vmatpush1.msra.mxu0 %v11565_v20  ;;  %6444 = vmatpush3.msra.mxu1 %v11566_v0  ;;  %v11588_v20 = vld [vmem:[#allocation78_spill] sm:$0xff]  ;;  %v11589_v0 = vld [vmem:[#allocation79_spill] sm:$0xff] }
 0x6bb   :  { %2735 = vmatprep.subr.mxu0 %v11567_v22  ;;  %6445 = vmatprep.subr.mxu1 %v11368_v58  ;;  %v11590_v22 = vld [vmem:[#allocation81_spill] sm:$0xff] }
 0x6bc   :  { %2736 = vmatpush1.msra.mxu0 %v11568_v63  ;;  %6446 = vmatpush3.msra.mxu1 %v11569_v11  ;;  %v11591_v63 = vld [vmem:[#allocation82_spill] sm:$0xff]  ;;  %v11592_v11 = vld [vmem:[#allocation83_spill] sm:$0xff] }
 0x6bd   :  { %2737 = vmatprep.subr.mxu0 %v11570_v15  ;;  %6447 = vmatprep.subr.mxu1 %v11368_v58  ;;  %v11593_v15 = vld [vmem:[#allocation84_spill] sm:$0xff] }
 0x6be   :  { %2738 = vmatpush1.msra.mxu0 %v11571_v17  ;;  %6448 = vmatpush3.msra.mxu1 %v11572_v23 }
 0x6bf   :  { %2739 = vmatprep.subr.mxu0 %v11573_v26  ;;  %6449 = vmatprep.subr.mxu1 %v11368_v58 }
 0x6c0   :  { %2740 = vmatpush1.msra.mxu0 %v11574_v32  ;;  %6450 = vmatpush3.msra.mxu1 %v11575_v35 }
 0x6c1   :  { %2741 = vmatprep.subr.mxu0 %v11576_v39  ;;  %6451 = vmatprep.subr.mxu1 %v11368_v58 }
 0x6c2   :  { %2742 = vmatpush1.msra.mxu0 %v11577_v44  ;;  %6452 = vmatpush3.msra.mxu1 %v11578_v48  ;;  %v11594_v44 = vld [vmem:[#allocation87_spill] sm:$0xff] }
 0x6c3   :  { %2743 = vmatprep.subr.mxu0 %v11579_v50  ;;  %6453 = vmatprep.subr.mxu1 %v11368_v58 }
 0x6c4   :  { %2744 = vmatpush1.msra.mxu0 %v11580_v55  ;;  %6454 = vmatpush3.msra.mxu1 %v11581_v57 }
 0x6c5   :  { %2745 = vmatprep.subr.mxu0 %v11582_v62  ;;  %6455 = vmatprep.subr.mxu1 %v11368_v58  ;;  %v11595_v62 = vld [vmem:[#allocation88_spill] sm:$0xff] }
 0x6c6   :  { %2746 = vmatpush1.msra.mxu0 %v11583_v1  ;;  %6456 = vmatpush3.msra.mxu1 %v11584_v19 }
 0x6c7   :  { %2747 = vmatprep.subr.mxu0 %v11585_v60  ;;  %6457 = vmatprep.subr.mxu1 %v11368_v58 }
 0x6c8   :  { %2748 = vmatpush1.msra.mxu0 %v11586_v9  ;;  %6458 = vmatpush3.msra.mxu1 %v11587_v4 }
 0x6c9   :  { %2749 = vmatprep.subr.mxu0 %v11588_v20  ;;  %6459 = vmatprep.subr.mxu1 %v11368_v58 }
 0x6ca   :  { %2750 = vmatpush1.msra.mxu0 %v11589_v0  ;;  %6460 = vmatpush3.msra.mxu1 %v11590_v22 }
 0x6cb   :  { %2751 = vmatprep.subr.mxu0 %v11591_v63  ;;  %6461 = vmatprep.subr.mxu1 %v11368_v58 }
 0x6cc   :  { %2752 = vmatpush1.msra.mxu0 %v11592_v11  ;;  %2785 = vmatprep.mubr.f32.mxu0 %v11368_v58  ;;  %v11596_v11 = vld [vmem:[#allocation91_spill] sm:$0xff] }
 0x6cd   :  { %6462 = vmatpush3.msra.mxu1 %v11593_v15  ;;  %6463 = vmatprep.mubr.msk.f32.mxu1 %vm7167_vm1, %v11368_v58 }
 0x6ce   :  { %6466 = vmatprep.subr.mxu1 %v11368_v58 }
 0x74b   :  { %v9152_v17 = vpop.f32.mrf.mxu1  ;;  %v9154_v26 = vpop.f32.mrf.mxu0 }
 0x74d   :  { %v6395_v23 = vpop.f32.mrf.mxu1  ;;  %v9156_v32 = vpop.f32.mrf.mxu0 }
 0x76c   :  { %v2576_v35 = vpop.f32.mrf.mxu0  ;;  %v2647_v39 = vpop.f32.mrf.mxu1 }
 0x76d   :  { %v2651_v48 = vadd.f32 %v2576_v35, %v11594_v44  ;;  %v2665_v0 = vadd.f32 %v8860_v25, %v2647_v39  ;;  %v9173_v25 = vld [vmem:[%s10974_s8 + $0x170] sm:$0xff]  ;;  %v9184_v39 = vld [vmem:[%s10974_s8 + $0x178] sm:$0xff] }
 0x76e   :  { %v6430_v50 = vpop.f32.mrf.mxu1  ;;  %v2578_v57 = vpop.f32.mrf.mxu0  ;;  %2934 = vmatprep.subr.mxu0 %v9173_v25 }
 0x76f   :  { %v5566_v55 = vmul.f32 -1.442695, %v2651_v48  ;;  %v2658_v1 = vadd.f32 %v2578_v57, %v11595_v62  ;;  %v9191_v57 = vld [vmem:[%s10974_s8 + $0x158] sm:$0xff]  ;;  %v9198_v62 = vld [vmem:[%s10974_s8 + $0x150] sm:$0xff] }
 0x771   :  { %6996 = vpow2.f32 %v5566_v55  ;;  %v5567_v19 = vmul.f32 -1.442695, %v2658_v1  ;;  %v9203_v1 = vld [vmem:[%s10974_s8 + $0x160] sm:$0xff] }
 0x773   :  { %6998 = vpow2.f32 %v5567_v19  ;;  %v9210_v19 = vld [vmem:[%s10974_s8 + $0x140] sm:$0xff] }
 0x77e   :  { %v6997_v60 = vpop.eup %6996 }
 0x77f   :  { %v2655_v9 = vadd.f32 1.0, %v6997_v60  ;;  %v9217_v60 = vld [vmem:[%s10974_s8 + $0x138] sm:$0xff] }
 0x780   :  { %v6999_v4 = vpop.eup %6998 }
 0x781   :  { %7000 = vrcp.f32 %v2655_v9  ;;  %v2662_v20 = vadd.f32 1.0, %v6999_v4  ;;  %v9222_v9 = vld [vmem:[%s10974_s8 + $0x148] sm:$0xff] }
 0x782   :  { %v9229_v4 = vld [vmem:[%s10974_s8 + $0x128] sm:$0xff] }
 0x783   :  { %7002 = vrcp.f32 %v2662_v20  ;;  %11597 = vst [vmem:[#allocation85_spill] sm:$0xff] %v9229_v4  ;;  %v9236_v20 = vld [vmem:[%s10974_s8 + $0x120] sm:$0xff] }
 0x784   :  { %11598 = vst [vmem:[#allocation86_spill] sm:$0xff] %v9236_v20 }
 0x78e   :  { %v7001_v22 = vpop.eup %7000 }
 0x78f   :  { %v2666_v63 = vmul.f32 %v7001_v22, %v2665_v0  ;;  %v9241_v0 = vld [vmem:[%s10974_s8 + $0x130] sm:$0xff] }
 0x790   :  { %v7003_v23 = vpop.eup %7002  ;;  %11599 = vst [vmem:[#allocation93_spill] sm:$0xff] %v9241_v0  ;;  %v9248_v22 = vld [vmem:[%s10974_s8 + $0x110] sm:$0xff] }
 0x791   :  { %v2667_v15 = vadd.f32 %v2666_v63, %v11596_v11  ;;  %v2669_v35 = vsub.f32 1.0, %v7003_v23  ;;  %v2671_v50 = vmul.f32 %v7003_v23, %v8865_v52  ;;  %v9179_v52 = vld [vmem:[%s10974_s8 + $0x168] sm:$0xff]  ;;  %11600 = vst [vmem:[#allocation12_spill] sm:$0xff] %v9248_v22  ;;  %v9260_v11 = vld [vmem:[%s10974_s8 + $0x118] sm:$0xff]  ;;  %v9274_v23 = vld [vmem:[%s10974_s8 + $0xf0] sm:$0xff] }
 0x792   :  { %v9255_v63 = vld [vmem:[%s10974_s8 + $0x108] sm:$0xff]  ;;  %11602 = vst [vmem:[#allocation16_spill] sm:$0xff] %v9260_v11  ;;  %11604 = vst [vmem:[#allocation14_spill] sm:$0xff] %v9274_v23 }
 0x793   :  { %7004 = vtanh.f32 %v2667_v15  ;;  %11601 = vst [vmem:[#allocation13_spill] sm:$0xff] %v9255_v63  ;;  %v9267_v15 = vld [vmem:[%s10974_s8 + $0xf8] sm:$0xff] }
 0x794   :  { %11603 = vst [vmem:[#allocation61_spill] sm:$0xff] %v9267_v15 }
 0x7a0   :  { %v7005_v44 = vpop.eup %7004 }
 0x7a1   :  { %v2670_v48 = vmul.f32 %v7005_v44, %v2669_v35  ;;  %v9279_v35 = vld [vmem:[%s10974_s8 + $0x100] sm:$0xff] }
 0x7a2   :  { %11605 = vst [vmem:[#allocation17_spill] sm:$0xff] %v9279_v35  ;;  %v9286_v44 = vld [vmem:[%s10974_s8 + $0xe0] sm:$0xff] }
 0x7a3   :  { %v9163_v55 = vadd.f32 %v2671_v50, %v2670_v48  ;;  %11606 = vst [vmem:[#allocation18_spill] sm:$0xff] %v9286_v44  ;;  %v9293_v48 = vld [vmem:[%s10974_s8 + $0xd8] sm:$0xff]  ;;  %v9298_v50 = vld [vmem:[%s10974_s8 + $0xe8] sm:$0xff] }
 0x7a4   :  { %11607 = vst [vmem:[#allocation19_spill] sm:$0xff] %v9293_v48  ;;  %11608 = vst [vmem:[#allocation20_spill] sm:$0xff] %v9298_v50 }
 0x7a5   :  { %2786 = vmatmul.mubr.f32.vlgmr.msra.gmra.mxu0 %v9163_v55  ;;  %6464 = vmatmul.mubr.f32.vlgmr.msra.gmra.mxu1 %v9163_v55 }
 0x7a6   :  { %2998 = vmatprep.mubr.f32.mxu0 %v11368_v58  ;;  %6498 = vmatprep.mubr.msk.f32.mxu1 %vm7167_vm1, %v11368_v58 }
 0x7a7   :  { %2935 = vmatpush1.msra.mxu0 %v9179_v52  ;;  %6467 = vmatpush3.msra.mxu1 %v9184_v39 }
 0x7a8   :  { %2936 = vmatprep.subr.mxu0 %v9191_v57  ;;  %6468 = vmatprep.subr.mxu1 %v11368_v58 }
 0x7a9   :  { %2937 = vmatpush1.msra.mxu0 %v9198_v62  ;;  %6469 = vmatpush3.msra.mxu1 %v9203_v1 }
 0x7aa   :  { %2938 = vmatprep.subr.mxu0 %v9210_v19  ;;  %6470 = vmatprep.subr.mxu1 %v11368_v58 }
 0x7ab   :  { %2939 = vmatpush1.msra.mxu0 %v9217_v60  ;;  %6471 = vmatpush3.msra.mxu1 %v9222_v9 }
 0x7ac   :  { %2940 = vmatprep.subr.mxu0 %v9229_v4  ;;  %6472 = vmatprep.subr.mxu1 %v11368_v58 }
 0x7ad   :  { %2941 = vmatpush1.msra.mxu0 %v9236_v20  ;;  %6473 = vmatpush3.msra.mxu1 %v9241_v0 }
 0x7ae   :  { %2942 = vmatprep.subr.mxu0 %v9248_v22  ;;  %6474 = vmatprep.subr.mxu1 %v11368_v58 }
 0x7af   :  { %2943 = vmatpush1.msra.mxu0 %v9255_v63  ;;  %6475 = vmatpush3.msra.mxu1 %v9260_v11 }
 0x7b0   :  { %2944 = vmatprep.subr.mxu0 %v9267_v15  ;;  %6476 = vmatprep.subr.mxu1 %v11368_v58  ;;  %v9365_v15 = vld [vmem:[%s10974_s8 + $0x78] sm:$0xff] }
 0x7b1   :  { %2945 = vmatpush1.msra.mxu0 %v9274_v23  ;;  %6477 = vmatpush3.msra.mxu1 %v9279_v35  ;;  %v9334_v35 = vld [vmem:[%s10974_s8 + $0xb8] sm:$0xff]  ;;  %v9351_v23 = vld [vmem:[%s10974_s8 + $0xa0] sm:$0xff]  ;;  %11619 = vst [vmem:[#allocation31_spill] sm:$0xff] %v9365_v15 }
 0x7b2   :  { %2946 = vmatprep.subr.mxu0 %v9286_v44  ;;  %6478 = vmatprep.subr.mxu1 %v11368_v58  ;;  %v9312_v44 = vld [vmem:[%s10974_s8 + $0xc0] sm:$0xff]  ;;  %11614 = vst [vmem:[#allocation26_spill] sm:$0xff] %v9334_v35  ;;  %11617 = vst [vmem:[#allocation29_spill] sm:$0xff] %v9351_v23 }
 0x7b3   :  { %2947 = vmatpush1.msra.mxu0 %v9293_v48  ;;  %6479 = vmatpush3.msra.mxu1 %v9298_v50  ;;  %11610 = vst [vmem:[#allocation22_spill] sm:$0xff] %v9312_v44  ;;  %v9317_v48 = vld [vmem:[%s10974_s8 + $0xd0] sm:$0xff]  ;;  %v9329_v50 = vld [vmem:[%s10974_s8 + $0xa8] sm:$0xff] }
 0x7b4   :  { %2948 = vmatprep.subr.mxu0 %v9305_v29  ;;  %6480 = vmatprep.subr.mxu1 %v11368_v58  ;;  %11611 = vst [vmem:[#allocation23_spill] sm:$0xff] %v9317_v48  ;;  %v9324_v29 = vld [vmem:[%s10974_s8 + $0xb0] sm:$0xff]  ;;  %11613 = vst [vmem:[#allocation25_spill] sm:$0xff] %v9329_v50 }
 0x7b5   :  { %2949 = vmatpush1.msra.mxu0 %v9312_v44  ;;  %6481 = vmatpush3.msra.mxu1 %v9317_v48  ;;  %11612 = vst [vmem:[#allocation24_spill] sm:$0xff] %v9324_v29  ;;  %v9341_v48 = vld [vmem:[%s10974_s8 + $0x98] sm:$0xff]  ;;  %v9346_v44 = vld [vmem:[%s10974_s8 + $0x90] sm:$0xff] }
 0x7b6   :  { %2950 = vmatprep.subr.mxu0 %v9324_v29  ;;  %6482 = vmatprep.subr.mxu1 %v11368_v58  ;;  %11615 = vst [vmem:[#allocation27_spill] sm:$0xff] %v9341_v48  ;;  %11616 = vst [vmem:[#allocation28_spill] sm:$0xff] %v9346_v44  ;;  %v9358_v29 = vld [vmem:[%s10974_s8 + $0x80] sm:$0xff] }
 0x7b7   :  { %2951 = vmatpush1.msra.mxu0 %v9329_v50  ;;  %6483 = vmatpush3.msra.mxu1 %v9334_v35  ;;  %11618 = vst [vmem:[#allocation30_spill] sm:$0xff] %v9358_v29  ;;  %v9370_v50 = vld [vmem:[%s10974_s8 + $0x88] sm:$0xff]  ;;  %v9384_v35 = vld [vmem:[%s10974_s8 + $0x60] sm:$0xff] }
 0x7b8   :  { %2952 = vmatprep.subr.mxu0 %v9341_v48  ;;  %6484 = vmatprep.subr.mxu1 %v11368_v58  ;;  %11620 = vst [vmem:[#allocation32_spill] sm:$0xff] %v9370_v50  ;;  %v9377_v48 = vld [vmem:[%s10974_s8 + $0x68] sm:$0xff]  ;;  %11622 = vst [vmem:[#allocation34_spill] sm:$0xff] %v9384_v35 }
 0x7b9   :  { %2953 = vmatpush1.msra.mxu0 %v9346_v44  ;;  %6485 = vmatpush3.msra.mxu1 %v9351_v23  ;;  %11621 = vst [vmem:[#allocation33_spill] sm:$0xff] %v9377_v48  ;;  %v9389_v44 = vld [vmem:[%s10974_s8 + $0x70] sm:$0xff]  ;;  %v9403_v23 = vld [vmem:[%s10974_s8 + $0x48] sm:$0xff] }
 0x7ba   :  { %2954 = vmatprep.subr.mxu0 %v9358_v29  ;;  %6486 = vmatprep.subr.mxu1 %v11368_v58  ;;  %11623 = vst [vmem:[#allocation35_spill] sm:$0xff] %v9389_v44  ;;  %v9396_v29 = vld [vmem:[%s10974_s8 + $0x50] sm:$0xff]  ;;  %11625 = vst [vmem:[#allocation37_spill] sm:$0xff] %v9403_v23 }
 0x7bb   :  { %2955 = vmatpush1.msra.mxu0 %v9365_v15  ;;  %6487 = vmatpush3.msra.mxu1 %v9370_v50  ;;  %11624 = vst [vmem:[#allocation36_spill] sm:$0xff] %v9396_v29  ;;  %v9408_v15 = vld [vmem:[%s10974_s8 + $0x58] sm:$0xff]  ;;  %v9422_v50 = vld [vmem:[%s10974_s8 + $0x30] sm:$0xff] }
 0x7bc   :  { %2956 = vmatprep.subr.mxu0 %v9377_v48  ;;  %6488 = vmatprep.subr.mxu1 %v11368_v58  ;;  %11626 = vst [vmem:[#allocation38_spill] sm:$0xff] %v9408_v15  ;;  %v9415_v48 = vld [vmem:[%s10974_s8 + $0x38] sm:$0xff]  ;;  %11628 = vst [vmem:[#allocation41_spill] sm:$0xff] %v9422_v50 }
 0x7bd   :  { %2957 = vmatpush1.msra.mxu0 %v9384_v35  ;;  %6489 = vmatpush3.msra.mxu1 %v9389_v44  ;;  %11627 = vst [vmem:[#allocation39_spill] sm:$0xff] %v9415_v48  ;;  %v9427_v35 = vld [vmem:[%s10974_s8 + $0x40] sm:$0xff]  ;;  %v9441_v44 = vld [vmem:[%s10974_s8 + $0x18] sm:$0xff] }
 0x7be   :  { %2958 = vmatprep.subr.mxu0 %v9396_v29  ;;  %6490 = vmatprep.subr.mxu1 %v11368_v58  ;;  %11629 = vst [vmem:[#allocation40_spill] sm:$0xff] %v9427_v35  ;;  %v9434_v29 = vld [vmem:[%s10974_s8 + $0x20] sm:$0xff]  ;;  %11631 = vst [vmem:[#allocation43_spill] sm:$0xff] %v9441_v44 }
 0x7bf   :  { %2959 = vmatpush1.msra.mxu0 %v9403_v23  ;;  %6491 = vmatpush3.msra.mxu1 %v9408_v15  ;;  %11630 = vst [vmem:[#allocation42_spill] sm:$0xff] %v9434_v29  ;;  %v9446_v23 = vld [vmem:[%s10974_s8 + $0x28] sm:$0xff]  ;;  %v9460_v15 = vld [vmem:[%s10974_s8] sm:$0xff] }
 0x7c0   :  { %2960 = vmatprep.subr.mxu0 %v9415_v48  ;;  %6492 = vmatprep.subr.mxu1 %v11368_v58  ;;  %11632 = vst [vmem:[#allocation44_spill] sm:$0xff] %v9446_v23  ;;  %v9453_v48 = vld [vmem:[%s10974_s8 + $0x8] sm:$0xff]  ;;  %11634 = vst [vmem:[#allocation46_spill] sm:$0xff] %v9460_v15 }
 0x7c1   :  { %2961 = vmatpush1.msra.mxu0 %v9422_v50  ;;  %6493 = vmatpush3.msra.mxu1 %v9427_v35  ;;  %11633 = vst [vmem:[#allocation45_spill] sm:$0xff] %v9453_v48  ;;  %v9465_v50 = vld [vmem:[%s10974_s8 + $0x10] sm:$0xff] }
 0x7c2   :  { %2962 = vmatprep.subr.mxu0 %v9434_v29  ;;  %6494 = vmatprep.subr.mxu1 %v11368_v58  ;;  %11635 = vst [vmem:[#allocation47_spill] sm:$0xff] %v9465_v50 }
 0x7c3   :  { %2963 = vmatpush1.msra.mxu0 %v9441_v44  ;;  %6495 = vmatpush3.msra.mxu1 %v9446_v23 }
 0x7c4   :  { %2964 = vmatprep.subr.mxu0 %v9453_v48  ;;  %6496 = vmatprep.subr.mxu1 %v11368_v58 }
 0x7c5   :  { %2965 = vmatpush1.msra.mxu0 %v9460_v15  ;;  %6497 = vmatpush3.msra.mxu1 %v9465_v50 }
 0x7c6   :  { %3129 = vmatprep.subr.mxu0 %v8935_v31  ;;  %6501 = vmatprep.subr.mxu1 %v11368_v58 }
 0x865   :  { %v2787_v29 = vpop.f32.mrf.mxu0  ;;  %v2858_v35 = vpop.f32.mrf.mxu1 }
 0x866   :  { %v2788_v11 = vadd.f32 %v2787_v29, %v11561_v28  ;;  %v2876_v29 = vadd.f32 %v8945_v6, %v9152_v17  ;;  %v9489_v6 = vld [vmem:[#allocation5 + $0x160] sm:$0xff]  ;;  %v9501_v17 = vld [vmem:[#allocation5 + $0x130] sm:$0xff] }
 0x867   :  { %v2789_v63 = vpop.f32.mrf.mxu0  ;;  %v6465_v44 = vpop.f32.mrf.mxu1 }
 0x868   :  { %v2862_v23 = vadd.f32 %v2788_v11, %v9154_v26  ;;  %v2790_v48 = vadd.f32 %v2789_v63, %v8031_v41  ;;  %v2859_v44 = vadd.f32 %v2858_v35, %v8043_v8  ;;  %v9659_v35 = vld [vmem:[#allocation7 + $0xc8] sm:$0xff] }
 0x869   :  { %11641 = vst [vmem:[#allocation54_spill] sm:$0xff] %v9659_v35 }
 0x86a   :  { %v5568_v22 = vmul.f32 -1.442695, %v2862_v23  ;;  %v2869_v15 = vadd.f32 %v2790_v48, %v9156_v32  ;;  %v9485_v48 = vld [vmem:[#allocation5 + $0x178] sm:$0xff] }
 0x86c   :  { %7006 = vpow2.f32 %v5568_v22  ;;  %v5569_v0 = vmul.f32 -1.442695, %v2869_v15 }
 0x86e   :  { %7008 = vpow2.f32 %v5569_v0 }
 0x879   :  { %v7007_v50 = vpop.eup %7006 }
 0x87a   :  { %v2866_v31 = vadd.f32 1.0, %v7007_v50  ;;  %v9663_v50 = vld [vmem:[#allocation7 + $0xc0] sm:$0xff] }
 0x87b   :  { %v7009_v20 = vpop.eup %7008  ;;  %11642 = vst [vmem:[#allocation55_spill] sm:$0xff] %v9663_v50 }
 0x87c   :  { %7010 = vrcp.f32 %v2866_v31  ;;  %v2873_v4 = vadd.f32 1.0, %v7009_v20  ;;  %v9655_v20 = vld [vmem:[#allocation7 + $0xe8] sm:$0xff]  ;;  %v9665_v31 = vld [vmem:[#allocation7 + $0xd0] sm:$0xff] }
 0x87d   :  { %11640 = vst [vmem:[#allocation53_spill] sm:$0xff] %v9655_v20  ;;  %11643 = vst [vmem:[#allocation56_spill] sm:$0xff] %v9665_v31 }
 0x87e   :  { %7012 = vrcp.f32 %v2873_v4  ;;  %v9653_v4 = vld [vmem:[#allocation7 + $0xd8] sm:$0xff] }
 0x87f   :  { %11639 = vst [vmem:[#allocation52_spill] sm:$0xff] %v9653_v4 }
 0x889   :  { %v7011_v28 = vpop.eup %7010 }
 0x88a   :  { %v2877_v26 = vmul.f32 %v7011_v28, %v2876_v29  ;;  %v9495_v28 = vld [vmem:[#allocation5 + $0x148] sm:$0xff]  ;;  %v9667_v29 = vld [vmem:[#allocation7 + $0xb0] sm:$0xff] }
 0x88b   :  { %v7013_v22 = vpop.eup %7012  ;;  %11644 = vst [vmem:[#allocation57_spill] sm:$0xff] %v9667_v29 }
 0x88c   :  { %v2878_v11 = vadd.f32 %v2877_v26, %v2859_v44  ;;  %v2880_v63 = vsub.f32 1.0, %v7013_v22  ;;  %v2882_v0 = vmul.f32 %v7013_v22, %v8951_v61  ;;  %v9671_v44 = vld [vmem:[#allocation7 + $0xa8] sm:$0xff]  ;;  %v9673_v26 = vld [vmem:[#allocation7 + $0xb8] sm:$0xff]  ;;  %v9679_v22 = vld [vmem:[#allocation7 + $0x90] sm:$0xff] }
 0x88d   :  { %11645 = vst [vmem:[#allocation58_spill] sm:$0xff] %v9671_v44  ;;  %11646 = vst [vmem:[#allocation59_spill] sm:$0xff] %v9673_v26  ;;  %v9695_v61 = vld [vmem:[#allocation7 + $0x68] sm:$0xff] }
 0x88e   :  { %7014 = vtanh.f32 %v2878_v11  ;;  %v9675_v11 = vld [vmem:[#allocation7 + $0x98] sm:$0xff]  ;;  %11648 = vst [vmem:[#allocation62_spill] sm:$0xff] %v9679_v22  ;;  %11653 = vst [vmem:[#allocation67_spill] sm:$0xff] %v9695_v61 }
 0x88f   :  { %11647 = vst [vmem:[#allocation60_spill] sm:$0xff] %v9675_v11 }
 0x89b   :  { %v7015_v32 = vpop.eup %7014 }
 0x89c   :  { %v2881_v15 = vmul.f32 %v7015_v32, %v2880_v63  ;;  %v9681_v63 = vld [vmem:[#allocation7 + $0xa0] sm:$0xff] }
 0x89d   :  { %11649 = vst [vmem:[#allocation63_spill] sm:$0xff] %v9681_v63  ;;  %v9685_v32 = vld [vmem:[#allocation7 + $0x80] sm:$0xff] }
 0x89e   :  { %v9483_v23 = vadd.f32 %v2882_v0, %v2881_v15  ;;  %11650 = vst [vmem:[#allocation64_spill] sm:$0xff] %v9685_v32  ;;  %v9689_v15 = vld [vmem:[#allocation7 + $0x78] sm:$0xff]  ;;  %v9691_v0 = vld [vmem:[#allocation7 + $0x88] sm:$0xff] }
 0x89f   :  { %11651 = vst [vmem:[#allocation65_spill] sm:$0xff] %v9689_v15  ;;  %11652 = vst [vmem:[#allocation66_spill] sm:$0xff] %v9691_v0 }
 0x8a0   :  { %11636 = vst [vmem:[#allocation48_spill] sm:$0xff] %v9483_v23  ;;  %2999 = vmatmul.mubr.f32.vlgmr.msra.gmra.mxu0 %v9483_v23  ;;  %6499 = vmatmul.mubr.f32.vlgmr.msra.gmra.mxu1 %v9483_v23 }
 0x8a1   :  { %3130 = vmatpush1.msra.mxu0 %v8953_v42  ;;  %6502 = vmatpush3.msra.mxu1 %v9485_v48  ;;  %v9507_v42 = vld [vmem:[#allocation5 + $0x118] sm:$0xff] }
 0x8a2   :  { %3131 = vmatprep.subr.mxu0 %v8955_v7  ;;  %6503 = vmatprep.subr.mxu1 %v11368_v58  ;;  %v9513_v7 = vld [vmem:[#allocation5 + $0x100] sm:$0xff] }
 0x8a3   :  { %3132 = vmatpush1.msra.mxu0 %v8959_v47  ;;  %6504 = vmatpush3.msra.mxu1 %v9489_v6  ;;  %v9519_v47 = vld [vmem:[#allocation5 + $0xe8] sm:$0xff] }
 0x8a4   :  { %3133 = vmatprep.subr.mxu0 %v8963_v53  ;;  %6505 = vmatprep.subr.mxu1 %v11368_v58  ;;  %v9525_v53 = vld [vmem:[#allocation5 + $0xd0] sm:$0xff] }
 0x8a5   :  { %3134 = vmatpush1.msra.mxu0 %v8967_v16  ;;  %6506 = vmatpush3.msra.mxu1 %v9495_v28  ;;  %v9531_v16 = vld [vmem:[#allocation5 + $0xb8] sm:$0xff] }
 0x8a6   :  { %3135 = vmatprep.subr.mxu0 %v8971_v54  ;;  %6507 = vmatprep.subr.mxu1 %v11368_v58  ;;  %v9537_v54 = vld [vmem:[#allocation5 + $0xa0] sm:$0xff] }
 0x8a7   :  { %3136 = vmatpush1.msra.mxu0 %v8975_v24  ;;  %6508 = vmatpush3.msra.mxu1 %v9501_v17  ;;  %v9543_v24 = vld [vmem:[#allocation5 + $0x88] sm:$0xff] }
 0x8a8   :  { %3137 = vmatprep.subr.mxu0 %v8979_v40  ;;  %6509 = vmatprep.subr.mxu1 %v11368_v58  ;;  %v9549_v40 = vld [vmem:[#allocation5 + $0x70] sm:$0xff] }
 0x8a9   :  { %3138 = vmatpush1.msra.mxu0 %v8983_v12  ;;  %6510 = vmatpush3.msra.mxu1 %v9507_v42  ;;  %v9555_v12 = vld [vmem:[#allocation5 + $0x58] sm:$0xff] }
 0x8aa   :  { %3139 = vmatprep.subr.mxu0 %v8987_v3  ;;  %6511 = vmatprep.subr.mxu1 %v11368_v58  ;;  %v9561_v3 = vld [vmem:[#allocation5 + $0x40] sm:$0xff] }
 0x8ab   :  { %3140 = vmatpush1.msra.mxu0 %v8991_v13  ;;  %6512 = vmatpush3.msra.mxu1 %v9513_v7  ;;  %v9567_v13 = vld [vmem:[#allocation5 + $0x28] sm:$0xff] }
 0x8ac   :  { %3141 = vmatprep.subr.mxu0 %v8995_v30  ;;  %6513 = vmatprep.subr.mxu1 %v11368_v58  ;;  %v9575_v30 = vld [vmem:[#allocation5 + $0x10] sm:$0xff] }
 0x8ad   :  { %3142 = vmatpush1.msra.mxu0 %v8999_v27  ;;  %6514 = vmatpush3.msra.mxu1 %v9519_v47  ;;  %v9590_v27 = vld [vmem:[#allocation7 + $0x170] sm:$0xff] }
 0x8ae   :  { %3143 = vmatprep.subr.mxu0 %v9003_v33  ;;  %6515 = vmatprep.subr.mxu1 %v11368_v58  ;;  %v9593_v33 = vld [vmem:[#allocation7 + $0x168] sm:$0xff] }
 0x8af   :  { %3144 = vmatpush1.msra.mxu0 %v9007_v38  ;;  %6516 = vmatpush3.msra.mxu1 %v9525_v53  ;;  %v9595_v38 = vld [vmem:[#allocation7 + $0x178] sm:$0xff] }
 0x8b0   :  { %3145 = vmatprep.subr.mxu0 %v9011_v49  ;;  %6517 = vmatprep.subr.mxu1 %v11368_v58  ;;  %v9599_v49 = vld [vmem:[#allocation7 + $0x158] sm:$0xff] }
 0x8b1   :  { %3146 = vmatpush1.msra.mxu0 %v9015_v37  ;;  %6518 = vmatpush3.msra.mxu1 %v9531_v16  ;;  %v9603_v37 = vld [vmem:[#allocation7 + $0x150] sm:$0xff] }
 0x8b2   :  { %3147 = vmatprep.subr.mxu0 %v9019_v51  ;;  %6519 = vmatprep.subr.mxu1 %v11368_v58  ;;  %v9605_v51 = vld [vmem:[#allocation7 + $0x160] sm:$0xff] }
 0x8b3   :  { %3148 = vmatpush1.msra.mxu0 %v9023_v36  ;;  %6520 = vmatpush3.msra.mxu1 %v9537_v54  ;;  %v9609_v36 = vld [vmem:[#allocation7 + $0x140] sm:$0xff] }
 0x8b4   :  { %3149 = vmatprep.subr.mxu0 %v9027_v10  ;;  %6521 = vmatprep.subr.mxu1 %v11368_v58  ;;  %v9613_v10 = vld [vmem:[#allocation7 + $0x138] sm:$0xff] }
 0x8b5   :  { %3150 = vmatpush1.msra.mxu0 %v9031_v21  ;;  %6522 = vmatpush3.msra.mxu1 %v9543_v24  ;;  %v9615_v21 = vld [vmem:[#allocation7 + $0x148] sm:$0xff] }
 0x8b6   :  { %3151 = vmatprep.subr.mxu0 %v9035_v14  ;;  %6523 = vmatprep.subr.mxu1 %v11368_v58  ;;  %v9619_v14 = vld [vmem:[#allocation7 + $0x128] sm:$0xff] }
 0x8b7   :  { %3152 = vmatpush1.msra.mxu0 %v9039_v45  ;;  %6524 = vmatpush3.msra.mxu1 %v9549_v40  ;;  %v9623_v45 = vld [vmem:[#allocation7 + $0x120] sm:$0xff] }
 0x8b8   :  { %3153 = vmatprep.subr.mxu0 %v9043_v2  ;;  %6525 = vmatprep.subr.mxu1 %v11368_v58  ;;  %v9625_v2 = vld [vmem:[#allocation7 + $0x130] sm:$0xff] }
 0x8b9   :  { %3154 = vmatpush1.msra.mxu0 %v9047_v34  ;;  %6526 = vmatpush3.msra.mxu1 %v9555_v12  ;;  %v9629_v34 = vld [vmem:[#allocation7 + $0x110] sm:$0xff] }
 0x8ba   :  { %3155 = vmatprep.subr.mxu0 %v9051_v18  ;;  %6527 = vmatprep.subr.mxu1 %v11368_v58  ;;  %v9633_v18 = vld [vmem:[#allocation7 + $0x108] sm:$0xff] }
 0x8bb   :  { %3156 = vmatpush1.msra.mxu0 %v9055_v43  ;;  %6528 = vmatpush3.msra.mxu1 %v9561_v3  ;;  %v9635_v43 = vld [vmem:[#allocation7 + $0x118] sm:$0xff] }
 0x8bc   :  { %3157 = vmatprep.subr.mxu0 %v9059_v5  ;;  %6529 = vmatprep.subr.mxu1 %v11368_v58  ;;  %v9639_v5 = vld [vmem:[#allocation7 + $0xf8] sm:$0xff] }
 0x8bd   :  { %3158 = vmatpush1.msra.mxu0 %v9063_v59  ;;  %6530 = vmatpush3.msra.mxu1 %v9567_v13  ;;  %v9643_v59 = vld [vmem:[#allocation7 + $0xf0] sm:$0xff] }
 0x8be   :  { %3159 = vmatprep.subr.mxu0 %v9067_v56  ;;  %6531 = vmatprep.subr.mxu1 %v11368_v58  ;;  %v9645_v56 = vld [vmem:[#allocation7 + $0x100] sm:$0xff] }
 0x8bf   :  { %3160 = vmatpush1.msra.mxu0 %v9071_v46  ;;  %3193 = vmatprep.mubr.f32.mxu0 %v11368_v58  ;;  %11637 = vst [vmem:[#allocation49_spill] sm:$0xff] %v9645_v56  ;;  %v9649_v46 = vld [vmem:[#allocation7 + $0xe0] sm:$0xff] }
 0x8c0   :  { %6532 = vmatpush3.msra.mxu1 %v9575_v30  ;;  %6533 = vmatprep.mubr.msk.f32.mxu1 %vm7167_vm1, %v11368_v58  ;;  %11638 = vst [vmem:[#allocation50_spill] sm:$0xff] %v9649_v46 }
 0x8c1   :  { %3194 = vmatmul.mubr.f32.vlgmr.msra.gmra.mxu0 %v9163_v55  ;;  %6534 = vmatmul.mubr.f32.vlgmr.msra.gmra.mxu1 %v9163_v55 }
 0x8c2   :  { %6536 = vmatprep.subr.mxu1 %v11368_v58  ;;  %3404 = vmatprep.mubr.f32.mxu0 %v11368_v58 }
 0x8c3   :  { %6568 = vmatprep.mubr.msk.f32.mxu1 %vm7167_vm1, %v11368_v58  ;;  %3340 = vmatprep.subr.mxu0 %v9590_v27 }
 0x8c4   :  { %3341 = vmatpush1.msra.mxu0 %v9593_v33  ;;  %6537 = vmatpush3.msra.mxu1 %v9595_v38 }
 0x8c5   :  { %3342 = vmatprep.subr.mxu0 %v9599_v49  ;;  %6538 = vmatprep.subr.mxu1 %v11368_v58 }
 0x8c6   :  { %3343 = vmatpush1.msra.mxu0 %v9603_v37  ;;  %6539 = vmatpush3.msra.mxu1 %v9605_v51 }
 0x8c7   :  { %3344 = vmatprep.subr.mxu0 %v9609_v36  ;;  %6540 = vmatprep.subr.mxu1 %v11368_v58 }
 0x8c8   :  { %3345 = vmatpush1.msra.mxu0 %v9613_v10  ;;  %6541 = vmatpush3.msra.mxu1 %v9615_v21 }
 0x8c9   :  { %3346 = vmatprep.subr.mxu0 %v9619_v14  ;;  %6542 = vmatprep.subr.mxu1 %v11368_v58 }
 0x8ca   :  { %3347 = vmatpush1.msra.mxu0 %v9623_v45  ;;  %6543 = vmatpush3.msra.mxu1 %v9625_v2 }
 0x8cb   :  { %3348 = vmatprep.subr.mxu0 %v9629_v34  ;;  %6544 = vmatprep.subr.mxu1 %v11368_v58 }
 0x8cc   :  { %3349 = vmatpush1.msra.mxu0 %v9633_v18  ;;  %6545 = vmatpush3.msra.mxu1 %v9635_v43 }
 0x8cd   :  { %3350 = vmatprep.subr.mxu0 %v9639_v5  ;;  %6546 = vmatprep.subr.mxu1 %v11368_v58 }
 0x8ce   :  { %3351 = vmatpush1.msra.mxu0 %v9643_v59  ;;  %6547 = vmatpush3.msra.mxu1 %v9645_v56  ;;  %v9762_v56 = vld [vmem:[%s10971_s5] ss:$0 sm:$0xff] }
 0x8cf   :  { %3352 = vmatprep.subr.mxu0 %v9649_v46  ;;  %6548 = vmatprep.subr.mxu1 %v11368_v58 }
 0x8d0   :  { %3353 = vmatpush1.msra.mxu0 %v9653_v4  ;;  %6549 = vmatpush3.msra.mxu1 %v9655_v20 }
 0x8d1   :  { %3354 = vmatprep.subr.mxu0 %v9659_v35  ;;  %6550 = vmatprep.subr.mxu1 %v11368_v58 }
 0x8d2   :  { %3355 = vmatpush1.msra.mxu0 %v9663_v50  ;;  %6551 = vmatpush3.msra.mxu1 %v9665_v31 }
 0x8d3   :  { %3356 = vmatprep.subr.mxu0 %v9667_v29  ;;  %6552 = vmatprep.subr.mxu1 %v11368_v58 }
 0x8d4   :  { %3357 = vmatpush1.msra.mxu0 %v9671_v44  ;;  %6553 = vmatpush3.msra.mxu1 %v9673_v26  ;;  %v9699_v26 = vld [vmem:[#allocation7 + $0x60] sm:$0xff]  ;;  %v9701_v44 = vld [vmem:[#allocation7 + $0x70] sm:$0xff] }
 0x8d5   :  { %3358 = vmatprep.subr.mxu0 %v9675_v11  ;;  %6554 = vmatprep.subr.mxu1 %v11368_v58  ;;  %11654 = vst [vmem:[#allocation68_spill] sm:$0xff] %v9699_v26  ;;  %11655 = vst [vmem:[#allocation69_spill] sm:$0xff] %v9701_v44  ;;  %v9705_v11 = vld [vmem:[#allocation7 + $0x50] sm:$0xff] }
 0x8d6   :  { %3359 = vmatpush1.msra.mxu0 %v9679_v22  ;;  %6555 = vmatpush3.msra.mxu1 %v9681_v63  ;;  %11656 = vst [vmem:[#allocation70_spill] sm:$0xff] %v9705_v11  ;;  %v9709_v63 = vld [vmem:[#allocation7 + $0x48] sm:$0xff]  ;;  %v9711_v22 = vld [vmem:[#allocation7 + $0x58] sm:$0xff] }
 0x8d7   :  { %3360 = vmatprep.subr.mxu0 %v9685_v32  ;;  %6556 = vmatprep.subr.mxu1 %v11368_v58  ;;  %11657 = vst [vmem:[#allocation71_spill] sm:$0xff] %v9709_v63  ;;  %11658 = vst [vmem:[#allocation72_spill] sm:$0xff] %v9711_v22  ;;  %v9715_v32 = vld [vmem:[#allocation7 + $0x38] sm:$0xff] }
 0x8d8   :  { %3361 = vmatpush1.msra.mxu0 %v9689_v15  ;;  %6557 = vmatpush3.msra.mxu1 %v9691_v0  ;;  %11659 = vst [vmem:[#allocation73_spill] sm:$0xff] %v9715_v32  ;;  %v9719_v0 = vld [vmem:[#allocation7 + $0x30] sm:$0xff]  ;;  %v9721_v15 = vld [vmem:[#allocation7 + $0x40] sm:$0xff] }
 0x8d9   :  { %3362 = vmatprep.subr.mxu0 %v9695_v61  ;;  %6558 = vmatprep.subr.mxu1 %v11368_v58  ;;  %11660 = vst [vmem:[#allocation74_spill] sm:$0xff] %v9719_v0  ;;  %11661 = vst [vmem:[#allocation75_spill] sm:$0xff] %v9721_v15  ;;  %v9725_v61 = vld [vmem:[#allocation7 + $0x20] sm:$0xff] }
 0x8da   :  { %3363 = vmatpush1.msra.mxu0 %v9699_v26  ;;  %6559 = vmatpush3.msra.mxu1 %v9701_v44  ;;  %11662 = vst [vmem:[#allocation76_spill] sm:$0xff] %v9725_v61  ;;  %v9729_v44 = vld [vmem:[#allocation7 + $0x18] sm:$0xff]  ;;  %v9731_v26 = vld [vmem:[#allocation7 + $0x28] sm:$0xff] }
 0x8db   :  { %3364 = vmatprep.subr.mxu0 %v9705_v11  ;;  %6560 = vmatprep.subr.mxu1 %v11368_v58  ;;  %11663 = vst [vmem:[#allocation77_spill] sm:$0xff] %v9729_v44  ;;  %11664 = vst [vmem:[#allocation78_spill] sm:$0xff] %v9731_v26  ;;  %v9735_v11 = vld [vmem:[#allocation7 + $0x8] sm:$0xff] }
 0x8dc   :  { %3365 = vmatpush1.msra.mxu0 %v9709_v63  ;;  %6561 = vmatpush3.msra.mxu1 %v9711_v22  ;;  %11665 = vst [vmem:[#allocation79_spill] sm:$0xff] %v9735_v11  ;;  %v9739_v22 = vld [vmem:[#allocation7] sm:$0xff]  ;;  %v9741_v63 = vld [vmem:[#allocation7 + $0x10] sm:$0xff] }
 0x8dd   :  { %3366 = vmatprep.subr.mxu0 %v9715_v32  ;;  %6562 = vmatprep.subr.mxu1 %v11368_v58  ;;  %11666 = vst [vmem:[#allocation81_spill] sm:$0xff] %v9739_v22  ;;  %11667 = vst [vmem:[#allocation82_spill] sm:$0xff] %v9741_v63 }
 0x8de   :  { %3367 = vmatpush1.msra.mxu0 %v9719_v0  ;;  %6563 = vmatpush3.msra.mxu1 %v9721_v15 }
 0x8df   :  { %3368 = vmatprep.subr.mxu0 %v9725_v61  ;;  %6564 = vmatprep.subr.mxu1 %v11368_v58 }
 0x8e0   :  { %3369 = vmatpush1.msra.mxu0 %v9729_v44  ;;  %6565 = vmatpush3.msra.mxu1 %v9731_v26 }
 0x8e1   :  { %3370 = vmatprep.subr.mxu0 %v9735_v11  ;;  %6566 = vmatprep.subr.mxu1 %v11368_v58  ;;  %v11668_v11 = vld [vmem:[#allocation89_spill] sm:$0xff] }
 0x8e2   :  { %3371 = vmatpush1.msra.mxu0 %v9739_v22  ;;  %6567 = vmatpush3.msra.mxu1 %v9741_v63  ;;  %v11669_v63 = vld [vmem:[#allocation90_spill] sm:$0xff] }
 0x8e3   :  { %3553 = vmatprep.subr.mxu0 %v9173_v25  ;;  %6571 = vmatprep.subr.mxu1 %v11368_v58 }
 0x960   :  { %v9751_v61 = vpop.f32.mrf.mxu1  ;;  %v9753_v0 = vpop.f32.mrf.mxu0 }
 0x962   :  { %v6500_v15 = vpop.f32.mrf.mxu1  ;;  %v9755_v44 = vpop.f32.mrf.mxu0 }
 0x981   :  { %v3195_v26 = vpop.f32.mrf.mxu0  ;;  %v3266_v32 = vpop.f32.mrf.mxu1 }
 0x982   :  { %v3270_v29 = vadd.f32 %v3195_v26, %v11668_v11  ;;  %v3284_v26 = vadd.f32 %v9762_v56, %v3266_v32  ;;  %v11681_v32 = vld [vmem:[#allocation19_spill] sm:$0xff] }
 0x983   :  { %v6535_v31 = vpop.f32.mrf.mxu1  ;;  %v3197_v22 = vpop.f32.mrf.mxu0 }
 0x984   :  { %v5570_v50 = vmul.f32 -1.442695, %v3270_v29  ;;  %v3277_v35 = vadd.f32 %v3197_v22, %v11669_v63 }
 0x986   :  { %7016 = vpow2.f32 %v5570_v50  ;;  %v5571_v25 = vmul.f32 -1.442695, %v3277_v35  ;;  %v11670_v50 = vld [vmem:[#allocation97_spill] sm:$0xff] }
 0x988   :  { %7018 = vpow2.f32 %v5571_v25 }
 0x993   :  { %v7017_v20 = vpop.eup %7016 }
 0x994   :  { %v3274_v4 = vadd.f32 1.0, %v7017_v20 }
 0x995   :  { %v7019_v15 = vpop.eup %7018 }
 0x996   :  { %7020 = vrcp.f32 %v3274_v4  ;;  %v3281_v46 = vadd.f32 1.0, %v7019_v15  ;;  %v11682_v15 = vld [vmem:[#allocation20_spill] sm:$0xff] }
 0x998   :  { %7022 = vrcp.f32 %v3281_v46  ;;  %v11680_v46 = vld [vmem:[#allocation18_spill] sm:$0xff] }
 0x9a3   :  { %v7021_v31 = vpop.eup %7020 }
 0x9a4   :  { %v3285_v29 = vmul.f32 %v7021_v31, %v3284_v26  ;;  %v11683_v26 = vld [vmem:[#allocation21_spill] sm:$0xff]  ;;  %v11684_v31 = vld [vmem:[#allocation22_spill] sm:$0xff] }
 0x9a5   :  { %v7023_v35 = vpop.eup %7022 }
 0x9a6   :  { %v3286_v11 = vadd.f32 %v3285_v29, %v11670_v50  ;;  %v3288_v22 = vsub.f32 1.0, %v7023_v35  ;;  %v3290_v4 = vmul.f32 %v7023_v35, %v9163_v55  ;;  %v11671_v55 = vld [vmem:[#allocation85_spill] sm:$0xff]  ;;  %v11685_v29 = vld [vmem:[#allocation23_spill] sm:$0xff]  ;;  %v11686_v50 = vld [vmem:[#allocation24_spill] sm:$0xff] }
 0x9a7   :  { %v11688_v35 = vld [vmem:[#allocation26_spill] sm:$0xff] }
 0x9a8   :  { %7024 = vtanh.f32 %v3286_v11  ;;  %v11687_v11 = vld [vmem:[#allocation25_spill] sm:$0xff] }
 0x9b5   :  { %v7025_v63 = vpop.eup %7024 }
 0x9b6   :  { %v3289_v20 = vmul.f32 %v7025_v63, %v3288_v22  ;;  %v11689_v22 = vld [vmem:[#allocation27_spill] sm:$0xff]  ;;  %v11690_v63 = vld [vmem:[#allocation28_spill] sm:$0xff] }
 0x9b8   :  { %v9767_v25 = vadd.f32 %v3290_v4, %v3289_v20  ;;  %v11691_v20 = vld [vmem:[#allocation29_spill] sm:$0xff]  ;;  %v11692_v4 = vld [vmem:[#allocation30_spill] sm:$0xff] }
 0x9ba   :  { %3405 = vmatmul.mubr.f32.vlgmr.msra.gmra.mxu0 %v9767_v25  ;;  %6569 = vmatmul.mubr.f32.vlgmr.msra.gmra.mxu1 %v9767_v25 }
 0x9bb   :  { %3554 = vmatpush1.msra.mxu0 %v9179_v52  ;;  %6572 = vmatpush3.msra.mxu1 %v9184_v39  ;;  %v11672_v52 = vld [vmem:[#allocation86_spill] sm:$0xff]  ;;  %v11673_v39 = vld [vmem:[#allocation93_spill] sm:$0xff] }
 0x9bc   :  { %3555 = vmatprep.subr.mxu0 %v9191_v57  ;;  %6573 = vmatprep.subr.mxu1 %v11368_v58  ;;  %v11674_v57 = vld [vmem:[#allocation12_spill] sm:$0xff] }
 0x9bd   :  { %3556 = vmatpush1.msra.mxu0 %v9198_v62  ;;  %6574 = vmatpush3.msra.mxu1 %v9203_v1  ;;  %v11675_v62 = vld [vmem:[#allocation13_spill] sm:$0xff]  ;;  %v11676_v1 = vld [vmem:[#allocation16_spill] sm:$0xff] }
 0x9be   :  { %3557 = vmatprep.subr.mxu0 %v9210_v19  ;;  %6575 = vmatprep.subr.mxu1 %v11368_v58  ;;  %v11677_v19 = vld [vmem:[#allocation61_spill] sm:$0xff] }
 0x9bf   :  { %3558 = vmatpush1.msra.mxu0 %v9217_v60  ;;  %6576 = vmatpush3.msra.mxu1 %v9222_v9  ;;  %v11678_v60 = vld [vmem:[#allocation14_spill] sm:$0xff]  ;;  %v11679_v9 = vld [vmem:[#allocation17_spill] sm:$0xff] }
 0x9c0   :  { %3559 = vmatprep.subr.mxu0 %v11671_v55  ;;  %6577 = vmatprep.subr.mxu1 %v11368_v58  ;;  %v11693_v55 = vld [vmem:[#allocation31_spill] sm:$0xff] }
 0x9c1   :  { %3560 = vmatpush1.msra.mxu0 %v11672_v52  ;;  %6578 = vmatpush3.msra.mxu1 %v11673_v39  ;;  %v11694_v52 = vld [vmem:[#allocation32_spill] sm:$0xff]  ;;  %v11695_v39 = vld [vmem:[#allocation33_spill] sm:$0xff] }
 0x9c2   :  { %3561 = vmatprep.subr.mxu0 %v11674_v57  ;;  %6579 = vmatprep.subr.mxu1 %v11368_v58  ;;  %v11696_v57 = vld [vmem:[#allocation34_spill] sm:$0xff] }
 0x9c3   :  { %3562 = vmatpush1.msra.mxu0 %v11675_v62  ;;  %6580 = vmatpush3.msra.mxu1 %v11676_v1  ;;  %v11697_v62 = vld [vmem:[#allocation35_spill] sm:$0xff]  ;;  %v11698_v1 = vld [vmem:[#allocation36_spill] sm:$0xff] }
 0x9c4   :  { %3563 = vmatprep.subr.mxu0 %v11677_v19  ;;  %6581 = vmatprep.subr.mxu1 %v11368_v58  ;;  %v11699_v19 = vld [vmem:[#allocation37_spill] sm:$0xff] }
 0x9c5   :  { %3564 = vmatpush1.msra.mxu0 %v11678_v60  ;;  %6582 = vmatpush3.msra.mxu1 %v11679_v9  ;;  %v11700_v60 = vld [vmem:[#allocation38_spill] sm:$0xff]  ;;  %v11701_v9 = vld [vmem:[#allocation39_spill] sm:$0xff] }
 0x9c6   :  { %3565 = vmatprep.subr.mxu0 %v11680_v46  ;;  %6583 = vmatprep.subr.mxu1 %v11368_v58  ;;  %v11702_v46 = vld [vmem:[#allocation41_spill] sm:$0xff] }
 0x9c7   :  { %3566 = vmatpush1.msra.mxu0 %v11681_v32  ;;  %6584 = vmatpush3.msra.mxu1 %v11682_v15  ;;  %v11703_v32 = vld [vmem:[#allocation40_spill] sm:$0xff]  ;;  %v11704_v15 = vld [vmem:[#allocation42_spill] sm:$0xff] }
 0x9c8   :  { %3567 = vmatprep.subr.mxu0 %v11683_v26  ;;  %6585 = vmatprep.subr.mxu1 %v11368_v58  ;;  %v11705_v26 = vld [vmem:[#allocation43_spill] sm:$0xff] }
 0x9c9   :  { %3568 = vmatpush1.msra.mxu0 %v11684_v31  ;;  %6586 = vmatpush3.msra.mxu1 %v11685_v29  ;;  %v11706_v31 = vld [vmem:[#allocation44_spill] sm:$0xff]  ;;  %v11707_v29 = vld [vmem:[#allocation45_spill] sm:$0xff] }
 0x9ca   :  { %3569 = vmatprep.subr.mxu0 %v11686_v50  ;;  %6587 = vmatprep.subr.mxu1 %v11368_v58  ;;  %v11708_v50 = vld [vmem:[#allocation46_spill] sm:$0xff] }
 0x9cb   :  { %3570 = vmatpush1.msra.mxu0 %v11687_v11  ;;  %6588 = vmatpush3.msra.mxu1 %v11688_v35  ;;  %v11709_v11 = vld [vmem:[#allocation47_spill] sm:$0xff]  ;;  %v9837_v35 = vld [vmem:[#allocation5 + $0x170] sm:$0xff] }
 0x9cc   :  { %3571 = vmatprep.subr.mxu0 %v11689_v22  ;;  %6589 = vmatprep.subr.mxu1 %v11368_v58 }
 0x9cd   :  { %3572 = vmatpush1.msra.mxu0 %v11690_v63  ;;  %6590 = vmatpush3.msra.mxu1 %v11691_v20  ;;  %v11710_v20 = vld [vmem:[#allocation11_spill] sm:$0xff] }
 0x9ce   :  { %3573 = vmatprep.subr.mxu0 %v11692_v4  ;;  %6591 = vmatprep.subr.mxu1 %v11368_v58 }
 0x9cf   :  { %3574 = vmatpush1.msra.mxu0 %v11693_v55  ;;  %6592 = vmatpush3.msra.mxu1 %v11694_v52 }
 0x9d0   :  { %3575 = vmatprep.subr.mxu0 %v11695_v39  ;;  %6593 = vmatprep.subr.mxu1 %v11368_v58 }
 0x9d1   :  { %3576 = vmatpush1.msra.mxu0 %v11696_v57  ;;  %6594 = vmatpush3.msra.mxu1 %v11697_v62 }
 0x9d2   :  { %3577 = vmatprep.subr.mxu0 %v11698_v1  ;;  %6595 = vmatprep.subr.mxu1 %v11368_v58 }
 0x9d3   :  { %3578 = vmatpush1.msra.mxu0 %v11699_v19  ;;  %6596 = vmatpush3.msra.mxu1 %v11700_v60 }
 0x9d4   :  { %3579 = vmatprep.subr.mxu0 %v11701_v9  ;;  %6597 = vmatprep.subr.mxu1 %v11368_v58 }
 0x9d5   :  { %3580 = vmatpush1.msra.mxu0 %v11702_v46  ;;  %6598 = vmatpush3.msra.mxu1 %v11703_v32 }
 0x9d6   :  { %3581 = vmatprep.subr.mxu0 %v11704_v15  ;;  %6599 = vmatprep.subr.mxu1 %v11368_v58  ;;  %v9847_v15 = vld [vmem:[%s10975_s9] ss:$0 sm:$0xff] }
 0x9d7   :  { %3582 = vmatpush1.msra.mxu0 %v11705_v26  ;;  %6600 = vmatpush3.msra.mxu1 %v11706_v31 }
 0x9d8   :  { %3583 = vmatprep.subr.mxu0 %v11707_v29  ;;  %6601 = vmatprep.subr.mxu1 %v11368_v58 }
 0x9d9   :  { %3584 = vmatpush1.msra.mxu0 %v11708_v50  ;;  %6602 = vmatpush3.msra.mxu1 %v11709_v11 }
 0x9da   :  { %3617 = vmatprep.mubr.f32.mxu0 %v11368_v58  ;;  %6603 = vmatprep.mubr.msk.f32.mxu1 %vm7167_vm1, %v11368_v58 }
 0x9db   :  { %6606 = vmatprep.subr.mxu1 %v11368_v58  ;;  %3748 = vmatprep.subr.mxu0 %v9837_v35 }
 0xa7a   :  { %v3406_v22 = vpop.f32.mrf.mxu0  ;;  %v3477_v63 = vpop.f32.mrf.mxu1 }
 0xa7b   :  { %v3407_v4 = vadd.f32 %v3406_v22, %v11710_v20  ;;  %v3478_v31 = vadd.f32 %v3477_v63, %v8043_v8  ;;  %v9865_v63 = vld [vmem:[#allocation5 + $0x140] sm:$0xff] }
 0xa7c   :  { %v3408_v55 = vpop.f32.mrf.mxu0  ;;  %v6570_v52 = vpop.f32.mrf.mxu1 }
 0xa7d   :  { %v3481_v39 = vadd.f32 %v3407_v4, %v9753_v0  ;;  %v3409_v62 = vadd.f32 %v3408_v55, %v8031_v41  ;;  %v3495_v0 = vadd.f32 %v9847_v15, %v9751_v61  ;;  %v9861_v61 = vld [vmem:[#allocation5 + $0x150] sm:$0xff] }
 0xa7f   :  { %v5572_v57 = vmul.f32 -1.442695, %v3481_v39  ;;  %v3488_v1 = vadd.f32 %v3409_v62, %v9755_v44  ;;  %v9855_v39 = vld [vmem:[#allocation5 + $0x168] sm:$0xff]  ;;  %v9869_v62 = vld [vmem:[#allocation5 + $0x138] sm:$0xff] }
 0xa81   :  { %7026 = vpow2.f32 %v5572_v57  ;;  %v5573_v19 = vmul.f32 -1.442695, %v3488_v1  ;;  %v9857_v57 = vld [vmem:[#allocation5 + $0x158] sm:$0xff]  ;;  %v9873_v1 = vld [vmem:[#allocation5 + $0x128] sm:$0xff] }
 0xa83   :  { %7028 = vpow2.f32 %v5573_v19  ;;  %v9877_v19 = vld [vmem:[#allocation5 + $0x120] sm:$0xff] }
 0xa8e   :  { %v7027_v60 = vpop.eup %7026 }
 0xa8f   :  { %v3485_v9 = vadd.f32 1.0, %v7027_v60  ;;  %v9885_v60 = vld [vmem:[#allocation5 + $0x108] sm:$0xff] }
 0xa90   :  { %v7029_v46 = vpop.eup %7028 }
 0xa91   :  { %7030 = vrcp.f32 %v3485_v9  ;;  %v3492_v32 = vadd.f32 1.0, %v7029_v46  ;;  %v9893_v9 = vld [vmem:[#allocation5 + $0xf0] sm:$0xff]  ;;  %v9901_v46 = vld [vmem:[#allocation5 + $0xd8] sm:$0xff] }
 0xa93   :  { %7032 = vrcp.f32 %v3492_v32  ;;  %v9909_v32 = vld [vmem:[#allocation5 + $0xc0] sm:$0xff] }
 0xa9e   :  { %v7031_v26 = vpop.eup %7030 }
 0xa9f   :  { %v3496_v29 = vmul.f32 %v7031_v26, %v3495_v0  ;;  %v9917_v0 = vld [vmem:[#allocation5 + $0xa8] sm:$0xff]  ;;  %v9925_v26 = vld [vmem:[#allocation5 + $0x90] sm:$0xff] }
 0xaa0   :  { %v7033_v50 = vpop.eup %7032 }
 0xaa1   :  { %v3497_v44 = vadd.f32 %v3496_v29, %v3478_v31  ;;  %v3499_v11 = vsub.f32 1.0, %v7033_v50  ;;  %v3501_v55 = vmul.f32 %v7033_v50, %v9483_v23  ;;  %v9933_v31 = vld [vmem:[#allocation5 + $0x78] sm:$0xff]  ;;  %v9941_v29 = vld [vmem:[#allocation5 + $0x60] sm:$0xff]  ;;  %v9957_v50 = vld [vmem:[#allocation5 + $0x30] sm:$0xff] }
 0xaa2   :  { %v10207_v23 = vld [vmem:[%s10974_s8 + $0xc8] sm:$0xff] }
 0xaa3   :  { %7034 = vtanh.f32 %v3497_v44  ;;  %v9949_v44 = vld [vmem:[#allocation5 + $0x48] sm:$0xff]  ;;  %11758 = vst [vmem:[#allocation16_spill] sm:$0xff] %v10207_v23 }
 0xab0   :  { %v7035_v22 = vpop.eup %7034 }
 0xab1   :  { %v3500_v4 = vmul.f32 %v7035_v22, %v3499_v11  ;;  %v9965_v11 = vld [vmem:[#allocation5 + $0x18] sm:$0xff]  ;;  %v9973_v22 = vld [vmem:[#allocation5] sm:$0xff] }
 0xab3   :  { %v9853_v52 = vadd.f32 %v3501_v55, %v3500_v4  ;;  %v11733_v4 = vld [vmem:[#allocation72_spill] sm:$0xff]  ;;  %v11734_v55 = vld [vmem:[#allocation73_spill] sm:$0xff] }
 0xab5   :  { %11711 = vst [vmem:[#allocation83_spill] sm:$0xff] %v9853_v52  ;;  %3618 = vmatmul.mubr.f32.vlgmr.msra.gmra.mxu0 %v9853_v52  ;;  %6604 = vmatmul.mubr.f32.vlgmr.msra.gmra.mxu1 %v9853_v52 }
 0xab6   :  { %3749 = vmatpush1.msra.mxu0 %v9855_v39  ;;  %6607 = vmatpush3.msra.mxu1 %v9485_v48  ;;  %v9881_v48 = vld [vmem:[#allocation5 + $0x110] sm:$0xff] }
 0xab7   :  { %3750 = vmatprep.subr.mxu0 %v9857_v57  ;;  %6608 = vmatprep.subr.mxu1 %v11368_v58 }
 0xab8   :  { %3751 = vmatpush1.msra.mxu0 %v9861_v61  ;;  %6609 = vmatpush3.msra.mxu1 %v9489_v6  ;;  %v9889_v6 = vld [vmem:[#allocation5 + $0xf8] sm:$0xff] }
 0xab9   :  { %3752 = vmatprep.subr.mxu0 %v9865_v63  ;;  %6610 = vmatprep.subr.mxu1 %v11368_v58 }
 0xaba   :  { %3753 = vmatpush1.msra.mxu0 %v9869_v62  ;;  %6611 = vmatpush3.msra.mxu1 %v9495_v28  ;;  %v9897_v28 = vld [vmem:[#allocation5 + $0xe0] sm:$0xff] }
 0xabb   :  { %3754 = vmatprep.subr.mxu0 %v9873_v1  ;;  %6612 = vmatprep.subr.mxu1 %v11368_v58 }
 0xabc   :  { %3755 = vmatpush1.msra.mxu0 %v9877_v19  ;;  %6613 = vmatpush3.msra.mxu1 %v9501_v17  ;;  %v9905_v17 = vld [vmem:[#allocation5 + $0xc8] sm:$0xff] }
 0xabd   :  { %3756 = vmatprep.subr.mxu0 %v9881_v48  ;;  %6614 = vmatprep.subr.mxu1 %v11368_v58 }
 0xabe   :  { %3757 = vmatpush1.msra.mxu0 %v9885_v60  ;;  %6615 = vmatpush3.msra.mxu1 %v9507_v42  ;;  %v9913_v42 = vld [vmem:[#allocation5 + $0xb0] sm:$0xff] }
 0xabf   :  { %3758 = vmatprep.subr.mxu0 %v9889_v6  ;;  %6616 = vmatprep.subr.mxu1 %v11368_v58 }
 0xac0   :  { %3759 = vmatpush1.msra.mxu0 %v9893_v9  ;;  %6617 = vmatpush3.msra.mxu1 %v9513_v7  ;;  %v9921_v7 = vld [vmem:[#allocation5 + $0x98] sm:$0xff] }
 0xac1   :  { %3760 = vmatprep.subr.mxu0 %v9897_v28  ;;  %6618 = vmatprep.subr.mxu1 %v11368_v58 }
 0xac2   :  { %3761 = vmatpush1.msra.mxu0 %v9901_v46  ;;  %6619 = vmatpush3.msra.mxu1 %v9519_v47  ;;  %v9929_v47 = vld [vmem:[#allocation5 + $0x80] sm:$0xff] }
 0xac3   :  { %3762 = vmatprep.subr.mxu0 %v9905_v17  ;;  %6620 = vmatprep.subr.mxu1 %v11368_v58 }
 0xac4   :  { %3763 = vmatpush1.msra.mxu0 %v9909_v32  ;;  %6621 = vmatpush3.msra.mxu1 %v9525_v53  ;;  %v9937_v53 = vld [vmem:[#allocation5 + $0x68] sm:$0xff] }
 0xac5   :  { %3764 = vmatprep.subr.mxu0 %v9913_v42  ;;  %6622 = vmatprep.subr.mxu1 %v11368_v58 }
 0xac6   :  { %3765 = vmatpush1.msra.mxu0 %v9917_v0  ;;  %6623 = vmatpush3.msra.mxu1 %v9531_v16  ;;  %v9945_v16 = vld [vmem:[#allocation5 + $0x50] sm:$0xff] }
 0xac7   :  { %3766 = vmatprep.subr.mxu0 %v9921_v7  ;;  %6624 = vmatprep.subr.mxu1 %v11368_v58 }
 0xac8   :  { %3767 = vmatpush1.msra.mxu0 %v9925_v26  ;;  %6625 = vmatpush3.msra.mxu1 %v9537_v54  ;;  %v9953_v54 = vld [vmem:[#allocation5 + $0x38] sm:$0xff] }
 0xac9   :  { %3768 = vmatprep.subr.mxu0 %v9929_v47  ;;  %6626 = vmatprep.subr.mxu1 %v11368_v58 }
 0xaca   :  { %3769 = vmatpush1.msra.mxu0 %v9933_v31  ;;  %6627 = vmatpush3.msra.mxu1 %v9543_v24  ;;  %v9961_v24 = vld [vmem:[#allocation5 + $0x20] sm:$0xff] }
 0xacb   :  { %3770 = vmatprep.subr.mxu0 %v9937_v53  ;;  %6628 = vmatprep.subr.mxu1 %v11368_v58 }
 0xacc   :  { %3771 = vmatpush1.msra.mxu0 %v9941_v29  ;;  %6629 = vmatpush3.msra.mxu1 %v9549_v40  ;;  %v9969_v40 = vld [vmem:[#allocation5 + $0x8] sm:$0xff] }
 0xacd   :  { %3772 = vmatprep.subr.mxu0 %v9945_v16  ;;  %6630 = vmatprep.subr.mxu1 %v11368_v58 }
 0xace   :  { %3773 = vmatpush1.msra.mxu0 %v9949_v44  ;;  %6631 = vmatpush3.msra.mxu1 %v9555_v12  ;;  %v11712_v12 = vld [vmem:[#allocation49_spill] sm:$0xff] }
 0xacf   :  { %3774 = vmatprep.subr.mxu0 %v9953_v54  ;;  %6632 = vmatprep.subr.mxu1 %v11368_v58 }
 0xad0   :  { %3775 = vmatpush1.msra.mxu0 %v9957_v50  ;;  %6633 = vmatpush3.msra.mxu1 %v9561_v3  ;;  %v11713_v3 = vld [vmem:[#allocation50_spill] sm:$0xff] }
 0xad1   :  { %3776 = vmatprep.subr.mxu0 %v9961_v24  ;;  %6634 = vmatprep.subr.mxu1 %v11368_v58 }
 0xad2   :  { %3777 = vmatpush1.msra.mxu0 %v9965_v11  ;;  %6635 = vmatpush3.msra.mxu1 %v9567_v13  ;;  %v11714_v13 = vld [vmem:[#allocation52_spill] sm:$0xff] }
 0xad3   :  { %3778 = vmatprep.subr.mxu0 %v9969_v40  ;;  %6636 = vmatprep.subr.mxu1 %v11368_v58 }
 0xad4   :  { %3779 = vmatpush1.msra.mxu0 %v9973_v22  ;;  %3812 = vmatprep.mubr.f32.mxu0 %v11368_v58 }
 0xad5   :  { %6637 = vmatpush3.msra.mxu1 %v9575_v30  ;;  %6638 = vmatprep.mubr.msk.f32.mxu1 %vm7167_vm1, %v11368_v58  ;;  %v11715_v30 = vld [vmem:[#allocation53_spill] sm:$0xff] }
 0xad6   :  { %3813 = vmatmul.mubr.f32.vlgmr.msra.gmra.mxu0 %v9767_v25  ;;  %6639 = vmatmul.mubr.f32.vlgmr.msra.gmra.mxu1 %v9767_v25 }
 0xad7   :  { %3959 = vmatprep.subr.mxu0 %v9590_v27  ;;  %6641 = vmatprep.subr.mxu1 %v11368_v58  ;;  %v11716_v27 = vld [vmem:[#allocation54_spill] sm:$0xff] }
 0xad8   :  { %3960 = vmatpush1.msra.mxu0 %v9593_v33  ;;  %6642 = vmatpush3.msra.mxu1 %v9595_v38  ;;  %v11717_v33 = vld [vmem:[#allocation55_spill] sm:$0xff]  ;;  %v11718_v38 = vld [vmem:[#allocation56_spill] sm:$0xff] }
 0xad9   :  { %3961 = vmatprep.subr.mxu0 %v9599_v49  ;;  %6643 = vmatprep.subr.mxu1 %v11368_v58  ;;  %v11719_v49 = vld [vmem:[#allocation57_spill] sm:$0xff] }
 0xada   :  { %3962 = vmatpush1.msra.mxu0 %v9603_v37  ;;  %6644 = vmatpush3.msra.mxu1 %v9605_v51  ;;  %v11720_v37 = vld [vmem:[#allocation58_spill] sm:$0xff]  ;;  %v11721_v51 = vld [vmem:[#allocation59_spill] sm:$0xff] }
 0xadb   :  { %3963 = vmatprep.subr.mxu0 %v9609_v36  ;;  %6645 = vmatprep.subr.mxu1 %v11368_v58  ;;  %v11722_v36 = vld [vmem:[#allocation60_spill] sm:$0xff] }
 0xadc   :  { %3964 = vmatpush1.msra.mxu0 %v9613_v10  ;;  %6646 = vmatpush3.msra.mxu1 %v9615_v21  ;;  %v11723_v10 = vld [vmem:[#allocation62_spill] sm:$0xff]  ;;  %v11724_v21 = vld [vmem:[#allocation63_spill] sm:$0xff] }
 0xadd   :  { %3965 = vmatprep.subr.mxu0 %v9619_v14  ;;  %6647 = vmatprep.subr.mxu1 %v11368_v58  ;;  %v11725_v14 = vld [vmem:[#allocation64_spill] sm:$0xff] }
 0xade   :  { %3966 = vmatpush1.msra.mxu0 %v9623_v45  ;;  %6648 = vmatpush3.msra.mxu1 %v9625_v2  ;;  %v11726_v45 = vld [vmem:[#allocation65_spill] sm:$0xff]  ;;  %v11727_v2 = vld [vmem:[#allocation66_spill] sm:$0xff] }
 0xadf   :  { %3967 = vmatprep.subr.mxu0 %v9629_v34  ;;  %6649 = vmatprep.subr.mxu1 %v11368_v58  ;;  %v11728_v34 = vld [vmem:[#allocation67_spill] sm:$0xff] }
 0xae0   :  { %3968 = vmatpush1.msra.mxu0 %v9633_v18  ;;  %6650 = vmatpush3.msra.mxu1 %v9635_v43  ;;  %v11729_v18 = vld [vmem:[#allocation68_spill] sm:$0xff]  ;;  %v11730_v43 = vld [vmem:[#allocation69_spill] sm:$0xff] }
 0xae1   :  { %3969 = vmatprep.subr.mxu0 %v9639_v5  ;;  %6651 = vmatprep.subr.mxu1 %v11368_v58  ;;  %v11731_v5 = vld [vmem:[#allocation70_spill] sm:$0xff] }
 0xae2   :  { %3970 = vmatpush1.msra.mxu0 %v9643_v59  ;;  %6652 = vmatpush3.msra.mxu1 %v11712_v12  ;;  %v11732_v59 = vld [vmem:[#allocation71_spill] sm:$0xff]  ;;  %v11735_v12 = vld [vmem:[#allocation74_spill] sm:$0xff] }
 0xae3   :  { %3971 = vmatprep.subr.mxu0 %v11713_v3  ;;  %6653 = vmatprep.subr.mxu1 %v11368_v58  ;;  %v11736_v3 = vld [vmem:[#allocation75_spill] sm:$0xff] }
 0xae4   :  { %3972 = vmatpush1.msra.mxu0 %v11714_v13  ;;  %6654 = vmatpush3.msra.mxu1 %v11715_v30  ;;  %v11737_v13 = vld [vmem:[#allocation76_spill] sm:$0xff]  ;;  %v11738_v30 = vld [vmem:[#allocation77_spill] sm:$0xff] }
 0xae5   :  { %3973 = vmatprep.subr.mxu0 %v11716_v27  ;;  %6655 = vmatprep.subr.mxu1 %v11368_v58  ;;  %v11739_v27 = vld [vmem:[#allocation78_spill] sm:$0xff] }
 0xae6   :  { %3974 = vmatpush1.msra.mxu0 %v11717_v33  ;;  %6656 = vmatpush3.msra.mxu1 %v11718_v38  ;;  %v11740_v33 = vld [vmem:[#allocation79_spill] sm:$0xff]  ;;  %v11741_v38 = vld [vmem:[#allocation81_spill] sm:$0xff] }
 0xae7   :  { %3975 = vmatprep.subr.mxu0 %v11719_v49  ;;  %6657 = vmatprep.subr.mxu1 %v11368_v58  ;;  %v11742_v49 = vld [vmem:[#allocation82_spill] sm:$0xff] }
 0xae8   :  { %3976 = vmatpush1.msra.mxu0 %v11720_v37  ;;  %6658 = vmatpush3.msra.mxu1 %v11721_v51 }
 0xae9   :  { %3977 = vmatprep.subr.mxu0 %v11722_v36  ;;  %6659 = vmatprep.subr.mxu1 %v11368_v58 }
 0xaea   :  { %3978 = vmatpush1.msra.mxu0 %v11723_v10  ;;  %6660 = vmatpush3.msra.mxu1 %v11724_v21 }
 0xaeb   :  { %3979 = vmatprep.subr.mxu0 %v11725_v14  ;;  %6661 = vmatprep.subr.mxu1 %v11368_v58 }
 0xaec   :  { %3980 = vmatpush1.msra.mxu0 %v11726_v45  ;;  %6662 = vmatpush3.msra.mxu1 %v11727_v2  ;;  %v11743_v45 = vld [vmem:[#allocation92_spill] sm:$0xff] }
 0xaed   :  { %3981 = vmatprep.subr.mxu0 %v11728_v34  ;;  %6663 = vmatprep.subr.mxu1 %v11368_v58 }
 0xaee   :  { %3982 = vmatpush1.msra.mxu0 %v11729_v18  ;;  %6664 = vmatpush3.msra.mxu1 %v11730_v43 }
 0xaef   :  { %3983 = vmatprep.subr.mxu0 %v11731_v5  ;;  %6665 = vmatprep.subr.mxu1 %v11368_v58  ;;  %v11744_v5 = vld [vmem:[#allocation94_spill] sm:$0xff] }
 0xaf0   :  { %3984 = vmatpush1.msra.mxu0 %v11732_v59  ;;  %6666 = vmatpush3.msra.mxu1 %v11733_v4 }
 0xaf1   :  { %3985 = vmatprep.subr.mxu0 %v11734_v55  ;;  %6667 = vmatprep.subr.mxu1 %v11368_v58 }
 0xaf2   :  { %3986 = vmatpush1.msra.mxu0 %v11735_v12  ;;  %6668 = vmatpush3.msra.mxu1 %v11736_v3 }
 0xaf3   :  { %3987 = vmatprep.subr.mxu0 %v11737_v13  ;;  %6669 = vmatprep.subr.mxu1 %v11368_v58 }
 0xaf4   :  { %3988 = vmatpush1.msra.mxu0 %v11738_v30  ;;  %6670 = vmatpush3.msra.mxu1 %v11739_v27 }
 0xaf5   :  { %3989 = vmatprep.subr.mxu0 %v11740_v33  ;;  %6671 = vmatprep.subr.mxu1 %v11368_v58 }
 0xaf6   :  { %3990 = vmatpush1.msra.mxu0 %v11741_v38  ;;  %4023 = vmatprep.mubr.f32.mxu0 %v11368_v58  ;;  %v11745_v38 = vld [vmem:[#allocation95_spill] sm:$0xff] }
 0xaf7   :  { %6672 = vmatpush3.msra.mxu1 %v11742_v49  ;;  %6673 = vmatprep.mubr.msk.f32.mxu1 %vm7167_vm1, %v11368_v58 }
 0xaf8   :  { %6676 = vmatprep.subr.mxu1 %v11368_v58 }
 0xb75   :  { %v10054_v37 = vpop.f32.mrf.mxu1  ;;  %v10056_v36 = vpop.f32.mrf.mxu0 }
 0xb77   :  { %v6605_v51 = vpop.f32.mrf.mxu1  ;;  %v10058_v10 = vpop.f32.mrf.mxu0 }
 0xb96   :  { %v3814_v21 = vpop.f32.mrf.mxu0  ;;  %v3885_v14 = vpop.f32.mrf.mxu1 }
 0xb97   :  { %v3889_v2 = vadd.f32 %v3814_v21, %v11743_v45  ;;  %v3903_v30 = vadd.f32 %v9762_v56, %v3885_v14  ;;  %v10075_v56 = vld [vmem:[%s10974_s8 + $0x170] sm:$0xff]  ;;  %v10086_v14 = vld [vmem:[%s10974_s8 + $0x178] sm:$0xff] }
 0xb98   :  { %v6640_v34 = vpop.f32.mrf.mxu1  ;;  %v3816_v43 = vpop.f32.mrf.mxu0  ;;  %4172 = vmatprep.subr.mxu0 %v10075_v56 }
 0xb99   :  { %v5574_v18 = vmul.f32 -1.442695, %v3889_v2  ;;  %v3896_v59 = vadd.f32 %v3816_v43, %v11744_v5  ;;  %v10093_v43 = vld [vmem:[%s10974_s8 + $0x158] sm:$0xff]  ;;  %v10100_v5 = vld [vmem:[%s10974_s8 + $0x150] sm:$0xff] }
 0xb9b   :  { %7036 = vpow2.f32 %v5574_v18  ;;  %v5575_v4 = vmul.f32 -1.442695, %v3896_v59  ;;  %v10105_v59 = vld [vmem:[%s10974_s8 + $0x160] sm:$0xff] }
 0xb9d   :  { %7038 = vpow2.f32 %v5575_v4  ;;  %v10112_v4 = vld [vmem:[%s10974_s8 + $0x140] sm:$0xff] }
 0xba8   :  { %v7037_v55 = vpop.eup %7036 }
 0xba9   :  { %v3893_v12 = vadd.f32 1.0, %v7037_v55  ;;  %v10119_v55 = vld [vmem:[%s10974_s8 + $0x138] sm:$0xff] }
 0xbaa   :  { %v7039_v3 = vpop.eup %7038 }
 0xbab   :  { %7040 = vrcp.f32 %v3893_v12  ;;  %v3900_v13 = vadd.f32 1.0, %v7039_v3  ;;  %v10124_v12 = vld [vmem:[%s10974_s8 + $0x148] sm:$0xff] }
 0xbac   :  { %v10131_v3 = vld [vmem:[%s10974_s8 + $0x128] sm:$0xff] }
 0xbad   :  { %7042 = vrcp.f32 %v3900_v13  ;;  %11746 = vst [vmem:[#allocation84_spill] sm:$0xff] %v10131_v3  ;;  %v10138_v13 = vld [vmem:[%s10974_s8 + $0x120] sm:$0xff] }
 0xbae   :  { %11747 = vst [vmem:[#allocation87_spill] sm:$0xff] %v10138_v13 }
 0xbb8   :  { %v7041_v27 = vpop.eup %7040 }
 0xbb9   :  { %v3904_v33 = vmul.f32 %v7041_v27, %v3903_v30  ;;  %v10143_v30 = vld [vmem:[%s10974_s8 + $0x130] sm:$0xff] }
 0xbba   :  { %v7043_v51 = vpop.eup %7042  ;;  %11748 = vst [vmem:[#allocation88_spill] sm:$0xff] %v10143_v30  ;;  %v10150_v27 = vld [vmem:[%s10974_s8 + $0x110] sm:$0xff] }
 0xbbb   :  { %v3905_v49 = vadd.f32 %v3904_v33, %v11745_v38  ;;  %v3907_v21 = vsub.f32 1.0, %v7043_v51  ;;  %v3909_v34 = vmul.f32 %v7043_v51, %v9767_v25  ;;  %v10081_v25 = vld [vmem:[%s10974_s8 + $0x168] sm:$0xff]  ;;  %11749 = vst [vmem:[#allocation91_spill] sm:$0xff] %v10150_v27  ;;  %v10162_v38 = vld [vmem:[%s10974_s8 + $0x118] sm:$0xff]  ;;  %v10176_v51 = vld [vmem:[%s10974_s8 + $0xf0] sm:$0xff] }
 0xbbc   :  { %v10157_v33 = vld [vmem:[%s10974_s8 + $0x108] sm:$0xff]  ;;  %11751 = vst [vmem:[#allocation90_spill] sm:$0xff] %v10162_v38  ;;  %11753 = vst [vmem:[#allocation85_spill] sm:$0xff] %v10176_v51 }
 0xbbd   :  { %7044 = vtanh.f32 %v3905_v49  ;;  %11750 = vst [vmem:[#allocation89_spill] sm:$0xff] %v10157_v33  ;;  %v10169_v49 = vld [vmem:[%s10974_s8 + $0xf8] sm:$0xff] }
 0xbbe   :  { %11752 = vst [vmem:[#allocation97_spill] sm:$0xff] %v10169_v49 }
 0xbca   :  { %v7045_v45 = vpop.eup %7044 }
 0xbcb   :  { %v3908_v2 = vmul.f32 %v7045_v45, %v3907_v21  ;;  %v10181_v21 = vld [vmem:[%s10974_s8 + $0x100] sm:$0xff] }
 0xbcc   :  { %11754 = vst [vmem:[#allocation86_spill] sm:$0xff] %v10181_v21  ;;  %v10188_v45 = vld [vmem:[%s10974_s8 + $0xe0] sm:$0xff] }
 0xbcd   :  { %v10065_v18 = vadd.f32 %v3909_v34, %v3908_v2  ;;  %11755 = vst [vmem:[#allocation93_spill] sm:$0xff] %v10188_v45  ;;  %v10195_v2 = vld [vmem:[%s10974_s8 + $0xd8] sm:$0xff]  ;;  %v10200_v34 = vld [vmem:[%s10974_s8 + $0xe8] sm:$0xff] }
 0xbce   :  { %11756 = vst [vmem:[#allocation12_spill] sm:$0xff] %v10195_v2  ;;  %11757 = vst [vmem:[#allocation13_spill] sm:$0xff] %v10200_v34 }
 0xbcf   :  { %4024 = vmatmul.mubr.f32.vlgmr.msra.gmra.mxu0 %v10065_v18  ;;  %6674 = vmatmul.mubr.f32.vlgmr.msra.gmra.mxu1 %v10065_v18 }
 0xbd0   :  { %4236 = vmatprep.mubr.f32.mxu0 %v11368_v58  ;;  %6708 = vmatprep.mubr.msk.f32.mxu1 %vm7167_vm1, %v11368_v58 }
 0xbd1   :  { %4173 = vmatpush1.msra.mxu0 %v10081_v25  ;;  %6677 = vmatpush3.msra.mxu1 %v10086_v14 }
 0xbd2   :  { %4174 = vmatprep.subr.mxu0 %v10093_v43  ;;  %6678 = vmatprep.subr.mxu1 %v11368_v58 }
 0xbd3   :  { %4175 = vmatpush1.msra.mxu0 %v10100_v5  ;;  %6679 = vmatpush3.msra.mxu1 %v10105_v59 }
 0xbd4   :  { %4176 = vmatprep.subr.mxu0 %v10112_v4  ;;  %6680 = vmatprep.subr.mxu1 %v11368_v58 }
 0xbd5   :  { %4177 = vmatpush1.msra.mxu0 %v10119_v55  ;;  %6681 = vmatpush3.msra.mxu1 %v10124_v12 }
 0xbd6   :  { %4178 = vmatprep.subr.mxu0 %v10131_v3  ;;  %6682 = vmatprep.subr.mxu1 %v11368_v58 }
 0xbd7   :  { %4179 = vmatpush1.msra.mxu0 %v10138_v13  ;;  %6683 = vmatpush3.msra.mxu1 %v10143_v30 }
 0xbd8   :  { %4180 = vmatprep.subr.mxu0 %v10150_v27  ;;  %6684 = vmatprep.subr.mxu1 %v11368_v58 }
 0xbd9   :  { %4181 = vmatpush1.msra.mxu0 %v10157_v33  ;;  %6685 = vmatpush3.msra.mxu1 %v10162_v38 }
 0xbda   :  { %4182 = vmatprep.subr.mxu0 %v10169_v49  ;;  %6686 = vmatprep.subr.mxu1 %v11368_v58  ;;  %v10267_v49 = vld [vmem:[%s10974_s8 + $0x78] sm:$0xff] }
 0xbdb   :  { %4183 = vmatpush1.msra.mxu0 %v10176_v51  ;;  %6687 = vmatpush3.msra.mxu1 %v10181_v21  ;;  %v10236_v21 = vld [vmem:[%s10974_s8 + $0xb8] sm:$0xff]  ;;  %v10253_v51 = vld [vmem:[%s10974_s8 + $0xa0] sm:$0xff]  ;;  %11768 = vst [vmem:[#allocation24_spill] sm:$0xff] %v10267_v49 }
 0xbdc   :  { %4184 = vmatprep.subr.mxu0 %v10188_v45  ;;  %6688 = vmatprep.subr.mxu1 %v11368_v58  ;;  %v10214_v45 = vld [vmem:[%s10974_s8 + $0xc0] sm:$0xff]  ;;  %11763 = vst [vmem:[#allocation19_spill] sm:$0xff] %v10236_v21  ;;  %11766 = vst [vmem:[#allocation22_spill] sm:$0xff] %v10253_v51 }
 0xbdd   :  { %4185 = vmatpush1.msra.mxu0 %v10195_v2  ;;  %6689 = vmatpush3.msra.mxu1 %v10200_v34  ;;  %11759 = vst [vmem:[#allocation61_spill] sm:$0xff] %v10214_v45  ;;  %v10219_v2 = vld [vmem:[%s10974_s8 + $0xd0] sm:$0xff]  ;;  %v10231_v34 = vld [vmem:[%s10974_s8 + $0xa8] sm:$0xff] }
 0xbde   :  { %4186 = vmatprep.subr.mxu0 %v10207_v23  ;;  %6690 = vmatprep.subr.mxu1 %v11368_v58  ;;  %11760 = vst [vmem:[#allocation14_spill] sm:$0xff] %v10219_v2  ;;  %v10226_v23 = vld [vmem:[%s10974_s8 + $0xb0] sm:$0xff]  ;;  %11762 = vst [vmem:[#allocation18_spill] sm:$0xff] %v10231_v34 }
 0xbdf   :  { %4187 = vmatpush1.msra.mxu0 %v10214_v45  ;;  %6691 = vmatpush3.msra.mxu1 %v10219_v2  ;;  %11761 = vst [vmem:[#allocation17_spill] sm:$0xff] %v10226_v23  ;;  %v10243_v2 = vld [vmem:[%s10974_s8 + $0x98] sm:$0xff]  ;;  %v10248_v45 = vld [vmem:[%s10974_s8 + $0x90] sm:$0xff] }
 0xbe0   :  { %4188 = vmatprep.subr.mxu0 %v10226_v23  ;;  %6692 = vmatprep.subr.mxu1 %v11368_v58  ;;  %11764 = vst [vmem:[#allocation20_spill] sm:$0xff] %v10243_v2  ;;  %11765 = vst [vmem:[#allocation21_spill] sm:$0xff] %v10248_v45  ;;  %v10260_v23 = vld [vmem:[%s10974_s8 + $0x80] sm:$0xff] }
 0xbe1   :  { %4189 = vmatpush1.msra.mxu0 %v10231_v34  ;;  %6693 = vmatpush3.msra.mxu1 %v10236_v21  ;;  %11767 = vst [vmem:[#allocation23_spill] sm:$0xff] %v10260_v23  ;;  %v10272_v34 = vld [vmem:[%s10974_s8 + $0x88] sm:$0xff]  ;;  %v10286_v21 = vld [vmem:[%s10974_s8 + $0x60] sm:$0xff] }
 0xbe2   :  { %4190 = vmatprep.subr.mxu0 %v10243_v2  ;;  %6694 = vmatprep.subr.mxu1 %v11368_v58  ;;  %11769 = vst [vmem:[#allocation25_spill] sm:$0xff] %v10272_v34  ;;  %v10279_v2 = vld [vmem:[%s10974_s8 + $0x68] sm:$0xff]  ;;  %11771 = vst [vmem:[#allocation27_spill] sm:$0xff] %v10286_v21 }
 0xbe3   :  { %4191 = vmatpush1.msra.mxu0 %v10248_v45  ;;  %6695 = vmatpush3.msra.mxu1 %v10253_v51  ;;  %11770 = vst [vmem:[#allocation26_spill] sm:$0xff] %v10279_v2  ;;  %v10291_v45 = vld [vmem:[%s10974_s8 + $0x70] sm:$0xff]  ;;  %v10305_v51 = vld [vmem:[%s10974_s8 + $0x48] sm:$0xff] }
 0xbe4   :  { %4192 = vmatprep.subr.mxu0 %v10260_v23  ;;  %6696 = vmatprep.subr.mxu1 %v11368_v58  ;;  %11772 = vst [vmem:[#allocation28_spill] sm:$0xff] %v10291_v45  ;;  %v10298_v23 = vld [vmem:[%s10974_s8 + $0x50] sm:$0xff]  ;;  %11774 = vst [vmem:[#allocation30_spill] sm:$0xff] %v10305_v51 }
 0xbe5   :  { %4193 = vmatpush1.msra.mxu0 %v10267_v49  ;;  %6697 = vmatpush3.msra.mxu1 %v10272_v34  ;;  %11773 = vst [vmem:[#allocation29_spill] sm:$0xff] %v10298_v23  ;;  %v10310_v49 = vld [vmem:[%s10974_s8 + $0x58] sm:$0xff]  ;;  %v10324_v34 = vld [vmem:[%s10974_s8 + $0x30] sm:$0xff] }
 0xbe6   :  { %4194 = vmatprep.subr.mxu0 %v10279_v2  ;;  %6698 = vmatprep.subr.mxu1 %v11368_v58  ;;  %11775 = vst [vmem:[#allocation31_spill] sm:$0xff] %v10310_v49  ;;  %v10317_v2 = vld [vmem:[%s10974_s8 + $0x38] sm:$0xff]  ;;  %11777 = vst [vmem:[#allocation33_spill] sm:$0xff] %v10324_v34 }
 0xbe7   :  { %4195 = vmatpush1.msra.mxu0 %v10286_v21  ;;  %6699 = vmatpush3.msra.mxu1 %v10291_v45  ;;  %11776 = vst [vmem:[#allocation32_spill] sm:$0xff] %v10317_v2  ;;  %v10329_v21 = vld [vmem:[%s10974_s8 + $0x40] sm:$0xff]  ;;  %v10343_v45 = vld [vmem:[%s10974_s8 + $0x18] sm:$0xff] }
 0xbe8   :  { %4196 = vmatprep.subr.mxu0 %v10298_v23  ;;  %6700 = vmatprep.subr.mxu1 %v11368_v58  ;;  %11778 = vst [vmem:[#allocation34_spill] sm:$0xff] %v10329_v21  ;;  %v10336_v23 = vld [vmem:[%s10974_s8 + $0x20] sm:$0xff]  ;;  %11780 = vst [vmem:[#allocation36_spill] sm:$0xff] %v10343_v45 }
 0xbe9   :  { %4197 = vmatpush1.msra.mxu0 %v10305_v51  ;;  %6701 = vmatpush3.msra.mxu1 %v10310_v49  ;;  %11779 = vst [vmem:[#allocation35_spill] sm:$0xff] %v10336_v23  ;;  %v10348_v51 = vld [vmem:[%s10974_s8 + $0x28] sm:$0xff]  ;;  %v10362_v49 = vld [vmem:[%s10974_s8] sm:$0xff] }
 0xbea   :  { %4198 = vmatprep.subr.mxu0 %v10317_v2  ;;  %6702 = vmatprep.subr.mxu1 %v11368_v58  ;;  %11781 = vst [vmem:[#allocation37_spill] sm:$0xff] %v10348_v51  ;;  %v10355_v2 = vld [vmem:[%s10974_s8 + $0x8] sm:$0xff]  ;;  %11783 = vst [vmem:[#allocation39_spill] sm:$0xff] %v10362_v49 }
 0xbeb   :  { %4199 = vmatpush1.msra.mxu0 %v10324_v34  ;;  %6703 = vmatpush3.msra.mxu1 %v10329_v21  ;;  %11782 = vst [vmem:[#allocation38_spill] sm:$0xff] %v10355_v2  ;;  %v10367_v34 = vld [vmem:[%s10974_s8 + $0x10] sm:$0xff] }
 0xbec   :  { %4200 = vmatprep.subr.mxu0 %v10336_v23  ;;  %6704 = vmatprep.subr.mxu1 %v11368_v58  ;;  %11784 = vst [vmem:[#allocation41_spill] sm:$0xff] %v10367_v34 }
 0xbed   :  { %4201 = vmatpush1.msra.mxu0 %v10343_v45  ;;  %6705 = vmatpush3.msra.mxu1 %v10348_v51 }
 0xbee   :  { %4202 = vmatprep.subr.mxu0 %v10355_v2  ;;  %6706 = vmatprep.subr.mxu1 %v11368_v58 }
 0xbef   :  { %4203 = vmatpush1.msra.mxu0 %v10362_v49  ;;  %6707 = vmatpush3.msra.mxu1 %v10367_v34 }
 0xbf0   :  { %4367 = vmatprep.subr.mxu0 %v9837_v35  ;;  %6711 = vmatprep.subr.mxu1 %v11368_v58 }
 0xc8f   :  { %v4025_v23 = vpop.f32.mrf.mxu0  ;;  %v4096_v21 = vpop.f32.mrf.mxu1 }
 0xc90   :  { %v4026_v38 = vadd.f32 %v4025_v23, %v11710_v20  ;;  %v4114_v23 = vadd.f32 %v9847_v15, %v10054_v37  ;;  %v10391_v15 = vld [vmem:[#allocation5 + $0x160] sm:$0xff]  ;;  %v10403_v37 = vld [vmem:[#allocation5 + $0x130] sm:$0xff] }
 0xc91   :  { %v4027_v33 = vpop.f32.mrf.mxu0  ;;  %v6675_v45 = vpop.f32.mrf.mxu1 }
 0xc92   :  { %v4100_v51 = vadd.f32 %v4026_v38, %v10056_v36  ;;  %v4028_v2 = vadd.f32 %v4027_v33, %v8031_v41  ;;  %v4097_v45 = vadd.f32 %v4096_v21, %v8043_v8  ;;  %v10561_v21 = vld [vmem:[#allocation7 + $0xc8] sm:$0xff] }
 0xc93   :  { %11789 = vst [vmem:[#allocation45_spill] sm:$0xff] %v10561_v21 }
 0xc94   :  { %v5576_v27 = vmul.f32 -1.442695, %v4100_v51  ;;  %v4107_v49 = vadd.f32 %v4028_v2, %v10058_v10  ;;  %v10387_v2 = vld [vmem:[#allocation5 + $0x178] sm:$0xff] }
 0xc96   :  { %7046 = vpow2.f32 %v5576_v27  ;;  %v5577_v30 = vmul.f32 -1.442695, %v4107_v49 }
 0xc98   :  { %7048 = vpow2.f32 %v5577_v30 }
 0xca3   :  { %v7047_v34 = vpop.eup %7046 }
 0xca4   :  { %v4104_v35 = vadd.f32 1.0, %v7047_v34  ;;  %v10565_v34 = vld [vmem:[#allocation7 + $0xc0] sm:$0xff] }
 0xca5   :  { %v7049_v13 = vpop.eup %7048  ;;  %11790 = vst [vmem:[#allocation46_spill] sm:$0xff] %v10565_v34 }
 0xca6   :  { %7050 = vrcp.f32 %v4104_v35  ;;  %v4111_v3 = vadd.f32 1.0, %v7049_v13  ;;  %v10557_v13 = vld [vmem:[#allocation7 + $0xe8] sm:$0xff]  ;;  %v10567_v35 = vld [vmem:[#allocation7 + $0xd0] sm:$0xff] }
 0xca7   :  { %11788 = vst [vmem:[#allocation44_spill] sm:$0xff] %v10557_v13  ;;  %11791 = vst [vmem:[#allocation47_spill] sm:$0xff] %v10567_v35 }
 0xca8   :  { %7052 = vrcp.f32 %v4111_v3  ;;  %v10555_v3 = vld [vmem:[#allocation7 + $0xd8] sm:$0xff] }
 0xca9   :  { %11787 = vst [vmem:[#allocation43_spill] sm:$0xff] %v10555_v3 }
 0xcb3   :  { %v7051_v20 = vpop.eup %7050 }
 0xcb4   :  { %v4115_v36 = vmul.f32 %v7051_v20, %v4114_v23  ;;  %v10397_v20 = vld [vmem:[#allocation5 + $0x148] sm:$0xff]  ;;  %v10569_v23 = vld [vmem:[#allocation7 + $0xb0] sm:$0xff] }
 0xcb5   :  { %v7053_v27 = vpop.eup %7052  ;;  %11792 = vst [vmem:[#allocation49_spill] sm:$0xff] %v10569_v23 }
 0xcb6   :  { %v4116_v38 = vadd.f32 %v4115_v36, %v4097_v45  ;;  %v4118_v33 = vsub.f32 1.0, %v7053_v27  ;;  %v4120_v30 = vmul.f32 %v7053_v27, %v9853_v52  ;;  %v10573_v45 = vld [vmem:[#allocation7 + $0xa8] sm:$0xff]  ;;  %v10575_v36 = vld [vmem:[#allocation7 + $0xb8] sm:$0xff]  ;;  %v10581_v27 = vld [vmem:[#allocation7 + $0x90] sm:$0xff] }
 0xcb7   :  { %11793 = vst [vmem:[#allocation50_spill] sm:$0xff] %v10573_v45  ;;  %11794 = vst [vmem:[#allocation52_spill] sm:$0xff] %v10575_v36  ;;  %v10597_v52 = vld [vmem:[#allocation7 + $0x68] sm:$0xff] }
 0xcb8   :  { %7054 = vtanh.f32 %v4116_v38  ;;  %v10577_v38 = vld [vmem:[#allocation7 + $0x98] sm:$0xff]  ;;  %11796 = vst [vmem:[#allocation54_spill] sm:$0xff] %v10581_v27  ;;  %11801 = vst [vmem:[#allocation59_spill] sm:$0xff] %v10597_v52 }
 0xcb9   :  { %11795 = vst [vmem:[#allocation53_spill] sm:$0xff] %v10577_v38 }
 0xcc5   :  { %v7055_v10 = vpop.eup %7054 }
 0xcc6   :  { %v4119_v49 = vmul.f32 %v7055_v10, %v4118_v33  ;;  %v10583_v33 = vld [vmem:[#allocation7 + $0xa0] sm:$0xff] }
 0xcc7   :  { %11797 = vst [vmem:[#allocation55_spill] sm:$0xff] %v10583_v33  ;;  %v10587_v10 = vld [vmem:[#allocation7 + $0x80] sm:$0xff] }
 0xcc8   :  { %v10385_v51 = vadd.f32 %v4120_v30, %v4119_v49  ;;  %11798 = vst [vmem:[#allocation56_spill] sm:$0xff] %v10587_v10  ;;  %v10591_v49 = vld [vmem:[#allocation7 + $0x78] sm:$0xff]  ;;  %v10593_v30 = vld [vmem:[#allocation7 + $0x88] sm:$0xff] }
 0xcc9   :  { %11799 = vst [vmem:[#allocation57_spill] sm:$0xff] %v10591_v49  ;;  %11800 = vst [vmem:[#allocation58_spill] sm:$0xff] %v10593_v30 }
 0xcca   :  { %4237 = vmatmul.mubr.f32.vlgmr.msra.gmra.mxu0 %v10385_v51  ;;  %6709 = vmatmul.mubr.f32.vlgmr.msra.gmra.mxu1 %v10385_v51 }
 0xccb   :  { %4368 = vmatpush1.msra.mxu0 %v9855_v39  ;;  %6712 = vmatpush3.msra.mxu1 %v10387_v2  ;;  %v10409_v39 = vld [vmem:[#allocation5 + $0x118] sm:$0xff] }
 0xccc   :  { %4369 = vmatprep.subr.mxu0 %v9857_v57  ;;  %6713 = vmatprep.subr.mxu1 %v11368_v58  ;;  %v10415_v57 = vld [vmem:[#allocation5 + $0x100] sm:$0xff] }
 0xccd   :  { %4370 = vmatpush1.msra.mxu0 %v9861_v61  ;;  %6714 = vmatpush3.msra.mxu1 %v10391_v15  ;;  %v10421_v61 = vld [vmem:[#allocation5 + $0xe8] sm:$0xff] }
 0xcce   :  { %4371 = vmatprep.subr.mxu0 %v9865_v63  ;;  %6715 = vmatprep.subr.mxu1 %v11368_v58  ;;  %v10427_v63 = vld [vmem:[#allocation5 + $0xd0] sm:$0xff] }
 0xccf   :  { %4372 = vmatpush1.msra.mxu0 %v9869_v62  ;;  %6716 = vmatpush3.msra.mxu1 %v10397_v20  ;;  %v10433_v62 = vld [vmem:[#allocation5 + $0xb8] sm:$0xff] }
 0xcd0   :  { %4373 = vmatprep.subr.mxu0 %v9873_v1  ;;  %6717 = vmatprep.subr.mxu1 %v11368_v58  ;;  %v10439_v1 = vld [vmem:[#allocation5 + $0xa0] sm:$0xff] }
 0xcd1   :  { %4374 = vmatpush1.msra.mxu0 %v9877_v19  ;;  %6718 = vmatpush3.msra.mxu1 %v10403_v37  ;;  %v10445_v19 = vld [vmem:[#allocation5 + $0x88] sm:$0xff] }
 0xcd2   :  { %4375 = vmatprep.subr.mxu0 %v9881_v48  ;;  %6719 = vmatprep.subr.mxu1 %v11368_v58  ;;  %v10451_v48 = vld [vmem:[#allocation5 + $0x70] sm:$0xff] }
 0xcd3   :  { %4376 = vmatpush1.msra.mxu0 %v9885_v60  ;;  %6720 = vmatpush3.msra.mxu1 %v10409_v39  ;;  %v10457_v60 = vld [vmem:[#allocation5 + $0x58] sm:$0xff] }
 0xcd4   :  { %4377 = vmatprep.subr.mxu0 %v9889_v6  ;;  %6721 = vmatprep.subr.mxu1 %v11368_v58  ;;  %v10463_v6 = vld [vmem:[#allocation5 + $0x40] sm:$0xff] }
 0xcd5   :  { %4378 = vmatpush1.msra.mxu0 %v9893_v9  ;;  %6722 = vmatpush3.msra.mxu1 %v10415_v57  ;;  %v10469_v9 = vld [vmem:[#allocation5 + $0x28] sm:$0xff] }
 0xcd6   :  { %4379 = vmatprep.subr.mxu0 %v9897_v28  ;;  %6723 = vmatprep.subr.mxu1 %v11368_v58  ;;  %v10477_v28 = vld [vmem:[#allocation5 + $0x10] sm:$0xff] }
 0xcd7   :  { %4380 = vmatpush1.msra.mxu0 %v9901_v46  ;;  %6724 = vmatpush3.msra.mxu1 %v10421_v61  ;;  %v10492_v46 = vld [vmem:[#allocation7 + $0x170] sm:$0xff] }
 0xcd8   :  { %4381 = vmatprep.subr.mxu0 %v9905_v17  ;;  %6725 = vmatprep.subr.mxu1 %v11368_v58  ;;  %v10495_v17 = vld [vmem:[#allocation7 + $0x168] sm:$0xff] }
 0xcd9   :  { %4382 = vmatpush1.msra.mxu0 %v9909_v32  ;;  %6726 = vmatpush3.msra.mxu1 %v10427_v63  ;;  %v10497_v32 = vld [vmem:[#allocation7 + $0x178] sm:$0xff] }
 0xcda   :  { %4383 = vmatprep.subr.mxu0 %v9913_v42  ;;  %6727 = vmatprep.subr.mxu1 %v11368_v58  ;;  %v10501_v42 = vld [vmem:[#allocation7 + $0x158] sm:$0xff] }
 0xcdb   :  { %4384 = vmatpush1.msra.mxu0 %v9917_v0  ;;  %6728 = vmatpush3.msra.mxu1 %v10433_v62  ;;  %v10505_v0 = vld [vmem:[#allocation7 + $0x150] sm:$0xff] }
 0xcdc   :  { %4385 = vmatprep.subr.mxu0 %v9921_v7  ;;  %6729 = vmatprep.subr.mxu1 %v11368_v58  ;;  %v10507_v7 = vld [vmem:[#allocation7 + $0x160] sm:$0xff] }
 0xcdd   :  { %4386 = vmatpush1.msra.mxu0 %v9925_v26  ;;  %6730 = vmatpush3.msra.mxu1 %v10439_v1  ;;  %v10511_v26 = vld [vmem:[#allocation7 + $0x140] sm:$0xff] }
 0xcde   :  { %4387 = vmatprep.subr.mxu0 %v9929_v47  ;;  %6731 = vmatprep.subr.mxu1 %v11368_v58  ;;  %v10515_v47 = vld [vmem:[#allocation7 + $0x138] sm:$0xff] }
 0xcdf   :  { %4388 = vmatpush1.msra.mxu0 %v9933_v31  ;;  %6732 = vmatpush3.msra.mxu1 %v10445_v19  ;;  %v10517_v31 = vld [vmem:[#allocation7 + $0x148] sm:$0xff] }
 0xce0   :  { %4389 = vmatprep.subr.mxu0 %v9937_v53  ;;  %6733 = vmatprep.subr.mxu1 %v11368_v58  ;;  %v10521_v53 = vld [vmem:[#allocation7 + $0x128] sm:$0xff] }
 0xce1   :  { %4390 = vmatpush1.msra.mxu0 %v9941_v29  ;;  %6734 = vmatpush3.msra.mxu1 %v10451_v48  ;;  %v10525_v29 = vld [vmem:[#allocation7 + $0x120] sm:$0xff] }
 0xce2   :  { %4391 = vmatprep.subr.mxu0 %v9945_v16  ;;  %6735 = vmatprep.subr.mxu1 %v11368_v58  ;;  %v10527_v16 = vld [vmem:[#allocation7 + $0x130] sm:$0xff] }
 0xce3   :  { %4392 = vmatpush1.msra.mxu0 %v9949_v44  ;;  %6736 = vmatpush3.msra.mxu1 %v10457_v60  ;;  %v10531_v44 = vld [vmem:[#allocation7 + $0x110] sm:$0xff] }
 0xce4   :  { %4393 = vmatprep.subr.mxu0 %v9953_v54  ;;  %6737 = vmatprep.subr.mxu1 %v11368_v58  ;;  %v10535_v54 = vld [vmem:[#allocation7 + $0x108] sm:$0xff] }
 0xce5   :  { %4394 = vmatpush1.msra.mxu0 %v9957_v50  ;;  %6738 = vmatpush3.msra.mxu1 %v10463_v6  ;;  %v10537_v50 = vld [vmem:[#allocation7 + $0x118] sm:$0xff] }
 0xce6   :  { %4395 = vmatprep.subr.mxu0 %v9961_v24  ;;  %6739 = vmatprep.subr.mxu1 %v11368_v58  ;;  %v10541_v24 = vld [vmem:[#allocation7 + $0xf8] sm:$0xff] }
 0xce7   :  { %4396 = vmatpush1.msra.mxu0 %v9965_v11  ;;  %6740 = vmatpush3.msra.mxu1 %v10469_v9  ;;  %v10545_v11 = vld [vmem:[#allocation7 + $0xf0] sm:$0xff] }
 0xce8   :  { %4397 = vmatprep.subr.mxu0 %v9969_v40  ;;  %6741 = vmatprep.subr.mxu1 %v11368_v58  ;;  %v10547_v40 = vld [vmem:[#allocation7 + $0x100] sm:$0xff] }
 0xce9   :  { %4398 = vmatpush1.msra.mxu0 %v9973_v22  ;;  %4431 = vmatprep.mubr.f32.mxu0 %v11368_v58  ;;  %11785 = vst [vmem:[#allocation40_spill] sm:$0xff] %v10547_v40  ;;  %v10551_v22 = vld [vmem:[#allocation7 + $0xe0] sm:$0xff] }
 0xcea   :  { %6742 = vmatpush3.msra.mxu1 %v10477_v28  ;;  %6743 = vmatprep.mubr.msk.f32.mxu1 %vm7167_vm1, %v11368_v58  ;;  %11786 = vst [vmem:[#allocation42_spill] sm:$0xff] %v10551_v22 }
 0xceb   :  { %4432 = vmatmul.mubr.f32.vlgmr.msra.gmra.mxu0 %v10065_v18  ;;  %6744 = vmatmul.mubr.f32.vlgmr.msra.gmra.mxu1 %v10065_v18 }
 0xcec   :  { %6746 = vmatprep.subr.mxu1 %v11368_v58  ;;  %4642 = vmatprep.mubr.f32.mxu0 %v11368_v58 }
 0xced   :  { %6778 = vmatprep.mubr.msk.f32.mxu1 %vm7167_vm1, %v11368_v58  ;;  %4578 = vmatprep.subr.mxu0 %v10492_v46 }
 0xcee   :  { %4579 = vmatpush1.msra.mxu0 %v10495_v17  ;;  %6747 = vmatpush3.msra.mxu1 %v10497_v32 }
 0xcef   :  { %4580 = vmatprep.subr.mxu0 %v10501_v42  ;;  %6748 = vmatprep.subr.mxu1 %v11368_v58 }
 0xcf0   :  { %4581 = vmatpush1.msra.mxu0 %v10505_v0  ;;  %6749 = vmatpush3.msra.mxu1 %v10507_v7 }
 0xcf1   :  { %4582 = vmatprep.subr.mxu0 %v10511_v26  ;;  %6750 = vmatprep.subr.mxu1 %v11368_v58 }
 0xcf2   :  { %4583 = vmatpush1.msra.mxu0 %v10515_v47  ;;  %6751 = vmatpush3.msra.mxu1 %v10517_v31 }
 0xcf3   :  { %4584 = vmatprep.subr.mxu0 %v10521_v53  ;;  %6752 = vmatprep.subr.mxu1 %v11368_v58 }
 0xcf4   :  { %4585 = vmatpush1.msra.mxu0 %v10525_v29  ;;  %6753 = vmatpush3.msra.mxu1 %v10527_v16 }
 0xcf5   :  { %4586 = vmatprep.subr.mxu0 %v10531_v44  ;;  %6754 = vmatprep.subr.mxu1 %v11368_v58 }
 0xcf6   :  { %4587 = vmatpush1.msra.mxu0 %v10535_v54  ;;  %6755 = vmatpush3.msra.mxu1 %v10537_v50 }
 0xcf7   :  { %4588 = vmatprep.subr.mxu0 %v10541_v24  ;;  %6756 = vmatprep.subr.mxu1 %v11368_v58 }
 0xcf8   :  { %4589 = vmatpush1.msra.mxu0 %v10545_v11  ;;  %6757 = vmatpush3.msra.mxu1 %v10547_v40  ;;  %v10664_v40 = vld [vmem:[%s10971_s5] ss:$0 sm:$0xff] }
 0xcf9   :  { %4590 = vmatprep.subr.mxu0 %v10551_v22  ;;  %6758 = vmatprep.subr.mxu1 %v11368_v58 }
 0xcfa   :  { %4591 = vmatpush1.msra.mxu0 %v10555_v3  ;;  %6759 = vmatpush3.msra.mxu1 %v10557_v13 }
 0xcfb   :  { %4592 = vmatprep.subr.mxu0 %v10561_v21  ;;  %6760 = vmatprep.subr.mxu1 %v11368_v58 }
 0xcfc   :  { %4593 = vmatpush1.msra.mxu0 %v10565_v34  ;;  %6761 = vmatpush3.msra.mxu1 %v10567_v35 }
 0xcfd   :  { %4594 = vmatprep.subr.mxu0 %v10569_v23  ;;  %6762 = vmatprep.subr.mxu1 %v11368_v58 }
 0xcfe   :  { %4595 = vmatpush1.msra.mxu0 %v10573_v45  ;;  %6763 = vmatpush3.msra.mxu1 %v10575_v36  ;;  %v10601_v36 = vld [vmem:[#allocation7 + $0x60] sm:$0xff]  ;;  %v10603_v45 = vld [vmem:[#allocation7 + $0x70] sm:$0xff] }
 0xcff   :  { %4596 = vmatprep.subr.mxu0 %v10577_v38  ;;  %6764 = vmatprep.subr.mxu1 %v11368_v58  ;;  %11802 = vst [vmem:[#allocation60_spill] sm:$0xff] %v10601_v36  ;;  %11803 = vst [vmem:[#allocation62_spill] sm:$0xff] %v10603_v45  ;;  %v10607_v38 = vld [vmem:[#allocation7 + $0x50] sm:$0xff] }
 0xd00   :  { %4597 = vmatpush1.msra.mxu0 %v10581_v27  ;;  %6765 = vmatpush3.msra.mxu1 %v10583_v33  ;;  %11804 = vst [vmem:[#allocation63_spill] sm:$0xff] %v10607_v38  ;;  %v10611_v33 = vld [vmem:[#allocation7 + $0x48] sm:$0xff]  ;;  %v10613_v27 = vld [vmem:[#allocation7 + $0x58] sm:$0xff] }
 0xd01   :  { %4598 = vmatprep.subr.mxu0 %v10587_v10  ;;  %6766 = vmatprep.subr.mxu1 %v11368_v58  ;;  %11805 = vst [vmem:[#allocation64_spill] sm:$0xff] %v10611_v33  ;;  %11806 = vst [vmem:[#allocation65_spill] sm:$0xff] %v10613_v27  ;;  %v10617_v10 = vld [vmem:[#allocation7 + $0x38] sm:$0xff] }
 0xd02   :  { %4599 = vmatpush1.msra.mxu0 %v10591_v49  ;;  %6767 = vmatpush3.msra.mxu1 %v10593_v30  ;;  %11807 = vst [vmem:[#allocation66_spill] sm:$0xff] %v10617_v10  ;;  %v10621_v30 = vld [vmem:[#allocation7 + $0x30] sm:$0xff]  ;;  %v10623_v49 = vld [vmem:[#allocation7 + $0x40] sm:$0xff] }
 0xd03   :  { %4600 = vmatprep.subr.mxu0 %v10597_v52  ;;  %6768 = vmatprep.subr.mxu1 %v11368_v58  ;;  %11808 = vst [vmem:[#allocation67_spill] sm:$0xff] %v10621_v30  ;;  %11809 = vst [vmem:[#allocation68_spill] sm:$0xff] %v10623_v49  ;;  %v10627_v52 = vld [vmem:[#allocation7 + $0x20] sm:$0xff] }
 0xd04   :  { %4601 = vmatpush1.msra.mxu0 %v10601_v36  ;;  %6769 = vmatpush3.msra.mxu1 %v10603_v45  ;;  %11810 = vst [vmem:[#allocation69_spill] sm:$0xff] %v10627_v52  ;;  %v10631_v45 = vld [vmem:[#allocation7 + $0x18] sm:$0xff]  ;;  %v10633_v36 = vld [vmem:[#allocation7 + $0x28] sm:$0xff] }
 0xd05   :  { %4602 = vmatprep.subr.mxu0 %v10607_v38  ;;  %6770 = vmatprep.subr.mxu1 %v11368_v58  ;;  %11811 = vst [vmem:[#allocation70_spill] sm:$0xff] %v10631_v45  ;;  %11812 = vst [vmem:[#allocation71_spill] sm:$0xff] %v10633_v36  ;;  %v10637_v38 = vld [vmem:[#allocation7 + $0x8] sm:$0xff] }
 0xd06   :  { %4603 = vmatpush1.msra.mxu0 %v10611_v33  ;;  %6771 = vmatpush3.msra.mxu1 %v10613_v27  ;;  %11813 = vst [vmem:[#allocation72_spill] sm:$0xff] %v10637_v38  ;;  %v10641_v27 = vld [vmem:[#allocation7] sm:$0xff]  ;;  %v10643_v33 = vld [vmem:[#allocation7 + $0x10] sm:$0xff] }
 0xd07   :  { %4604 = vmatprep.subr.mxu0 %v10617_v10  ;;  %6772 = vmatprep.subr.mxu1 %v11368_v58  ;;  %11814 = vst [vmem:[#allocation73_spill] sm:$0xff] %v10641_v27  ;;  %11815 = vst [vmem:[#allocation74_spill] sm:$0xff] %v10643_v33 }
 0xd08   :  { %4605 = vmatpush1.msra.mxu0 %v10621_v30  ;;  %6773 = vmatpush3.msra.mxu1 %v10623_v49 }
 0xd09   :  { %4606 = vmatprep.subr.mxu0 %v10627_v52  ;;  %6774 = vmatprep.subr.mxu1 %v11368_v58 }
 0xd0a   :  { %4607 = vmatpush1.msra.mxu0 %v10631_v45  ;;  %6775 = vmatpush3.msra.mxu1 %v10633_v36 }
 0xd0b   :  { %4608 = vmatprep.subr.mxu0 %v10637_v38  ;;  %6776 = vmatprep.subr.mxu1 %v11368_v58  ;;  %v11816_v38 = vld [vmem:[#allocation96_spill] sm:$0xff] }
 0xd0c   :  { %4609 = vmatpush1.msra.mxu0 %v10641_v27  ;;  %6777 = vmatpush3.msra.mxu1 %v10643_v33  ;;  %v11817_v33 = vld [vmem:[#allocation98_spill] sm:$0xff] }
 0xd0d   :  { %4791 = vmatprep.subr.mxu0 %v10075_v56  ;;  %6781 = vmatprep.subr.mxu1 %v11368_v58 }
 0xd8a   :  { %v10653_v52 = vpop.f32.mrf.mxu1  ;;  %v10655_v30 = vpop.f32.mrf.mxu0 }
 0xd8c   :  { %v6710_v49 = vpop.f32.mrf.mxu1  ;;  %v10657_v45 = vpop.f32.mrf.mxu0 }
 0xdab   :  { %v4433_v36 = vpop.f32.mrf.mxu0  ;;  %v4504_v10 = vpop.f32.mrf.mxu1 }
 0xdac   :  { %v4508_v23 = vadd.f32 %v4433_v36, %v11816_v38  ;;  %v4522_v36 = vadd.f32 %v10664_v40, %v4504_v10  ;;  %v11829_v10 = vld [vmem:[#allocation12_spill] sm:$0xff] }
 0xdad   :  { %v6745_v35 = vpop.f32.mrf.mxu1  ;;  %v4435_v27 = vpop.f32.mrf.mxu0 }
 0xdae   :  { %v5578_v34 = vmul.f32 -1.442695, %v4508_v23  ;;  %v4515_v21 = vadd.f32 %v4435_v27, %v11817_v33 }
 0xdb0   :  { %7056 = vpow2.f32 %v5578_v34  ;;  %v5579_v56 = vmul.f32 -1.442695, %v4515_v21  ;;  %v11818_v34 = vld [vmem:[#allocation101_spill] sm:$0xff] }
 0xdb2   :  { %7058 = vpow2.f32 %v5579_v56 }
 0xdbd   :  { %v7057_v13 = vpop.eup %7056 }
 0xdbe   :  { %v4512_v3 = vadd.f32 1.0, %v7057_v13 }
 0xdbf   :  { %v7059_v49 = vpop.eup %7058 }
 0xdc0   :  { %7060 = vrcp.f32 %v4512_v3  ;;  %v4519_v22 = vadd.f32 1.0, %v7059_v49  ;;  %v11830_v49 = vld [vmem:[#allocation13_spill] sm:$0xff] }
 0xdc2   :  { %7062 = vrcp.f32 %v4519_v22  ;;  %v11828_v22 = vld [vmem:[#allocation93_spill] sm:$0xff] }
 0xdcd   :  { %v7061_v35 = vpop.eup %7060 }
 0xdce   :  { %v4523_v23 = vmul.f32 %v7061_v35, %v4522_v36  ;;  %v11831_v36 = vld [vmem:[#allocation16_spill] sm:$0xff]  ;;  %v11832_v35 = vld [vmem:[#allocation61_spill] sm:$0xff] }
 0xdcf   :  { %v7063_v21 = vpop.eup %7062 }
 0xdd0   :  { %v4524_v38 = vadd.f32 %v4523_v23, %v11818_v34  ;;  %v4526_v27 = vsub.f32 1.0, %v7063_v21  ;;  %v4528_v3 = vmul.f32 %v7063_v21, %v10065_v18  ;;  %v11819_v18 = vld [vmem:[#allocation84_spill] sm:$0xff]  ;;  %v11833_v23 = vld [vmem:[#allocation14_spill] sm:$0xff]  ;;  %v11834_v34 = vld [vmem:[#allocation17_spill] sm:$0xff] }
 0xdd1   :  { %v11836_v21 = vld [vmem:[#allocation19_spill] sm:$0xff] }
 0xdd2   :  { %7064 = vtanh.f32 %v4524_v38  ;;  %v11835_v38 = vld [vmem:[#allocation18_spill] sm:$0xff] }
 0xddf   :  { %v7065_v33 = vpop.eup %7064 }
 0xde0   :  { %v4527_v13 = vmul.f32 %v7065_v33, %v4526_v27  ;;  %v11837_v27 = vld [vmem:[#allocation20_spill] sm:$0xff]  ;;  %v11838_v33 = vld [vmem:[#allocation21_spill] sm:$0xff] }
 0xde2   :  { %v10669_v56 = vadd.f32 %v4528_v3, %v4527_v13  ;;  %v11839_v13 = vld [vmem:[#allocation22_spill] sm:$0xff]  ;;  %v11840_v3 = vld [vmem:[#allocation23_spill] sm:$0xff] }
 0xde4   :  { %4643 = vmatmul.mubr.f32.vlgmr.msra.gmra.mxu0 %v10669_v56  ;;  %6779 = vmatmul.mubr.f32.vlgmr.msra.gmra.mxu1 %v10669_v56 }
 0xde5   :  { %4792 = vmatpush1.msra.mxu0 %v10081_v25  ;;  %6782 = vmatpush3.msra.mxu1 %v10086_v14  ;;  %v11820_v25 = vld [vmem:[#allocation87_spill] sm:$0xff]  ;;  %v11821_v14 = vld [vmem:[#allocation88_spill] sm:$0xff] }
 0xde6   :  { %4793 = vmatprep.subr.mxu0 %v10093_v43  ;;  %6783 = vmatprep.subr.mxu1 %v11368_v58  ;;  %v11822_v43 = vld [vmem:[#allocation91_spill] sm:$0xff] }
 0xde7   :  { %4794 = vmatpush1.msra.mxu0 %v10100_v5  ;;  %6784 = vmatpush3.msra.mxu1 %v10105_v59  ;;  %v11823_v5 = vld [vmem:[#allocation89_spill] sm:$0xff]  ;;  %v11824_v59 = vld [vmem:[#allocation90_spill] sm:$0xff] }
 0xde8   :  { %4795 = vmatprep.subr.mxu0 %v10112_v4  ;;  %6785 = vmatprep.subr.mxu1 %v11368_v58  ;;  %v11825_v4 = vld [vmem:[#allocation97_spill] sm:$0xff] }
 0xde9   :  { %4796 = vmatpush1.msra.mxu0 %v10119_v55  ;;  %6786 = vmatpush3.msra.mxu1 %v10124_v12  ;;  %v11826_v55 = vld [vmem:[#allocation85_spill] sm:$0xff]  ;;  %v11827_v12 = vld [vmem:[#allocation86_spill] sm:$0xff] }
 0xdea   :  { %4797 = vmatprep.subr.mxu0 %v11819_v18  ;;  %6787 = vmatprep.subr.mxu1 %v11368_v58  ;;  %v11841_v18 = vld [vmem:[#allocation24_spill] sm:$0xff] }
 0xdeb   :  { %4798 = vmatpush1.msra.mxu0 %v11820_v25  ;;  %6788 = vmatpush3.msra.mxu1 %v11821_v14  ;;  %v11842_v25 = vld [vmem:[#allocation25_spill] sm:$0xff]  ;;  %v11843_v14 = vld [vmem:[#allocation26_spill] sm:$0xff] }
 0xdec   :  { %4799 = vmatprep.subr.mxu0 %v11822_v43  ;;  %6789 = vmatprep.subr.mxu1 %v11368_v58  ;;  %v11844_v43 = vld [vmem:[#allocation27_spill] sm:$0xff] }
 0xded   :  { %4800 = vmatpush1.msra.mxu0 %v11823_v5  ;;  %6790 = vmatpush3.msra.mxu1 %v11824_v59  ;;  %v11845_v5 = vld [vmem:[#allocation28_spill] sm:$0xff]  ;;  %v11846_v59 = vld [vmem:[#allocation29_spill] sm:$0xff] }
 0xdee   :  { %4801 = vmatprep.subr.mxu0 %v11825_v4  ;;  %6791 = vmatprep.subr.mxu1 %v11368_v58  ;;  %v11847_v4 = vld [vmem:[#allocation30_spill] sm:$0xff] }
 0xdef   :  { %4802 = vmatpush1.msra.mxu0 %v11826_v55  ;;  %6792 = vmatpush3.msra.mxu1 %v11827_v12  ;;  %v11848_v55 = vld [vmem:[#allocation31_spill] sm:$0xff]  ;;  %v11849_v12 = vld [vmem:[#allocation32_spill] sm:$0xff] }
 0xdf0   :  { %4803 = vmatprep.subr.mxu0 %v11828_v22  ;;  %6793 = vmatprep.subr.mxu1 %v11368_v58  ;;  %v11850_v22 = vld [vmem:[#allocation33_spill] sm:$0xff] }
 0xdf1   :  { %4804 = vmatpush1.msra.mxu0 %v11829_v10  ;;  %6794 = vmatpush3.msra.mxu1 %v11830_v49  ;;  %v11851_v10 = vld [vmem:[#allocation34_spill] sm:$0xff]  ;;  %v11852_v49 = vld [vmem:[#allocation35_spill] sm:$0xff] }
 0xdf2   :  { %4805 = vmatprep.subr.mxu0 %v11831_v36  ;;  %6795 = vmatprep.subr.mxu1 %v11368_v58  ;;  %v11853_v36 = vld [vmem:[#allocation36_spill] sm:$0xff] }
 0xdf3   :  { %4806 = vmatpush1.msra.mxu0 %v11832_v35  ;;  %6796 = vmatpush3.msra.mxu1 %v11833_v23  ;;  %v11854_v35 = vld [vmem:[#allocation37_spill] sm:$0xff]  ;;  %v11855_v23 = vld [vmem:[#allocation38_spill] sm:$0xff] }
 0xdf4   :  { %4807 = vmatprep.subr.mxu0 %v11834_v34  ;;  %6797 = vmatprep.subr.mxu1 %v11368_v58  ;;  %v11856_v34 = vld [vmem:[#allocation39_spill] sm:$0xff] }
 0xdf5   :  { %4808 = vmatpush1.msra.mxu0 %v11835_v38  ;;  %6798 = vmatpush3.msra.mxu1 %v11836_v21  ;;  %v11857_v38 = vld [vmem:[#allocation41_spill] sm:$0xff] }
 0xdf6   :  { %4809 = vmatprep.subr.mxu0 %v11837_v27  ;;  %6799 = vmatprep.subr.mxu1 %v11368_v58  ;;  %v4984_v21 = vld [vmem:[#allocation5 + $0x170] sm:$0xff] }
 0xdf7   :  { %4810 = vmatpush1.msra.mxu0 %v11838_v33  ;;  %6800 = vmatpush3.msra.mxu1 %v11839_v13  ;;  %v11858_v13 = vld [vmem:[#allocation11_spill] sm:$0xff] }
 0xdf8   :  { %4811 = vmatprep.subr.mxu0 %v11840_v3  ;;  %6801 = vmatprep.subr.mxu1 %v11368_v58 }
 0xdf9   :  { %4812 = vmatpush1.msra.mxu0 %v11841_v18  ;;  %6802 = vmatpush3.msra.mxu1 %v11842_v25 }
 0xdfa   :  { %4813 = vmatprep.subr.mxu0 %v11843_v14  ;;  %6803 = vmatprep.subr.mxu1 %v11368_v58 }
 0xdfb   :  { %4814 = vmatpush1.msra.mxu0 %v11844_v43  ;;  %6804 = vmatpush3.msra.mxu1 %v11845_v5 }
 0xdfc   :  { %4815 = vmatprep.subr.mxu0 %v11846_v59  ;;  %6805 = vmatprep.subr.mxu1 %v11368_v58 }
 0xdfd   :  { %4816 = vmatpush1.msra.mxu0 %v11847_v4  ;;  %6806 = vmatpush3.msra.mxu1 %v11848_v55 }
 0xdfe   :  { %4817 = vmatprep.subr.mxu0 %v11849_v12  ;;  %6807 = vmatprep.subr.mxu1 %v11368_v58 }
 0xdff   :  { %4818 = vmatpush1.msra.mxu0 %v11850_v22  ;;  %6808 = vmatpush3.msra.mxu1 %v11851_v10 }
 0xe00   :  { %4819 = vmatprep.subr.mxu0 %v11852_v49  ;;  %6809 = vmatprep.subr.mxu1 %v11368_v58  ;;  %v10746_v49 = vld [vmem:[%s10975_s9] ss:$0 sm:$0xff] }
 0xe01   :  { %4820 = vmatpush1.msra.mxu0 %v11853_v36  ;;  %6810 = vmatpush3.msra.mxu1 %v11854_v35 }
 0xe02   :  { %4821 = vmatprep.subr.mxu0 %v11855_v23  ;;  %6811 = vmatprep.subr.mxu1 %v11368_v58 }
 0xe03   :  { %4822 = vmatpush1.msra.mxu0 %v11856_v34  ;;  %6812 = vmatpush3.msra.mxu1 %v11857_v38 }
 0xe04   :  { %4855 = vmatprep.mubr.f32.mxu0 %v11368_v58  ;;  %6813 = vmatprep.mubr.msk.f32.mxu1 %vm7167_vm1, %v11368_v58 }
 0xe05   :  { %6816 = vmatprep.subr.mxu1 %v11368_v58  ;;  %4986 = vmatprep.subr.mxu0 %v4984_v21 }
 0xea4   :  { %v4644_v27 = vpop.f32.mrf.mxu0  ;;  %v4715_v33 = vpop.f32.mrf.mxu1 }
 0xea5   :  { %v4645_v3 = vadd.f32 %v4644_v27, %v11858_v13  ;;  %v4716_v35 = vadd.f32 %v4715_v33, %v8043_v8  ;;  %v4978_v33 = vld [vmem:[#allocation5 + $0x140] sm:$0xff] }
 0xea6   :  { %v4646_v18 = vpop.f32.mrf.mxu0  ;;  %v6780_v25 = vpop.f32.mrf.mxu1 }
 0xea7   :  { %v4719_v14 = vadd.f32 %v4645_v3, %v10655_v30  ;;  %v4647_v5 = vadd.f32 %v4646_v18, %v8031_v41  ;;  %v4733_v30 = vadd.f32 %v10746_v49, %v10653_v52  ;;  %v4983_v25 = vld [vmem:[#allocation5 + $0x168] sm:$0xff]  ;;  %v4980_v52 = vld [vmem:[#allocation5 + $0x150] sm:$0xff] }
 0xea9   :  { %v5580_v43 = vmul.f32 -1.442695, %v4719_v14  ;;  %v4726_v59 = vadd.f32 %v4647_v5, %v10657_v45  ;;  %v4981_v14 = vld [vmem:[#allocation5 + $0x158] sm:$0xff]  ;;  %v4975_v5 = vld [vmem:[#allocation5 + $0x128] sm:$0xff] }
 0xeab   :  { %7066 = vpow2.f32 %v5580_v43  ;;  %v5581_v4 = vmul.f32 -1.442695, %v4726_v59  ;;  %v4977_v43 = vld [vmem:[#allocation5 + $0x138] sm:$0xff]  ;;  %v4974_v59 = vld [vmem:[#allocation5 + $0x120] sm:$0xff] }
 0xead   :  { %7068 = vpow2.f32 %v5581_v4  ;;  %v4972_v4 = vld [vmem:[#allocation5 + $0x110] sm:$0xff] }
 0xeb8   :  { %v7067_v55 = vpop.eup %7066 }
 0xeb9   :  { %v4723_v12 = vadd.f32 1.0, %v7067_v55  ;;  %v4969_v55 = vld [vmem:[#allocation5 + $0xf8] sm:$0xff] }
 0xeba   :  { %v7069_v22 = vpop.eup %7068 }
 0xebb   :  { %7070 = vrcp.f32 %v4723_v12  ;;  %v4730_v10 = vadd.f32 1.0, %v7069_v22  ;;  %v4966_v12 = vld [vmem:[#allocation5 + $0xe0] sm:$0xff]  ;;  %v4963_v22 = vld [vmem:[#allocation5 + $0xc8] sm:$0xff] }
 0xebd   :  { %7072 = vrcp.f32 %v4730_v10  ;;  %v4960_v10 = vld [vmem:[#allocation5 + $0xb0] sm:$0xff] }
 0xec8   :  { %v7071_v36 = vpop.eup %7070 }
 0xec9   :  { %v4734_v23 = vmul.f32 %v7071_v36, %v4733_v30  ;;  %v4957_v30 = vld [vmem:[#allocation5 + $0x98] sm:$0xff]  ;;  %v4954_v36 = vld [vmem:[#allocation5 + $0x80] sm:$0xff] }
 0xeca   :  { %v7073_v34 = vpop.eup %7072 }
 0xecb   :  { %v4735_v45 = vadd.f32 %v4734_v23, %v4716_v35  ;;  %v4737_v38 = vsub.f32 1.0, %v7073_v34  ;;  %v4739_v3 = vmul.f32 %v7073_v34, %v10385_v51  ;;  %v4951_v35 = vld [vmem:[#allocation5 + $0x68] sm:$0xff]  ;;  %v4948_v23 = vld [vmem:[#allocation5 + $0x50] sm:$0xff]  ;;  %v4942_v34 = vld [vmem:[#allocation5 + $0x20] sm:$0xff] }
 0xecd   :  { %7074 = vtanh.f32 %v4735_v45  ;;  %v4945_v45 = vld [vmem:[#allocation5 + $0x38] sm:$0xff] }
 0xeda   :  { %v7075_v21 = vpop.eup %7074 }
 0xedb   :  { %v4738_v27 = vmul.f32 %v7075_v21, %v4737_v38  ;;  %v4939_v38 = vld [vmem:[#allocation5 + $0x8] sm:$0xff]  ;;  %v11880_v21 = vld [vmem:[#allocation65_spill] sm:$0xff] }
 0xedd   :  { %v10752_v18 = vadd.f32 %v4739_v3, %v4738_v27  ;;  %v11881_v27 = vld [vmem:[#allocation66_spill] sm:$0xff]  ;;  %v11882_v3 = vld [vmem:[#allocation67_spill] sm:$0xff] }
 0xedf   :  { %4856 = vmatmul.mubr.f32.vlgmr.msra.gmra.mxu0 %v10752_v18  ;;  %6814 = vmatmul.mubr.f32.vlgmr.msra.gmra.mxu1 %v10752_v18 }
 0xee0   :  { %4987 = vmatpush1.msra.mxu0 %v4983_v25  ;;  %6817 = vmatpush3.msra.mxu1 %v10387_v2  ;;  %v4971_v2 = vld [vmem:[#allocation5 + $0x108] sm:$0xff] }
 0xee1   :  { %4988 = vmatprep.subr.mxu0 %v4981_v14  ;;  %6818 = vmatprep.subr.mxu1 %v11368_v58  ;;  %v11883_v25 = vld [vmem:[#allocation68_spill] sm:$0xff]  ;;  %v11884_v14 = vld [vmem:[#allocation69_spill] sm:$0xff] }
 0xee2   :  { %4989 = vmatpush1.msra.mxu0 %v4980_v52  ;;  %6819 = vmatpush3.msra.mxu1 %v10391_v15  ;;  %v4968_v15 = vld [vmem:[#allocation5 + $0xf0] sm:$0xff]  ;;  %v11885_v52 = vld [vmem:[#allocation70_spill] sm:$0xff] }
 0xee3   :  { %4990 = vmatprep.subr.mxu0 %v4978_v33  ;;  %6820 = vmatprep.subr.mxu1 %v11368_v58  ;;  %v11886_v33 = vld [vmem:[#allocation71_spill] sm:$0xff] }
 0xee4   :  { %4991 = vmatpush1.msra.mxu0 %v4977_v43  ;;  %6821 = vmatpush3.msra.mxu1 %v10397_v20  ;;  %v4965_v20 = vld [vmem:[#allocation5 + $0xd8] sm:$0xff]  ;;  %v11887_v43 = vld [vmem:[#allocation72_spill] sm:$0xff] }
 0xee5   :  { %4992 = vmatprep.subr.mxu0 %v4975_v5  ;;  %6822 = vmatprep.subr.mxu1 %v11368_v58  ;;  %v11888_v5 = vld [vmem:[#allocation73_spill] sm:$0xff] }
 0xee6   :  { %4993 = vmatpush1.msra.mxu0 %v4974_v59  ;;  %6823 = vmatpush3.msra.mxu1 %v10403_v37  ;;  %v4962_v37 = vld [vmem:[#allocation5 + $0xc0] sm:$0xff]  ;;  %v11889_v59 = vld [vmem:[#allocation74_spill] sm:$0xff] }
 0xee7   :  { %4994 = vmatprep.subr.mxu0 %v4972_v4  ;;  %6824 = vmatprep.subr.mxu1 %v11368_v58  ;;  %v5390_v4 = vld [vmem:[%s10976_s10 + $0x78] sm:$0xff] }
 0xee8   :  { %4995 = vmatpush1.msra.mxu0 %v4971_v2  ;;  %6825 = vmatpush3.msra.mxu1 %v10409_v39  ;;  %v4959_v39 = vld [vmem:[#allocation5 + $0xa8] sm:$0xff] }
 0xee9   :  { %4996 = vmatprep.subr.mxu0 %v4969_v55  ;;  %6826 = vmatprep.subr.mxu1 %v11368_v58 }
 0xeea   :  { %4997 = vmatpush1.msra.mxu0 %v4968_v15  ;;  %6827 = vmatpush3.msra.mxu1 %v10415_v57  ;;  %v4956_v57 = vld [vmem:[#allocation5 + $0x90] sm:$0xff] }
 0xeeb   :  { %4998 = vmatprep.subr.mxu0 %v4966_v12  ;;  %6828 = vmatprep.subr.mxu1 %v11368_v58 }
 0xeec   :  { %4999 = vmatpush1.msra.mxu0 %v4965_v20  ;;  %6829 = vmatpush3.msra.mxu1 %v10421_v61  ;;  %v4953_v61 = vld [vmem:[#allocation5 + $0x78] sm:$0xff] }
 0xeed   :  { %5000 = vmatprep.subr.mxu0 %v4963_v22  ;;  %6830 = vmatprep.subr.mxu1 %v11368_v58 }
 0xeee   :  { %5001 = vmatpush1.msra.mxu0 %v4962_v37  ;;  %6831 = vmatpush3.msra.mxu1 %v10427_v63  ;;  %v4950_v63 = vld [vmem:[#allocation5 + $0x60] sm:$0xff]  ;;  %v11890_v37 = vld [vmem:[#allocation100_spill] sm:$0xff] }
 0xeef   :  { %5002 = vmatprep.subr.mxu0 %v4960_v10  ;;  %6832 = vmatprep.subr.mxu1 %v11368_v58 }
 0xef0   :  { %5003 = vmatpush1.msra.mxu0 %v4959_v39  ;;  %6833 = vmatpush3.msra.mxu1 %v10433_v62  ;;  %v4947_v62 = vld [vmem:[#allocation5 + $0x48] sm:$0xff] }
 0xef1   :  { %5004 = vmatprep.subr.mxu0 %v4957_v30  ;;  %6834 = vmatprep.subr.mxu1 %v11368_v58 }
 0xef2   :  { %5005 = vmatpush1.msra.mxu0 %v4956_v57  ;;  %6835 = vmatpush3.msra.mxu1 %v10439_v1  ;;  %v4944_v1 = vld [vmem:[#allocation5 + $0x30] sm:$0xff] }
 0xef3   :  { %5006 = vmatprep.subr.mxu0 %v4954_v36  ;;  %6836 = vmatprep.subr.mxu1 %v11368_v58 }
 0xef4   :  { %5007 = vmatpush1.msra.mxu0 %v4953_v61  ;;  %6837 = vmatpush3.msra.mxu1 %v10445_v19  ;;  %v4941_v19 = vld [vmem:[#allocation5 + $0x18] sm:$0xff] }
 0xef5   :  { %5008 = vmatprep.subr.mxu0 %v4951_v35  ;;  %6838 = vmatprep.subr.mxu1 %v11368_v58 }
 0xef6   :  { %5009 = vmatpush1.msra.mxu0 %v4950_v63  ;;  %6839 = vmatpush3.msra.mxu1 %v10451_v48  ;;  %v4938_v48 = vld [vmem:[#allocation5] sm:$0xff] }
 0xef7   :  { %5010 = vmatprep.subr.mxu0 %v4948_v23  ;;  %6840 = vmatprep.subr.mxu1 %v11368_v58 }
 0xef8   :  { %5011 = vmatpush1.msra.mxu0 %v4947_v62  ;;  %6841 = vmatpush3.msra.mxu1 %v10457_v60  ;;  %v11859_v60 = vld [vmem:[#allocation40_spill] sm:$0xff] }
 0xef9   :  { %5012 = vmatprep.subr.mxu0 %v4945_v45  ;;  %6842 = vmatprep.subr.mxu1 %v11368_v58 }
 0xefa   :  { %5013 = vmatpush1.msra.mxu0 %v4944_v1  ;;  %6843 = vmatpush3.msra.mxu1 %v10463_v6  ;;  %v11860_v6 = vld [vmem:[#allocation42_spill] sm:$0xff] }
 0xefb   :  { %5014 = vmatprep.subr.mxu0 %v4942_v34  ;;  %6844 = vmatprep.subr.mxu1 %v11368_v58 }
 0xefc   :  { %5015 = vmatpush1.msra.mxu0 %v4941_v19  ;;  %6845 = vmatpush3.msra.mxu1 %v10469_v9  ;;  %v11861_v9 = vld [vmem:[#allocation43_spill] sm:$0xff] }
 0xefd   :  { %5016 = vmatprep.subr.mxu0 %v4939_v38  ;;  %6846 = vmatprep.subr.mxu1 %v11368_v58  ;;  %v11892_v19 = vld [vmem:[#allocation99_spill] sm:$0xff] }
 0xefe   :  { %5017 = vmatpush1.msra.mxu0 %v4938_v48  ;;  %5050 = vmatprep.mubr.f32.mxu0 %v11368_v58 }
 0xeff   :  { %6847 = vmatpush3.msra.mxu1 %v10477_v28  ;;  %6848 = vmatprep.mubr.msk.f32.mxu1 %vm7167_vm1, %v11368_v58  ;;  %v11862_v28 = vld [vmem:[#allocation44_spill] sm:$0xff] }
 0xf00   :  { %5051 = vmatmul.mubr.f32.vlgmr.msra.gmra.mxu0 %v10669_v56  ;;  %6849 = vmatmul.mubr.f32.vlgmr.msra.gmra.mxu1 %v10669_v56 }
 0xf01   :  { %5197 = vmatprep.subr.mxu0 %v10492_v46  ;;  %6851 = vmatprep.subr.mxu1 %v11368_v58  ;;  %v11863_v46 = vld [vmem:[#allocation45_spill] sm:$0xff] }
 0xf02   :  { %5198 = vmatpush1.msra.mxu0 %v10495_v17  ;;  %6852 = vmatpush3.msra.mxu1 %v10497_v32  ;;  %v11864_v17 = vld [vmem:[#allocation46_spill] sm:$0xff]  ;;  %v11865_v32 = vld [vmem:[#allocation47_spill] sm:$0xff] }
 0xf03   :  { %5199 = vmatprep.subr.mxu0 %v10501_v42  ;;  %6853 = vmatprep.subr.mxu1 %v11368_v58  ;;  %v11866_v42 = vld [vmem:[#allocation49_spill] sm:$0xff] }
 0xf04   :  { %5200 = vmatpush1.msra.mxu0 %v10505_v0  ;;  %6854 = vmatpush3.msra.mxu1 %v10507_v7  ;;  %v11867_v0 = vld [vmem:[#allocation50_spill] sm:$0xff]  ;;  %v11868_v7 = vld [vmem:[#allocation52_spill] sm:$0xff] }
 0xf05   :  { %5201 = vmatprep.subr.mxu0 %v10511_v26  ;;  %6855 = vmatprep.subr.mxu1 %v11368_v58  ;;  %v11869_v26 = vld [vmem:[#allocation53_spill] sm:$0xff] }
 0xf06   :  { %5202 = vmatpush1.msra.mxu0 %v10515_v47  ;;  %6856 = vmatpush3.msra.mxu1 %v10517_v31  ;;  %v11870_v47 = vld [vmem:[#allocation54_spill] sm:$0xff]  ;;  %v11871_v31 = vld [vmem:[#allocation55_spill] sm:$0xff] }
 0xf07   :  { %5203 = vmatprep.subr.mxu0 %v10521_v53  ;;  %6857 = vmatprep.subr.mxu1 %v11368_v58  ;;  %v11872_v53 = vld [vmem:[#allocation56_spill] sm:$0xff] }
 0xf08   :  { %5204 = vmatpush1.msra.mxu0 %v10525_v29  ;;  %6858 = vmatpush3.msra.mxu1 %v10527_v16  ;;  %v11873_v29 = vld [vmem:[#allocation57_spill] sm:$0xff]  ;;  %v11874_v16 = vld [vmem:[#allocation58_spill] sm:$0xff] }
 0xf09   :  { %5205 = vmatprep.subr.mxu0 %v10531_v44  ;;  %6859 = vmatprep.subr.mxu1 %v11368_v58  ;;  %v11875_v44 = vld [vmem:[#allocation59_spill] sm:$0xff] }
 0xf0a   :  { %5206 = vmatpush1.msra.mxu0 %v10535_v54  ;;  %6860 = vmatpush3.msra.mxu1 %v10537_v50  ;;  %v11876_v54 = vld [vmem:[#allocation60_spill] sm:$0xff]  ;;  %v11877_v50 = vld [vmem:[#allocation62_spill] sm:$0xff] }
 0xf0b   :  { %5207 = vmatprep.subr.mxu0 %v10541_v24  ;;  %6861 = vmatprep.subr.mxu1 %v11368_v58  ;;  %v11878_v24 = vld [vmem:[#allocation63_spill] sm:$0xff] }
 0xf0c   :  { %5208 = vmatpush1.msra.mxu0 %v10545_v11  ;;  %6862 = vmatpush3.msra.mxu1 %v11859_v60  ;;  %v11879_v11 = vld [vmem:[#allocation64_spill] sm:$0xff] }
 0xf0d   :  { %5209 = vmatprep.subr.mxu0 %v11860_v6  ;;  %6863 = vmatprep.subr.mxu1 %v11368_v58 }
 0xf0e   :  { %5210 = vmatpush1.msra.mxu0 %v11861_v9  ;;  %6864 = vmatpush3.msra.mxu1 %v11862_v28 }
 0xf0f   :  { %5211 = vmatprep.subr.mxu0 %v11863_v46  ;;  %6865 = vmatprep.subr.mxu1 %v11368_v58 }
 0xf10   :  { %5212 = vmatpush1.msra.mxu0 %v11864_v17  ;;  %6866 = vmatpush3.msra.mxu1 %v11865_v32  ;;  %v5389_v17 = vld [vmem:[%s10976_s10 + $0x70] sm:$0xff]  ;;  %v5388_v32 = vld [vmem:[%s10976_s10 + $0x68] sm:$0xff] }
 0xf11   :  { %5213 = vmatprep.subr.mxu0 %v11866_v42  ;;  %6867 = vmatprep.subr.mxu1 %v11368_v58  ;;  %v5386_v42 = vld [vmem:[%s10976_s10 + $0x58] sm:$0xff] }
 0xf12   :  { %5214 = vmatpush1.msra.mxu0 %v11867_v0  ;;  %6868 = vmatpush3.msra.mxu1 %v11868_v7  ;;  %v5385_v0 = vld [vmem:[%s10976_s10 + $0x50] sm:$0xff]  ;;  %v5384_v7 = vld [vmem:[%s10976_s10 + $0x48] sm:$0xff] }
 0xf13   :  { %5215 = vmatprep.subr.mxu0 %v11869_v26  ;;  %6869 = vmatprep.subr.mxu1 %v11368_v58  ;;  %v5383_v26 = vld [vmem:[%s10976_s10 + $0x40] sm:$0xff] }
 0xf14   :  { %5216 = vmatpush1.msra.mxu0 %v11870_v47  ;;  %6870 = vmatpush3.msra.mxu1 %v11871_v31  ;;  %v5382_v47 = vld [vmem:[%s10976_s10 + $0x38] sm:$0xff]  ;;  %v5381_v31 = vld [vmem:[%s10976_s10 + $0x30] sm:$0xff] }
 0xf15   :  { %5217 = vmatprep.subr.mxu0 %v11872_v53  ;;  %6871 = vmatprep.subr.mxu1 %v11368_v58  ;;  %v5380_v53 = vld [vmem:[%s10976_s10 + $0x28] sm:$0xff] }
 0xf16   :  { %5218 = vmatpush1.msra.mxu0 %v11873_v29  ;;  %6872 = vmatpush3.msra.mxu1 %v11874_v16  ;;  %v5379_v29 = vld [vmem:[%s10976_s10 + $0x20] sm:$0xff]  ;;  %v5378_v16 = vld [vmem:[%s10976_s10 + $0x18] sm:$0xff] }
 0xf17   :  { %5219 = vmatprep.subr.mxu0 %v11875_v44  ;;  %6873 = vmatprep.subr.mxu1 %v11368_v58  ;;  %v5377_v44 = vld [vmem:[%s10976_s10 + $0x10] sm:$0xff] }
 0xf18   :  { %5220 = vmatpush1.msra.mxu0 %v11876_v54  ;;  %6874 = vmatpush3.msra.mxu1 %v11877_v50  ;;  %v5376_v54 = vld [vmem:[%s10976_s10 + $0x8] sm:$0xff]  ;;  %v5375_v50 = vld [vmem:[%s10976_s10] sm:$0xff] }
 0xf19   :  { %5221 = vmatprep.subr.mxu0 %v11878_v24  ;;  %6875 = vmatprep.subr.mxu1 %v11368_v58  ;;  %v11894_v24 = vld [vmem:[#allocation51_spill] sm:$0xff] }
 0xf1a   :  { %5222 = vmatpush1.msra.mxu0 %v11879_v11  ;;  %6876 = vmatpush3.msra.mxu1 %v11880_v21  ;;  %v11895_v11 = vld [vmem:[#allocation80_spill] sm:$0xff] }
 0xf1b   :  { %5223 = vmatprep.subr.mxu0 %v11881_v27  ;;  %6877 = vmatprep.subr.mxu1 %v11368_v58  ;;  %v11896_v21 = vld [vmem:[#allocation48_spill] sm:$0xff]  ;;  %v11897_v27 = vld [vmem:[#allocation83_spill] sm:$0xff] }
 0xf1c   :  { %5224 = vmatpush1.msra.mxu0 %v11882_v3  ;;  %6878 = vmatpush3.msra.mxu1 %v11883_v25 }
 0xf1d   :  { %5225 = vmatprep.subr.mxu0 %v11884_v14  ;;  %6879 = vmatprep.subr.mxu1 %v11368_v58 }
 0xf1e   :  { %5226 = vmatpush1.msra.mxu0 %v11885_v52  ;;  %6880 = vmatpush3.msra.mxu1 %v11886_v33 }
 0xf1f   :  { %5227 = vmatprep.subr.mxu0 %v11887_v43  ;;  %6881 = vmatprep.subr.mxu1 %v11368_v58 }
 0xf20   :  { %5228 = vmatpush1.msra.mxu0 %v11888_v5  ;;  %5261 = vmatprep.mubr.f32.mxu0 %v11368_v58 }
 0xf21   :  { %6882 = vmatpush3.msra.mxu1 %v11889_v59  ;;  %6883 = vmatprep.mubr.msk.f32.mxu1 %vm7167_vm1, %v11368_v58  ;;  %v11891_v58 = vld [vmem:[#allocation102_spill] sm:$0xff] }
 0xf22   :  { %6886 = vmatprep.subr.mxu0 %v5390_v4 }
 0xf9f   :  { %v10862_v2 = vpop.f32.mrf.mxu1  ;;  %v10864_v15 = vpop.f32.mrf.mxu0 }
 0xfa1   :  { %v6815_v55 = vpop.f32.mrf.mxu1  ;;  %v10866_v12 = vpop.f32.mrf.mxu0 }
 0xfc0   :  { %v5052_v20 = vpop.f32.mrf.mxu0  ;;  %v5123_v22 = vpop.f32.mrf.mxu1 }
 0xfc1   :  { %v5127_v10 = vadd.f32 %v5052_v20, %v11890_v37  ;;  %v5141_v45 = vadd.f32 %v10664_v40, %v5123_v22  ;;  %v11893_v40 = vld [vmem:[#allocation15_spill] sm:$0xff] }
 0xfc2   :  { %v6850_v39 = vpop.f32.mrf.mxu1  ;;  %v5054_v57 = vpop.f32.mrf.mxu0 }
 0xfc3   :  { %v5582_v30 = vmul.f32 -1.442695, %v5127_v10  ;;  %v5134_v36 = vadd.f32 %v5054_v57, %v11891_v58 }
 0xfc5   :  { %7076 = vpow2.f32 %v5582_v30  ;;  %v5583_v61 = vmul.f32 -1.442695, %v5134_v36 }
 0xfc7   :  { %7078 = vpow2.f32 %v5583_v61 }
 0xfd2   :  { %v7077_v35 = vpop.eup %7076 }
 0xfd3   :  { %v5131_v63 = vadd.f32 1.0, %v7077_v35 }
 0xfd4   :  { %v7079_v23 = vpop.eup %7078 }
 0xfd5   :  { %7080 = vrcp.f32 %v5131_v63  ;;  %v5138_v62 = vadd.f32 1.0, %v7079_v23 }
 0xfd7   :  { %7082 = vrcp.f32 %v5138_v62 }
 0xfe2   :  { %v7081_v1 = vpop.eup %7080 }
 0xfe3   :  { %v5142_v34 = vmul.f32 %v7081_v1, %v5141_v45 }
 0xfe4   :  { %v7083_v48 = vpop.eup %7082 }
 0xfe5   :  { %v5143_v38 = vadd.f32 %v5142_v34, %v11892_v19  ;;  %v5145_v60 = vsub.f32 1.0, %v7083_v48  ;;  %v5147_v28 = vmul.f32 %v7083_v48, %v10669_v56  ;;  %v5387_v56 = vld [vmem:[%s10976_s10 + $0x60] sm:$0xff] }
 0xfe7   :  { %7084 = vtanh.f32 %v5143_v38 }
 0xff4   :  { %v7085_v6 = vpop.eup %7084 }
 0xff5   :  { %v5146_v9 = vmul.f32 %v7085_v6, %v5145_v60 }
 0xff7   :  { %v5148_v46 = vadd.f32 %v5147_v28, %v5146_v9 }
 0xff9   :  { %5262 = vmatmul.mubr.f32.vlgmr.msra.gmra.mxu0 %v5148_v46  ;;  %5364 = vst [vmem:[%s10979_s13] sm:$0xff] %v5148_v46  ;;  %6884 = vmatmul.mubr.f32.vlgmr.msra.gmra.mxu1 %v5148_v46 }
 0xffa   :  { %6887 = vmatpush3.msra.mxu0 %v5390_v4  ;;  %6918 = vmatprep.mubr.f32.mxu0 %v11893_v40 }
 0xffb   :  { %6888 = vmatprep.subr.mxu0 %v5389_v17 }
 0xffc   :  { %6889 = vmatpush3.msra.mxu0 %v5389_v17 }
 0xffd   :  { %6890 = vmatprep.subr.mxu0 %v5388_v32 }
 0xffe   :  { %6891 = vmatpush3.msra.mxu0 %v5388_v32 }
 0xfff   :  { %6892 = vmatprep.subr.mxu0 %v5387_v56 }
0x1000   :  { %6893 = vmatpush3.msra.mxu0 %v5387_v56 }
0x1001   :  { %6894 = vmatprep.subr.mxu0 %v5386_v42 }
0x1002   :  { %6895 = vmatpush3.msra.mxu0 %v5386_v42 }
0x1003   :  { %6896 = vmatprep.subr.mxu0 %v5385_v0 }
0x1004   :  { %6897 = vmatpush3.msra.mxu0 %v5385_v0 }
0x1005   :  { %6898 = vmatprep.subr.mxu0 %v5384_v7 }
0x1006   :  { %6899 = vmatpush3.msra.mxu0 %v5384_v7 }
0x1007   :  { %6900 = vmatprep.subr.mxu0 %v5383_v26 }
0x1008   :  { %6901 = vmatpush3.msra.mxu0 %v5383_v26 }
0x1009   :  { %6902 = vmatprep.subr.mxu0 %v5382_v47 }
0x100a   :  { %6903 = vmatpush3.msra.mxu0 %v5382_v47 }
0x100b   :  { %6904 = vmatprep.subr.mxu0 %v5381_v31 }
0x100c   :  { %6905 = vmatpush3.msra.mxu0 %v5381_v31 }
0x100d   :  { %6906 = vmatprep.subr.mxu0 %v5380_v53 }
0x100e   :  { %6907 = vmatpush3.msra.mxu0 %v5380_v53 }
0x100f   :  { %6908 = vmatprep.subr.mxu0 %v5379_v29 }
0x1010   :  { %6909 = vmatpush3.msra.mxu0 %v5379_v29 }
0x1011   :  { %6910 = vmatprep.subr.mxu0 %v5378_v16 }
0x1012   :  { %6911 = vmatpush3.msra.mxu0 %v5378_v16 }
0x1013   :  { %6912 = vmatprep.subr.mxu0 %v5377_v44 }
0x1014   :  { %6913 = vmatpush3.msra.mxu0 %v5377_v44 }
0x1015   :  { %6914 = vmatprep.subr.mxu0 %v5376_v54 }
0x1016   :  { %6915 = vmatpush3.msra.mxu0 %v5376_v54 }
0x1017   :  { %6916 = vmatprep.subr.mxu0 %v5375_v50 }
0x1018   :  { %6917 = vmatpush3.msra.mxu0 %v5375_v50 }
0x1019   :  { %6919 = vmatmul.mubr.f32.vlgmr.msra.gmra.mxu0 %v11894_v24 }
0x101a   :  { %6921 = vmatprep.mubr.f32.mxu0 %v11895_v11 }
0x101d   :  { %6922 = vmatmul.mubr.f32.gmra.mxu0 %v11896_v21 }
0x101e   :  { %6924 = vmatprep.mubr.f32.mxu0 %v11897_v27 }
0x1021   :  { %6925 = vmatmul.mubr.f32.gmra.mxu0 %v10385_v51 }
0x1022   :  { %6927 = vmatprep.mubr.f32.mxu0 %v10752_v18 }
0x10b9   :  { %v5263_v3 = vpop.f32.mrf.mxu0  ;;  %v5334_v25 = vpop.f32.mrf.mxu1 }
0x10ba   :  { %v5264_v14 = vadd.f32 %v5263_v3, %v11858_v13  ;;  %v5587_v13 = vld [vmem:[%s10977_s11] ss:$0 sm:$0xff]  ;;  %v5335_v58 = vadd.f32 %v5334_v25, %v8043_v8 }
0x10bb   :  { %v5265_v52 = vpop.f32.mrf.mxu0  ;;  %v6885_v33 = vpop.f32.mrf.mxu1 }
0x10bc   :  { %v5338_v43 = vadd.f32 %v5264_v14, %v10864_v15  ;;  %v5266_v5 = vadd.f32 %v5265_v52, %v8031_v41  ;;  %v5352_v41 = vadd.f32 %v10746_v49, %v10862_v2 }
0x10be   :  { %v5584_v59 = vmul.f32 -1.442695, %v5338_v43  ;;  %v5345_v4 = vadd.f32 %v5266_v5, %v10866_v12 }
0x10c0   :  { %7086 = vpow2.f32 %v5584_v59  ;;  %v5585_v55 = vmul.f32 -1.442695, %v5345_v4 }
0x10c2   :  { %7088 = vpow2.f32 %v5585_v55 }
0x10cd   :  { %v7087_v20 = vpop.eup %7086 }
0x10ce   :  { %v5342_v51 = vadd.f32 1.0, %v7087_v20 }
0x10cf   :  { %v7089_v22 = vpop.eup %7088 }
0x10d0   :  { %7090 = vrcp.f32 %v5342_v51  ;;  %v5349_v37 = vadd.f32 1.0, %v7089_v22 }
0x10d9   :  { %v6920_v10 = vpop.f32.mrf.mxu0 }
0x10da   :  { %v5470_v39 = vadd.f32 %v6920_v10, %v5587_v13 }
0x10db   :  { %v5464_v15 = vpop.f32.mrf.mxu0 }
0x10dc   :  { %7092 = vtanh.f32 %v5470_v39  ;;  %v5465_v30 = vadd.f32 %v5587_v13, %v5464_v15 }
0x10dd   :  { %v7091_v12 = vpop.eup %7090  ;;  %7094 = vrcp.f32 %v5349_v37  ;;  %v6923_v57 = vpop.f32.mrf.mxu0 }
0x10de   :  { %v5353_v36 = vmul.f32 %v7091_v12, %v5352_v41  ;;  %7096 = vtanh.f32 %v5465_v30  ;;  %v5480_v61 = vadd.f32 %v6923_v57, %v5587_v13 }
0x10df   :  { %v5474_v35 = vpop.f32.mrf.mxu0 }
0x10e0   :  { %v5354_v63 = vadd.f32 %v5353_v36, %v5335_v58  ;;  %7098 = vtanh.f32 %v5480_v61  ;;  %v5475_v23 = vadd.f32 %v5587_v13, %v5474_v35 }
0x10e1   :  { %v6926_v62 = vpop.f32.mrf.mxu0 }
0x10e2   :  { %7100 = vtanh.f32 %v5354_v63  ;;  %v5490_v45 = vadd.f32 %v6926_v62, %v5587_v13 }
0x10e3   :  { %7102 = vtanh.f32 %v5475_v23  ;;  %v5484_v1 = vpop.f32.mrf.mxu0 }
0x10e4   :  { %7104 = vtanh.f32 %v5490_v45  ;;  %v5485_v49 = vadd.f32 %v5587_v13, %v5484_v1 }
0x10e6   :  { %7106 = vtanh.f32 %v5485_v49 }
0x10e9   :  { %v7093_v2 = vpop.eup %7092 }
0x10ea   :  { %v7095_v34 = vpop.eup %7094  ;;  %5512 = vst [vmem:[%s10978_s12 + $0x8] sm:$0xff] %v7093_v2 }
0x10eb   :  { %v7097_v8 = vpop.eup %7096  ;;  %v5356_v38 = vsub.f32 1.0, %v7095_v34  ;;  %v5358_v9 = vmul.f32 %v7095_v34, %v10752_v18 }
0x10ec   :  { %5511 = vst [vmem:[%s10978_s12] sm:$0xff] %v7097_v8 }
0x10ed   :  { %v7099_v19 = vpop.eup %7098 }
0x10ee   :  { %5514 = vst [vmem:[%s10978_s12 + $0x18] sm:$0xff] %v7099_v19 }
0x10ef   :  { %v7101_v48 = vpop.eup %7100 }
0x10f0   :  { %v7103_v60 = vpop.eup %7102  ;;  %v5357_v6 = vmul.f32 %v7101_v48, %v5356_v38 }
0x10f1   :  { %v7105_v28 = vpop.eup %7104  ;;  %5513 = vst [vmem:[%s10978_s12 + $0x10] sm:$0xff] %v7103_v60 }
0x10f2   :  { %5516 = vst [vmem:[%s10978_s12 + $0x28] sm:$0xff] %v7105_v28  ;;  %v5359_v46 = vadd.f32 %v5358_v9, %v5357_v6 }
0x10f3   :  { %v7107_v17 = vpop.eup %7106 }
0x10f4   :  { %5515 = vst [vmem:[%s10978_s12 + $0x20] sm:$0xff] %v7107_v17  ;;  %5586 = vst [vmem:[%s10979_s13 + $0x8] sm:$0xff] %v5359_v46  ;;  %6928 = vmatmul.mubr.f32.gmra.mxu0 %v5359_v46 }
0x11b4   :  { %v6929_v18 = vpop.f32.mrf.mxu0 }
0x11b5   :  { %v5500_v40 = vadd.f32 %v6929_v18, %v5587_v13 }
0x11b6   :  { %v5494_v32 = vpop.f32.mrf.mxu0 }
0x11b7   :  { %7108 = vtanh.f32 %v5500_v40  ;;  %v5495_v56 = vadd.f32 %v5587_v13, %v5494_v32 }
0x11b9   :  { %7110 = vtanh.f32 %v5495_v56 }
0x11c4   :  { %v7109_v42 = vpop.eup %7108 }
0x11c5   :  { %5518 = vst [vmem:[%s10978_s12 + $0x38] sm:$0xff] %v7109_v42 }
0x11c6   :  { %v7111_v0 = vpop.eup %7110 }
0x11c7   :  { %5517 = vst [vmem:[%s10978_s12 + $0x30] sm:$0xff] %v7111_v0 }
0x11c8   :  { %5527 = vsyncpa [#allocation6], 1 }
0x11c9   :  { %5528 = vsyncpa [#allocation8], 1 }

</bundles_post_ra>
